<compile_context>
chip_gen: v6e
topology: v6e:2x2x1
jax: 0.10.0
libtpu: 0.0.40
codegen_flags: <defaults>
</compile_context>

<pallas_src>
import functools

import jax
import jax.numpy as jnp
from jax.experimental import pallas as pl
from jax.experimental.pallas import tpu as pltpu

EPS = 1e-5  # torch.nn.LayerNorm default


# ---------------------------------------------------------------------------
# Fused kernel: 1x1 conv (split weights) + LayerNorm(W) + sigmoid + residual
# ---------------------------------------------------------------------------
def _interaction_kernel(x1_ref, x2_ref, w1_ref, w2_ref,
                        bt_ref, seg_ref, segtg_ref, o_ref, *, inv_w):
    # x1_ref / x2_ref / o_ref : (C, L) with L = TH * W (time-major flattening)
    # w1_ref / w2_ref         : (C, C)   conv weight halves (bf16)
    # bt_ref                  : (1, L)   LayerNorm beta tiled TH times (f32)
    # seg_ref                 : (L, TH)  0/1 segment matrix (bf16, lossless)
    # segtg_ref               : (TH, L)  transpose with gamma folded in (bf16)
    x1 = x1_ref[...]                                    # f32
    x2 = x2_ref[...]

    # 1x1 conv over the (virtually) concatenated channel dim: two
    # weight-stationary MXU matmuls, bf16 operands, f32 accumulation.
    # The conv bias is intentionally dropped: LayerNorm over W cancels it.
    mm_dt = w1_ref.dtype
    y = jnp.dot(w1_ref[...], x1.astype(mm_dt), preferred_element_type=jnp.float32)
    y = y + jnp.dot(w2_ref[...], x2.astype(mm_dt), preferred_element_type=jnp.float32)

    # LayerNorm(W) per (channel, time step): one-pass sum / sum-of-squares over
    # each W-long lane segment as single-pass bf16 MXU matmuls (no XLU work).
    seg = seg_ref[...]                                            # (L, TH) bf16
    yb = y.astype(mm_dt)
    yyb = (y * y).astype(mm_dt)
    s1 = jnp.dot(yb, seg, preferred_element_type=jnp.float32)     # (C, TH)
    s2 = jnp.dot(yyb, seg, preferred_element_type=jnp.float32)    # (C, TH)
    mu = s1 * inv_w
    var = jnp.maximum(s2 * inv_w - mu * mu, 0.0)                  # clamp: one-pass
    rstd = jax.lax.rsqrt(var + EPS)

    # Broadcast the per-segment affine back to lane resolution with the
    # gamma-folded transpose: scale = gamma*rstd, shift = gamma*mu*rstd.
    segtg = segtg_ref[...]                                        # (TH, L) bf16
    scale = jnp.dot(rstd.astype(mm_dt), segtg,
                    preferred_element_type=jnp.float32)           # (C, L)
    shift = jnp.dot((mu * rstd).astype(mm_dt), segtg,
                    preferred_element_type=jnp.float32)           # (C, L)
    yn = y * scale - shift + bt_ref[...]        # == gamma*(y-mu)*rstd + beta

    # Sigmoid via tanh -> EUP slot, no VALU divide, no exp overflow.
    mask = 0.5 * jnp.tanh(0.5 * yn) + 0.5
    o_ref[...] = x1 + x2 * mask                                   # residual (f32)


# ---------------------------------------------------------------------------
# Tile picker: largest time tile TH s.t. TH | H and TH*W % 128 == 0 (lane-dense
# blocks) or TH == H, subject only to a generous VMEM budget.  No artificial
# small caps -> at typical sizes TH == H and the grid collapses to (B, 1).
# ---------------------------------------------------------------------------
def _pick_time_tile(H, W, C, itemsize, vmem_budget_bytes=40 << 20):
    def working_set(th):
        L = th * W
        blk = C * L * itemsize
        # double-buffered x1/x2/out + in-kernel temporaries + seg matrices
        return 3 * 2 * blk + 8 * blk + 2 * L * th * 2 + (2 << 20)

    best = None
    for th in range(1, H + 1):
        if H % th:
            continue
        if th != H and (th * W) % 128:          # (8,128) constraint on last dim
            continue
        if working_set(th) <= vmem_budget_bytes:
            best = th
    # Fallback: a full time axis per grid step (block dim == full array dim).
    return best if best is not None else H


# ---------------------------------------------------------------------------
# Forward wrapper (NCHW interface, matching the torch module)
# ---------------------------------------------------------------------------
def interaction_forward(input1, input2, params, matmul_dtype=jnp.bfloat16):
    B, C, H, W = input1.shape
    assert input2.shape == (B, C, H, W)

    w = params['conv_w'][:, :, 0, 0]                      # (C, 2C)
    w1 = w[:, :C].astype(matmul_dtype)                    # acts on input1
    w2 = w[:, C:].astype(matmul_dtype)                    # acts on input2
    # conv bias is mathematically cancelled by LayerNorm(W) -> not passed in.

    TH = _pick_time_tile(H, W, C, 4)
    L = TH * W

    # Free reshapes: (B, C, H, W) -> (B, C, H*W); activations kept in f32 so the
    # LayerNorm math and the residual stay in full precision.
    x1r = input1.reshape(B, C, H * W).astype(jnp.float32)
    x2r = input2.reshape(B, C, H * W).astype(jnp.float32)

    # LayerNorm beta tiled across the TH time steps of one block.
    bt_t = jnp.tile(params['ln_b'].astype(jnp.float32), TH).reshape(1, L)

    # 0/1 segment matrix (lane l belongs to time step l // W); bf16 is lossless.
    lane_c = jax.lax.broadcasted_iota(jnp.int32, (L, TH), 0) // W
    tgt_c = jax.lax.broadcasted_iota(jnp.int32, (L, TH), 1)
    seg = (lane_c == tgt_c).astype(matmul_dtype)          # (L, TH)

    # Transpose with gamma folded in: segt_g[t, l] = gamma[l % W] * [l//W == t].
    lane_r = jax.lax.broadcasted_iota(jnp.int32, (TH, L), 1)
    tgt_r = jax.lax.broadcasted_iota(jnp.int32, (TH, L), 0)
    g_full = jnp.tile(params['ln_g'].astype(jnp.float32), TH)          # (L,)
    segt_g = jnp.where(lane_r // W == tgt_r, g_full[None, :], 0.0
                       ).astype(matmul_dtype)             # (TH, L)

    grid = (B, H // TH)

    # VMEM budget: computed need + headroom, capped at 48 MiB (v7x-safe).
    blk = C * L * 4
    vmem_need = 3 * 2 * blk + 8 * blk + 2 * L * TH * 2 + L * 4 + (4 << 20)
    vmem_limit = int(min(vmem_need, 48 << 20))

    kernel = functools.partial(_interaction_kernel, inv_w=1.0 / W)
    out = pl.pallas_call(
        kernel,
        out_shape=jax.ShapeDtypeStruct((B, C, H * W), jnp.float32),
        grid=grid,
        in_specs=[
            pl.BlockSpec((None, C, L), lambda b, t: (b, 0, t)),   # x1
            pl.BlockSpec((None, C, L), lambda b, t: (b, 0, t)),   # x2
            pl.BlockSpec((C, C), lambda b, t: (0, 0)),            # w1
            pl.BlockSpec((C, C), lambda b, t: (0, 0)),            # w2
            pl.BlockSpec((1, L), lambda b, t: (0, 0)),            # beta (tiled)
            pl.BlockSpec((L, TH), lambda b, t: (0, 0)),           # segment matrix
            pl.BlockSpec((TH, L), lambda b, t: (0, 0)),           # seg^T * gamma
        ],
        out_specs=pl.BlockSpec((None, C, L), lambda b, t: (b, 0, t)),
        compiler_params=pltpu.CompilerParams(
            dimension_semantics=("parallel", "parallel"),
            vmem_limit_bytes=vmem_limit,
        ),
    )(x1r, x2r, w1, w2, bt_t, seg, segt_g)

    return out.reshape(B, C, H, W).astype(input1.dtype)


# ---------------------------------------------------------------------------
# Pure-JAX reference (direct transcription of the torch module) + init
# ---------------------------------------------------------------------------
def interaction_reference(input1, input2, params):
    x = jnp.concatenate([input1, input2], axis=1)                    # (B, 2C, H, W)
    w = params['conv_w'][:, :, 0, 0]                                 # (C, 2C)
    y = jnp.einsum('oc,bchw->bohw', w, x) + params['conv_b'][None, :, None, None]
    mu = jnp.mean(y, axis=-1, keepdims=True)
    var = jnp.mean(jnp.square(y - mu), axis=-1, keepdims=True)
    yn = (y - mu) / jnp.sqrt(var + EPS)
    yn = yn * params['ln_g'] + params['ln_b']
    mask = jax.nn.sigmoid(yn)
    return input1 + input2 * mask


def init_params(key, input_size, normsize):
    k1, k2 = jax.random.split(key)
    fan_in = 2 * input_size                       # 1x1 kernel
    bound = 1.0 / float(fan_in) ** 0.5            # torch Conv2d default init
    w = jax.random.uniform(k1, (input_size, 2 * input_size, 1, 1),
                           jnp.float32, -bound, bound)
    b = jax.random.uniform(k2, (input_size,), jnp.float32, -bound, bound)
    return {
        'conv_w': w,
        'conv_b': b,
        'ln_g': jnp.ones((normsize,), jnp.float32),
        'ln_b': jnp.zeros((normsize,), jnp.float32),
    }


if __name__ == "__main__":
    # input_size = 16 channels, normsize = W = 160 (LayerNorm over last dim).
    B, C, H, W = 2, 16, 32, 160
    key = jax.random.PRNGKey(0)
    k1, k2, kp = jax.random.split(key, 3)
    x1 = jax.random.normal(k1, (B, C, H, W), jnp.float32)
    x2 = jax.random.normal(k2, (B, C, H, W), jnp.float32)
    params = init_params(kp, C, W)

    fwd = jax.jit(interaction_forward)
    out = fwd(x1, x2, params)
    jax.block_until_ready(out)
    assert out.shape == (B, C, H, W), out.shape
    assert bool(jnp.all(jnp.isfinite(out)))

    ref = interaction_reference(x1, x2, params)
    err = float(jnp.max(jnp.abs(out - ref)))
    # bf16 matmul operands for conv + LN stats (f32 accumulation everywhere)
    # -> small, tolerance-covered divergence from the f32 reference.
    assert err < 1.0e-1, f"max abs err {err}"
    print("KERNEL_OK")
</pallas_src>

<mosaic_0001>
module attributes {stable_mosaic.version = 11 : i64} {
  func.func @_interaction_kernel(%arg0: i32, %arg1: i32, %arg2: memref<1x16x5120xf32, #tpu.memory_space<vmem>>, %arg3: memref<1x16x5120xf32, #tpu.memory_space<vmem>>, %arg4: memref<16x16xbf16, #tpu.memory_space<vmem>>, %arg5: memref<16x16xbf16, #tpu.memory_space<vmem>>, %arg6: memref<1x5120xf32, #tpu.memory_space<vmem>>, %arg7: memref<5120x32xbf16, #tpu.memory_space<vmem>>, %arg8: memref<32x5120xbf16, #tpu.memory_space<vmem>>, %arg9: memref<1x16x5120xf32, #tpu.memory_space<vmem>>) attributes {dimension_semantics = [#tpu.dimension_semantics<parallel>, #tpu.dimension_semantics<parallel>], iteration_bounds = array<i64: 2, 1>, scalar_prefetch = 0 : i64, scratch_operands = 0 : i64, tpu.core_type = #tpu.core_type<tc>, window_params = [{transform_indices = @transform_0, window_bounds = array<i64: 1, 16, 5120>}, {transform_indices = @transform_1, window_bounds = array<i64: 1, 16, 5120>}, {pipeline_mode = #tpu.pipeline_mode<synchronous>, transform_indices = @transform_2, window_bounds = array<i64: 16, 16>}, {pipeline_mode = #tpu.pipeline_mode<synchronous>, transform_indices = @transform_3, window_bounds = array<i64: 16, 16>}, {pipeline_mode = #tpu.pipeline_mode<synchronous>, transform_indices = @transform_4, window_bounds = array<i64: 1, 5120>}, {pipeline_mode = #tpu.pipeline_mode<synchronous>, transform_indices = @transform_5, window_bounds = array<i64: 5120, 32>}, {pipeline_mode = #tpu.pipeline_mode<synchronous>, transform_indices = @transform_6, window_bounds = array<i64: 32, 5120>}, {transform_indices = @transform_7, window_bounds = array<i64: 1, 16, 5120>}]} {
    %c0 = arith.constant 0 : index
    %c0_0 = arith.constant 0 : index
    %c0_1 = arith.constant 0 : index
    %0 = vector.load %arg2[%c0, %c0_0, %c0_1] : memref<1x16x5120xf32, #tpu.memory_space<vmem>>, vector<1x16x5120xf32>
    %1 = vector.shape_cast %0 : vector<1x16x5120xf32> to vector<16x5120xf32>
    %c0_2 = arith.constant 0 : index
    %c0_3 = arith.constant 0 : index
    %c0_4 = arith.constant 0 : index
    %2 = vector.load %arg3[%c0_2, %c0_3, %c0_4] : memref<1x16x5120xf32, #tpu.memory_space<vmem>>, vector<1x16x5120xf32>
    %3 = vector.shape_cast %2 : vector<1x16x5120xf32> to vector<16x5120xf32>
    %c0_5 = arith.constant 0 : index
    %c0_6 = arith.constant 0 : index
    %4 = vector.load %arg4[%c0_5, %c0_6] : memref<16x16xbf16, #tpu.memory_space<vmem>>, vector<16x16xbf16>
    %5 = arith.truncf %1 : vector<16x5120xf32> to vector<16x5120xbf16>
    %cst = arith.constant dense<0.000000e+00> : vector<16x5120xf32>
    %6 = tpu.matmul %4, %5, %cst {dimension_numbers = #tpu.dot_dimension_numbers<[1], [0], [0], [1], [0, 0, 1, 1], [], []>} : vector<16x16xbf16>, vector<16x5120xbf16>, vector<16x5120xf32> -> vector<16x5120xf32>
    %c0_7 = arith.constant 0 : index
    %c0_8 = arith.constant 0 : index
    %7 = vector.load %arg5[%c0_7, %c0_8] : memref<16x16xbf16, #tpu.memory_space<vmem>>, vector<16x16xbf16>
    %8 = arith.truncf %3 : vector<16x5120xf32> to vector<16x5120xbf16>
    %cst_9 = arith.constant dense<0.000000e+00> : vector<16x5120xf32>
    %9 = tpu.matmul %7, %8, %cst_9 {dimension_numbers = #tpu.dot_dimension_numbers<[1], [0], [0], [1], [0, 0, 1, 1], [], []>} : vector<16x16xbf16>, vector<16x5120xbf16>, vector<16x5120xf32> -> vector<16x5120xf32>
    %10 = arith.addf %6, %9 : vector<16x5120xf32>
    %c0_10 = arith.constant 0 : index
    %c0_11 = arith.constant 0 : index
    %11 = vector.load %arg7[%c0_10, %c0_11] : memref<5120x32xbf16, #tpu.memory_space<vmem>>, vector<5120x32xbf16>
    %12 = arith.truncf %10 : vector<16x5120xf32> to vector<16x5120xbf16>
    %13 = arith.mulf %10, %10 : vector<16x5120xf32>
    %14 = arith.truncf %13 : vector<16x5120xf32> to vector<16x5120xbf16>
    %cst_12 = arith.constant dense<0.000000e+00> : vector<16x32xf32>
    %15 = tpu.matmul %12, %11, %cst_12 {dimension_numbers = #tpu.dot_dimension_numbers<[1], [0], [0], [1], [0, 0, 1, 1], [], []>} : vector<16x5120xbf16>, vector<5120x32xbf16>, vector<16x32xf32> -> vector<16x32xf32>
    %cst_13 = arith.constant dense<0.000000e+00> : vector<16x32xf32>
    %16 = tpu.matmul %14, %11, %cst_13 {dimension_numbers = #tpu.dot_dimension_numbers<[1], [0], [0], [1], [0, 0, 1, 1], [], []>} : vector<16x5120xbf16>, vector<5120x32xbf16>, vector<16x32xf32> -> vector<16x32xf32>
    %cst_14 = arith.constant 6.250000e-03 : f32
    %17 = vector.broadcast %cst_14 : f32 to vector<16x32xf32>
    %18 = arith.mulf %15, %17 : vector<16x32xf32>
    %cst_15 = arith.constant 6.250000e-03 : f32
    %19 = vector.broadcast %cst_15 : f32 to vector<16x32xf32>
    %20 = arith.mulf %16, %19 : vector<16x32xf32>
    %21 = arith.mulf %18, %18 : vector<16x32xf32>
    %22 = arith.subf %20, %21 : vector<16x32xf32>
    %cst_16 = arith.constant 0.000000e+00 : f32
    %23 = vector.broadcast %cst_16 : f32 to vector<16x32xf32>
    %24 = arith.maximumf %22, %23 : vector<16x32xf32>
    %cst_17 = arith.constant 9.99999974E-6 : f32
    %25 = vector.broadcast %cst_17 : f32 to vector<16x32xf32>
    %26 = arith.addf %24, %25 : vector<16x32xf32>
    %27 = math.rsqrt %26 : vector<16x32xf32>
    %c0_18 = arith.constant 0 : index
    %c0_19 = arith.constant 0 : index
    %28 = vector.load %arg8[%c0_18, %c0_19] : memref<32x5120xbf16, #tpu.memory_space<vmem>>, vector<32x5120xbf16>
    %29 = arith.truncf %27 : vector<16x32xf32> to vector<16x32xbf16>
    %cst_20 = arith.constant dense<0.000000e+00> : vector<16x5120xf32>
    %30 = tpu.matmul %29, %28, %cst_20 {dimension_numbers = #tpu.dot_dimension_numbers<[1], [0], [0], [1], [0, 0, 1, 1], [], []>} : vector<16x32xbf16>, vector<32x5120xbf16>, vector<16x5120xf32> -> vector<16x5120xf32>
    %31 = arith.mulf %18, %27 : vector<16x32xf32>
    %32 = arith.truncf %31 : vector<16x32xf32> to vector<16x32xbf16>
    %cst_21 = arith.constant dense<0.000000e+00> : vector<16x5120xf32>
    %33 = tpu.matmul %32, %28, %cst_21 {dimension_numbers = #tpu.dot_dimension_numbers<[1], [0], [0], [1], [0, 0, 1, 1], [], []>} : vector<16x32xbf16>, vector<32x5120xbf16>, vector<16x5120xf32> -> vector<16x5120xf32>
    %34 = arith.mulf %10, %30 : vector<16x5120xf32>
    %35 = arith.subf %34, %33 : vector<16x5120xf32>
    %c0_22 = arith.constant 0 : index
    %c0_23 = arith.constant 0 : index
    %36 = vector.load %arg6[%c0_22, %c0_23] : memref<1x5120xf32, #tpu.memory_space<vmem>>, vector<1x5120xf32>
    %37 = vector.broadcast %36 : vector<1x5120xf32> to vector<16x5120xf32>
    %38 = arith.addf %35, %37 : vector<16x5120xf32>
    %cst_24 = arith.constant 5.000000e-01 : f32
    %39 = vector.broadcast %cst_24 : f32 to vector<16x5120xf32>
    %40 = arith.mulf %39, %38 : vector<16x5120xf32>
    %41 = math.tanh %40 : vector<16x5120xf32>
    %cst_25 = arith.constant 5.000000e-01 : f32
    %42 = vector.broadcast %cst_25 : f32 to vector<16x5120xf32>
    %43 = arith.mulf %42, %41 : vector<16x5120xf32>
    %cst_26 = arith.constant 5.000000e-01 : f32
    %44 = vector.broadcast %cst_26 : f32 to vector<16x5120xf32>
    %45 = arith.addf %43, %44 : vector<16x5120xf32>
    %46 = arith.mulf %3, %45 : vector<16x5120xf32>
    %47 = arith.addf %1, %46 : vector<16x5120xf32>
    %c0_27 = arith.constant 0 : index
    %c0_28 = arith.constant 0 : index
    %c0_29 = arith.constant 0 : index
    %48 = vector.load %arg9[%c0_27, %c0_28, %c0_29] : memref<1x16x5120xf32, #tpu.memory_space<vmem>>, vector<1x16x5120xf32>
    %49 = vector.shape_cast %48 : vector<1x16x5120xf32> to vector<16x5120xf32>
    %50 = vector.shape_cast %47 : vector<16x5120xf32> to vector<1x16x5120xf32>
    tpu.vector_store %arg9[%c0_27, %c0_28, %c0_29], %50 {strides = array<i32>} : memref<1x16x5120xf32, #tpu.memory_space<vmem>>, vector<1x16x5120xf32>,
    return
  }
  func.func @transform_0(%arg0: i32, %arg1: i32) -> (i32, i32, i32) {
    %c0_i32 = arith.constant 0 : i32
    %c0_i32_0 = arith.constant 0 : i32
    return %arg0, %c0_i32, %arg1 : i32, i32, i32
  }
  func.func @transform_1(%arg0: i32, %arg1: i32) -> (i32, i32, i32) {
    %c0_i32 = arith.constant 0 : i32
    %c0_i32_0 = arith.constant 0 : i32
    return %arg0, %c0_i32, %arg1 : i32, i32, i32
  }
  func.func @transform_2(%arg0: i32, %arg1: i32) -> (i32, i32) {
    %c0_i32 = arith.constant 0 : i32
    %c0_i32_0 = arith.constant 0 : i32
    %c0_i32_1 = arith.constant 0 : i32
    return %c0_i32, %c0_i32_0 : i32, i32
  }
  func.func @transform_3(%arg0: i32, %arg1: i32) -> (i32, i32) {
    %c0_i32 = arith.constant 0 : i32
    %c0_i32_0 = arith.constant 0 : i32
    %c0_i32_1 = arith.constant 0 : i32
    return %c0_i32, %c0_i32_0 : i32, i32
  }
  func.func @transform_4(%arg0: i32, %arg1: i32) -> (i32, i32) {
    %c0_i32 = arith.constant 0 : i32
    %c0_i32_0 = arith.constant 0 : i32
    %c0_i32_1 = arith.constant 0 : i32
    return %c0_i32, %c0_i32_0 : i32, i32
  }
  func.func @transform_5(%arg0: i32, %arg1: i32) -> (i32, i32) {
    %c0_i32 = arith.constant 0 : i32
    %c0_i32_0 = arith.constant 0 : i32
    %c0_i32_1 = arith.constant 0 : i32
    return %c0_i32, %c0_i32_0 : i32, i32
  }
  func.func @transform_6(%arg0: i32, %arg1: i32) -> (i32, i32) {
    %c0_i32 = arith.constant 0 : i32
    %c0_i32_0 = arith.constant 0 : i32
    %c0_i32_1 = arith.constant 0 : i32
    return %c0_i32, %c0_i32_0 : i32, i32
  }
  func.func @transform_7(%arg0: i32, %arg1: i32) -> (i32, i32, i32) {
    %c0_i32 = arith.constant 0 : i32
    %c0_i32_0 = arith.constant 0 : i32
    return %arg0, %c0_i32, %arg1 : i32, i32, i32
  }
}

</mosaic_0001>

<bundles_post_ra>
// kernel: tile.18
= control target key start
LH: loop header
LB: loop body
LE: loop exit
PB: predicated region body
PF: predicated region fallthrough
CT: control target
= control target key end

     0   :  { %2 = vsyncpa [#allocation1], 0  ;;  %s86_s6 = smov [#allocation0]   ;;  %s112_s0 = inlined_call_operand.hbm [shape: f32[160], index: 0, kind: input, shape index: {}]   ;;  %s113_s1 = inlined_call_operand.vmem [shape: bf16[32,160], index: 1, kind: output, shape index: {}]  }
   0x1   :  { %s9_s7 = sshll.u32 %s86_s6, 4  ;;  %s10_s7 = int_to_ptr.vmem [resolvable:$true] %s9_s7 }
   0x2   :  { %s72_s8 = scalar_lea.vmem %s10_s7, 32  ;;  %p77_p1 = scmp.lt.s32.totalorder %s10_s7, %s10_s7 }
   0x3   :  { %p73_p0 = scmp.ne.s32.totalorder %s10_s7, %s72_s8  ;;  %p78_p2 = scmp.lt.s32.totalorder %s72_s8, %s72_s8 }
   0x5   :  { %p79_p3 = por %p78_p2, %p77_p1 }
   0x7   :  { %p80_p4 = pnand %p79_p3, %p73_p0 }
   0x9   :  { %83 = shalt.err (!%p80_p4)
}
   0xa   :  { %12 = dma.hbm_to_vmem [thread:$0]  %s112_s0, 32, %s10_s7, [#allocation1]  }
   0xb   :  { %84 = dma.done.wait [#allocation1], 32  }
   0xc   :  { %85 = vsyncadd [#allocation1], 4294967264  ;;  %v16_v0 = vld [vmem:[#allocation0] ss:$0 sm:$0xff]  ;;  %v21_v1 = vld [vmem:[#allocation0 + $0x1] ss:$0 sm:$0xff] }
   0xd   :  { %v26_v2 = vpack.c.bf16 %v21_v1, %v16_v0 }
   0xf   :  { %56 = vst [vmem:[%s113_s1] sm:$0xff] %v26_v2  ;;  %58 = vst [vmem:[%s113_s1 + $0x8] sm:$0xff] %v26_v2 }
  0x10   :  { %60 = vst [vmem:[%s113_s1 + $0x10] sm:$0xff] %v26_v2  ;;  %62 = vst [vmem:[%s113_s1 + $0x18] sm:$0xff] %v26_v2 }
  0x11   :  { %46 = vsyncpa [#allocation1], 1 }

// kernel: tile.13
= control target key start
LH: loop header
LB: loop body
LE: loop exit
PB: predicated region body
PF: predicated region fallthrough
CT: control target
= control target key end

     0   :  { %2 = vsyncpa [#allocation1], 0  ;;  %s65_s6 = smov [#allocation0]   ;;  %s103_s0 = inlined_call_operand.hbm [shape: f32[160], index: 0, kind: input, shape index: {}]   ;;  %s104_s1 = inlined_call_operand.vmem [shape: f32[32,160], index: 1, kind: output, shape index: {}]  }
   0x1   :  { %s9_s7 = sshll.u32 %s65_s6, 4  ;;  %s10_s7 = int_to_ptr.vmem [resolvable:$true] %s9_s7 }
   0x2   :  { %s51_s8 = scalar_lea.vmem %s10_s7, 32  ;;  %p56_p1 = scmp.lt.s32.totalorder %s10_s7, %s10_s7 }
   0x3   :  { %p52_p0 = scmp.ne.s32.totalorder %s10_s7, %s51_s8  ;;  %p57_p2 = scmp.lt.s32.totalorder %s51_s8, %s51_s8 }
   0x5   :  { %p58_p3 = por %p57_p2, %p56_p1 }
   0x7   :  { %p59_p4 = pnand %p58_p3, %p52_p0 }
   0x9   :  { %62 = shalt.err (!%p59_p4)
}
   0xa   :  { %12 = dma.hbm_to_vmem [thread:$0]  %s103_s0, 32, %s10_s7, [#allocation1]  }
   0xb   :  { %63 = dma.done.wait [#allocation1], 32  }
   0xc   :  { %64 = vsyncadd [#allocation1], 4294967264  ;;  %v16_v0 = vld [vmem:[#allocation0] ss:$0 sm:$0xff]  ;;  %v25_v1 = vld [vmem:[#allocation0 + $0x1] ss:$0 sm:$0xff] }
   0xd   :  { %17 = vst [vmem:[%s104_s1] sm:$0xff] %v16_v0  ;;  %35 = vst [vmem:[%s104_s1 + $0x10] sm:$0xff] %v16_v0 }
   0xe   :  { %36 = vst [vmem:[%s104_s1 + $0x20] sm:$0xff] %v16_v0  ;;  %37 = vst [vmem:[%s104_s1 + $0x30] sm:$0xff] %v16_v0 }
   0xf   :  { %38 = vst [vmem:[%s104_s1 + $0x8] sm:$0xff] %v25_v1  ;;  %39 = vst [vmem:[%s104_s1 + $0x18] sm:$0xff] %v25_v1 }
  0x10   :  { %40 = vst [vmem:[%s104_s1 + $0x28] sm:$0xff] %v25_v1  ;;  %41 = vst [vmem:[%s104_s1 + $0x38] sm:$0xff] %v25_v1 }
  0x11   :  { %34 = vsyncpa [#allocation1], 1 }

// kernel: tile.14
= control target key start
LH: loop header
LB: loop body
LE: loop exit
PB: predicated region body
PF: predicated region fallthrough
CT: control target
= control target key end

     0   :  { %vm66_vm0 = vcmask 1046531   ;;  %vm70_vm1 = vcmask 1047559   ;;  %vm50_vm2 = vcmask 1043458   ;;  %s170_s12 = smov 3  ;;  %vm55_vm3 = vcmask 1045508   ;;  %s173_s15 = smov 12  ;;  %s1007_s0 = inlined_call_operand.vmem [shape: f32[32,160], index: 0, kind: input, shape index: {}]   ;;  %s1008_s1 = inlined_call_operand.vmem [shape: f32[1,5120], index: 1, kind: output, shape index: {}]  }
   0x1   :  { %v617_v0 = vld [vmem:[%s1007_s0 + $0x27] ss:$8 sm:$0x7]   ;;  %v618_v1 = vld [vmem:[%s1007_s0 + $0xb] ss:$8 sm:$0x78]  }
   0x2   :  { %v619_v2 = vld [vmem:[%s1007_s0 + $0x38] sm:$0x80]   ;;  %v95_v3 = vsel %vm66_vm0, %v618_v1, %v617_v0  ;;  %v628_v5 = vld [vmem:[%s1007_s0 + $0x12] ss:$4 sm:%s170_s12]   ;;  %s178_s16 = smov 48  ;;  %s686_s17 = smov 96  }
   0x3   :  { %v99_v4 = vsel %vm70_vm1, %v619_v2, %v95_v3  ;;  %vm60_vm4 = vcmask 1047558   ;;  %v629_v6 = vld [vmem:[%s1007_s0 - $0x6] ss:$4 sm:%s173_s15]   ;;  %s183_s20 = smov 192  ;;  %vm5_vm5 = vcmask 261120   ;;  %s45_s21 = smov 3 }
   0x4   :  { %100 = vrot.lane.b32.xlu0 %v99_v4, %s686_s17  ;;  %v176_v7 = vsel %vm50_vm2, %v629_v6, %v628_v5  ;;  %v630_v8 = vld [vmem:[%s1007_s0 + $0x22] ss:$4 sm:%s178_s16]   ;;  %s48_s26 = smov 12  ;;  %s53_s27 = smov 48  ;;  %v616_v10 = vld [vmem:[%s1007_s0 + $0x18] sm:$0x80]  }
   0x5   :  { %v631_v9 = vld [vmem:[%s1007_s0 + $0xa] ss:$4 sm:%s183_s20]   ;;  %v181_v11 = vsel %vm55_vm3, %v630_v8, %v176_v7  ;;  %v610_v12 = vld [vmem:[%s1007_s0 + $0x3] ss:$4 sm:%s45_s21]   ;;  %s58_s5 = smov 192  ;;  %s112_s6 = smov 3 }
   0x6   :  { %v611_v13 = vld [vmem:[%s1007_s0 + $0xb] ss:$4 sm:%s48_s26]   ;;  %v186_v14 = vsel %vm60_vm4, %v631_v9, %v181_v11  ;;  %s115_s11 = smov 12  ;;  %s120_s12 = smov 48  ;;  %v620_v23 = vld [vmem:[%s1007_s0 + $0x6] ss:$12 sm:%s112_s6]  }
   0x7   :  { %v51_v15 = vsel %vm50_vm2, %v611_v13, %v610_v12  ;;  %v612_v16 = vld [vmem:[%s1007_s0 + $0x13] ss:$4 sm:%s53_s27]   ;;  %s687_s13 = smov 64   ;;  %v621_v24 = vld [vmem:[%s1007_s0 + $0x3e] ss:$-20 sm:%s115_s11]   ;;  %s125_s23 = smov 192 }
   0x8   :  { %v613_v17 = vld [vmem:[%s1007_s0 + $0x1b] ss:$4 sm:%s58_s5]   ;;  %187 = vrot.lane.b32.xlu1 %v186_v14, %s687_s13  ;;  %v56_v18 = vsel %vm55_vm3, %v612_v16, %v51_v15  ;;  %s130_s24 = smov 3  ;;  %v118_v26 = vsel %vm50_vm2, %v621_v24, %v620_v23  ;;  %s133_s29 = smov 12  ;;  %vm147_vm6 = vcmask 523264   ;;  %vm76_vm7 = vcmask 785408  }
   0x9   :  { %v614_v19 = vld [vmem:[%s1007_s0 + $0x7] ss:$8 sm:$0x7]   ;;  %v615_v20 = vld [vmem:[%s1007_s0 - $0x15] ss:$8 sm:$0x78]   ;;  %v61_v21 = vsel %vm60_vm4, %v613_v17, %v56_v18 }
   0xa   :  { %v67_v22 = vsel %vm66_vm0, %v615_v20, %v614_v19  ;;  %v622_v27 = vld [vmem:[%s1007_s0 - $0xa] ss:$12 sm:%s120_s12]   ;;  %s138_s30 = smov 48  ;;  %s143_s6 = smov 192  ;;  %vm81_vm8 = vcmask 1048320   ;;  %vm189_vm9 = vcmask 1048064  }
   0xb   :  { %v71_v25 = vsel %vm70_vm1, %v616_v10, %v67_v22  ;;  %v623_v28 = vld [vmem:[%s1007_s0 + $0xae] ss:$-20 sm:%s125_s23]   ;;  %v123_v30 = vsel %vm55_vm3, %v622_v27, %v118_v26  ;;  %s199_s7 = smov 3  ;;  %s202_s9 = smov 12  ;;  %vm160_vm10 = vcmask 785920   ;;  %vm247_vm11 = vcmask 523520  }
   0xc   :  { %v73_v29 = vsel %vm5_vm5, %v71_v25, %v61_v21  ;;  %v624_v31 = vld [vmem:[%s1007_s0 + $0xe] ss:$12 sm:%s130_s24]   ;;  %v128_v33 = vsel %vm60_vm4, %v623_v28, %v123_v30  ;;  %s207_s10 = smov 48  ;;  %v632_v38 = vld [vmem:[%s1007_s0 + $0x11] ss:$4 sm:%s199_s7]   ;;  %s212_s16 = smov 192 }
   0xd   :  { %v625_v32 = vld [vmem:[%s1007_s0 + $0x46] ss:$-20 sm:%s133_s29]   ;;  %74 = vrot.lane.b32.xlu0 %v73_v29, %s686_s17  ;;  %s217_s18 = smov 3  ;;  %s220_s23 = smov 12  ;;  %vm276_vm12 = vcmask 1047808  }
   0xe   :  { %v136_v34 = vsel %vm50_vm2, %v625_v32, %v624_v31  ;;  %v626_v35 = vld [vmem:[%s1007_s0 - $0x2] ss:$12 sm:%s138_s30]   ;;  %v633_v40 = vld [vmem:[%s1007_s0 - $0x7] ss:$4 sm:%s202_s9]   ;;  %s225_s24 = smov 48  ;;  %s230_s29 = smov 192 }
   0xf   :  { %v141_v36 = vsel %vm55_vm3, %v626_v35, %v136_v34  ;;  %v627_v37 = vld [vmem:[%s1007_s0 + $0xb6] ss:$-20 sm:%s143_s6]   ;;  %v634_v41 = vld [vmem:[%s1007_s0 + $0x21] ss:$4 sm:%s207_s10]   ;;  %v205_v43 = vsel %vm50_vm2, %v633_v40, %v632_v38  ;;  %s257_s2 = smov 3  ;;  %s260_s3 = smov 12 }
  0x10   :  { %v146_v39 = vsel %vm60_vm4, %v627_v37, %v141_v36  ;;  %v635_v44 = vld [vmem:[%s1007_s0 + $0x9] ss:$4 sm:%s212_s16]   ;;  %v210_v46 = vsel %vm55_vm3, %v634_v41, %v205_v43  ;;  %s265_s17 = smov 48  ;;  %s270_s8 = smov 192 }
  0x11   :  { %v148_v42 = vsel %vm147_vm6, %v146_v39, %v128_v33  ;;  %v636_v45 = vld [vmem:[%s1007_s0 + $0x19] ss:$4 sm:%s217_s18]   ;;  %v215_v48 = vsel %vm60_vm4, %v635_v44, %v210_v46  ;;  %s3_s14 = smov 3  ;;  %s9_s20 = smov 3 }
  0x12   :  { %149 = vrot.lane.b32.xlu1 %v148_v42, %s687_s13  ;;  %v637_v47 = vld [vmem:[%s1007_s0 + $0x1] ss:$4 sm:%s220_s23]   ;;  %s15_s21 = smov 3  ;;  %s21_s26 = smov 3 }
  0x13   :  { %v223_v49 = vsel %vm50_vm2, %v637_v47, %v636_v45  ;;  %v638_v50 = vld [vmem:[%s1007_s0 + $0x29] ss:$4 sm:%s225_s24]   ;;  %v603_v61 = vld [vmem:[%s1007_s0 + $0x8] ss:$4 sm:%s3_s14]   ;;  %s26_s27 = smov 3  ;;  %s688_s28 = smov 32  }
  0x14   :  { %v639_v51 = vld [vmem:[%s1007_s0 + $0x11] ss:$4 sm:%s230_s29]   ;;  %v228_v52 = vsel %vm55_vm3, %v638_v50, %v223_v49  ;;  %v604_v62 = vld [vmem:[%s1007_s0 + $0x18] ss:$4 sm:%s9_s20]   ;;  %s30_s30 = smov 3  ;;  %s40_s5 = smov 3 }
  0x15   :  { %v640_v53 = vld [vmem:[%s1007_s0 + $0x15] ss:$-20 sm:%s257_s2]   ;;  %v233_v55 = vsel %vm60_vm4, %v639_v51, %v228_v52  ;;  %7 = vst.msk [vmem:[#allocation0 + $0x8] ss:$40 sm:$0x3] %vm5_vm5, %v603_v61   ;;  %s35_s2 = smov 3 }
  0x16   :  { %v641_v54 = vld [vmem:[%s1007_s0 - $0x13] ss:$12 sm:%s260_s3]   ;;  %v235_v59 = vsel %vm76_vm7, %v233_v55, %v215_v48  ;;  %13 = vst.msk [vmem:[#allocation0 + $0x58] ss:$40 sm:$0x3] %vm5_vm5, %v604_v62  }
  0x17   :  { %v263_v56 = vsel %vm50_vm2, %v641_v54, %v640_v53  ;;  %v642_v57 = vld [vmem:[%s1007_s0 + $0x85] ss:$-20 sm:%s265_s17]   ;;  %236 = vrot.lane.b32.xlu0 %v235_v59, %s688_s28 }
  0x18   :  { %v643_v58 = vld [vmem:[%s1007_s0 - $0x23] ss:$12 sm:%s270_s8]   ;;  %v268_v60 = vsel %vm55_vm3, %v642_v57, %v263_v56  ;;  %v605_v0 = vld [vmem:[%s1007_s0 + $0x28] ss:$4 sm:%s15_s21]  }
  0x19   :  { %v273_v63 = vsel %vm60_vm4, %v643_v58, %v268_v60  ;;  %19 = vst.msk [vmem:[#allocation0 + $0xa8] ss:$40 sm:$0x3] %vm5_vm5, %v605_v0   ;;  %v606_v1 = vld [vmem:[%s1007_s0 + $0x38] ss:$4 sm:%s21_s26]  }
  0x1a   :  { %274 = vrot.lane.b32.xlu1 %v273_v63, %s688_s28  ;;  %25 = vst.msk [vmem:[#allocation0 + $0xf8] ss:$40 sm:$0x3] %vm5_vm5, %v606_v1   ;;  %v27_v2 = vld [vmem:[%s1007_s0] ss:$4 sm:%s26_s27]  }
  0x1b   :  { %v607_v3 = vld [vmem:[%s1007_s0 + $0x10] ss:$4 sm:%s30_s30]   ;;  %28 = vst [vmem:[#allocation0] ss:$40 sm:$0x3] %v27_v2  }
  0x1c   :  { %33 = vst [vmem:[#allocation0 + $0x50] ss:$40 sm:$0x3] %v607_v3   ;;  %v608_v4 = vld [vmem:[%s1007_s0 + $0x20] ss:$4 sm:%s35_s2]  }
  0x1d   :  { %v609_v5 = vld [vmem:[%s1007_s0 + $0x30] ss:$4 sm:%s40_s5]   ;;  %38 = vst [vmem:[#allocation0 + $0xa0] ss:$40 sm:$0x3] %v608_v4  }
  0x1e   :  { %43 = vst [vmem:[#allocation0 + $0xf0] ss:$40 sm:$0x3] %v609_v5  }
  0x22   :  { %v289_v6 = vld [vmem:[#allocation0] sm:$0x1]  ;;  %v321_v7 = vld [vmem:[#allocation0 + $0x28] sm:$0x1] }
  0x23   :  { %v356_v8 = vld [vmem:[#allocation0 + $0x50] sm:$0x1]  ;;  %292 = vst [vmem:[%s1008_s1] sm:$0x1] %v289_v6  ;;  %648 = vst [vmem:[%s1008_s1 + $0x5] sm:$0x1] %v321_v7 }
  0x24   :  { %653 = vst [vmem:[%s1008_s1 + $0xa] sm:$0x1] %v356_v8  ;;  %v391_v9 = vld [vmem:[#allocation0 + $0x78] sm:$0x1]  ;;  %v426_v10 = vld [vmem:[#allocation0 + $0xa0] sm:$0x1] }
  0x25   :  { %v461_v11 = vld [vmem:[#allocation0 + $0xc8] sm:$0x1]  ;;  %658 = vst [vmem:[%s1008_s1 + $0xf] sm:$0x1] %v391_v9  ;;  %663 = vst [vmem:[%s1008_s1 + $0x14] sm:$0x1] %v426_v10 }
  0x26   :  { %668 = vst [vmem:[%s1008_s1 + $0x19] sm:$0x1] %v461_v11  ;;  %v496_v12 = vld [vmem:[#allocation0 + $0xf0] sm:$0x1]  ;;  %v531_v13 = vld [vmem:[#allocation0 + $0x118] sm:$0x1] }
  0x27   :  { %673 = vst [vmem:[%s1008_s1 + $0x1e] sm:$0x1] %v496_v12  ;;  %678 = vst [vmem:[%s1008_s1 + $0x23] sm:$0x1] %v531_v13 }
  0x76   :  { %v101_v14 = vpop.permute.xlu0 %100  }
  0x77   :  { %106 = vst.msk [vmem:[#allocation0 + $0x220] ss:$-120 sm:$0xc] %vm81_vm8, %v101_v14  }
  0x7a   :  { %v188_v15 = vpop.permute.xlu1 %187  }
  0x7b   :  { %191 = vst.msk [vmem:[#allocation0 + $0x60] ss:$40 sm:$0x3] %vm189_vm9, %v188_v15   ;;  %193 = vst.msk [vmem:[#allocation0 - $0x40] ss:$40 sm:$0xc] %vm189_vm9, %v188_v15  }
  0x7c   :  { %195 = vst.msk [vmem:[#allocation0 + $0x60] ss:$40 sm:$0x30] %vm189_vm9, %v188_v15   ;;  %197 = vst.msk [vmem:[#allocation0 - $0x40] ss:$40 sm:$0xc0] %vm189_vm9, %v188_v15  }
  0x7f   :  { %v75_v16 = vpop.permute.xlu0 %74  }
  0x80   :  { %85 = vst.msk [vmem:[#allocation0 + $0x180] ss:$-120 sm:$0xc] %vm81_vm8, %v75_v16  }
  0x81   :  { %78 = vst.msk [vmem:[#allocation0 + $0x20] ss:$40 sm:$0xf] %vm76_vm7, %v75_v16   ;;  %80 = vst.msk [vmem:[#allocation0 + $0x20] ss:$40 sm:$0xf0] %vm76_vm7, %v75_v16  }
  0x82   :  { %83 = vst.msk [vmem:[#allocation0 + $0x40] ss:$8 sm:$0x3] %vm81_vm8, %v75_v16   ;;  %87 = vst.msk [vmem:[#allocation0 - $0x100] ss:$72 sm:$0x30] %vm81_vm8, %v75_v16  }
  0x83   :  { %89 = vst.msk [vmem:[#allocation0 - $0x80] ss:$40 sm:$0xc0] %vm81_vm8, %v75_v16   ;;  %104 = vst.msk [vmem:[#allocation0 + $0xe0] ss:$8 sm:$0x3] %vm81_vm8, %v101_v14  }
  0x84   :  { %108 = vst.msk [vmem:[#allocation0 - $0x60] ss:$72 sm:$0x30] %vm81_vm8, %v101_v14   ;;  %110 = vst.msk [vmem:[#allocation0 + $0x20] ss:$40 sm:$0xc0] %vm81_vm8, %v101_v14   ;;  %v150_v17 = vpop.permute.xlu1 %149  }
  0x85   :  { %159 = vst.msk [vmem:[#allocation0 + $0xb1] sm:$0x80] %vm147_vm6, %v150_v17   ;;  %153 = vst.msk [vmem:[#allocation0 + $0x40] ss:$40 sm:$0x7] %vm147_vm6, %v150_v17  }
  0x86   :  { %155 = vst.msk [vmem:[#allocation0 - $0x240] ss:$200 sm:$0x18] %vm147_vm6, %v150_v17   ;;  %157 = vst.msk [vmem:[#allocation0 + $0x40] ss:$40 sm:$0x60] %vm147_vm6, %v150_v17  }
  0x87   :  { %168 = vst.msk [vmem:[#allocation0 + $0xb1] sm:$0x80] %vm160_vm10, %v150_v17   ;;  %162 = vst.msk [vmem:[#allocation0 + $0x40] ss:$40 sm:$0x7] %vm160_vm10, %v150_v17  }
  0x88   :  { %164 = vst.msk [vmem:[#allocation0 - $0x240] ss:$200 sm:$0x18] %vm160_vm10, %v150_v17   ;;  %166 = vst.msk [vmem:[#allocation0 + $0x40] ss:$40 sm:$0x60] %vm160_vm10, %v150_v17  }
  0x89   :  { %v237_v18 = vpop.permute.xlu0 %236   ;;  %v314_v19 = vld [vmem:[#allocation0 + $0x20] sm:$0x1]  ;;  %v349_v20 = vld [vmem:[#allocation0 + $0x48] sm:$0x1] }
  0x8a   :  { %v384_v21 = vld [vmem:[#allocation0 + $0x70] sm:$0x1]  ;;  %240 = vst.msk [vmem:[#allocation0 + $0x60] ss:$40 sm:$0x3] %vm5_vm5, %v237_v18  }
  0x8b   :  { %242 = vst.msk [vmem:[#allocation0 - $0x40] ss:$40 sm:$0xc] %vm5_vm5, %v237_v18   ;;  %244 = vst.msk [vmem:[#allocation0 + $0x60] ss:$40 sm:$0x30] %vm5_vm5, %v237_v18  }
  0x8c   :  { %246 = vst.msk [vmem:[#allocation0 - $0x40] ss:$40 sm:$0xc0] %vm5_vm5, %v237_v18   ;;  %v419_v22 = vld [vmem:[#allocation0 + $0x98] sm:$0x1]  ;;  %v275_v25 = vpop.permute.xlu1 %274  }
  0x8d   :  { %v454_v23 = vld [vmem:[#allocation0 + $0xc0] sm:$0x1]  ;;  %v489_v24 = vld [vmem:[#allocation0 + $0xe8] sm:$0x1]  ;;  %647 = vst [vmem:[%s1008_s1 + $0x4] sm:$0x1] %v314_v19 }
  0x8e   :  { %652 = vst [vmem:[%s1008_s1 + $0x9] sm:$0x1] %v349_v20  ;;  %657 = vst [vmem:[%s1008_s1 + $0xe] sm:$0x1] %v384_v21  ;;  %v524_v26 = vld [vmem:[#allocation0 + $0x110] sm:$0x1] }
  0x8f   :  { %v559_v27 = vld [vmem:[#allocation0 + $0x138] sm:$0x1]  ;;  %278 = vst.msk [vmem:[#allocation0 + $0x80] ss:$-120 sm:$0x3] %vm276_vm12, %v275_v25  }
  0x90   :  { %280 = vst.msk [vmem:[#allocation0 - $0x20] ss:$40 sm:$0xc] %vm276_vm12, %v275_v25   ;;  %282 = vst.msk [vmem:[#allocation0 + $0x300] ss:$-120 sm:$0x30] %vm276_vm12, %v275_v25  }
  0x91   :  { %284 = vst.msk [vmem:[#allocation0 - $0x20] ss:$40 sm:$0xc0] %vm276_vm12, %v275_v25   ;;  %662 = vst [vmem:[%s1008_s1 + $0x13] sm:$0x1] %v419_v22 }
  0x92   :  { %249 = vst.msk [vmem:[#allocation0 + $0x60] ss:$40 sm:$0x3] %vm247_vm11, %v237_v18   ;;  %251 = vst.msk [vmem:[#allocation0 - $0x40] ss:$40 sm:$0xc] %vm247_vm11, %v237_v18  }
  0x93   :  { %253 = vst.msk [vmem:[#allocation0 + $0x60] ss:$40 sm:$0x30] %vm247_vm11, %v237_v18   ;;  %255 = vst.msk [vmem:[#allocation0 - $0x40] ss:$40 sm:$0xc0] %vm247_vm11, %v237_v18  }
  0x94   :  { %667 = vst [vmem:[%s1008_s1 + $0x18] sm:$0x1] %v454_v23  ;;  %672 = vst [vmem:[%s1008_s1 + $0x1d] sm:$0x1] %v489_v24  ;;  %v307_v28 = vld [vmem:[#allocation0 + $0x18] sm:$0x1] }
  0x95   :  { %677 = vst [vmem:[%s1008_s1 + $0x22] sm:$0x1] %v524_v26  ;;  %682 = vst [vmem:[%s1008_s1 + $0x27] sm:$0x1] %v559_v27  ;;  %v342_v29 = vld [vmem:[#allocation0 + $0x40] sm:$0x1] }
  0x96   :  { %v377_v30 = vld [vmem:[#allocation0 + $0x68] sm:$0x1]  ;;  %646 = vst [vmem:[%s1008_s1 + $0x3] sm:$0x1] %v307_v28  ;;  %651 = vst [vmem:[%s1008_s1 + $0x8] sm:$0x1] %v342_v29 }
  0x97   :  { %656 = vst [vmem:[%s1008_s1 + $0xd] sm:$0x1] %v377_v30  ;;  %v412_v31 = vld [vmem:[#allocation0 + $0x90] sm:$0x1]  ;;  %v447_v32 = vld [vmem:[#allocation0 + $0xb8] sm:$0x1] }
  0x98   :  { %v482_v33 = vld [vmem:[#allocation0 + $0xe0] sm:$0x1]  ;;  %661 = vst [vmem:[%s1008_s1 + $0x12] sm:$0x1] %v412_v31  ;;  %666 = vst [vmem:[%s1008_s1 + $0x17] sm:$0x1] %v447_v32 }
  0x99   :  { %671 = vst [vmem:[%s1008_s1 + $0x1c] sm:$0x1] %v482_v33  ;;  %v517_v34 = vld [vmem:[#allocation0 + $0x108] sm:$0x1]  ;;  %v552_v35 = vld [vmem:[#allocation0 + $0x130] sm:$0x1] }
  0x9a   :  { %676 = vst [vmem:[%s1008_s1 + $0x21] sm:$0x1] %v517_v34  ;;  %681 = vst [vmem:[%s1008_s1 + $0x26] sm:$0x1] %v552_v35  ;;  %v294_v36 = vld [vmem:[#allocation0 + $0x8] sm:$0x1] }
  0x9b   :  { %v328_v37 = vld [vmem:[#allocation0 + $0x30] sm:$0x1]  ;;  %v363_v38 = vld [vmem:[#allocation0 + $0x58] sm:$0x1]  ;;  %644 = vst [vmem:[%s1008_s1 + $0x1] sm:$0x1] %v294_v36 }
  0x9c   :  { %649 = vst [vmem:[%s1008_s1 + $0x6] sm:$0x1] %v328_v37  ;;  %654 = vst [vmem:[%s1008_s1 + $0xb] sm:$0x1] %v363_v38  ;;  %v398_v39 = vld [vmem:[#allocation0 + $0x80] sm:$0x1] }
  0x9d   :  { %v433_v40 = vld [vmem:[#allocation0 + $0xa8] sm:$0x1]  ;;  %v468_v41 = vld [vmem:[#allocation0 + $0xd0] sm:$0x1]  ;;  %659 = vst [vmem:[%s1008_s1 + $0x10] sm:$0x1] %v398_v39 }
  0x9e   :  { %664 = vst [vmem:[%s1008_s1 + $0x15] sm:$0x1] %v433_v40  ;;  %669 = vst [vmem:[%s1008_s1 + $0x1a] sm:$0x1] %v468_v41  ;;  %v503_v42 = vld [vmem:[#allocation0 + $0xf8] sm:$0x1] }
  0x9f   :  { %v538_v43 = vld [vmem:[#allocation0 + $0x120] sm:$0x1]  ;;  %v300_v44 = vld [vmem:[#allocation0 + $0x10] sm:$0x1]  ;;  %674 = vst [vmem:[%s1008_s1 + $0x1f] sm:$0x1] %v503_v42 }
  0xa0   :  { %679 = vst [vmem:[%s1008_s1 + $0x24] sm:$0x1] %v538_v43  ;;  %645 = vst [vmem:[%s1008_s1 + $0x2] sm:$0x1] %v300_v44  ;;  %v335_v45 = vld [vmem:[#allocation0 + $0x38] sm:$0x1] }
  0xa1   :  { %v370_v46 = vld [vmem:[#allocation0 + $0x60] sm:$0x1]  ;;  %v405_v47 = vld [vmem:[#allocation0 + $0x88] sm:$0x1]  ;;  %650 = vst [vmem:[%s1008_s1 + $0x7] sm:$0x1] %v335_v45 }
  0xa2   :  { %655 = vst [vmem:[%s1008_s1 + $0xc] sm:$0x1] %v370_v46  ;;  %660 = vst [vmem:[%s1008_s1 + $0x11] sm:$0x1] %v405_v47  ;;  %v440_v48 = vld [vmem:[#allocation0 + $0xb0] sm:$0x1] }
  0xa3   :  { %v475_v49 = vld [vmem:[#allocation0 + $0xd8] sm:$0x1]  ;;  %v510_v50 = vld [vmem:[#allocation0 + $0x100] sm:$0x1]  ;;  %665 = vst [vmem:[%s1008_s1 + $0x16] sm:$0x1] %v440_v48 }
  0xa4   :  { %670 = vst [vmem:[%s1008_s1 + $0x1b] sm:$0x1] %v475_v49  ;;  %675 = vst [vmem:[%s1008_s1 + $0x20] sm:$0x1] %v510_v50  ;;  %v545_v51 = vld [vmem:[#allocation0 + $0x128] sm:$0x1] }
  0xa5   :  { %680 = vst [vmem:[%s1008_s1 + $0x25] sm:$0x1] %v545_v51 }

// kernel: interaction_forward.1
= control target key start
LH: loop header
LB: loop body
LE: loop exit
PB: predicated region body
PF: predicated region fallthrough
CT: control target
= control target key end

     0   :  { %s12466_s24 = smov 0   ;;  %s12468_s25 = smov 0   ;;  %s17411_s0 = inlined_call_operand.vmem [shape: f32[2,16,5120], index: 0, kind: input, shape index: {}]   ;;  %s17412_s1 = inlined_call_operand.vmem [shape: f32[2,16,5120], index: 1, kind: input, shape index: {}]   ;;  %s17413_s2 = inlined_call_operand.vmem [shape: bf16[16,16], index: 2, kind: input, shape index: {}]   ;;  %s17414_s3 = inlined_call_operand.vmem [shape: bf16[16,16], index: 3, kind: input, shape index: {}]   ;;  %s17415_s4 = inlined_call_operand.vmem [shape: f32[1,5120], index: 4, kind: input, shape index: {}]   ;;  %s17416_s5 = inlined_call_operand.vmem [shape: bf16[5120,32], index: 5, kind: input, shape index: {}]   ;;  %s17417_s6 = inlined_call_operand.vmem [shape: bf16[32,5120], index: 6, kind: input, shape index: {}]   ;;  %s17418_s7 = inlined_call_operand.vmem [shape: f32[2,16,5120], index: 7, kind: output, shape index: {}]  }
   0x1   :  { %s12470_s26 = smov 0  }
   0x2 LB: > { %s29_s27 = sadd.s32 1, %s12419_s25  ;;  %p10040_p0 = scmp.ge.s32.totalorder %s12423_s26, 1  ;;  %s12423_s26 = sphi %s12470_s26, %s17_s26   ;;  %s12419_s25 = sphi %s12468_s25, %s18088_s25   ;;  %s12415_s24 = sphi %s12466_s24, %s18087_s24  }
   0x3   : > { %p31_p1 = scmp.ge.s32.totalorder %s29_s27, 2  ;;  %p275_p2 = scmp.lt.s32.totalorder %s12423_s26, 3 }
   0x5   : > { %s18090_s27 = smov (%p31_p1, %s29_s27), 0  ;;  %p276_p3 = pnand %p10040_p0, %p275_p2 }
   0x7   : > { %279 = sbr.rel (%p276_p3) target bundleno = 1610 (0x64a), region = 48 }
   0xc   : > { %p325_p4 = scmp.lt.s32.totalorder %s12415_s24, 1  ;;  %v17419_v0 = vmov 0   ;;  %v12503_v8 = vld [vmem:[%s17414_s3] sm:$0xff]   ;;  %vm604_vm0 = vcmask 130048   ;;  %vm7191_vm1 = vcmask 261120  }
   0xd   : > { %640 = vmatprep.mubr.bf16.mxu0 %v17419_v0  ;;  %683 = vmatprep.mubr.bf16.mxu1 %v17419_v0 }
   0xe   : > { %s18092_s24 = smov (!%p325_p4, %s12415_s24), 1 }
   0xf   : > { %s12486_s28 = smul.u32 640, %s18092_s24 }
  0x11   : > { %s12492_s8 = scalar_lea.vmem %s17412_s1, %s12486_s28  ;;  %s12621_s13 = scalar_lea.vmem %s17411_s0, %s12486_s28 }
  0x12   : > { %v436_v1 = vld [vmem:[%s12492_s8 + $0x8] sm:$0xff]  ;;  %v438_v3 = vld [vmem:[%s12492_s8 + $0x18] sm:$0xff]  ;;  %v435_v6 = vld [vmem:[%s12492_s8] sm:$0xff]  ;;  %s16941_s23 = scalar_lea.vmem %s17418_s7, %s12486_s28 }
  0x13   : > { %v476_v2 = vld [vmem:[%s12492_s8 + $0x148] sm:$0xff]  ;;  %v478_v5 = vld [vmem:[%s12492_s8 + $0x158] sm:$0xff]  ;;  %v475_v7 = vld [vmem:[%s12492_s8 + $0x140] sm:$0xff] }
  0x14   : > { %v560_v4 = vpack.c.bf16 %v476_v2, %v436_v1  ;;  %v562_v9 = vpack.c.bf16 %v478_v5, %v438_v3  ;;  %v559_v10 = vpack.c.bf16 %v475_v7, %v435_v6  ;;  %v437_v11 = vld [vmem:[%s12492_s8 + $0x10] sm:$0xff]  ;;  %v440_v13 = vld [vmem:[%s12492_s8 + $0x28] sm:$0xff]  ;;  %v439_v16 = vld [vmem:[%s12492_s8 + $0x20] sm:$0xff] }
  0x15   : > { %v477_v12 = vld [vmem:[%s12492_s8 + $0x150] sm:$0xff]  ;;  %v480_v15 = vld [vmem:[%s12492_s8 + $0x168] sm:$0xff]  ;;  %v479_v17 = vld [vmem:[%s12492_s8 + $0x160] sm:$0xff] }
  0x16   : > { %622 = vmatprep.subr.bf16.mxu0 %v560_v4  ;;  %v561_v14 = vpack.c.bf16 %v477_v12, %v437_v11  ;;  %665 = vmatprep.subr.bf16.mxu1 %v562_v9  ;;  %v564_v18 = vpack.c.bf16 %v480_v15, %v440_v13  ;;  %v563_v19 = vpack.c.bf16 %v479_v17, %v439_v16  ;;  %v442_v20 = vld [vmem:[%s12492_s8 + $0x38] sm:$0xff]  ;;  %v441_v22 = vld [vmem:[%s12492_s8 + $0x30] sm:$0xff]  ;;  %v444_v25 = vld [vmem:[%s12492_s8 + $0x48] sm:$0xff] }
  0x17   : > { %623 = vmatpush1.bf16.msra.mxu0 %v559_v10  ;;  %v482_v21 = vld [vmem:[%s12492_s8 + $0x178] sm:$0xff]  ;;  %v481_v24 = vld [vmem:[%s12492_s8 + $0x170] sm:$0xff]  ;;  %v484_v26 = vld [vmem:[%s12492_s8 + $0x188] sm:$0xff] }
  0x18   : > { %666 = vmatpush1.bf16.msra.mxu1 %v561_v14  ;;  %v566_v23 = vpack.c.bf16 %v482_v21, %v442_v20  ;;  %708 = vmatprep.subr.bf16.mxu0 %v564_v18  ;;  %v565_v27 = vpack.c.bf16 %v481_v24, %v441_v22  ;;  %v568_v28 = vpack.c.bf16 %v484_v26, %v444_v25  ;;  %v446_v29 = vld [vmem:[%s12492_s8 + $0x58] sm:$0xff]  ;;  %v443_v32 = vld [vmem:[%s12492_s8 + $0x40] sm:$0xff]  ;;  %v445_v34 = vld [vmem:[%s12492_s8 + $0x50] sm:$0xff] }
  0x19   : > { %v486_v30 = vld [vmem:[%s12492_s8 + $0x198] sm:$0xff]  ;;  %v483_v33 = vld [vmem:[%s12492_s8 + $0x180] sm:$0xff]  ;;  %v485_v35 = vld [vmem:[%s12492_s8 + $0x190] sm:$0xff] }
  0x1a   : > { %10045 = vmatmul.mubr.msk.bf16.vlgmr.msra.gmra.mxu0 %vm604_vm0, %v12503_v8  ;;  %751 = vmatprep.subr.bf16.mxu1 %v566_v23  ;;  %v570_v31 = vpack.c.bf16 %v486_v30, %v446_v29  ;;  %v448_v36 = vld [vmem:[%s12492_s8 + $0x68] sm:$0xff]  ;;  %v567_v38 = vpack.c.bf16 %v483_v33, %v443_v32  ;;  %v450_v39 = vld [vmem:[%s12492_s8 + $0x78] sm:$0xff]  ;;  %v569_v41 = vpack.c.bf16 %v485_v35, %v445_v34  ;;  %v447_v44 = vld [vmem:[%s12492_s8 + $0x60] sm:$0xff] }
  0x1b   : > { %10046 = vmatmul.mubr.msk.bf16.vlgmr.msra.gmra.mxu1 %vm604_vm0, %v12503_v8  ;;  %709 = vmatpush1.bf16.msra.mxu0 %v563_v19  ;;  %v488_v37 = vld [vmem:[%s12492_s8 + $0x1a8] sm:$0xff]  ;;  %v490_v40 = vld [vmem:[%s12492_s8 + $0x1b8] sm:$0xff]  ;;  %v487_v45 = vld [vmem:[%s12492_s8 + $0x1a0] sm:$0xff] }
  0x1c   : > { %752 = vmatpush1.bf16.msra.mxu1 %v565_v27  ;;  %726 = vmatprep.mubr.bf16.mxu0 %v17419_v0  ;;  %v572_v42 = vpack.c.bf16 %v488_v37, %v448_v36  ;;  %v574_v43 = vpack.c.bf16 %v490_v40, %v450_v39  ;;  %v449_v46 = vld [vmem:[%s12492_s8 + $0x70] sm:$0xff]  ;;  %v452_v48 = vld [vmem:[%s12492_s8 + $0x88] sm:$0xff]  ;;  %v571_v50 = vpack.c.bf16 %v487_v45, %v447_v44  ;;  %v454_v51 = vld [vmem:[%s12492_s8 + $0x98] sm:$0xff] }
  0x1d   : > { %769 = vmatprep.mubr.bf16.mxu1 %v17419_v0  ;;  %794 = vmatprep.subr.bf16.mxu0 %v568_v28  ;;  %v489_v47 = vld [vmem:[%s12492_s8 + $0x1b0] sm:$0xff]  ;;  %v492_v49 = vld [vmem:[%s12492_s8 + $0x1c8] sm:$0xff]  ;;  %v494_v52 = vld [vmem:[%s12492_s8 + $0x1d8] sm:$0xff] }
  0x1e   : > { %837 = vmatprep.subr.bf16.mxu1 %v570_v31  ;;  %v573_v53 = vpack.c.bf16 %v489_v47, %v449_v46  ;;  %v576_v54 = vpack.c.bf16 %v492_v49, %v452_v48  ;;  %v578_v55 = vpack.c.bf16 %v494_v52, %v454_v51  ;;  %v451_v56 = vld [vmem:[%s12492_s8 + $0x80] sm:$0xff]  ;;  %v453_v58 = vld [vmem:[%s12492_s8 + $0x90] sm:$0xff]  ;;  %v456_v60 = vld [vmem:[%s12492_s8 + $0xa8] sm:$0xff] }
  0x1f   : > { %v491_v57 = vld [vmem:[%s12492_s8 + $0x1c0] sm:$0xff]  ;;  %v493_v59 = vld [vmem:[%s12492_s8 + $0x1d0] sm:$0xff]  ;;  %v496_v61 = vld [vmem:[%s12492_s8 + $0x1e8] sm:$0xff] }
  0x20   : > { %v575_v62 = vpack.c.bf16 %v491_v57, %v451_v56  ;;  %v458_v63 = vld [vmem:[%s12492_s8 + $0xb8] sm:$0xff]  ;;  %v577_v2 = vpack.c.bf16 %v493_v59, %v453_v58  ;;  %v580_v3 = vpack.c.bf16 %v496_v61, %v456_v60  ;;  %v455_v5 = vld [vmem:[%s12492_s8 + $0xa0] sm:$0xff]  ;;  %v457_v7 = vld [vmem:[%s12492_s8 + $0xb0] sm:$0xff] }
  0x21   : > { %v498_v1 = vld [vmem:[%s12492_s8 + $0x1f8] sm:$0xff]  ;;  %v495_v6 = vld [vmem:[%s12492_s8 + $0x1e0] sm:$0xff]  ;;  %v497_v9 = vld [vmem:[%s12492_s8 + $0x1f0] sm:$0xff] }
  0x22   : > { %10047 = vmatmul.mubr.msk.bf16.vlgmr.msra.gmra.mxu0 %vm604_vm0, %v12503_v8  ;;  %v582_v4 = vpack.c.bf16 %v498_v1, %v458_v63  ;;  %v460_v10 = vld [vmem:[%s12492_s8 + $0xc8] sm:$0xff]  ;;  %v579_v12 = vpack.c.bf16 %v495_v6, %v455_v5  ;;  %v462_v13 = vld [vmem:[%s12492_s8 + $0xd8] sm:$0xff]  ;;  %v581_v15 = vpack.c.bf16 %v497_v9, %v457_v7  ;;  %v459_v18 = vld [vmem:[%s12492_s8 + $0xc0] sm:$0xff] }
  0x23   : > { %10048 = vmatmul.mubr.msk.bf16.vlgmr.msra.gmra.mxu1 %vm604_vm0, %v12503_v8  ;;  %795 = vmatpush1.bf16.msra.mxu0 %v567_v38  ;;  %v500_v11 = vld [vmem:[%s12492_s8 + $0x208] sm:$0xff]  ;;  %v502_v14 = vld [vmem:[%s12492_s8 + $0x218] sm:$0xff]  ;;  %v499_v19 = vld [vmem:[%s12492_s8 + $0x200] sm:$0xff] }
  0x24   : > { %838 = vmatpush1.bf16.msra.mxu1 %v569_v41  ;;  %812 = vmatprep.mubr.bf16.mxu0 %v17419_v0  ;;  %v584_v16 = vpack.c.bf16 %v500_v11, %v460_v10  ;;  %v586_v17 = vpack.c.bf16 %v502_v14, %v462_v13  ;;  %v461_v20 = vld [vmem:[%s12492_s8 + $0xd0] sm:$0xff]  ;;  %v464_v22 = vld [vmem:[%s12492_s8 + $0xe8] sm:$0xff]  ;;  %v583_v24 = vpack.c.bf16 %v499_v19, %v459_v18  ;;  %v466_v25 = vld [vmem:[%s12492_s8 + $0xf8] sm:$0xff] }
  0x25   : > { %855 = vmatprep.mubr.bf16.mxu1 %v17419_v0  ;;  %880 = vmatprep.subr.bf16.mxu0 %v572_v42  ;;  %v501_v21 = vld [vmem:[%s12492_s8 + $0x210] sm:$0xff]  ;;  %v504_v23 = vld [vmem:[%s12492_s8 + $0x228] sm:$0xff]  ;;  %v506_v26 = vld [vmem:[%s12492_s8 + $0x238] sm:$0xff] }
  0x26   : > { %923 = vmatprep.subr.bf16.mxu1 %v574_v43  ;;  %v585_v27 = vpack.c.bf16 %v501_v21, %v461_v20  ;;  %v588_v28 = vpack.c.bf16 %v504_v23, %v464_v22  ;;  %v590_v29 = vpack.c.bf16 %v506_v26, %v466_v25  ;;  %v463_v30 = vld [vmem:[%s12492_s8 + $0xe0] sm:$0xff]  ;;  %v465_v32 = vld [vmem:[%s12492_s8 + $0xf0] sm:$0xff]  ;;  %v468_v34 = vld [vmem:[%s12492_s8 + $0x108] sm:$0xff] }
  0x27   : > { %v503_v31 = vld [vmem:[%s12492_s8 + $0x220] sm:$0xff]  ;;  %v505_v33 = vld [vmem:[%s12492_s8 + $0x230] sm:$0xff]  ;;  %v508_v35 = vld [vmem:[%s12492_s8 + $0x248] sm:$0xff] }
  0x28   : > { %v587_v36 = vpack.c.bf16 %v503_v31, %v463_v30  ;;  %v470_v37 = vld [vmem:[%s12492_s8 + $0x118] sm:$0xff]  ;;  %v589_v39 = vpack.c.bf16 %v505_v33, %v465_v32  ;;  %v592_v40 = vpack.c.bf16 %v508_v35, %v468_v34  ;;  %v467_v41 = vld [vmem:[%s12492_s8 + $0x100] sm:$0xff]  ;;  %v469_v44 = vld [vmem:[%s12492_s8 + $0x110] sm:$0xff] }
  0x29   : > { %v510_v38 = vld [vmem:[%s12492_s8 + $0x258] sm:$0xff]  ;;  %v507_v42 = vld [vmem:[%s12492_s8 + $0x240] sm:$0xff]  ;;  %v509_v45 = vld [vmem:[%s12492_s8 + $0x250] sm:$0xff] }
  0x2a   : > { %10049 = vmatmul.mubr.msk.bf16.vlgmr.msra.gmra.mxu0 %vm604_vm0, %v12503_v8  ;;  %v594_v43 = vpack.c.bf16 %v510_v38, %v470_v37  ;;  %v472_v46 = vld [vmem:[%s12492_s8 + $0x128] sm:$0xff]  ;;  %v474_v48 = vld [vmem:[%s12492_s8 + $0x138] sm:$0xff]  ;;  %v593_v51 = vpack.c.bf16 %v509_v45, %v469_v44  ;;  %v473_v56 = vld [vmem:[%s12492_s8 + $0x130] sm:$0xff] }
  0x2b   : > { %10050 = vmatmul.mubr.msk.bf16.vlgmr.msra.gmra.mxu1 %vm604_vm0, %v12503_v8  ;;  %881 = vmatpush1.bf16.msra.mxu0 %v571_v50  ;;  %v512_v47 = vld [vmem:[%s12492_s8 + $0x268] sm:$0xff]  ;;  %v514_v49 = vld [vmem:[%s12492_s8 + $0x278] sm:$0xff]  ;;  %v591_v50 = vpack.c.bf16 %v507_v42, %v467_v41  ;;  %v513_v57 = vld [vmem:[%s12492_s8 + $0x270] sm:$0xff] }
  0x2c   : > { %924 = vmatpush1.bf16.msra.mxu1 %v573_v53  ;;  %898 = vmatprep.mubr.bf16.mxu0 %v17419_v0  ;;  %v596_v52 = vpack.c.bf16 %v512_v47, %v472_v46  ;;  %v471_v53 = vld [vmem:[%s12492_s8 + $0x120] sm:$0xff]  ;;  %v356_v58 = vld [vmem:[%s12621_s13 + $0x8] sm:$0xff]  ;;  %v358_v60 = vld [vmem:[%s12621_s13 + $0x18] sm:$0xff]  ;;  %v597_v63 = vpack.c.bf16 %v513_v57, %v473_v56 }
  0x2d   : > { %941 = vmatprep.mubr.bf16.mxu1 %v17419_v0  ;;  %966 = vmatprep.subr.bf16.mxu0 %v576_v54  ;;  %v511_v54 = vld [vmem:[%s12492_s8 + $0x260] sm:$0xff]  ;;  %v396_v59 = vld [vmem:[%s12621_s13 + $0x148] sm:$0xff]  ;;  %v398_v61 = vld [vmem:[%s12621_s13 + $0x158] sm:$0xff] }
  0x2e   : > { %1009 = vmatprep.subr.bf16.mxu1 %v578_v55  ;;  %v598_v55 = vpack.c.bf16 %v514_v49, %v474_v48  ;;  %v518_v1 = vpack.c.bf16 %v396_v59, %v356_v58  ;;  %v357_v5 = vld [vmem:[%s12621_s13 + $0x10] sm:$0xff]  ;;  %v360_v7 = vld [vmem:[%s12621_s13 + $0x28] sm:$0xff]  ;;  %v362_v10 = vld [vmem:[%s12621_s13 + $0x38] sm:$0xff] }
  0x2f   : > { %v397_v6 = vld [vmem:[%s12621_s13 + $0x150] sm:$0xff]  ;;  %v400_v9 = vld [vmem:[%s12621_s13 + $0x168] sm:$0xff]  ;;  %v402_v11 = vld [vmem:[%s12621_s13 + $0x178] sm:$0xff] }
  0x30   : > { %v519_v13 = vpack.c.bf16 %v397_v6, %v357_v5  ;;  %v522_v14 = vpack.c.bf16 %v400_v9, %v360_v7  ;;  %v361_v18 = vld [vmem:[%s12621_s13 + $0x30] sm:$0xff]  ;;  %v12663_v20 = vld [vmem:[%s17413_s2] sm:$0xff]   ;;  %v364_v21 = vld [vmem:[%s12621_s13 + $0x48] sm:$0xff] }
  0x31   : > { %v401_v19 = vld [vmem:[%s12621_s13 + $0x170] sm:$0xff]  ;;  %v404_v22 = vld [vmem:[%s12621_s13 + $0x188] sm:$0xff]  ;;  %v406_v23 = vld [vmem:[%s12621_s13 + $0x198] sm:$0xff] }
  0x32   : > { %10051 = vmatmul.mubr.msk.bf16.vlgmr.msra.gmra.mxu0 %vm604_vm0, %v12503_v8  ;;  %v523_v25 = vpack.c.bf16 %v401_v19, %v361_v18  ;;  %v526_v26 = vpack.c.bf16 %v404_v22, %v364_v21  ;;  %v365_v30 = vld [vmem:[%s12621_s13 + $0x50] sm:$0xff]  ;;  %v368_v32 = vld [vmem:[%s12621_s13 + $0x68] sm:$0xff]  ;;  %v370_v34 = vld [vmem:[%s12621_s13 + $0x78] sm:$0xff] }
  0x33   : > { %10052 = vmatmul.mubr.msk.bf16.vlgmr.msra.gmra.mxu1 %vm604_vm0, %v12503_v8  ;;  %967 = vmatpush1.bf16.msra.mxu0 %v575_v62  ;;  %v595_v62 = vpack.c.bf16 %v511_v54, %v471_v53  ;;  %v405_v31 = vld [vmem:[%s12621_s13 + $0x190] sm:$0xff]  ;;  %v408_v33 = vld [vmem:[%s12621_s13 + $0x1a8] sm:$0xff]  ;;  %v410_v35 = vld [vmem:[%s12621_s13 + $0x1b8] sm:$0xff] }
  0x34   : > { %1010 = vmatpush1.bf16.msra.mxu1 %v577_v2  ;;  %984 = vmatprep.mubr.bf16.mxu0 %v17419_v0  ;;  %v355_v2 = vld [vmem:[%s12621_s13] sm:$0xff]  ;;  %v527_v37 = vpack.c.bf16 %v405_v31, %v365_v30  ;;  %v530_v38 = vpack.c.bf16 %v408_v33, %v368_v32  ;;  %v369_v42 = vld [vmem:[%s12621_s13 + $0x70] sm:$0xff]  ;;  %v372_v44 = vld [vmem:[%s12621_s13 + $0x88] sm:$0xff] }
  0x35   : > { %1027 = vmatprep.mubr.bf16.mxu1 %v17419_v0  ;;  %1052 = vmatprep.subr.bf16.mxu0 %v580_v3  ;;  %v395_v3 = vld [vmem:[%s12621_s13 + $0x140] sm:$0xff]  ;;  %v412_v45 = vld [vmem:[%s12621_s13 + $0x1c8] sm:$0xff]  ;;  %v374_v46 = vld [vmem:[%s12621_s13 + $0x98] sm:$0xff] }
  0x36   : > { %1095 = vmatprep.subr.bf16.mxu1 %v582_v4  ;;  %v520_v4 = vpack.c.bf16 %v398_v61, %v358_v60  ;;  %v407_v41 = vld [vmem:[%s12621_s13 + $0x1a0] sm:$0xff]  ;;  %v414_v47 = vld [vmem:[%s12621_s13 + $0x1d8] sm:$0xff]  ;;  %v373_v54 = vld [vmem:[%s12621_s13 + $0x90] sm:$0xff] }
  0x37   : > { %v411_v53 = vld [vmem:[%s12621_s13 + $0x1c0] sm:$0xff]  ;;  %v376_v56 = vld [vmem:[%s12621_s13 + $0xa8] sm:$0xff]  ;;  %v378_v58 = vld [vmem:[%s12621_s13 + $0xb8] sm:$0xff] }
  0x38   : > { %v416_v57 = vld [vmem:[%s12621_s13 + $0x1e8] sm:$0xff]  ;;  %v418_v59 = vld [vmem:[%s12621_s13 + $0x1f8] sm:$0xff] }
  0x39   : > { %v380_v5 = vld [vmem:[%s12621_s13 + $0xc8] sm:$0xff]  ;;  %v382_v7 = vld [vmem:[%s12621_s13 + $0xd8] sm:$0xff] }
  0x3a   : > { %10053 = vmatmul.mubr.msk.bf16.vlgmr.msra.gmra.mxu0 %vm604_vm0, %v12503_v8  ;;  %v420_v6 = vld [vmem:[%s12621_s13 + $0x208] sm:$0xff]  ;;  %v422_v9 = vld [vmem:[%s12621_s13 + $0x218] sm:$0xff] }
  0x3b   : > { %10054 = vmatmul.mubr.msk.bf16.vlgmr.msra.gmra.mxu1 %vm604_vm0, %v12503_v8  ;;  %1053 = vmatpush1.bf16.msra.mxu0 %v579_v12  ;;  %v517_v12 = vpack.c.bf16 %v395_v3, %v355_v2  ;;  %v415_v2 = vld [vmem:[%s12621_s13 + $0x1e0] sm:$0xff]  ;;  %v377_v3 = vld [vmem:[%s12621_s13 + $0xb0] sm:$0xff]  ;;  %v384_v18 = vld [vmem:[%s12621_s13 + $0xe8] sm:$0xff] }
  0x3c   : > { %1096 = vmatpush1.bf16.msra.mxu1 %v581_v15  ;;  %1070 = vmatprep.mubr.bf16.mxu0 %v17419_v0  ;;  %v524_v15 = vpack.c.bf16 %v402_v11, %v362_v10  ;;  %v424_v19 = vld [vmem:[%s12621_s13 + $0x228] sm:$0xff]  ;;  %v386_v21 = vld [vmem:[%s12621_s13 + $0xf8] sm:$0xff] }
  0x3d   : > { %1113 = vmatprep.mubr.bf16.mxu1 %v17419_v0  ;;  %1138 = vmatprep.subr.bf16.mxu0 %v584_v16  ;;  %v359_v16 = vld [vmem:[%s12621_s13 + $0x20] sm:$0xff]  ;;  %v426_v22 = vld [vmem:[%s12621_s13 + $0x238] sm:$0xff]  ;;  %v388_v30 = vld [vmem:[%s12621_s13 + $0x108] sm:$0xff] }
  0x3e   : > { %1181 = vmatprep.subr.bf16.mxu1 %v586_v17  ;;  %v399_v17 = vld [vmem:[%s12621_s13 + $0x160] sm:$0xff]  ;;  %v428_v31 = vld [vmem:[%s12621_s13 + $0x248] sm:$0xff]  ;;  %v390_v32 = vld [vmem:[%s12621_s13 + $0x118] sm:$0xff] }
  0x3f   : > { %v430_v33 = vld [vmem:[%s12621_s13 + $0x258] sm:$0xff] }
  0x42   : > { %10055 = vmatmul.mubr.msk.bf16.vlgmr.msra.gmra.mxu0 %vm604_vm0, %v12503_v8 }
  0x43   : > { %10056 = vmatmul.mubr.msk.bf16.vlgmr.msra.gmra.mxu1 %vm604_vm0, %v12503_v8  ;;  %1139 = vmatpush1.bf16.msra.mxu0 %v583_v24  ;;  %v521_v24 = vpack.c.bf16 %v399_v17, %v359_v16  ;;  %v381_v16 = vld [vmem:[%s12621_s13 + $0xd0] sm:$0xff] }
  0x44   : > { %1182 = vmatpush1.bf16.msra.mxu1 %v585_v27  ;;  %1156 = vmatprep.mubr.bf16.mxu0 %v17419_v0  ;;  %v421_v17 = vld [vmem:[%s12621_s13 + $0x210] sm:$0xff] }
  0x45   : > { %1199 = vmatprep.mubr.bf16.mxu1 %v17419_v0  ;;  %1224 = vmatprep.subr.bf16.mxu0 %v588_v28  ;;  %v363_v28 = vld [vmem:[%s12621_s13 + $0x40] sm:$0xff] }
  0x46   : > { %1267 = vmatprep.subr.bf16.mxu1 %v590_v29  ;;  %v403_v29 = vld [vmem:[%s12621_s13 + $0x180] sm:$0xff] }
  0x4a   : > { %10057 = vmatmul.mubr.msk.bf16.vlgmr.msra.gmra.mxu0 %vm604_vm0, %v12503_v8 }
  0x4b   : > { %10058 = vmatmul.mubr.msk.bf16.vlgmr.msra.gmra.mxu1 %vm604_vm0, %v12503_v8  ;;  %1225 = vmatpush1.bf16.msra.mxu0 %v587_v36  ;;  %v525_v36 = vpack.c.bf16 %v403_v29, %v363_v28  ;;  %v385_v28 = vld [vmem:[%s12621_s13 + $0xf0] sm:$0xff] }
  0x4c   : > { %1268 = vmatpush1.bf16.msra.mxu1 %v589_v39  ;;  %1242 = vmatprep.mubr.bf16.mxu0 %v17419_v0  ;;  %v532_v39 = vpack.c.bf16 %v410_v35, %v370_v34  ;;  %v425_v29 = vld [vmem:[%s12621_s13 + $0x230] sm:$0xff] }
  0x4d   : > { %1285 = vmatprep.mubr.bf16.mxu1 %v17419_v0  ;;  %1310 = vmatprep.subr.bf16.mxu0 %v592_v40  ;;  %v367_v40 = vld [vmem:[%s12621_s13 + $0x60] sm:$0xff]  ;;  %v547_v35 = vpack.c.bf16 %v425_v29, %v385_v28 }
  0x4e   : > { %1353 = vmatprep.subr.bf16.mxu1 %v594_v43  ;;  %v409_v43 = vld [vmem:[%s12621_s13 + $0x1b0] sm:$0xff]  ;;  %v529_v48 = vpack.c.bf16 %v407_v41, %v367_v40 }
  0x4f   : > { %v531_v49 = vpack.c.bf16 %v409_v43, %v369_v42  ;;  %v389_v40 = vld [vmem:[%s12621_s13 + $0x110] sm:$0xff]  ;;  %v392_v42 = vld [vmem:[%s12621_s13 + $0x128] sm:$0xff] }
  0x50   : > { %v429_v41 = vld [vmem:[%s12621_s13 + $0x250] sm:$0xff]  ;;  %v432_v43 = vld [vmem:[%s12621_s13 + $0x268] sm:$0xff] }
  0x52   : > { %10059 = vmatmul.mubr.msk.bf16.vlgmr.msra.gmra.mxu0 %vm604_vm0, %v12503_v8 }
  0x53   : > { %10060 = vmatmul.mubr.msk.bf16.vlgmr.msra.gmra.mxu1 %vm604_vm0, %v12503_v8  ;;  %1311 = vmatpush1.bf16.msra.mxu0 %v591_v50  ;;  %v534_v50 = vpack.c.bf16 %v412_v45, %v372_v44  ;;  %v394_v44 = vld [vmem:[%s12621_s13 + $0x138] sm:$0xff] }
  0x54   : > { %1354 = vmatpush1.bf16.msra.mxu1 %v593_v51  ;;  %1328 = vmatprep.mubr.bf16.mxu0 %v17419_v0  ;;  %v536_v51 = vpack.c.bf16 %v414_v47, %v374_v46  ;;  %v434_v45 = vld [vmem:[%s12621_s13 + $0x278] sm:$0xff]  ;;  %v551_v47 = vpack.c.bf16 %v429_v41, %v389_v40 }
  0x55   : > { %1371 = vmatprep.mubr.bf16.mxu1 %v17419_v0  ;;  %1396 = vmatprep.subr.bf16.mxu0 %v596_v52  ;;  %v371_v52 = vld [vmem:[%s12621_s13 + $0x80] sm:$0xff] }
  0x56   : > { %1439 = vmatprep.subr.bf16.mxu1 %v598_v55  ;;  %v413_v55 = vld [vmem:[%s12621_s13 + $0x1d0] sm:$0xff]  ;;  %v533_v60 = vpack.c.bf16 %v411_v53, %v371_v52 }
  0x57   : > { %v535_v61 = vpack.c.bf16 %v413_v55, %v373_v54  ;;  %v393_v52 = vld [vmem:[%s12621_s13 + $0x130] sm:$0xff] }
  0x58   : > { %v433_v53 = vld [vmem:[%s12621_s13 + $0x270] sm:$0xff] }
  0x59   : > { %v555_v55 = vpack.c.bf16 %v433_v53, %v393_v52 }
  0x5a   : > { %10061 = vmatmul.mubr.msk.bf16.vlgmr.msra.gmra.mxu0 %vm604_vm0, %v12503_v8 }
  0x5b   : > { %10062 = vmatmul.mubr.msk.bf16.vlgmr.msra.gmra.mxu1 %vm604_vm0, %v12503_v8  ;;  %1397 = vmatpush1.bf16.msra.mxu0 %v595_v62  ;;  %v538_v62 = vpack.c.bf16 %v416_v57, %v376_v56  ;;  %v11436_v56 = vld [vmem:[%s17416_s5 + $0x78] sm:$0xff]  }
  0x5c   : > { %1440 = vmatpush1.bf16.msra.mxu1 %v597_v63  ;;  %1414 = vmatprep.mubr.bf16.mxu0 %v17419_v0  ;;  %v540_v63 = vpack.c.bf16 %v418_v59, %v378_v58  ;;  %v11437_v57 = vld [vmem:[%s17416_s5 + $0xf8] sm:$0xff]  }
  0x5d   : > { %1457 = vmatprep.mubr.bf16.mxu1 %v17419_v0  ;;  %1490 = vmatprep.subr.bf16.mxu0 %v518_v1  ;;  %v375_v1 = vld [vmem:[%s12621_s13 + $0xa0] sm:$0xff]  ;;  %v11438_v58 = vld [vmem:[%s17416_s5 + $0x38] sm:$0xff]  }
  0x5e   : > { %1533 = vmatprep.subr.bf16.mxu1 %v520_v4  ;;  %v417_v4 = vld [vmem:[%s12621_s13 + $0x1f0] sm:$0xff]  ;;  %v537_v10 = vpack.c.bf16 %v415_v2, %v375_v1  ;;  %v11439_v59 = vld [vmem:[%s17416_s5 + $0xb8] sm:$0xff]   ;;  %v11444_v1 = vld [vmem:[%s17416_s5 + $0x68] sm:$0xff]  }
  0x5f   : > { %v539_v11 = vpack.c.bf16 %v417_v4, %v377_v3  ;;  %v11445_v2 = vld [vmem:[%s17416_s5 + $0xe8] sm:$0xff]   ;;  %v11448_v4 = vld [vmem:[%s17416_s5 + $0x60] sm:$0xff]  }
  0x60   : > { %v11447_v3 = vld [vmem:[%s17416_s5 + $0xa8] sm:$0xff]  }
  0x62   : > { %10063 = vmatmul.mubr.msk.bf16.vlgmr.msra.gmra.mxu0 %vm604_vm0, %v12503_v8 }
  0x63   : > { %10064 = vmatmul.mubr.msk.bf16.vlgmr.msra.gmra.mxu1 %vm604_vm0, %v12503_v8  ;;  %1491 = vmatpush1.bf16.msra.mxu0 %v517_v12  ;;  %v366_v8 = vld [vmem:[%s12621_s13 + $0x58] sm:$0xff]  ;;  %v542_v12 = vpack.c.bf16 %v420_v6, %v380_v5  ;;  %v11449_v5 = vld [vmem:[%s17416_s5 + $0xe0] sm:$0xff]  }
  0x64   : > { %1534 = vmatpush1.bf16.msra.mxu1 %v519_v13  ;;  %1508 = vmatprep.mubr.bf16.mxu0 %v17419_v0  ;;  %v528_v27 = vpack.c.bf16 %v406_v23, %v366_v8  ;;  %v544_v13 = vpack.c.bf16 %v422_v9, %v382_v7  ;;  %v543_v23 = vpack.c.bf16 %v421_v17, %v381_v16  ;;  %v11450_v6 = vld [vmem:[%s17416_s5 + $0x20] sm:$0xff]   ;;  %v11452_v9 = vld [vmem:[%s17416_s5 + $0x58] sm:$0xff]   ;;  %v11459_v16 = vld [vmem:[%s17416_s5 + $0x90] sm:$0xff]  }
  0x65   : > { %1551 = vmatprep.mubr.bf16.mxu1 %v17419_v0  ;;  %1576 = vmatprep.subr.bf16.mxu0 %v522_v14  ;;  %v379_v14 = vld [vmem:[%s12621_s13 + $0xc0] sm:$0xff]  ;;  %v11460_v17 = vld [vmem:[%s17416_s5 + $0x48] sm:$0xff]  }
  0x66   : > { %1619 = vmatprep.subr.bf16.mxu1 %v524_v15  ;;  %v419_v15 = vld [vmem:[%s12621_s13 + $0x200] sm:$0xff] }
  0x67   : > { %v541_v8 = vpack.c.bf16 %v419_v15, %v379_v14  ;;  %v11451_v7 = vld [vmem:[%s17416_s5 + $0xa0] sm:$0xff]   ;;  %v11457_v14 = vld [vmem:[%s17416_s5 + $0xd0] sm:$0xff]  }
  0x68   : > { %v11458_v15 = vld [vmem:[%s17416_s5 + $0x10] sm:$0xff]  }
  0x6a   : > { %10066 = vmatmul.mubr.msk.bf16.vlgmr.msra.gmra.mxu0 %vm604_vm0, %v12663_v20 }
  0x6b   : > { %10067 = vmatmul.mubr.msk.bf16.vlgmr.msra.gmra.mxu1 %vm604_vm0, %v12663_v20  ;;  %1577 = vmatpush1.bf16.msra.mxu0 %v521_v24  ;;  %v546_v24 = vpack.c.bf16 %v424_v19, %v384_v18  ;;  %v11461_v18 = vld [vmem:[%s17416_s5 + $0xc8] sm:$0xff]  }
  0x6c   : > { %1620 = vmatpush1.bf16.msra.mxu1 %v523_v25  ;;  %1594 = vmatprep.mubr.bf16.mxu0 %v17419_v0  ;;  %v548_v25 = vpack.c.bf16 %v426_v22, %v386_v21  ;;  %v11462_v19 = vld [vmem:[%s17416_s5 + $0x8] sm:$0xff]   ;;  %v11464_v22 = vld [vmem:[%s17416_s5 + $0x40] sm:$0xff]  }
  0x6d   : > { %1637 = vmatprep.mubr.bf16.mxu1 %v17419_v0  ;;  %1662 = vmatprep.subr.bf16.mxu0 %v526_v26  ;;  %v383_v26 = vld [vmem:[%s12621_s13 + $0xe0] sm:$0xff]  ;;  %v11463_v21 = vld [vmem:[%s17416_s5 + $0x88] sm:$0xff]  }
  0x6e   : > { %1705 = vmatprep.subr.bf16.mxu1 %v528_v27  ;;  %v423_v27 = vld [vmem:[%s12621_s13 + $0x220] sm:$0xff] }
  0x6f   : > { %v545_v34 = vpack.c.bf16 %v423_v27, %v383_v26  ;;  %v11469_v26 = vld [vmem:[%s17416_s5 + $0x1f8] sm:$0xff]  }
  0x72   : > { %10068 = vmatmul.mubr.msk.bf16.vlgmr.msra.gmra.mxu0 %vm604_vm0, %v12663_v20 }
  0x73   : > { %10069 = vmatmul.mubr.msk.bf16.vlgmr.msra.gmra.mxu1 %vm604_vm0, %v12663_v20  ;;  %1663 = vmatpush1.bf16.msra.mxu0 %v525_v36  ;;  %v550_v36 = vpack.c.bf16 %v428_v31, %v388_v30 }
  0x74   : > { %1706 = vmatpush1.bf16.msra.mxu1 %v527_v37  ;;  %1680 = vmatprep.mubr.bf16.mxu0 %v17419_v0  ;;  %v552_v37 = vpack.c.bf16 %v430_v33, %v390_v32 }
  0x75   : > { %1723 = vmatprep.mubr.bf16.mxu1 %v17419_v0  ;;  %1748 = vmatprep.subr.bf16.mxu0 %v530_v38  ;;  %v387_v38 = vld [vmem:[%s12621_s13 + $0x100] sm:$0xff] }
  0x76   : > { %1791 = vmatprep.subr.bf16.mxu1 %v532_v39  ;;  %v427_v39 = vld [vmem:[%s12621_s13 + $0x240] sm:$0xff] }
  0x77   : > { %v549_v46 = vpack.c.bf16 %v427_v39, %v387_v38 }
  0x7a   : > { %10070 = vmatmul.mubr.msk.bf16.vlgmr.msra.gmra.mxu0 %vm604_vm0, %v12663_v20 }
  0x7b   : > { %10071 = vmatmul.mubr.msk.bf16.vlgmr.msra.gmra.mxu1 %vm604_vm0, %v12663_v20  ;;  %1749 = vmatpush1.bf16.msra.mxu0 %v529_v48  ;;  %v554_v48 = vpack.c.bf16 %v432_v43, %v392_v42 }
  0x7c   : > { %1792 = vmatpush1.bf16.msra.mxu1 %v531_v49  ;;  %1766 = vmatprep.mubr.bf16.mxu0 %v17419_v0  ;;  %v556_v49 = vpack.c.bf16 %v434_v45, %v394_v44 }
  0x7d   : > { %1809 = vmatprep.mubr.bf16.mxu1 %v17419_v0  ;;  %1834 = vmatprep.subr.bf16.mxu0 %v534_v50  ;;  %v391_v50 = vld [vmem:[%s12621_s13 + $0x120] sm:$0xff] }
  0x7e   : > { %1877 = vmatprep.subr.bf16.mxu1 %v536_v51  ;;  %v431_v51 = vld [vmem:[%s12621_s13 + $0x260] sm:$0xff] }
  0x7f   : > { %v553_v54 = vpack.c.bf16 %v431_v51, %v391_v50 }
  0x82   : > { %10072 = vmatmul.mubr.msk.bf16.vlgmr.msra.gmra.mxu0 %vm604_vm0, %v12663_v20 }
  0x83   : > { %10073 = vmatmul.mubr.msk.bf16.vlgmr.msra.gmra.mxu1 %vm604_vm0, %v12663_v20  ;;  %1835 = vmatpush1.bf16.msra.mxu0 %v533_v60  ;;  %v11440_v60 = vld [vmem:[%s17416_s5 + $0x70] sm:$0xff]  }
  0x84   : > { %1878 = vmatpush1.bf16.msra.mxu1 %v535_v61  ;;  %1852 = vmatprep.mubr.bf16.mxu0 %v17419_v0  ;;  %v11441_v61 = vld [vmem:[%s17416_s5 + $0xf0] sm:$0xff]  }
  0x85   : > { %1895 = vmatprep.mubr.bf16.mxu1 %v17419_v0  ;;  %1920 = vmatprep.subr.bf16.mxu0 %v538_v62  ;;  %v11442_v62 = vld [vmem:[%s17416_s5 + $0x30] sm:$0xff]  }
  0x86   : > { %1963 = vmatprep.subr.bf16.mxu1 %v540_v63  ;;  %v11443_v63 = vld [vmem:[%s17416_s5 + $0xb0] sm:$0xff]  }
  0x8a   : > { %10074 = vmatmul.mubr.msk.bf16.vlgmr.msra.gmra.mxu0 %vm604_vm0, %v12663_v20 }
  0x8b   : > { %10075 = vmatmul.mubr.msk.bf16.vlgmr.msra.gmra.mxu1 %vm604_vm0, %v12663_v20  ;;  %1921 = vmatpush1.bf16.msra.mxu0 %v537_v10  ;;  %v11453_v10 = vld [vmem:[%s17416_s5 + $0xd8] sm:$0xff]  }
  0x8c   : > { %1964 = vmatpush1.bf16.msra.mxu1 %v539_v11  ;;  %1938 = vmatprep.mubr.bf16.mxu0 %v17419_v0  ;;  %v11454_v11 = vld [vmem:[%s17416_s5 + $0x18] sm:$0xff]  }
  0x8d   : > { %1981 = vmatprep.mubr.bf16.mxu1 %v17419_v0  ;;  %2006 = vmatprep.subr.bf16.mxu0 %v542_v12  ;;  %v11455_v12 = vld [vmem:[%s17416_s5 + $0x98] sm:$0xff]  }
  0x8e   : > { %2049 = vmatprep.subr.bf16.mxu1 %v544_v13  ;;  %v11456_v13 = vld [vmem:[%s17416_s5 + $0x50] sm:$0xff]  }
  0x92   : > { %10076 = vmatmul.mubr.msk.bf16.vlgmr.msra.gmra.mxu0 %vm604_vm0, %v12663_v20 }
  0x93   : > { %10077 = vmatmul.mubr.msk.bf16.vlgmr.msra.gmra.mxu1 %vm604_vm0, %v12663_v20  ;;  %2007 = vmatpush1.bf16.msra.mxu0 %v541_v8  ;;  %v11465_v8 = vld [vmem:[%s17416_s5 + $0xc0] sm:$0xff]  }
  0x94   : > { %2050 = vmatpush1.bf16.msra.mxu1 %v543_v23  ;;  %2024 = vmatprep.mubr.bf16.mxu0 %v17419_v0  ;;  %v11466_v23 = vld [vmem:[%s17416_s5] sm:$0xff]  }
  0x95   : > { %2067 = vmatprep.mubr.bf16.mxu1 %v17419_v0  ;;  %2092 = vmatprep.subr.bf16.mxu0 %v546_v24  ;;  %v11467_v24 = vld [vmem:[%s17416_s5 + $0x80] sm:$0xff]  }
  0x96   : > { %2135 = vmatprep.subr.bf16.mxu1 %v548_v25  ;;  %v11468_v25 = vld [vmem:[%s17416_s5 + $0x178] sm:$0xff]  }
  0x9a   : > { %10078 = vmatmul.mubr.msk.bf16.vlgmr.msra.gmra.mxu0 %vm604_vm0, %v12663_v20 }
  0x9b   : > { %10079 = vmatmul.mubr.msk.bf16.vlgmr.msra.gmra.mxu1 %vm604_vm0, %v12663_v20  ;;  %2093 = vmatpush1.bf16.msra.mxu0 %v545_v34 }
  0x9c   : > { %2136 = vmatpush1.bf16.msra.mxu1 %v547_v35  ;;  %2110 = vmatprep.mubr.bf16.mxu0 %v17419_v0 }
  0x9d   : > { %2153 = vmatprep.mubr.bf16.mxu1 %v17419_v0  ;;  %2178 = vmatprep.subr.bf16.mxu0 %v550_v36 }
  0x9e   : > { %2221 = vmatprep.subr.bf16.mxu1 %v552_v37 }
  0xa2   : > { %10080 = vmatmul.mubr.msk.bf16.vlgmr.msra.gmra.mxu0 %vm604_vm0, %v12663_v20 }
  0xa3   : > { %10081 = vmatmul.mubr.msk.bf16.vlgmr.msra.gmra.mxu1 %vm604_vm0, %v12663_v20  ;;  %2179 = vmatpush1.bf16.msra.mxu0 %v549_v46 }
  0xa4   : > { %2222 = vmatpush1.bf16.msra.mxu1 %v551_v47  ;;  %2196 = vmatprep.mubr.bf16.mxu0 %v17419_v0 }
  0xa5   : > { %2239 = vmatprep.mubr.bf16.mxu1 %v17419_v0  ;;  %2264 = vmatprep.subr.bf16.mxu0 %v554_v48 }
  0xa6   : > { %2307 = vmatprep.subr.bf16.mxu1 %v556_v49 }
  0xaa   : > { %10082 = vmatmul.mubr.msk.bf16.vlgmr.msra.gmra.mxu0 %vm604_vm0, %v12663_v20 }
  0xab   : > { %10083 = vmatmul.mubr.msk.bf16.vlgmr.msra.gmra.mxu1 %vm604_vm0, %v12663_v20  ;;  %2265 = vmatpush1.bf16.msra.mxu0 %v553_v54 }
  0xac   : > { %2308 = vmatpush1.bf16.msra.mxu1 %v555_v55  ;;  %2282 = vmatprep.mubr.bf16.mxu0 %v17419_v0 }
  0xad   : > { %2325 = vmatprep.mubr.bf16.mxu1 %v17419_v0  ;;  %10528 = vmatprep.subr.bf16.mxu0 %v11436_v56 }
  0xae   : > { %10550 = vmatprep.subr.bf16.mxu1 %v11437_v57 }
  0xb2   : > { %10084 = vmatmul.mubr.msk.bf16.vlgmr.msra.gmra.mxu0 %vm604_vm0, %v12663_v20 }
  0xb3   : > { %10085 = vmatmul.mubr.msk.bf16.vlgmr.msra.gmra.mxu1 %vm604_vm0, %v12663_v20  ;;  %10529 = vmatpush3.bf16.msra.mxu0 %v11438_v58  ;;  %v11446_v20 = vld [vmem:[%s17416_s5 + $0x28] sm:$0xff]  }
  0xb4   : > { %10551 = vmatpush3.bf16.msra.mxu1 %v11439_v59  ;;  %10530 = vmatprep.subr.bf16.mxu0 %v11440_v60 }
  0xb5   : > { %10552 = vmatprep.subr.bf16.mxu1 %v11441_v61 }
  0xb7   : > { %10531 = vmatpush3.bf16.msra.mxu0 %v11442_v62 }
  0xb8   : > { %10553 = vmatpush3.bf16.msra.mxu1 %v11443_v63  ;;  %10532 = vmatprep.subr.bf16.mxu0 %v11444_v1 }
  0xb9   : > { %10554 = vmatprep.subr.bf16.mxu1 %v11445_v2 }
  0xbb   : > { %10533 = vmatpush3.bf16.msra.mxu0 %v11446_v20 }
  0xbc   : > { %10555 = vmatpush3.bf16.msra.mxu1 %v11447_v3  ;;  %10534 = vmatprep.subr.bf16.mxu0 %v11448_v4 }
  0xbd   : > { %10556 = vmatprep.subr.bf16.mxu1 %v11449_v5 }
  0xbf   : > { %10535 = vmatpush3.bf16.msra.mxu0 %v11450_v6 }
  0xc0   : > { %10557 = vmatpush3.bf16.msra.mxu1 %v11451_v7  ;;  %10536 = vmatprep.subr.bf16.mxu0 %v11452_v9 }
  0xc1   : > { %10558 = vmatprep.subr.bf16.mxu1 %v11453_v10 }
  0xc3   : > { %10537 = vmatpush3.bf16.msra.mxu0 %v11454_v11 }
  0xc4   : > { %10559 = vmatpush3.bf16.msra.mxu1 %v11455_v12  ;;  %10538 = vmatprep.subr.bf16.mxu0 %v11456_v13 }
  0xc5   : > { %10560 = vmatprep.subr.bf16.mxu1 %v11457_v14 }
  0xc7   : > { %10539 = vmatpush3.bf16.msra.mxu0 %v11458_v15 }
  0xc8   : > { %10561 = vmatpush3.bf16.msra.mxu1 %v11459_v16  ;;  %10540 = vmatprep.subr.bf16.mxu0 %v11460_v17 }
  0xc9   : > { %10562 = vmatprep.subr.bf16.mxu1 %v11461_v18 }
  0xcb   : > { %10541 = vmatpush3.bf16.msra.mxu0 %v11462_v19 }
  0xcc   : > { %10563 = vmatpush3.bf16.msra.mxu1 %v11463_v21  ;;  %10542 = vmatprep.subr.bf16.mxu0 %v11464_v22 }
  0xcd   : > { %10564 = vmatprep.subr.bf16.mxu1 %v11465_v8 }
  0xcf   : > { %10543 = vmatpush3.bf16.msra.mxu0 %v11466_v23 }
  0xd0   : > { %10565 = vmatpush3.bf16.msra.mxu1 %v11467_v24  ;;  %10572 = vmatprep.subr.bf16.mxu0 %v11468_v25 }
  0xd1   : > { %10594 = vmatprep.subr.bf16.mxu1 %v11469_v26 }
  0xda   : > { %v12890_v27 = vpop.f32.mrf.mxu0 }
  0xdb   : > { %v12892_v28 = vpop.f32.mrf.mxu1 }
  0xdc   : > { %v12894_v29 = vpop.f32.mrf.mxu0 }
  0xdd   : > { %v12896_v30 = vpop.f32.mrf.mxu1 }
  0xde   : > { %v12898_v31 = vpop.f32.mrf.mxu0 }
  0xdf   : > { %v12900_v32 = vpop.f32.mrf.mxu1 }
  0xe0   : > { %v12902_v33 = vpop.f32.mrf.mxu0 }
  0xe1   : > { %v12904_v34 = vpop.f32.mrf.mxu1 }
  0xe2   : > { %v12906_v35 = vpop.f32.mrf.mxu0 }
  0xe3   : > { %v12908_v36 = vpop.f32.mrf.mxu1 }
  0xe4   : > { %v12910_v37 = vpop.f32.mrf.mxu0 }
  0xe5   : > { %v12912_v38 = vpop.f32.mrf.mxu1 }
  0xe6   : > { %v12914_v39 = vpop.f32.mrf.mxu0 }
  0xe7   : > { %v12916_v40 = vpop.f32.mrf.mxu1 }
  0xe8   : > { %v12918_v41 = vpop.f32.mrf.mxu0 }
  0xe9   : > { %v12920_v42 = vpop.f32.mrf.mxu1 }
  0xea   : > { %v12922_v43 = vpop.f32.mrf.mxu0 }
  0xeb   : > { %v12924_v44 = vpop.f32.mrf.mxu1 }
  0xec   : > { %v12926_v45 = vpop.f32.mrf.mxu0 }
  0xed   : > { %v12928_v46 = vpop.f32.mrf.mxu1 }
  0xee   : > { %v12930_v47 = vpop.f32.mrf.mxu0 }
  0xef   : > { %v12932_v48 = vpop.f32.mrf.mxu1 }
  0xf0   : > { %v12934_v49 = vpop.f32.mrf.mxu0 }
  0xf1   : > { %v12936_v50 = vpop.f32.mrf.mxu1 }
  0xf2   : > { %v12938_v51 = vpop.f32.mrf.mxu0 }
  0xf3   : > { %v12940_v52 = vpop.f32.mrf.mxu1 }
  0xf4   : > { %v12942_v53 = vpop.f32.mrf.mxu0 }
  0xf5   : > { %v12944_v54 = vpop.f32.mrf.mxu1 }
  0xf6   : > { %v12946_v55 = vpop.f32.mrf.mxu0 }
  0xf7   : > { %v12948_v56 = vpop.f32.mrf.mxu1 }
  0xf8   : > { %v12950_v57 = vpop.f32.mrf.mxu0 }
  0xf9   : > { %v12952_v58 = vpop.f32.mrf.mxu1 }
  0xfa   : > { %v12954_v59 = vpop.f32.mrf.mxu0 }
  0xfb   : > { %v12956_v60 = vpop.f32.mrf.mxu1 }
  0xfc   : > { %v12958_v61 = vpop.f32.mrf.mxu0 }
  0xfd   : > { %v12960_v62 = vpop.f32.mrf.mxu1 }
  0xfe   : > { %v12962_v63 = vpop.f32.mrf.mxu0 }
  0xff   : > { %v12964_v1 = vpop.f32.mrf.mxu1 }
 0x100   : > { %v12966_v2 = vpop.f32.mrf.mxu0 }
 0x101   : > { %v12968_v20 = vpop.f32.mrf.mxu1 }
 0x102   : > { %v12970_v3 = vpop.f32.mrf.mxu0 }
 0x103   : > { %v12972_v4 = vpop.f32.mrf.mxu1 }
 0x104   : > { %v12974_v5 = vpop.f32.mrf.mxu0 }
 0x105   : > { %v12976_v6 = vpop.f32.mrf.mxu1 }
 0x106   : > { %v12978_v7 = vpop.f32.mrf.mxu0 }
 0x107   : > { %v12980_v9 = vpop.f32.mrf.mxu1 }
 0x108   : > { %v12982_v10 = vpop.f32.mrf.mxu0 }
 0x109   : > { %v12984_v11 = vpop.f32.mrf.mxu1 }
 0x10a   : > { %v12986_v12 = vpop.f32.mrf.mxu0 }
 0x10b   : > { %17595 = vst [vmem:[#allocation2_spill] sm:$0xff] %v12986_v12  ;;  %v12988_v13 = vpop.f32.mrf.mxu1 }
 0x10c   : > { %17596 = vst [vmem:[#allocation3_spill] sm:$0xff] %v12988_v13  ;;  %v12990_v14 = vpop.f32.mrf.mxu0 }
 0x10d   : > { %17597 = vst [vmem:[#allocation4_spill] sm:$0xff] %v12990_v14  ;;  %v12992_v15 = vpop.f32.mrf.mxu1 }
 0x10e   : > { %17598 = vst [vmem:[#allocation5_spill] sm:$0xff] %v12992_v15  ;;  %v12994_v16 = vpop.f32.mrf.mxu0 }
 0x10f   : > { %17599 = vst [vmem:[#allocation6_spill] sm:$0xff] %v12994_v16  ;;  %v12996_v17 = vpop.f32.mrf.mxu1 }
 0x110   : > { %17600 = vst [vmem:[#allocation7_spill] sm:$0xff] %v12996_v17  ;;  %v12998_v18 = vpop.f32.mrf.mxu0 }
 0x111   : > { %v13000_v19 = vpop.f32.mrf.mxu1 }
 0x112   : > { %v13002_v21 = vpop.f32.mrf.mxu0 }
 0x113   : > { %17601 = vst [vmem:[#allocation8_spill] sm:$0xff] %v13002_v21  ;;  %v13004_v22 = vpop.f32.mrf.mxu1 }
 0x114   : > { %17602 = vst [vmem:[#allocation9_spill] sm:$0xff] %v13004_v22  ;;  %v13006_v8 = vpop.f32.mrf.mxu0 }
 0x115   : > { %17603 = vst [vmem:[#allocation10_spill] sm:$0xff] %v13006_v8  ;;  %v13008_v23 = vpop.f32.mrf.mxu1 }
 0x116   : > { %17604 = vst [vmem:[#allocation11_spill] sm:$0xff] %v13008_v23  ;;  %v13010_v24 = vpop.f32.mrf.mxu0 }
 0x117   : > { %17605 = vst [vmem:[#allocation12_spill] sm:$0xff] %v13010_v24  ;;  %v13012_v25 = vpop.f32.mrf.mxu1 }
 0x118   : > { %17606 = vst [vmem:[#allocation13_spill] sm:$0xff] %v13012_v25  ;;  %v13014_v26 = vpop.f32.mrf.mxu0 }
 0x119   : > { %17607 = vst [vmem:[#allocation14_spill] sm:$0xff] %v13014_v26  ;;  %v13016_v0 = vpop.f32.mrf.mxu1 }
 0x11a   : > { %17608 = vst [vmem:[#allocation15_spill] sm:$0xff] %v13016_v0  ;;  %v13018_v13 = vpop.f32.mrf.mxu0 }
 0x11b   : > { %17609 = vst [vmem:[#allocation16_spill] sm:$0xff] %v13018_v13  ;;  %v13020_v12 = vpop.f32.mrf.mxu1 }
 0x11c   : > { %17610 = vst [vmem:[#allocation17_spill] sm:$0xff] %v13020_v12  ;;  %v13022_v17 = vpop.f32.mrf.mxu0 }
 0x11d   : > { %17611 = vst [vmem:[#allocation18_spill] sm:$0xff] %v13022_v17  ;;  %v13024_v21 = vpop.f32.mrf.mxu1 }
 0x11e   : > { %17612 = vst [vmem:[#allocation19_spill] sm:$0xff] %v13024_v21  ;;  %v13026_v22 = vpop.f32.mrf.mxu0 }
 0x11f   : > { %17613 = vst [vmem:[#allocation20_spill] sm:$0xff] %v13026_v22  ;;  %v13028_v8 = vpop.f32.mrf.mxu1 }
 0x120   : > { %17614 = vst [vmem:[#allocation21_spill] sm:$0xff] %v13028_v8  ;;  %v13030_v23 = vpop.f32.mrf.mxu0 }
 0x121   : > { %17615 = vst [vmem:[#allocation22_spill] sm:$0xff] %v13030_v23  ;;  %v13032_v24 = vpop.f32.mrf.mxu1 }
 0x122   : > { %17616 = vst [vmem:[#allocation23_spill] sm:$0xff] %v13032_v24  ;;  %v13034_v25 = vpop.f32.mrf.mxu0 }
 0x123   : > { %17617 = vst [vmem:[#allocation24_spill] sm:$0xff] %v13034_v25  ;;  %v13036_v26 = vpop.f32.mrf.mxu1 }
 0x124   : > { %17618 = vst [vmem:[#allocation25_spill] sm:$0xff] %v13036_v26  ;;  %v13038_v0 = vpop.f32.mrf.mxu0 }
 0x125   : > { %17619 = vst [vmem:[#allocation26_spill] sm:$0xff] %v13038_v0  ;;  %v13040_v13 = vpop.f32.mrf.mxu1 }
 0x126   : > { %17620 = vst [vmem:[#allocation27_spill] sm:$0xff] %v13040_v13  ;;  %v13042_v12 = vpop.f32.mrf.mxu0 }
 0x127   : > { %17621 = vst [vmem:[#allocation28_spill] sm:$0xff] %v13042_v12  ;;  %v13044_v17 = vpop.f32.mrf.mxu1 }
 0x128   : > { %17622 = vst [vmem:[#allocation29_spill] sm:$0xff] %v13044_v17  ;;  %v13046_v21 = vpop.f32.mrf.mxu0 }
 0x129   : > { %17623 = vst [vmem:[#allocation30_spill] sm:$0xff] %v13046_v21  ;;  %v13048_v22 = vpop.f32.mrf.mxu1  ;;  %v11470_v21 = vld [vmem:[%s17416_s5 + $0x138] sm:$0xff]  }
 0x12a   : > { %17624 = vst [vmem:[#allocation31_spill] sm:$0xff] %v13048_v22  ;;  %v1510_v8 = vpop.f32.mrf.mxu0 }
 0x12b   : > { %v1553_v23 = vpop.f32.mrf.mxu1  ;;  %v13066_v14 = vadd.f32 %v1510_v8, %v12890_v27 }
 0x12c   : > { %v1512_v16 = vpop.f32.mrf.mxu0 }
 0x12d   : > { %v1555_v24 = vpop.f32.mrf.mxu1  ;;  %v13054_v13 = vadd.f32 %v1512_v16, %v12894_v29  ;;  %17629 = vst [vmem:[#allocation36_spill] sm:$0xff] %v13066_v14 }
 0x12e   : > { %v1514_v15 = vpop.f32.mrf.mxu0 }
 0x12f   : > { %v1557_v25 = vpop.f32.mrf.mxu1  ;;  %v13051_v26 = vadd.f32 %v1514_v15, %v12898_v31  ;;  %17626 = vst [vmem:[#allocation33_spill] sm:$0xff] %v13054_v13  ;;  %v13069_v31 = vadd.f32 %v1555_v24, %v12896_v30 }
 0x130   : > { %v1516_v0 = vpop.f32.mrf.mxu0  ;;  %v13057_v12 = vadd.f32 %v1557_v25, %v12900_v32  ;;  %v11472_v32 = vld [vmem:[%s17416_s5 + $0x170] sm:$0xff]  }
 0x131   : > { %17625 = vst [vmem:[#allocation32_spill] sm:$0xff] %v13051_v26  ;;  %v13060_v17 = vadd.f32 %v1516_v0, %v12902_v33  ;;  %v1559_v22 = vpop.f32.mrf.mxu1  ;;  %17630 = vst [vmem:[#allocation37_spill] sm:$0xff] %v13069_v31  ;;  %v11471_v0 = vld [vmem:[%s17416_s5 + $0x1b8] sm:$0xff]   ;;  %v13083_v33 = vadd.f32 %v1553_v23, %v12892_v28  ;;  %v2976_v16 = vpack.c.bf16 %v13051_v26, %v13066_v14  ;;  %v11474_v25 = vld [vmem:[%s17416_s5 + $0x130] sm:$0xff]  }
 0x132   : > { %17627 = vst [vmem:[#allocation34_spill] sm:$0xff] %v13057_v12  ;;  %v13072_v29 = vadd.f32 %v1559_v22, %v12904_v34  ;;  %v13074_v15 = vpop.f32.mrf.mxu0  ;;  %v11473_v34 = vld [vmem:[%s17416_s5 + $0x1f0] sm:$0xff]  }
 0x133   : > { %17628 = vst [vmem:[#allocation35_spill] sm:$0xff] %v13060_v17  ;;  %17632 = vst [vmem:[#allocation39_spill] sm:$0xff] %v13083_v33  ;;  %v13085_v27 = vpop.f32.mrf.mxu1  ;;  %v2977_v30 = vpack.c.bf16 %v13060_v17, %v13054_v13  ;;  %v2978_v28 = vpack.c.bf16 %v13057_v12, %v13083_v33  ;;  %v11475_v14 = vld [vmem:[%s17416_s5 + $0x1b0] sm:$0xff]  }
 0x134   : > { %17631 = vst [vmem:[#allocation38_spill] sm:$0xff] %v13072_v29  ;;  %v1598_v22 = vpop.f32.mrf.mxu0  ;;  %v2979_v8 = vpack.c.bf16 %v13072_v29, %v13069_v31 }
 0x135   : > { %v1641_v23 = vpop.f32.mrf.mxu1  ;;  %5088 = vmatprep.mubr.bf16.mxu0 %v2977_v30  ;;  %v11476_v30 = vld [vmem:[%s17416_s5 + $0x168] sm:$0xff]  }
 0x136   : > { %5129 = vmatprep.mubr.bf16.mxu1 %v2979_v8  ;;  %v13098_v24 = vpop.f32.mrf.mxu0  ;;  %5089 = vmatmul.mubr.bf16.vlgmr.msra.gmra.mxu0 %v2976_v16  ;;  %v13112_v16 = vadd.f32 %v1598_v22, %v12910_v37  ;;  %v11478_v37 = vld [vmem:[%s17416_s5 + $0x128] sm:$0xff]   ;;  %v11485_v22 = vld [vmem:[%s17416_s5 + $0x1d8] sm:$0xff]  }
 0x137   : > { %v13103_v13 = vpop.f32.mrf.mxu1  ;;  %5130 = vmatmul.mubr.bf16.vlgmr.msra.gmra.mxu1 %v2978_v28  ;;  %10573 = vmatpush3.bf16.msra.mxu0 %v11470_v21  ;;  %v11477_v21 = vld [vmem:[%s17416_s5 + $0x1e8] sm:$0xff]   ;;  %v13121_v28 = vadd.f32 %v1641_v23, %v12912_v38  ;;  %v11486_v23 = vld [vmem:[%s17416_s5 + $0x118] sm:$0xff]  }
 0x138   : > { %10595 = vmatpush3.bf16.msra.mxu1 %v11471_v0  ;;  %v1602_v8 = vpop.f32.mrf.mxu0  ;;  %10574 = vmatprep.subr.bf16.mxu0 %v11472_v32  ;;  %17633 = vst [vmem:[#allocation40_spill] sm:$0xff] %v13112_v16  ;;  %v11479_v0 = vld [vmem:[%s17416_s5 + $0x1a8] sm:$0xff]   ;;  %v11482_v32 = vld [vmem:[%s17416_s5 + $0x120] sm:$0xff]  }
 0x139   : > { %v13115_v33 = vadd.f32 %v1602_v8, %v12918_v41  ;;  %v1645_v12 = vpop.f32.mrf.mxu1  ;;  %10596 = vmatprep.subr.bf16.mxu1 %v11473_v34  ;;  %17635 = vst [vmem:[#allocation42_spill] sm:$0xff] %v13121_v28  ;;  %v11484_v34 = vld [vmem:[%s17416_s5 + $0x158] sm:$0xff]  }
 0x13a   : > { %v13124_v26 = vadd.f32 %v1645_v12, %v12920_v42  ;;  %v11480_v42 = vld [vmem:[%s17416_s5 + $0x160] sm:$0xff]  }
 0x13b   : > { %17634 = vst [vmem:[#allocation41_spill] sm:$0xff] %v13115_v33  ;;  %10575 = vmatpush3.bf16.msra.mxu0 %v11474_v25  ;;  %v2981_v41 = vpack.c.bf16 %v13115_v33, %v13112_v16  ;;  %v11481_v12 = vld [vmem:[%s17416_s5 + $0x1e0] sm:$0xff]   ;;  %v13157_v25 = vpop.f32.mrf.mxu0  ;;  %v13162_v8 = vpop.f32.mrf.mxu1  ;;  %v11501_v16 = vld [vmem:[%s17416_s5 + $0x2f8] sm:$0xff]  }
 0x13c   : > { %17636 = vst [vmem:[#allocation43_spill] sm:$0xff] %v13124_v26  ;;  %10597 = vmatpush3.bf16.msra.mxu1 %v11475_v14  ;;  %10576 = vmatprep.subr.bf16.mxu0 %v11476_v30  ;;  %v2983_v38 = vpack.c.bf16 %v13124_v26, %v13121_v28  ;;  %v11483_v14 = vld [vmem:[%s17416_s5 + $0x1a0] sm:$0xff]   ;;  %v11487_v30 = vld [vmem:[%s17416_s5 + $0x198] sm:$0xff]  }
 0x13d   : > { %5170 = vmatprep.mubr.bf16.mxu0 %v2981_v41  ;;  %10598 = vmatprep.subr.bf16.mxu1 %v11477_v21  ;;  %v11488_v21 = vld [vmem:[%s17416_s5 + $0x150] sm:$0xff]  }
 0x13e   : > { %5211 = vmatprep.mubr.bf16.mxu1 %v2983_v38  ;;  %v11490_v41 = vld [vmem:[%s17416_s5 + $0x110] sm:$0xff]  }
 0x13f   : > { %10577 = vmatpush3.bf16.msra.mxu0 %v11478_v37  ;;  %v11489_v37 = vld [vmem:[%s17416_s5 + $0x1d0] sm:$0xff]  }
 0x140   : > { %10599 = vmatpush3.bf16.msra.mxu1 %v11479_v0  ;;  %10578 = vmatprep.subr.bf16.mxu0 %v11480_v42  ;;  %v1684_v0 = vpop.f32.mrf.mxu0  ;;  %v11491_v38 = vld [vmem:[%s17416_s5 + $0x190] sm:$0xff]   ;;  %v1727_v42 = vpop.f32.mrf.mxu1 }
 0x141   : > { %10600 = vmatprep.subr.bf16.mxu1 %v11481_v12  ;;  %v11492_v12 = vld [vmem:[%s17416_s5 + $0x148] sm:$0xff]  }
 0x143   : > { %10579 = vmatpush3.bf16.msra.mxu0 %v11482_v32  ;;  %v11493_v32 = vld [vmem:[%s17416_s5 + $0x1c8] sm:$0xff]  }
 0x144   : > { %10601 = vmatpush3.bf16.msra.mxu1 %v11483_v14  ;;  %10580 = vmatprep.subr.bf16.mxu0 %v11484_v34  ;;  %v11494_v14 = vld [vmem:[%s17416_s5 + $0x108] sm:$0xff]   ;;  %v13185_v34 = vpop.f32.mrf.mxu0 }
 0x145   : > { %10602 = vmatprep.subr.bf16.mxu1 %v11485_v22  ;;  %v11495_v22 = vld [vmem:[%s17416_s5 + $0x188] sm:$0xff]  }
 0x147   : > { %10581 = vmatpush3.bf16.msra.mxu0 %v11486_v23  ;;  %v13190_v23 = vpop.f32.mrf.mxu1 }
 0x148   : > { %10603 = vmatpush3.bf16.msra.mxu1 %v11487_v30  ;;  %10582 = vmatprep.subr.bf16.mxu0 %v11488_v21  ;;  %v11496_v30 = vld [vmem:[%s17416_s5 + $0x140] sm:$0xff]  }
 0x149   : > { %10604 = vmatprep.subr.bf16.mxu1 %v11489_v37  ;;  %v11497_v21 = vld [vmem:[%s17416_s5 + $0x1c0] sm:$0xff]   ;;  %v1731_v28 = vpop.f32.mrf.mxu1 }
 0x14a   : > { %v11498_v37 = vld [vmem:[%s17416_s5 + $0x100] sm:$0xff]  }
 0x14b   : > { %10583 = vmatpush3.bf16.msra.mxu0 %v11490_v41  ;;  %v1688_v41 = vpop.f32.mrf.mxu0 }
 0x14c   : > { %10605 = vmatpush3.bf16.msra.mxu1 %v11491_v38  ;;  %10584 = vmatprep.subr.bf16.mxu0 %v11492_v12  ;;  %v11499_v38 = vld [vmem:[%s17416_s5 + $0x180] sm:$0xff]   ;;  %v13206_v12 = vadd.f32 %v13098_v24, %v12914_v39  ;;  %v11502_v39 = vld [vmem:[%s17416_s5 + $0x238] sm:$0xff]   ;;  %v13223_v24 = vadd.f32 %v13074_v15, %v12906_v35  ;;  %v11504_v35 = vld [vmem:[%s17416_s5 + $0x270] sm:$0xff]   ;;  %v13244_v15 = vadd.f32 %v1684_v0, %v12926_v45 }
 0x14d   : > { %10606 = vmatprep.subr.bf16.mxu1 %v11493_v32  ;;  %v11500_v32 = vld [vmem:[%s17416_s5 + $0x278] sm:$0xff]   ;;  %v11506_v45 = vld [vmem:[%s17416_s5 + $0x230] sm:$0xff]  }
 0x14e   : > { %17637 = vst [vmem:[#allocation44_spill] sm:$0xff] %v13206_v12  ;;  %17639 = vst [vmem:[#allocation46_spill] sm:$0xff] %v13223_v24 }
 0x14f   : > { %10585 = vmatpush3.bf16.msra.mxu0 %v11494_v14  ;;  %v13216_v14 = vadd.f32 %v13103_v13, %v12916_v40  ;;  %v13233_v40 = vadd.f32 %v13085_v27, %v12908_v36  ;;  %v13236_v13 = vadd.f32 %v1731_v28, %v12936_v50  ;;  %17643 = vst [vmem:[#allocation50_spill] sm:$0xff] %v13244_v15  ;;  %v11505_v28 = vld [vmem:[%s17416_s5 + $0x2f0] sm:$0xff]  }
 0x150   : > { %10607 = vmatpush3.bf16.msra.mxu1 %v11495_v22  ;;  %10586 = vmatprep.subr.bf16.mxu0 %v11496_v30  ;;  %v13226_v22 = vadd.f32 %v1688_v41, %v12934_v49  ;;  %v11503_v30 = vld [vmem:[%s17416_s5 + $0x2b8] sm:$0xff]   ;;  %v2980_v49 = vpack.c.bf16 %v13206_v12, %v13223_v24  ;;  %v13249_v27 = vadd.f32 %v1727_v42, %v12928_v46  ;;  %v11507_v46 = vld [vmem:[%s17416_s5 + $0x2b0] sm:$0xff]   ;;  %v11509_v42 = vld [vmem:[%s17416_s5 + $0x2e8] sm:$0xff]  }
 0x151   : > { %17638 = vst [vmem:[#allocation45_spill] sm:$0xff] %v13216_v14  ;;  %10608 = vmatprep.subr.bf16.mxu1 %v11497_v21  ;;  %17641 = vst [vmem:[#allocation48_spill] sm:$0xff] %v13233_v40  ;;  %v2982_v36 = vpack.c.bf16 %v13216_v14, %v13233_v40  ;;  %v11510_v21 = vld [vmem:[%s17416_s5 + $0x228] sm:$0xff]   ;;  %v11512_v41 = vld [vmem:[%s17416_s5 + $0x260] sm:$0xff]  }
 0x152   : > { %17640 = vst [vmem:[#allocation47_spill] sm:$0xff] %v13226_v22  ;;  %17642 = vst [vmem:[#allocation49_spill] sm:$0xff] %v13236_v13  ;;  %v2985_v50 = vpack.c.bf16 %v13226_v22, %v13244_v15  ;;  %v2987_v0 = vpack.c.bf16 %v13236_v13, %v13249_v27 }
 0x153   : > { %10587 = vmatpush3.bf16.msra.mxu0 %v11498_v37  ;;  %17644 = vst [vmem:[#allocation51_spill] sm:$0xff] %v13249_v27  ;;  %v11511_v37 = vld [vmem:[%s17416_s5 + $0x2a8] sm:$0xff]  }
 0x154   : > { %10609 = vmatpush3.bf16.msra.mxu1 %v11499_v38  ;;  %10616 = vmatprep.subr.bf16.mxu0 %v11500_v32  ;;  %v11513_v38 = vld [vmem:[%s17416_s5 + $0x2e0] sm:$0xff]  }
 0x155   : > { %10638 = vmatprep.subr.bf16.mxu1 %v11501_v16  ;;  %v11508_v16 = vld [vmem:[%s17416_s5 + $0x268] sm:$0xff]   ;;  %v11514_v32 = vld [vmem:[%s17416_s5 + $0x220] sm:$0xff]  }
 0x156   : > { %5171 = vmatmul.mubr.bf16.vlgmr.msra.gmra.mxu0 %v2980_v49  ;;  %v13294_v49 = vpop.f32.mrf.mxu0 }
 0x157   : > { %5212 = vmatmul.mubr.bf16.vlgmr.msra.gmra.mxu1 %v2982_v36  ;;  %10617 = vmatpush3.bf16.msra.mxu0 %v11502_v39  ;;  %v11515_v39 = vld [vmem:[%s17416_s5 + $0x2a0] sm:$0xff]   ;;  %v11518_v36 = vld [vmem:[%s17416_s5 + $0x218] sm:$0xff]  }
 0x158   : > { %5252 = vmatprep.mubr.bf16.mxu0 %v2985_v50  ;;  %10639 = vmatpush3.bf16.msra.mxu1 %v11503_v30  ;;  %v11516_v30 = vld [vmem:[%s17416_s5 + $0x258] sm:$0xff]   ;;  %v13299_v50 = vpop.f32.mrf.mxu1 }
 0x159   : > { %5293 = vmatprep.mubr.bf16.mxu1 %v2987_v0  ;;  %10618 = vmatprep.subr.bf16.mxu0 %v11504_v35  ;;  %v11517_v35 = vld [vmem:[%s17416_s5 + $0x2d8] sm:$0xff]   ;;  %v11521_v0 = vld [vmem:[%s17416_s5 + $0x2d0] sm:$0xff]  }
 0x15a   : > { %10640 = vmatprep.subr.bf16.mxu1 %v11505_v28  ;;  %v11519_v28 = vld [vmem:[%s17416_s5 + $0x298] sm:$0xff]  }
 0x15b   : > { %10619 = vmatpush3.bf16.msra.mxu0 %v11506_v45  ;;  %v11520_v45 = vld [vmem:[%s17416_s5 + $0x250] sm:$0xff]  }
 0x15c   : > { %10641 = vmatpush3.bf16.msra.mxu1 %v11507_v46  ;;  %10620 = vmatprep.subr.bf16.mxu0 %v11508_v16  ;;  %v1770_v46 = vpop.f32.mrf.mxu0  ;;  %v11522_v16 = vld [vmem:[%s17416_s5 + $0x210] sm:$0xff]  }
 0x15d   : > { %10642 = vmatprep.subr.bf16.mxu1 %v11509_v42  ;;  %v1813_v42 = vpop.f32.mrf.mxu1 }
 0x15f   : > { %10621 = vmatpush3.bf16.msra.mxu0 %v11510_v21  ;;  %v11523_v21 = vld [vmem:[%s17416_s5 + $0x290] sm:$0xff]  }
 0x160   : > { %10643 = vmatpush3.bf16.msra.mxu1 %v11511_v37  ;;  %10622 = vmatprep.subr.bf16.mxu0 %v11512_v41  ;;  %v11524_v37 = vld [vmem:[%s17416_s5 + $0x248] sm:$0xff]  }
 0x161   : > { %10644 = vmatprep.subr.bf16.mxu1 %v11513_v38  ;;  %v11525_v41 = vld [vmem:[%s17416_s5 + $0x2c8] sm:$0xff]   ;;  %v13322_v38 = vpop.f32.mrf.mxu0 }
 0x163   : > { %10623 = vmatpush3.bf16.msra.mxu0 %v11514_v32  ;;  %v11526_v32 = vld [vmem:[%s17416_s5 + $0x208] sm:$0xff]  }
 0x164   : > { %10645 = vmatpush3.bf16.msra.mxu1 %v11515_v39  ;;  %10624 = vmatprep.subr.bf16.mxu0 %v11516_v30  ;;  %v13327_v39 = vpop.f32.mrf.mxu1  ;;  %v11527_v30 = vld [vmem:[%s17416_s5 + $0x288] sm:$0xff]  }
 0x165   : > { %10646 = vmatprep.subr.bf16.mxu1 %v11517_v35  ;;  %v11528_v35 = vld [vmem:[%s17416_s5 + $0x240] sm:$0xff]  }
 0x167   : > { %10625 = vmatpush3.bf16.msra.mxu0 %v11518_v36  ;;  %v11529_v36 = vld [vmem:[%s17416_s5 + $0x2c0] sm:$0xff]  }
 0x168   : > { %10647 = vmatpush3.bf16.msra.mxu1 %v11519_v28  ;;  %10626 = vmatprep.subr.bf16.mxu0 %v11520_v45  ;;  %v1774_v28 = vpop.f32.mrf.mxu0  ;;  %v11530_v45 = vld [vmem:[%s17416_s5 + $0x200] sm:$0xff]  }
 0x169   : > { %10648 = vmatprep.subr.bf16.mxu1 %v11521_v0  ;;  %v13343_v0 = vadd.f32 %v13185_v34, %v12930_v47  ;;  %v11533_v47 = vld [vmem:[%s17416_s5 + $0x3f8] sm:$0xff]   ;;  %v13360_v34 = vadd.f32 %v13157_v25, %v12922_v43  ;;  %v13378_v43 = vadd.f32 %v1770_v46, %v12942_v53  ;;  %v11536_v25 = vld [vmem:[%s17416_s5 + $0x370] sm:$0xff]  }
 0x16b   : > { %10627 = vmatpush3.bf16.msra.mxu0 %v11522_v16  ;;  %17645 = vst [vmem:[#allocation52_spill] sm:$0xff] %v13343_v0  ;;  %v1817_v16 = vpop.f32.mrf.mxu1  ;;  %17647 = vst [vmem:[#allocation54_spill] sm:$0xff] %v13360_v34 }
 0x16c   : > { %10649 = vmatpush3.bf16.msra.mxu1 %v11523_v21  ;;  %10628 = vmatprep.subr.bf16.mxu0 %v11524_v37  ;;  %v11531_v21 = vld [vmem:[%s17416_s5 + $0x280] sm:$0xff]   ;;  %v11532_v37 = vld [vmem:[%s17416_s5 + $0x378] sm:$0xff]   ;;  %17651 = vst [vmem:[#allocation58_spill] sm:$0xff] %v13378_v43 }
 0x16d   : > { %10650 = vmatprep.subr.bf16.mxu1 %v11525_v41  ;;  %v13353_v41 = vadd.f32 %v13190_v23, %v12932_v48  ;;  %v11534_v48 = vld [vmem:[%s17416_s5 + $0x338] sm:$0xff]   ;;  %v2984_v23 = vpack.c.bf16 %v13343_v0, %v13360_v34 }
 0x16f   : > { %10629 = vmatpush3.bf16.msra.mxu0 %v11526_v32  ;;  %17646 = vst [vmem:[#allocation53_spill] sm:$0xff] %v13353_v41  ;;  %v13363_v32 = vadd.f32 %v1774_v28, %v12950_v57  ;;  %v11541_v28 = vld [vmem:[%s17416_s5 + $0x3e8] sm:$0xff]  }
 0x170   : > { %10651 = vmatpush3.bf16.msra.mxu1 %v11527_v30  ;;  %10630 = vmatprep.subr.bf16.mxu0 %v11528_v35  ;;  %v13367_v30 = vadd.f32 %v13162_v8, %v12924_v44  ;;  %v13370_v35 = vadd.f32 %v1817_v16, %v12952_v58  ;;  %v11535_v44 = vld [vmem:[%s17416_s5 + $0x3b8] sm:$0xff]   ;;  %v13386_v58 = vadd.f32 %v1813_v42, %v12944_v54  ;;  %v11537_v8 = vld [vmem:[%s17416_s5 + $0x3f0] sm:$0xff]   ;;  %v11543_v16 = vld [vmem:[%s17416_s5 + $0x3a8] sm:$0xff]  }
 0x171   : > { %10652 = vmatprep.subr.bf16.mxu1 %v11529_v36  ;;  %17648 = vst [vmem:[#allocation55_spill] sm:$0xff] %v13363_v32  ;;  %v2989_v53 = vpack.c.bf16 %v13363_v32, %v13378_v43  ;;  %v11538_v54 = vld [vmem:[%s17416_s5 + $0x330] sm:$0xff]   ;;  %v11540_v36 = vld [vmem:[%s17416_s5 + $0x368] sm:$0xff]  }
 0x172   : > { %17649 = vst [vmem:[#allocation56_spill] sm:$0xff] %v13367_v30  ;;  %17650 = vst [vmem:[#allocation57_spill] sm:$0xff] %v13370_v35  ;;  %v2986_v57 = vpack.c.bf16 %v13353_v41, %v13367_v30  ;;  %v2991_v46 = vpack.c.bf16 %v13370_v35, %v13386_v58  ;;  %v11539_v42 = vld [vmem:[%s17416_s5 + $0x3b0] sm:$0xff]  }
 0x173   : > { %10631 = vmatpush3.bf16.msra.mxu0 %v11530_v45  ;;  %17652 = vst [vmem:[#allocation59_spill] sm:$0xff] %v13386_v58  ;;  %v11542_v45 = vld [vmem:[%s17416_s5 + $0x328] sm:$0xff]  }
 0x174   : > { %10653 = vmatpush3.bf16.msra.mxu1 %v11531_v21  ;;  %10660 = vmatprep.subr.bf16.mxu0 %v11532_v37  ;;  %v11544_v21 = vld [vmem:[%s17416_s5 + $0x360] sm:$0xff]  }
 0x175   : > { %10682 = vmatprep.subr.bf16.mxu1 %v11533_v47  ;;  %v11545_v37 = vld [vmem:[%s17416_s5 + $0x3e0] sm:$0xff]  }
 0x176   : > { %5253 = vmatmul.mubr.bf16.vlgmr.msra.gmra.mxu0 %v2984_v23  ;;  %v11546_v47 = vld [vmem:[%s17416_s5 + $0x320] sm:$0xff]   ;;  %v11548_v23 = vld [vmem:[%s17416_s5 + $0x358] sm:$0xff]  }
 0x177   : > { %5294 = vmatmul.mubr.bf16.vlgmr.msra.gmra.mxu1 %v2986_v57  ;;  %10661 = vmatpush3.bf16.msra.mxu0 %v11534_v48  ;;  %v11547_v48 = vld [vmem:[%s17416_s5 + $0x3a0] sm:$0xff]   ;;  %v13434_v57 = vpop.f32.mrf.mxu0 }
 0x178   : > { %5334 = vmatprep.mubr.bf16.mxu0 %v2989_v53  ;;  %10683 = vmatpush3.bf16.msra.mxu1 %v11535_v44  ;;  %v11549_v44 = vld [vmem:[%s17416_s5 + $0x3d8] sm:$0xff]   ;;  %v13439_v53 = vpop.f32.mrf.mxu1 }
 0x179   : > { %5375 = vmatprep.mubr.bf16.mxu1 %v2991_v46  ;;  %10662 = vmatprep.subr.bf16.mxu0 %v11536_v25  ;;  %v11550_v25 = vld [vmem:[%s17416_s5 + $0x318] sm:$0xff]   ;;  %v11552_v46 = vld [vmem:[%s17416_s5 + $0x350] sm:$0xff]  }
 0x17a   : > { %10684 = vmatprep.subr.bf16.mxu1 %v11537_v8  ;;  %v11551_v8 = vld [vmem:[%s17416_s5 + $0x398] sm:$0xff]  }
 0x17b   : > { %10663 = vmatpush3.bf16.msra.mxu0 %v11538_v54  ;;  %v11553_v54 = vld [vmem:[%s17416_s5 + $0x3d0] sm:$0xff]  }
 0x17c   : > { %10685 = vmatpush3.bf16.msra.mxu1 %v11539_v42  ;;  %10664 = vmatprep.subr.bf16.mxu0 %v11540_v36  ;;  %v1856_v42 = vpop.f32.mrf.mxu0  ;;  %v11554_v36 = vld [vmem:[%s17416_s5 + $0x310] sm:$0xff]  }
 0x17d   : > { %10686 = vmatprep.subr.bf16.mxu1 %v11541_v28  ;;  %v1899_v28 = vpop.f32.mrf.mxu1 }
 0x17f   : > { %10665 = vmatpush3.bf16.msra.mxu0 %v11542_v45  ;;  %v11555_v45 = vld [vmem:[%s17416_s5 + $0x390] sm:$0xff]  }
 0x180   : > { %10687 = vmatpush3.bf16.msra.mxu1 %v11543_v16  ;;  %10666 = vmatprep.subr.bf16.mxu0 %v11544_v21  ;;  %v11556_v16 = vld [vmem:[%s17416_s5 + $0x348] sm:$0xff]  }
 0x181   : > { %10688 = vmatprep.subr.bf16.mxu1 %v11545_v37  ;;  %v11557_v21 = vld [vmem:[%s17416_s5 + $0x3c8] sm:$0xff]   ;;  %v13462_v37 = vpop.f32.mrf.mxu0 }
 0x183   : > { %10667 = vmatpush3.bf16.msra.mxu0 %v11546_v47  ;;  %v11558_v47 = vld [vmem:[%s17416_s5 + $0x308] sm:$0xff]  }
 0x184   : > { %10689 = vmatpush3.bf16.msra.mxu1 %v11547_v48  ;;  %10668 = vmatprep.subr.bf16.mxu0 %v11548_v23  ;;  %v13467_v48 = vpop.f32.mrf.mxu1  ;;  %v11559_v23 = vld [vmem:[%s17416_s5 + $0x388] sm:$0xff]  }
 0x185   : > { %10690 = vmatprep.subr.bf16.mxu1 %v11549_v44  ;;  %v11560_v44 = vld [vmem:[%s17416_s5 + $0x340] sm:$0xff]  }
 0x187   : > { %10669 = vmatpush3.bf16.msra.mxu0 %v11550_v25  ;;  %v11561_v25 = vld [vmem:[%s17416_s5 + $0x3c0] sm:$0xff]  }
 0x188   : > { %10691 = vmatpush3.bf16.msra.mxu1 %v11551_v8  ;;  %10670 = vmatprep.subr.bf16.mxu0 %v11552_v46  ;;  %v1860_v8 = vpop.f32.mrf.mxu0  ;;  %v11562_v46 = vld [vmem:[%s17416_s5 + $0x300] sm:$0xff]  }
 0x189   : > { %10692 = vmatprep.subr.bf16.mxu1 %v11553_v54  ;;  %v13483_v54 = vadd.f32 %v13322_v38, %v12946_v55  ;;  %v11565_v55 = vld [vmem:[%s17416_s5 + $0x4f8] sm:$0xff]   ;;  %v13500_v38 = vadd.f32 %v13294_v49, %v12938_v51  ;;  %v13518_v51 = vadd.f32 %v1856_v42, %v12958_v61  ;;  %v11568_v49 = vld [vmem:[%s17416_s5 + $0x470] sm:$0xff]  }
 0x18b   : > { %10671 = vmatpush3.bf16.msra.mxu0 %v11554_v36  ;;  %17653 = vst [vmem:[#allocation60_spill] sm:$0xff] %v13483_v54  ;;  %v1903_v36 = vpop.f32.mrf.mxu1  ;;  %17655 = vst [vmem:[#allocation62_spill] sm:$0xff] %v13500_v38 }
 0x18c   : > { %10693 = vmatpush3.bf16.msra.mxu1 %v11555_v45  ;;  %10672 = vmatprep.subr.bf16.mxu0 %v11556_v16  ;;  %v11563_v45 = vld [vmem:[%s17416_s5 + $0x380] sm:$0xff]   ;;  %v11564_v16 = vld [vmem:[%s17416_s5 + $0x478] sm:$0xff]   ;;  %17659 = vst [vmem:[#allocation66_spill] sm:$0xff] %v13518_v51 }
 0x18d   : > { %10694 = vmatprep.subr.bf16.mxu1 %v11557_v21  ;;  %v13493_v21 = vadd.f32 %v13327_v39, %v12948_v56  ;;  %v11566_v56 = vld [vmem:[%s17416_s5 + $0x438] sm:$0xff]   ;;  %v2988_v39 = vpack.c.bf16 %v13483_v54, %v13500_v38 }
 0x18f   : > { %10673 = vmatpush3.bf16.msra.mxu0 %v11558_v47  ;;  %17654 = vst [vmem:[#allocation61_spill] sm:$0xff] %v13493_v21  ;;  %v13503_v47 = vadd.f32 %v1860_v8, %v12966_v2  ;;  %v11573_v8 = vld [vmem:[%s17416_s5 + $0x4e8] sm:$0xff]  }
 0x190   : > { %10695 = vmatpush3.bf16.msra.mxu1 %v11559_v23  ;;  %10674 = vmatprep.subr.bf16.mxu0 %v11560_v44  ;;  %v13507_v23 = vadd.f32 %v13299_v50, %v12940_v52  ;;  %v13510_v44 = vadd.f32 %v1903_v36, %v12968_v20  ;;  %v11567_v52 = vld [vmem:[%s17416_s5 + $0x4b8] sm:$0xff]   ;;  %v13526_v20 = vadd.f32 %v1899_v28, %v12960_v62  ;;  %v11569_v50 = vld [vmem:[%s17416_s5 + $0x4f0] sm:$0xff]   ;;  %v11575_v36 = vld [vmem:[%s17416_s5 + $0x4a8] sm:$0xff]  }
 0x191   : > { %10696 = vmatprep.subr.bf16.mxu1 %v11561_v25  ;;  %17656 = vst [vmem:[#allocation63_spill] sm:$0xff] %v13503_v47  ;;  %v2993_v61 = vpack.c.bf16 %v13503_v47, %v13518_v51  ;;  %v11570_v62 = vld [vmem:[%s17416_s5 + $0x430] sm:$0xff]   ;;  %v11572_v25 = vld [vmem:[%s17416_s5 + $0x468] sm:$0xff]  }
 0x192   : > { %17657 = vst [vmem:[#allocation64_spill] sm:$0xff] %v13507_v23  ;;  %17658 = vst [vmem:[#allocation65_spill] sm:$0xff] %v13510_v44  ;;  %v2990_v2 = vpack.c.bf16 %v13493_v21, %v13507_v23  ;;  %v2995_v42 = vpack.c.bf16 %v13510_v44, %v13526_v20  ;;  %v11571_v28 = vld [vmem:[%s17416_s5 + $0x4b0] sm:$0xff]   ;;  %v17687_v44 = vld [vmem:[#allocation3_spill] sm:$0xff] }
 0x193   : > { %10675 = vmatpush3.bf16.msra.mxu0 %v11562_v46  ;;  %17660 = vst [vmem:[#allocation67_spill] sm:$0xff] %v13526_v20  ;;  %v11574_v46 = vld [vmem:[%s17416_s5 + $0x428] sm:$0xff]  }
 0x194   : > { %10697 = vmatpush3.bf16.msra.mxu1 %v11563_v45  ;;  %10704 = vmatprep.subr.bf16.mxu0 %v11564_v16  ;;  %v11576_v45 = vld [vmem:[%s17416_s5 + $0x460] sm:$0xff]  }
 0x195   : > { %10726 = vmatprep.subr.bf16.mxu1 %v11565_v55  ;;  %v11577_v16 = vld [vmem:[%s17416_s5 + $0x4e0] sm:$0xff]  }
 0x196   : > { %5335 = vmatmul.mubr.bf16.vlgmr.msra.gmra.mxu0 %v2988_v39  ;;  %v11578_v55 = vld [vmem:[%s17416_s5 + $0x420] sm:$0xff]   ;;  %v11580_v39 = vld [vmem:[%s17416_s5 + $0x458] sm:$0xff]  }
 0x197   : > { %5376 = vmatmul.mubr.bf16.vlgmr.msra.gmra.mxu1 %v2990_v2  ;;  %10705 = vmatpush3.bf16.msra.mxu0 %v11566_v56  ;;  %v11579_v56 = vld [vmem:[%s17416_s5 + $0x4a0] sm:$0xff]   ;;  %v13574_v2 = vpop.f32.mrf.mxu0 }
 0x198   : > { %5416 = vmatprep.mubr.bf16.mxu0 %v2993_v61  ;;  %10727 = vmatpush3.bf16.msra.mxu1 %v11567_v52  ;;  %v11581_v52 = vld [vmem:[%s17416_s5 + $0x4d8] sm:$0xff]   ;;  %v13579_v61 = vpop.f32.mrf.mxu1 }
 0x199   : > { %5457 = vmatprep.mubr.bf16.mxu1 %v2995_v42  ;;  %10706 = vmatprep.subr.bf16.mxu0 %v11568_v49  ;;  %v11582_v49 = vld [vmem:[%s17416_s5 + $0x418] sm:$0xff]   ;;  %v11584_v42 = vld [vmem:[%s17416_s5 + $0x450] sm:$0xff]  }
 0x19a   : > { %10728 = vmatprep.subr.bf16.mxu1 %v11569_v50  ;;  %v11583_v50 = vld [vmem:[%s17416_s5 + $0x498] sm:$0xff]  }
 0x19b   : > { %10707 = vmatpush3.bf16.msra.mxu0 %v11570_v62  ;;  %v11585_v62 = vld [vmem:[%s17416_s5 + $0x4d0] sm:$0xff]  }
 0x19c   : > { %10729 = vmatpush3.bf16.msra.mxu1 %v11571_v28  ;;  %10708 = vmatprep.subr.bf16.mxu0 %v11572_v25  ;;  %v1942_v28 = vpop.f32.mrf.mxu0  ;;  %v11586_v25 = vld [vmem:[%s17416_s5 + $0x410] sm:$0xff]  }
 0x19d   : > { %10730 = vmatprep.subr.bf16.mxu1 %v11573_v8  ;;  %v1985_v8 = vpop.f32.mrf.mxu1 }
 0x19f   : > { %10709 = vmatpush3.bf16.msra.mxu0 %v11574_v46  ;;  %v11587_v46 = vld [vmem:[%s17416_s5 + $0x490] sm:$0xff]  }
 0x1a0   : > { %10731 = vmatpush3.bf16.msra.mxu1 %v11575_v36  ;;  %10710 = vmatprep.subr.bf16.mxu0 %v11576_v45  ;;  %v11588_v36 = vld [vmem:[%s17416_s5 + $0x448] sm:$0xff]  }
 0x1a1   : > { %10732 = vmatprep.subr.bf16.mxu1 %v11577_v16  ;;  %v11589_v45 = vld [vmem:[%s17416_s5 + $0x4c8] sm:$0xff]   ;;  %v13602_v16 = vpop.f32.mrf.mxu0 }
 0x1a3   : > { %10711 = vmatpush3.bf16.msra.mxu0 %v11578_v55  ;;  %v11590_v55 = vld [vmem:[%s17416_s5 + $0x408] sm:$0xff]  }
 0x1a4   : > { %10733 = vmatpush3.bf16.msra.mxu1 %v11579_v56  ;;  %10712 = vmatprep.subr.bf16.mxu0 %v11580_v39  ;;  %v13607_v56 = vpop.f32.mrf.mxu1  ;;  %v11591_v39 = vld [vmem:[%s17416_s5 + $0x488] sm:$0xff]  }
 0x1a5   : > { %10734 = vmatprep.subr.bf16.mxu1 %v11581_v52  ;;  %v11592_v52 = vld [vmem:[%s17416_s5 + $0x440] sm:$0xff]  }
 0x1a7   : > { %10713 = vmatpush3.bf16.msra.mxu0 %v11582_v49  ;;  %v11593_v49 = vld [vmem:[%s17416_s5 + $0x4c0] sm:$0xff]  }
 0x1a8   : > { %10735 = vmatpush3.bf16.msra.mxu1 %v11583_v50  ;;  %10714 = vmatprep.subr.bf16.mxu0 %v11584_v42  ;;  %v1946_v50 = vpop.f32.mrf.mxu0  ;;  %v11594_v42 = vld [vmem:[%s17416_s5 + $0x400] sm:$0xff]  }
 0x1a9   : > { %10736 = vmatprep.subr.bf16.mxu1 %v11585_v62  ;;  %v13623_v62 = vadd.f32 %v13462_v37, %v12962_v63  ;;  %v11597_v63 = vld [vmem:[%s17416_s5 + $0x5f8] sm:$0xff]   ;;  %v13640_v37 = vadd.f32 %v13434_v57, %v12954_v59  ;;  %v13658_v59 = vadd.f32 %v1942_v28, %v12974_v5  ;;  %v11600_v57 = vld [vmem:[%s17416_s5 + $0x570] sm:$0xff]  }
 0x1ab   : > { %10715 = vmatpush3.bf16.msra.mxu0 %v11586_v25  ;;  %17661 = vst [vmem:[#allocation68_spill] sm:$0xff] %v13623_v62  ;;  %v1989_v25 = vpop.f32.mrf.mxu1  ;;  %17663 = vst [vmem:[#allocation70_spill] sm:$0xff] %v13640_v37 }
 0x1ac   : > { %10737 = vmatpush3.bf16.msra.mxu1 %v11587_v46  ;;  %10716 = vmatprep.subr.bf16.mxu0 %v11588_v36  ;;  %v11595_v46 = vld [vmem:[%s17416_s5 + $0x480] sm:$0xff]   ;;  %v11596_v36 = vld [vmem:[%s17416_s5 + $0x578] sm:$0xff]   ;;  %17667 = vst [vmem:[#allocation74_spill] sm:$0xff] %v13658_v59 }
 0x1ad   : > { %10738 = vmatprep.subr.bf16.mxu1 %v11589_v45  ;;  %v13633_v45 = vadd.f32 %v13467_v48, %v12964_v1  ;;  %v11598_v1 = vld [vmem:[%s17416_s5 + $0x538] sm:$0xff]   ;;  %v2992_v48 = vpack.c.bf16 %v13623_v62, %v13640_v37 }
 0x1af   : > { %10717 = vmatpush3.bf16.msra.mxu0 %v11590_v55  ;;  %17662 = vst [vmem:[#allocation69_spill] sm:$0xff] %v13633_v45  ;;  %v13643_v55 = vadd.f32 %v1946_v50, %v12982_v10  ;;  %v11604_v50 = vld [vmem:[%s17416_s5 + $0x568] sm:$0xff]  }
 0x1b0   : > { %10739 = vmatpush3.bf16.msra.mxu1 %v11591_v39  ;;  %10718 = vmatprep.subr.bf16.mxu0 %v11592_v52  ;;  %v13647_v39 = vadd.f32 %v13439_v53, %v12956_v60  ;;  %v13650_v52 = vadd.f32 %v1989_v25, %v12984_v11  ;;  %v11599_v60 = vld [vmem:[%s17416_s5 + $0x5b8] sm:$0xff]   ;;  %v13666_v11 = vadd.f32 %v1985_v8, %v12976_v6  ;;  %v11601_v53 = vld [vmem:[%s17416_s5 + $0x5f0] sm:$0xff]   ;;  %v13681_v8 = vpop.f32.mrf.mxu0  ;;  %v11605_v25 = vld [vmem:[%s17416_s5 + $0x5e8] sm:$0xff]  }
 0x1b1   : > { %10740 = vmatprep.subr.bf16.mxu1 %v11593_v49  ;;  %17664 = vst [vmem:[#allocation71_spill] sm:$0xff] %v13643_v55  ;;  %v2997_v5 = vpack.c.bf16 %v13643_v55, %v13658_v59  ;;  %v11602_v6 = vld [vmem:[%s17416_s5 + $0x530] sm:$0xff]  }
 0x1b2   : > { %17665 = vst [vmem:[#allocation72_spill] sm:$0xff] %v13647_v39  ;;  %17666 = vst [vmem:[#allocation73_spill] sm:$0xff] %v13650_v52  ;;  %v2994_v10 = vpack.c.bf16 %v13633_v45, %v13647_v39  ;;  %v2999_v28 = vpack.c.bf16 %v13650_v52, %v13666_v11  ;;  %v11603_v49 = vld [vmem:[%s17416_s5 + $0x5b0] sm:$0xff]   ;;  %v13787_v39 = vadd.f32 %v13607_v56, %v12980_v9  ;;  %v11630_v56 = vld [vmem:[%s17416_s5 + $0x638] sm:$0xff]  }
 0x1b3   : > { %10719 = vmatpush3.bf16.msra.mxu0 %v11594_v42  ;;  %17668 = vst [vmem:[#allocation75_spill] sm:$0xff] %v13666_v11  ;;  %v13689_v42 = vpop.f32.mrf.mxu1  ;;  %v11623_v11 = vld [vmem:[%s17416_s5 + $0x588] sm:$0xff]  }
 0x1b4   : > { %10741 = vmatpush3.bf16.msra.mxu1 %v11595_v46  ;;  %10748 = vmatprep.subr.bf16.mxu0 %v11596_v36  ;;  %v11606_v46 = vld [vmem:[%s17416_s5 + $0x528] sm:$0xff]   ;;  %v13697_v36 = vpop.f32.mrf.mxu0  ;;  %17670 = vst [vmem:[#allocation77_spill] sm:$0xff] %v13787_v39  ;;  %v13970_v23 = vadd.f32 %v13689_v42, %v17687_v44  ;;  %v11663_v44 = vld [vmem:[%s17416_s5 + $0x7b8] sm:$0xff]  }
 0x1b5   : > { %10770 = vmatprep.subr.bf16.mxu1 %v11597_v63  ;;  %v11607_v63 = vld [vmem:[%s17416_s5 + $0x5a8] sm:$0xff]  }
 0x1b6   : > { %5417 = vmatmul.mubr.bf16.vlgmr.msra.gmra.mxu0 %v2992_v48  ;;  %v13705_v48 = vpop.f32.mrf.mxu1  ;;  %v17681_v45 = vld [vmem:[#allocation7_spill] sm:$0xff]  ;;  %17688 = vst [vmem:[#allocation3_spill] sm:$0xff] %v13970_v23 }
 0x1b7   : > { %5458 = vmatmul.mubr.bf16.vlgmr.msra.gmra.mxu1 %v2994_v10  ;;  %10749 = vmatpush3.bf16.msra.mxu0 %v11598_v1  ;;  %v11608_v1 = vld [vmem:[%s17416_s5 + $0x560] sm:$0xff]  }
 0x1b8   : > { %5498 = vmatprep.mubr.bf16.mxu0 %v2997_v5  ;;  %10771 = vmatpush3.bf16.msra.mxu1 %v11599_v60  ;;  %v11609_v60 = vld [vmem:[%s17416_s5 + $0x5e0] sm:$0xff]  }
 0x1b9   : > { %5539 = vmatprep.mubr.bf16.mxu1 %v2999_v28  ;;  %10750 = vmatprep.subr.bf16.mxu0 %v11600_v57  ;;  %v11610_v10 = vld [vmem:[%s17416_s5 + $0x520] sm:$0xff]   ;;  %v13713_v57 = vpop.f32.mrf.mxu0  ;;  %v13721_v28 = vpop.f32.mrf.mxu1 }
 0x1ba   : > { %10772 = vmatprep.subr.bf16.mxu1 %v11601_v53  ;;  %v11611_v5 = vld [vmem:[%s17416_s5 + $0x5a0] sm:$0xff]   ;;  %v11612_v53 = vld [vmem:[%s17416_s5 + $0x558] sm:$0xff]   ;;  %v13953_v62 = vadd.f32 %v13721_v28, %v17681_v45  ;;  %v17689_v45 = vld [vmem:[#allocation15_spill] sm:$0xff] }
 0x1bb   : > { %10751 = vmatpush3.bf16.msra.mxu0 %v11602_v6  ;;  %v11613_v6 = vld [vmem:[%s17416_s5 + $0x5d8] sm:$0xff]  }
 0x1bc   : > { %10773 = vmatpush3.bf16.msra.mxu1 %v11603_v49  ;;  %10752 = vmatprep.subr.bf16.mxu0 %v11604_v50  ;;  %v11614_v49 = vld [vmem:[%s17416_s5 + $0x518] sm:$0xff]   ;;  %v2032_v50 = vpop.f32.mrf.mxu0  ;;  %17682 = vst [vmem:[#allocation7_spill] sm:$0xff] %v13953_v62  ;;  %v3002_v42 = vpack.c.bf16 %v13953_v62, %v13970_v23 }
 0x1bd   : > { %10774 = vmatprep.subr.bf16.mxu1 %v11605_v25  ;;  %v11615_v25 = vld [vmem:[%s17416_s5 + $0x598] sm:$0xff]  }
 0x1bf   : > { %10753 = vmatpush3.bf16.msra.mxu0 %v11606_v46  ;;  %v11616_v46 = vld [vmem:[%s17416_s5 + $0x550] sm:$0xff]  }
 0x1c0   : > { %10775 = vmatpush3.bf16.msra.mxu1 %v11607_v63  ;;  %10754 = vmatprep.subr.bf16.mxu0 %v11608_v1  ;;  %v2075_v63 = vpop.f32.mrf.mxu1  ;;  %v11617_v1 = vld [vmem:[%s17416_s5 + $0x5d0] sm:$0xff]  }
 0x1c1   : > { %10776 = vmatprep.subr.bf16.mxu1 %v11609_v60  ;;  %v11618_v60 = vld [vmem:[%s17416_s5 + $0x510] sm:$0xff]   ;;  %v13806_v9 = vadd.f32 %v2075_v63, %v13000_v19 }
 0x1c3   : > { %10755 = vmatpush3.bf16.msra.mxu0 %v11610_v10  ;;  %v13741_v10 = vpop.f32.mrf.mxu0  ;;  %17674 = vst [vmem:[#allocation81_spill] sm:$0xff] %v13806_v9 }
 0x1c4   : > { %10777 = vmatpush3.bf16.msra.mxu1 %v11611_v5  ;;  %10756 = vmatprep.subr.bf16.mxu0 %v11612_v53  ;;  %v11619_v5 = vld [vmem:[%s17416_s5 + $0x590] sm:$0xff]   ;;  %v11620_v53 = vld [vmem:[%s17416_s5 + $0x548] sm:$0xff]  }
 0x1c5   : > { %10778 = vmatprep.subr.bf16.mxu1 %v11613_v6  ;;  %v13749_v6 = vpop.f32.mrf.mxu1 }
 0x1c7   : > { %10757 = vmatpush3.bf16.msra.mxu0 %v11614_v49  ;;  %v11621_v49 = vld [vmem:[%s17416_s5 + $0x5c8] sm:$0xff]   ;;  %v13765_v59 = vpop.f32.mrf.mxu1 }
 0x1c8   : > { %10779 = vmatpush3.bf16.msra.mxu1 %v11615_v25  ;;  %10758 = vmatprep.subr.bf16.mxu0 %v11616_v46  ;;  %v11622_v25 = vld [vmem:[%s17416_s5 + $0x508] sm:$0xff]   ;;  %v13757_v46 = vpop.f32.mrf.mxu0 }
 0x1c9   : > { %10780 = vmatprep.subr.bf16.mxu1 %v11617_v1  ;;  %v11624_v1 = vld [vmem:[%s17416_s5 + $0x540] sm:$0xff]   ;;  %v13789_v55 = vpop.f32.mrf.mxu1 }
 0x1ca   : > { %v13777_v52 = vpop.f32.mrf.mxu0 }
 0x1cb   : > { %10759 = vmatpush3.bf16.msra.mxu0 %v11618_v60  ;;  %v11625_v60 = vld [vmem:[%s17416_s5 + $0x5c0] sm:$0xff]   ;;  %v13828_v63 = vpop.f32.mrf.mxu1 }
 0x1cc   : > { %10781 = vmatpush3.bf16.msra.mxu1 %v11619_v5  ;;  %10760 = vmatprep.subr.bf16.mxu0 %v11620_v53  ;;  %v11626_v5 = vld [vmem:[%s17416_s5 + $0x500] sm:$0xff]   ;;  %v13775_v53 = vadd.f32 %v13602_v16, %v12978_v7  ;;  %v11629_v7 = vld [vmem:[%s17416_s5 + $0x6f8] sm:$0xff]   ;;  %v13796_v16 = vadd.f32 %v13574_v2, %v12970_v3  ;;  %v17675_v3 = vld [vmem:[#allocation4_spill] sm:$0xff]  ;;  %v13974_v28 = vadd.f32 %v13828_v63, %v17689_v45 }
 0x1cd   : > { %10782 = vmatprep.subr.bf16.mxu1 %v11621_v49  ;;  %v11627_v49 = vld [vmem:[%s17416_s5 + $0x580] sm:$0xff]   ;;  %v13815_v2 = vadd.f32 %v13697_v36, %v17675_v3  ;;  %v11632_v36 = vld [vmem:[%s17416_s5 + $0x670] sm:$0xff]   ;;  %v11636_v3 = vld [vmem:[%s17416_s5 + $0x668] sm:$0xff]  }
 0x1ce   : > { %17669 = vst [vmem:[#allocation76_spill] sm:$0xff] %v13775_v53  ;;  %17671 = vst [vmem:[#allocation78_spill] sm:$0xff] %v13796_v16  ;;  %v17693_v63 = vld [vmem:[#allocation11_spill] sm:$0xff] }
 0x1cf   : > { %10761 = vmatpush3.bf16.msra.mxu0 %v11622_v25  ;;  %v11628_v25 = vld [vmem:[%s17416_s5 + $0x678] sm:$0xff]   ;;  %17676 = vst [vmem:[#allocation4_spill] sm:$0xff] %v13815_v2  ;;  %17690 = vst [vmem:[#allocation15_spill] sm:$0xff] %v13974_v28 }
 0x1d0   : > { %10783 = vmatpush3.bf16.msra.mxu1 %v11623_v11  ;;  %10762 = vmatprep.subr.bf16.mxu0 %v11624_v1  ;;  %v13799_v11 = vadd.f32 %v2032_v50, %v12998_v18  ;;  %v13803_v1 = vadd.f32 %v13579_v61, %v12972_v4  ;;  %v13817_v18 = vpop.f32.mrf.mxu0  ;;  %v11631_v4 = vld [vmem:[%s17416_s5 + $0x6b8] sm:$0xff]  }
 0x1d1   : > { %10784 = vmatprep.subr.bf16.mxu1 %v11625_v60  ;;  %v2996_v60 = vpack.c.bf16 %v13775_v53, %v13796_v16  ;;  %v17677_v61 = vld [vmem:[#allocation5_spill] sm:$0xff]  ;;  %v11655_v16 = vld [vmem:[%s17416_s5 + $0x688] sm:$0xff]  }
 0x1d2   : > { %17672 = vst [vmem:[#allocation79_spill] sm:$0xff] %v13799_v11  ;;  %17673 = vst [vmem:[#allocation80_spill] sm:$0xff] %v13803_v1  ;;  %v2998_v19 = vpack.c.bf16 %v13787_v39, %v13803_v1  ;;  %v13826_v50 = vadd.f32 %v13705_v48, %v17677_v61  ;;  %v11651_v1 = vld [vmem:[%s17416_s5 + $0x690] sm:$0xff]  }
 0x1d3   : > { %10763 = vmatpush3.bf16.msra.mxu0 %v11626_v5  ;;  %v3001_v5 = vpack.c.bf16 %v13799_v11, %v13815_v2  ;;  %v11647_v2 = vld [vmem:[%s17416_s5 + $0x698] sm:$0xff]  }
 0x1d4   : > { %10785 = vmatpush3.bf16.msra.mxu1 %v11627_v49  ;;  %10792 = vmatprep.subr.bf16.mxu0 %v11628_v25  ;;  %17678 = vst [vmem:[#allocation5_spill] sm:$0xff] %v13826_v50  ;;  %v11633_v49 = vld [vmem:[%s17416_s5 + $0x6f0] sm:$0xff]   ;;  %v3003_v48 = vpack.c.bf16 %v13806_v9, %v13826_v50 }
 0x1d5   : > { %10814 = vmatprep.subr.bf16.mxu1 %v11629_v7  ;;  %v11634_v25 = vld [vmem:[%s17416_s5 + $0x630] sm:$0xff]   ;;  %v13843_v7 = vpop.f32.mrf.mxu0 }
 0x1d6   : > { %5499 = vmatmul.mubr.bf16.vlgmr.msra.gmra.mxu0 %v2996_v60  ;;  %v11635_v60 = vld [vmem:[%s17416_s5 + $0x6b0] sm:$0xff]  }
 0x1d7   : > { %5540 = vmatmul.mubr.bf16.vlgmr.msra.gmra.mxu1 %v2998_v19  ;;  %10793 = vmatpush3.bf16.msra.mxu0 %v11630_v56  ;;  %v13851_v56 = vpop.f32.mrf.mxu1  ;;  %v11637_v19 = vld [vmem:[%s17416_s5 + $0x6e8] sm:$0xff]   ;;  %v13859_v61 = vpop.f32.mrf.mxu0 }
 0x1d8   : > { %5580 = vmatprep.mubr.bf16.mxu0 %v3001_v5  ;;  %10815 = vmatpush3.bf16.msra.mxu1 %v11631_v4  ;;  %v11638_v4 = vld [vmem:[%s17416_s5 + $0x628] sm:$0xff]  }
 0x1d9   : > { %5621 = vmatprep.mubr.bf16.mxu1 %v3003_v48  ;;  %10794 = vmatprep.subr.bf16.mxu0 %v11632_v36  ;;  %v11639_v5 = vld [vmem:[%s17416_s5 + $0x6a8] sm:$0xff]   ;;  %v11640_v36 = vld [vmem:[%s17416_s5 + $0x660] sm:$0xff]   ;;  %v13867_v48 = vpop.f32.mrf.mxu1 }
 0x1da   : > { %10816 = vmatprep.subr.bf16.mxu1 %v11633_v49  ;;  %v11641_v49 = vld [vmem:[%s17416_s5 + $0x6e0] sm:$0xff]  }
 0x1db   : > { %10795 = vmatpush3.bf16.msra.mxu0 %v11634_v25  ;;  %v11642_v25 = vld [vmem:[%s17416_s5 + $0x620] sm:$0xff]   ;;  %v13883_v50 = vpop.f32.mrf.mxu1 }
 0x1dc   : > { %10817 = vmatpush3.bf16.msra.mxu1 %v11635_v60  ;;  %10796 = vmatprep.subr.bf16.mxu0 %v11636_v3  ;;  %v13875_v60 = vpop.f32.mrf.mxu0  ;;  %v11643_v3 = vld [vmem:[%s17416_s5 + $0x6a0] sm:$0xff]  }
 0x1dd   : > { %10818 = vmatprep.subr.bf16.mxu1 %v11637_v19  ;;  %v11644_v19 = vld [vmem:[%s17416_s5 + $0x658] sm:$0xff]   ;;  %v13899_v9 = vpop.f32.mrf.mxu1 }
 0x1df   : > { %10797 = vmatpush3.bf16.msra.mxu0 %v11638_v4  ;;  %v11645_v4 = vld [vmem:[%s17416_s5 + $0x6d8] sm:$0xff]   ;;  %v13915_v11 = vpop.f32.mrf.mxu1 }
 0x1e0   : > { %10819 = vmatpush3.bf16.msra.mxu1 %v11639_v5  ;;  %10798 = vmatprep.subr.bf16.mxu0 %v11640_v36  ;;  %v11646_v5 = vld [vmem:[%s17416_s5 + $0x618] sm:$0xff]   ;;  %v13891_v36 = vpop.f32.mrf.mxu0 }
 0x1e1   : > { %10820 = vmatprep.subr.bf16.mxu1 %v11641_v49  ;;  %v11648_v49 = vld [vmem:[%s17416_s5 + $0x650] sm:$0xff]   ;;  %v13931_v39 = vpop.f32.mrf.mxu1 }
 0x1e3   : > { %10799 = vmatpush3.bf16.msra.mxu0 %v11642_v25  ;;  %v11649_v25 = vld [vmem:[%s17416_s5 + $0x6d0] sm:$0xff]   ;;  %v13955_v20 = vpop.f32.mrf.mxu1 }
 0x1e4   : > { %10821 = vmatpush3.bf16.msra.mxu1 %v11643_v3  ;;  %10800 = vmatprep.subr.bf16.mxu0 %v11644_v19  ;;  %v11650_v3 = vld [vmem:[%s17416_s5 + $0x610] sm:$0xff]   ;;  %v13907_v19 = vpop.f32.mrf.mxu0 }
 0x1e5   : > { %10822 = vmatprep.subr.bf16.mxu1 %v11645_v4  ;;  %v11652_v4 = vld [vmem:[%s17416_s5 + $0x648] sm:$0xff]   ;;  %v13996_v45 = vpop.f32.mrf.mxu1 }
 0x1e7   : > { %10801 = vmatpush3.bf16.msra.mxu0 %v11646_v5  ;;  %v11653_v5 = vld [vmem:[%s17416_s5 + $0x6c8] sm:$0xff]  }
 0x1e8   : > { %10823 = vmatpush3.bf16.msra.mxu1 %v11647_v2  ;;  %10802 = vmatprep.subr.bf16.mxu0 %v11648_v49  ;;  %v11654_v2 = vld [vmem:[%s17416_s5 + $0x608] sm:$0xff]   ;;  %v13923_v49 = vpop.f32.mrf.mxu0 }
 0x1e9   : > { %10824 = vmatprep.subr.bf16.mxu1 %v11649_v25  ;;  %v11656_v25 = vld [vmem:[%s17416_s5 + $0x640] sm:$0xff]  }
 0x1ea   : > { %v13943_v37 = vpop.f32.mrf.mxu0 }
 0x1eb   : > { %10803 = vmatpush3.bf16.msra.mxu0 %v11650_v3  ;;  %v11657_v3 = vld [vmem:[%s17416_s5 + $0x6c0] sm:$0xff]  }
 0x1ec   : > { %10825 = vmatpush3.bf16.msra.mxu1 %v11651_v1  ;;  %10804 = vmatprep.subr.bf16.mxu0 %v11652_v4  ;;  %v11658_v1 = vld [vmem:[%s17416_s5 + $0x600] sm:$0xff]  }
 0x1ed   : > { %10826 = vmatprep.subr.bf16.mxu1 %v11653_v5  ;;  %v17679_v4 = vld [vmem:[#allocation6_spill] sm:$0xff] }
 0x1ee   : > { %v13941_v53 = vadd.f32 %v13713_v57, %v17679_v4  ;;  %v11659_v5 = vld [vmem:[%s17416_s5 + $0x680] sm:$0xff]   ;;  %v11661_v57 = vld [vmem:[%s17416_s5 + $0x7f8] sm:$0xff]  }
 0x1ef   : > { %10805 = vmatpush3.bf16.msra.mxu0 %v11654_v2  ;;  %v11660_v2 = vld [vmem:[%s17416_s5 + $0x778] sm:$0xff]   ;;  %v17685_v4 = vld [vmem:[#allocation14_spill] sm:$0xff] }
 0x1f0   : > { %17680 = vst [vmem:[#allocation6_spill] sm:$0xff] %v13941_v53  ;;  %10827 = vmatpush3.bf16.msra.mxu1 %v11655_v16  ;;  %10806 = vmatprep.subr.bf16.mxu0 %v11656_v25  ;;  %v17683_v16 = vld [vmem:[#allocation2_spill] sm:$0xff]  ;;  %v13966_v51 = vadd.f32 %v13817_v18, %v17685_v4  ;;  %v13985_v4 = vpop.f32.mrf.mxu0 }
 0x1f1   : > { %10828 = vmatprep.subr.bf16.mxu1 %v11657_v3  ;;  %v13962_v25 = vadd.f32 %v13681_v8, %v17683_v16  ;;  %v11662_v3 = vld [vmem:[%s17416_s5 + $0x738] sm:$0xff]   ;;  %v17691_v16 = vld [vmem:[#allocation10_spill] sm:$0xff] }
 0x1f2   : > { %17686 = vst [vmem:[#allocation14_spill] sm:$0xff] %v13966_v51  ;;  %v13983_v18 = vadd.f32 %v13757_v46, %v17691_v16  ;;  %v11664_v46 = vld [vmem:[%s17416_s5 + $0x770] sm:$0xff]  }
 0x1f3   : > { %17684 = vst [vmem:[#allocation2_spill] sm:$0xff] %v13962_v25  ;;  %10807 = vmatpush3.bf16.msra.mxu0 %v11658_v1  ;;  %v3000_v8 = vpack.c.bf16 %v13941_v53, %v13962_v25  ;;  %v13994_v1 = vadd.f32 %v13765_v59, %v17693_v63  ;;  %v11665_v16 = vld [vmem:[%s17416_s5 + $0x7f0] sm:$0xff]  }
 0x1f4   : > { %17692 = vst [vmem:[#allocation10_spill] sm:$0xff] %v13983_v18  ;;  %10829 = vmatpush3.bf16.msra.mxu1 %v11659_v5  ;;  %10836 = vmatprep.subr.bf16.mxu0 %v11660_v2  ;;  %v3005_v2 = vpack.c.bf16 %v13966_v51, %v13983_v18  ;;  %v11667_v63 = vld [vmem:[%s17416_s5 + $0x7b0] sm:$0xff]   ;;  %v11670_v51 = vld [vmem:[%s17416_s5 + $0x728] sm:$0xff]  }
 0x1f5   : > { %17694 = vst [vmem:[#allocation11_spill] sm:$0xff] %v13994_v1  ;;  %10858 = vmatprep.subr.bf16.mxu1 %v11661_v57  ;;  %v3007_v59 = vpack.c.bf16 %v13974_v28, %v13994_v1  ;;  %v11666_v57 = vld [vmem:[%s17416_s5 + $0x730] sm:$0xff]   ;;  %v11669_v1 = vld [vmem:[%s17416_s5 + $0x7e8] sm:$0xff]  }
 0x1f6   : > { %5581 = vmatmul.mubr.bf16.vlgmr.msra.gmra.mxu0 %v3000_v8  ;;  %v10544_v5 = vpop.f32.mrf.mxu0 }
 0x1f7   : > { %5622 = vmatmul.mubr.bf16.vlgmr.msra.gmra.mxu1 %v3002_v42  ;;  %v10566_v23 = vpop.f32.mrf.mxu1  ;;  %10837 = vmatpush3.bf16.msra.mxu0 %v11662_v3  ;;  %v11668_v42 = vld [vmem:[%s17416_s5 + $0x768] sm:$0xff]  }
 0x1f8   : > { %5662 = vmatprep.mubr.bf16.mxu0 %v3005_v2  ;;  %10859 = vmatpush3.bf16.msra.mxu1 %v11663_v44  ;;  %v10545_v8 = vpop.f32.mrf.mxu0 }
 0x1f9   : > { %5703 = vmatprep.mubr.bf16.mxu1 %v3007_v59  ;;  %v10546_v3 = vadd.f32 %v10545_v8, %v10544_v5  ;;  %v10567_v18 = vpop.f32.mrf.mxu1  ;;  %10838 = vmatprep.subr.bf16.mxu0 %v11664_v46  ;;  %v11671_v46 = vld [vmem:[%s17416_s5 + $0x7a8] sm:$0xff]  }
 0x1fa   : > { %v10568_v28 = vadd.f32 %v10567_v18, %v10566_v23  ;;  %10860 = vmatprep.subr.bf16.mxu1 %v11665_v16  ;;  %v10547_v44 = vpop.f32.mrf.mxu0  ;;  %v11672_v23 = vld [vmem:[%s17416_s5 + $0x760] sm:$0xff]  }
 0x1fb   : > { %v10569_v2 = vpop.f32.mrf.mxu1  ;;  %10839 = vmatpush3.bf16.msra.mxu0 %v11666_v57  ;;  %v11673_v16 = vld [vmem:[%s17416_s5 + $0x7e0] sm:$0xff]  }
 0x1fc   : > { %v14023_v25 = vadd.f32 %v10568_v28, %v10546_v3  ;;  %10861 = vmatpush3.bf16.msra.mxu1 %v11667_v63  ;;  %v10548_v59 = vpop.f32.mrf.mxu0  ;;  %10840 = vmatprep.subr.bf16.mxu0 %v11668_v42  ;;  %v11674_v57 = vld [vmem:[%s17416_s5 + $0x720] sm:$0xff]   ;;  %v11678_v42 = vld [vmem:[%s17416_s5 + $0x718] sm:$0xff]  }
 0x1fd   : > { %v10549_v18 = vadd.f32 %v10548_v59, %v10547_v44  ;;  %v10570_v5 = vpop.f32.mrf.mxu1  ;;  %10862 = vmatprep.subr.bf16.mxu1 %v11669_v1  ;;  %v11675_v63 = vld [vmem:[%s17416_s5 + $0x7a0] sm:$0xff]   ;;  %v11676_v1 = vld [vmem:[%s17416_s5 + $0x758] sm:$0xff]   ;;  %v11680_v44 = vld [vmem:[%s17416_s5 + $0x750] sm:$0xff]  }
 0x1fe   : > { %v10571_v28 = vadd.f32 %v10570_v5, %v10569_v2  ;;  %v11679_v3 = vld [vmem:[%s17416_s5 + $0x798] sm:$0xff]   ;;  %v11681_v2 = vld [vmem:[%s17416_s5 + $0x7d0] sm:$0xff]   ;;  %v11686_v5 = vld [vmem:[%s17416_s5 + $0x708] sm:$0xff]  }
 0x1ff   : > { %10841 = vmatpush3.bf16.msra.mxu0 %v11670_v51  ;;  %v11677_v51 = vld [vmem:[%s17416_s5 + $0x7d8] sm:$0xff]   ;;  %v11682_v59 = vld [vmem:[%s17416_s5 + $0x710] sm:$0xff]  }
 0x200   : > { %v14037_v8 = vadd.f32 %v10571_v28, %v10549_v18  ;;  %10863 = vmatpush3.bf16.msra.mxu1 %v11671_v46  ;;  %10842 = vmatprep.subr.bf16.mxu0 %v11672_v23  ;;  %v11683_v46 = vld [vmem:[%s17416_s5 + $0x790] sm:$0xff]   ;;  %v11684_v23 = vld [vmem:[%s17416_s5 + $0x748] sm:$0xff]   ;;  %v11688_v28 = vld [vmem:[%s17416_s5 + $0x740] sm:$0xff]  }
 0x201   : > { %10864 = vmatprep.subr.bf16.mxu1 %v11673_v16  ;;  %v11685_v18 = vld [vmem:[%s17416_s5 + $0x7c8] sm:$0xff]  }
 0x202   : > { %v11687_v16 = vld [vmem:[%s17416_s5 + $0x788] sm:$0xff]  }
 0x203   : > { %10843 = vmatpush3.bf16.msra.mxu0 %v11674_v57  ;;  %v11689_v57 = vld [vmem:[%s17416_s5 + $0x7c0] sm:$0xff]  }
 0x204   : > { %10865 = vmatpush3.bf16.msra.mxu1 %v11675_v63  ;;  %10844 = vmatprep.subr.bf16.mxu0 %v11676_v1  ;;  %v11690_v63 = vld [vmem:[%s17416_s5 + $0x700] sm:$0xff]   ;;  %v17695_v1 = vld [vmem:[#allocation12_spill] sm:$0xff] }
 0x205   : > { %10866 = vmatprep.subr.bf16.mxu1 %v11677_v51  ;;  %v14089_v51 = vadd.f32 %v13777_v52, %v17695_v1  ;;  %v11693_v52 = vld [vmem:[%s17416_s5 + $0x8f8] sm:$0xff]   ;;  %v17707_v1 = vld [vmem:[#allocation18_spill] sm:$0xff] }
 0x207   : > { %10845 = vmatpush3.bf16.msra.mxu0 %v11678_v42  ;;  %17696 = vst [vmem:[#allocation12_spill] sm:$0xff] %v14089_v51  ;;  %v11691_v42 = vld [vmem:[%s17416_s5 + $0x780] sm:$0xff]  }
 0x208   : > { %10867 = vmatpush3.bf16.msra.mxu1 %v11679_v3  ;;  %10846 = vmatprep.subr.bf16.mxu0 %v11680_v44  ;;  %v11692_v3 = vld [vmem:[%s17416_s5 + $0x878] sm:$0xff]  }
 0x209   : > { %10868 = vmatprep.subr.bf16.mxu1 %v11681_v2  ;;  %v17697_v44 = vld [vmem:[#allocation13_spill] sm:$0xff] }
 0x20a   : > { %v14099_v2 = vadd.f32 %v13789_v55, %v17697_v44 }
 0x20b   : > { %10847 = vmatpush3.bf16.msra.mxu0 %v11682_v59  ;;  %v17699_v59 = vld [vmem:[#allocation8_spill] sm:$0xff] }
 0x20c   : > { %10869 = vmatpush3.bf16.msra.mxu1 %v11683_v46  ;;  %10848 = vmatprep.subr.bf16.mxu0 %v11684_v23  ;;  %17698 = vst [vmem:[#allocation13_spill] sm:$0xff] %v14099_v2  ;;  %v14106_v46 = vadd.f32 %v13741_v10, %v17699_v59  ;;  %v17701_v23 = vld [vmem:[#allocation22_spill] sm:$0xff]  ;;  %v11696_v59 = vld [vmem:[%s17416_s5 + $0x870] sm:$0xff]  }
 0x20d   : > { %10870 = vmatprep.subr.bf16.mxu1 %v11685_v18  ;;  %v14110_v18 = vadd.f32 %v13891_v36, %v17701_v23  ;;  %v14127_v36 = vadd.f32 %v13859_v61, %v17707_v1 }
 0x20e   : > { %17700 = vst [vmem:[#allocation8_spill] sm:$0xff] %v14106_v46  ;;  %v3004_v10 = vpack.c.bf16 %v14089_v51, %v14106_v46 }
 0x20f   : > { %10849 = vmatpush3.bf16.msra.mxu0 %v11686_v5  ;;  %17702 = vst [vmem:[#allocation22_spill] sm:$0xff] %v14110_v18  ;;  %v17703_v5 = vld [vmem:[#allocation9_spill] sm:$0xff]  ;;  %17708 = vst [vmem:[#allocation18_spill] sm:$0xff] %v14127_v36 }
 0x210   : > { %10871 = vmatpush3.bf16.msra.mxu1 %v11687_v16  ;;  %10850 = vmatprep.subr.bf16.mxu0 %v11688_v28  ;;  %v14114_v16 = vadd.f32 %v13749_v6, %v17703_v5  ;;  %v17705_v28 = vld [vmem:[#allocation23_spill] sm:$0xff]  ;;  %v11695_v6 = vld [vmem:[%s17416_s5 + $0x8b8] sm:$0xff]  }
 0x211   : > { %10872 = vmatprep.subr.bf16.mxu1 %v11689_v57  ;;  %v14118_v55 = vadd.f32 %v13899_v9, %v17705_v28  ;;  %v11694_v57 = vld [vmem:[%s17416_s5 + $0x838] sm:$0xff]   ;;  %v11699_v28 = vld [vmem:[%s17416_s5 + $0x8b0] sm:$0xff]  }
 0x212   : > { %17704 = vst [vmem:[#allocation9_spill] sm:$0xff] %v14114_v16  ;;  %v3006_v9 = vpack.c.bf16 %v14099_v2, %v14114_v16 }
 0x213   : > { %17706 = vst [vmem:[#allocation23_spill] sm:$0xff] %v14118_v55  ;;  %10851 = vmatpush3.bf16.msra.mxu0 %v11690_v63  ;;  %v17709_v63 = vld [vmem:[#allocation19_spill] sm:$0xff] }
 0x214   : > { %10873 = vmatpush3.bf16.msra.mxu1 %v11691_v42  ;;  %10880 = vmatprep.subr.bf16.mxu0 %v11692_v3  ;;  %v14136_v44 = vadd.f32 %v13867_v48, %v17709_v63  ;;  %v3009_v42 = vpack.c.bf16 %v14110_v18, %v14127_v36  ;;  %v11697_v3 = vld [vmem:[%s17416_s5 + $0x8f0] sm:$0xff]   ;;  %v11702_v36 = vld [vmem:[%s17416_s5 + $0x828] sm:$0xff]  }
 0x215   : > { %10902 = vmatprep.subr.bf16.mxu1 %v11693_v52  ;;  %v11698_v52 = vld [vmem:[%s17416_s5 + $0x830] sm:$0xff]  }
 0x216   : > { %17710 = vst [vmem:[#allocation19_spill] sm:$0xff] %v14136_v44  ;;  %v10588_v61 = vpop.f32.mrf.mxu0  ;;  %5663 = vmatmul.mubr.bf16.vlgmr.msra.gmra.mxu0 %v3004_v10  ;;  %v3011_v48 = vpack.c.bf16 %v14118_v55, %v14136_v44  ;;  %v11700_v10 = vld [vmem:[%s17416_s5 + $0x868] sm:$0xff]  }
 0x217   : > { %v10610_v23 = vpop.f32.mrf.mxu1  ;;  %5704 = vmatmul.mubr.bf16.vlgmr.msra.gmra.mxu1 %v3006_v9  ;;  %10881 = vmatpush3.bf16.msra.mxu0 %v11694_v57  ;;  %v11701_v9 = vld [vmem:[%s17416_s5 + $0x8e8] sm:$0xff]  }
 0x218   : > { %5744 = vmatprep.mubr.bf16.mxu0 %v3009_v42  ;;  %10903 = vmatpush3.bf16.msra.mxu1 %v11695_v6  ;;  %v10589_v5 = vpop.f32.mrf.mxu0 }
 0x219   : > { %5785 = vmatprep.mubr.bf16.mxu1 %v3011_v48  ;;  %v10590_v57 = vadd.f32 %v10589_v5, %v10588_v61  ;;  %v10611_v1 = vpop.f32.mrf.mxu1  ;;  %10882 = vmatprep.subr.bf16.mxu0 %v11696_v59  ;;  %v11703_v59 = vld [vmem:[%s17416_s5 + $0x8a8] sm:$0xff]   ;;  %v11704_v61 = vld [vmem:[%s17416_s5 + $0x860] sm:$0xff]  }
 0x21a   : > { %v10612_v63 = vadd.f32 %v10611_v1, %v10610_v23  ;;  %v10591_v42 = vpop.f32.mrf.mxu0  ;;  %10904 = vmatprep.subr.bf16.mxu1 %v11697_v3  ;;  %v11708_v1 = vld [vmem:[%s17416_s5 + $0x858] sm:$0xff]  }
 0x21b   : > { %v5173_v6 = vadd.f32 %v10590_v57, %v14023_v25  ;;  %v10613_v44 = vpop.f32.mrf.mxu1  ;;  %10883 = vmatpush3.bf16.msra.mxu0 %v11698_v52  ;;  %v11705_v52 = vld [vmem:[%s17416_s5 + $0x8e0] sm:$0xff]  }
 0x21c   : > { %10905 = vmatpush3.bf16.msra.mxu1 %v11699_v28  ;;  %v10592_v48 = vpop.f32.mrf.mxu0  ;;  %10884 = vmatprep.subr.bf16.mxu0 %v11700_v10  ;;  %v11706_v10 = vld [vmem:[%s17416_s5 + $0x820] sm:$0xff]  }
 0x21d   : > { %v14170_v3 = vadd.f32 %v10612_v63, %v5173_v6  ;;  %v10593_v25 = vadd.f32 %v10592_v48, %v10591_v42  ;;  %v10614_v23 = vpop.f32.mrf.mxu1  ;;  %10906 = vmatprep.subr.bf16.mxu1 %v11701_v9  ;;  %v11707_v57 = vld [vmem:[%s17416_s5 + $0x8a0] sm:$0xff]   ;;  %v11712_v63 = vld [vmem:[%s17416_s5 + $0x850] sm:$0xff]  }
 0x21e   : > { %v10615_v28 = vadd.f32 %v10614_v23, %v10613_v44  ;;  %v11711_v44 = vld [vmem:[%s17416_s5 + $0x898] sm:$0xff]   ;;  %v11713_v42 = vld [vmem:[%s17416_s5 + $0x8d0] sm:$0xff]   ;;  %v11719_v23 = vld [vmem:[%s17416_s5 + $0x888] sm:$0xff]  }
 0x21f   : > { %v5176_v5 = vadd.f32 %v10593_v25, %v14037_v8  ;;  %10885 = vmatpush3.bf16.msra.mxu0 %v11702_v36  ;;  %v11709_v8 = vld [vmem:[%s17416_s5 + $0x8d8] sm:$0xff]   ;;  %v11714_v6 = vld [vmem:[%s17416_s5 + $0x810] sm:$0xff]   ;;  %v11718_v25 = vld [vmem:[%s17416_s5 + $0x808] sm:$0xff]  }
 0x220   : > { %10907 = vmatpush3.bf16.msra.mxu1 %v11703_v59  ;;  %10886 = vmatprep.subr.bf16.mxu0 %v11704_v61  ;;  %v11710_v36 = vld [vmem:[%s17416_s5 + $0x818] sm:$0xff]   ;;  %v11715_v48 = vld [vmem:[%s17416_s5 + $0x890] sm:$0xff]   ;;  %v11716_v59 = vld [vmem:[%s17416_s5 + $0x848] sm:$0xff]  }
 0x221   : > { %v14185_v9 = vadd.f32 %v10615_v28, %v5176_v5  ;;  %10908 = vmatprep.subr.bf16.mxu1 %v11705_v52  ;;  %v11717_v61 = vld [vmem:[%s17416_s5 + $0x8c8] sm:$0xff]   ;;  %v11720_v52 = vld [vmem:[%s17416_s5 + $0x840] sm:$0xff]  }
 0x222   : > { %v11721_v5 = vld [vmem:[%s17416_s5 + $0x8c0] sm:$0xff]  }
 0x223   : > { %10887 = vmatpush3.bf16.msra.mxu0 %v11706_v10  ;;  %v11722_v28 = vld [vmem:[%s17416_s5 + $0x800] sm:$0xff]   ;;  %v17711_v10 = vld [vmem:[#allocation20_spill] sm:$0xff] }
 0x224   : > { %10909 = vmatpush3.bf16.msra.mxu1 %v11707_v57  ;;  %10888 = vmatprep.subr.bf16.mxu0 %v11708_v1  ;;  %v14231_v57 = vadd.f32 %v13875_v60, %v17711_v10  ;;  %v11723_v1 = vld [vmem:[%s17416_s5 + $0x880] sm:$0xff]   ;;  %v11725_v60 = vld [vmem:[%s17416_s5 + $0x9f8] sm:$0xff]   ;;  %v11728_v10 = vld [vmem:[%s17416_s5 + $0x970] sm:$0xff]  }
 0x225   : > { %10910 = vmatprep.subr.bf16.mxu1 %v11709_v8  ;;  %v11724_v8 = vld [vmem:[%s17416_s5 + $0x978] sm:$0xff]  }
 0x226   : > { %17712 = vst [vmem:[#allocation20_spill] sm:$0xff] %v14231_v57 }
 0x227   : > { %10889 = vmatpush3.bf16.msra.mxu0 %v11710_v36  ;;  %v17713_v36 = vld [vmem:[#allocation21_spill] sm:$0xff] }
 0x228   : > { %10911 = vmatpush3.bf16.msra.mxu1 %v11711_v44  ;;  %10890 = vmatprep.subr.bf16.mxu0 %v11712_v63  ;;  %v14241_v44 = vadd.f32 %v13883_v50, %v17713_v36  ;;  %v17715_v63 = vld [vmem:[#allocation16_spill] sm:$0xff] }
 0x229   : > { %10912 = vmatprep.subr.bf16.mxu1 %v11713_v42  ;;  %v14248_v42 = vadd.f32 %v13843_v7, %v17715_v63 }
 0x22a   : > { %17714 = vst [vmem:[#allocation21_spill] sm:$0xff] %v14241_v44 }
 0x22b   : > { %10891 = vmatpush3.bf16.msra.mxu0 %v11714_v6  ;;  %17716 = vst [vmem:[#allocation16_spill] sm:$0xff] %v14248_v42  ;;  %v17717_v6 = vld [vmem:[#allocation30_spill] sm:$0xff]  ;;  %v3008_v7 = vpack.c.bf16 %v14231_v57, %v14248_v42 }
 0x22c   : > { %10913 = vmatpush3.bf16.msra.mxu1 %v11715_v48  ;;  %10892 = vmatprep.subr.bf16.mxu0 %v11716_v59  ;;  %v14252_v48 = vadd.f32 %v13985_v4, %v17717_v6  ;;  %v17719_v59 = vld [vmem:[#allocation17_spill] sm:$0xff]  ;;  %v11731_v6 = vld [vmem:[%s17416_s5 + $0x9b0] sm:$0xff]  }
 0x22d   : > { %10914 = vmatprep.subr.bf16.mxu1 %v11717_v61  ;;  %v14256_v61 = vadd.f32 %v13851_v56, %v17719_v59  ;;  %v11727_v56 = vld [vmem:[%s17416_s5 + $0x9b8] sm:$0xff]   ;;  %v11732_v59 = vld [vmem:[%s17416_s5 + $0x968] sm:$0xff]  }
 0x22e   : > { %17718 = vst [vmem:[#allocation30_spill] sm:$0xff] %v14252_v48 }
 0x22f   : > { %10893 = vmatpush3.bf16.msra.mxu0 %v11718_v25  ;;  %17720 = vst [vmem:[#allocation17_spill] sm:$0xff] %v14256_v61  ;;  %v17721_v25 = vld [vmem:[#allocation31_spill] sm:$0xff] }
 0x230   : > { %10915 = vmatpush3.bf16.msra.mxu1 %v11719_v23  ;;  %10894 = vmatprep.subr.bf16.mxu0 %v11720_v52  ;;  %v14260_v50 = vadd.f32 %v13996_v45, %v17721_v25  ;;  %v11726_v23 = vld [vmem:[%s17416_s5 + $0x938] sm:$0xff]   ;;  %v17723_v52 = vld [vmem:[#allocation26_spill] sm:$0xff]  ;;  %v3010_v45 = vpack.c.bf16 %v14241_v44, %v14256_v61 }
 0x231   : > { %10916 = vmatprep.subr.bf16.mxu1 %v11721_v5  ;;  %v14269_v4 = vadd.f32 %v13923_v49, %v17723_v52  ;;  %v17725_v5 = vld [vmem:[#allocation27_spill] sm:$0xff] }
 0x232   : > { %17722 = vst [vmem:[#allocation31_spill] sm:$0xff] %v14260_v50 }
 0x233   : > { %10895 = vmatpush3.bf16.msra.mxu0 %v11722_v28  ;;  %17724 = vst [vmem:[#allocation26_spill] sm:$0xff] %v14269_v4  ;;  %v14278_v28 = vadd.f32 %v13931_v39, %v17725_v5 }
 0x234   : > { %10917 = vmatpush3.bf16.msra.mxu1 %v11723_v1  ;;  %10924 = vmatprep.subr.bf16.mxu0 %v11724_v8  ;;  %v3013_v1 = vpack.c.bf16 %v14252_v48, %v14269_v4  ;;  %v11729_v8 = vld [vmem:[%s17416_s5 + $0x9f0] sm:$0xff]  }
 0x235   : > { %17726 = vst [vmem:[#allocation27_spill] sm:$0xff] %v14278_v28  ;;  %10946 = vmatprep.subr.bf16.mxu1 %v11725_v60  ;;  %v3015_v39 = vpack.c.bf16 %v14260_v50, %v14278_v28  ;;  %v11730_v60 = vld [vmem:[%s17416_s5 + $0x930] sm:$0xff]  }
 0x236   : > { %v10632_v49 = vpop.f32.mrf.mxu0  ;;  %5745 = vmatmul.mubr.bf16.vlgmr.msra.gmra.mxu0 %v3008_v7  ;;  %v11733_v7 = vld [vmem:[%s17416_s5 + $0x9e8] sm:$0xff]  }
 0x237   : > { %v10654_v36 = vpop.f32.mrf.mxu1  ;;  %5786 = vmatmul.mubr.bf16.vlgmr.msra.gmra.mxu1 %v3010_v45  ;;  %10925 = vmatpush3.bf16.msra.mxu0 %v11726_v23 }
 0x238   : > { %5826 = vmatprep.mubr.bf16.mxu0 %v3013_v1  ;;  %10947 = vmatpush3.bf16.msra.mxu1 %v11727_v56  ;;  %v10633_v63 = vpop.f32.mrf.mxu0  ;;  %v11734_v1 = vld [vmem:[%s17416_s5 + $0x928] sm:$0xff]  }
 0x239   : > { %5867 = vmatprep.mubr.bf16.mxu1 %v3015_v39  ;;  %v10634_v25 = vadd.f32 %v10633_v63, %v10632_v49  ;;  %v10655_v23 = vpop.f32.mrf.mxu1  ;;  %10926 = vmatprep.subr.bf16.mxu0 %v11728_v10  ;;  %v11735_v10 = vld [vmem:[%s17416_s5 + $0x9a8] sm:$0xff]   ;;  %v11736_v49 = vld [vmem:[%s17416_s5 + $0x960] sm:$0xff]  }
 0x23a   : > { %v10656_v52 = vadd.f32 %v10655_v23, %v10654_v36  ;;  %v10635_v45 = vpop.f32.mrf.mxu0  ;;  %10948 = vmatprep.subr.bf16.mxu1 %v11729_v8  ;;  %v11740_v23 = vld [vmem:[%s17416_s5 + $0x958] sm:$0xff]  }
 0x23b   : > { %v5255_v56 = vadd.f32 %v10634_v25, %v14170_v3  ;;  %v10657_v5 = vpop.f32.mrf.mxu1  ;;  %10927 = vmatpush3.bf16.msra.mxu0 %v11730_v60  ;;  %v11737_v60 = vld [vmem:[%s17416_s5 + $0x9e0] sm:$0xff]  }
 0x23c   : > { %10949 = vmatpush3.bf16.msra.mxu1 %v11731_v6  ;;  %v10636_v39 = vpop.f32.mrf.mxu0  ;;  %10928 = vmatprep.subr.bf16.mxu0 %v11732_v59  ;;  %v11738_v59 = vld [vmem:[%s17416_s5 + $0x920] sm:$0xff]  }
 0x23d   : > { %v14312_v8 = vadd.f32 %v10656_v52, %v5255_v56  ;;  %v10637_v3 = vadd.f32 %v10636_v39, %v10635_v45  ;;  %v10658_v36 = vpop.f32.mrf.mxu1  ;;  %10950 = vmatprep.subr.bf16.mxu1 %v11733_v7  ;;  %v11739_v25 = vld [vmem:[%s17416_s5 + $0x9a0] sm:$0xff]   ;;  %v11742_v52 = vld [vmem:[%s17416_s5 + $0x918] sm:$0xff]   ;;  %v11744_v56 = vld [vmem:[%s17416_s5 + $0x950] sm:$0xff]  }
 0x23e   : > { %v10659_v6 = vadd.f32 %v10658_v36, %v10657_v5  ;;  %v11743_v45 = vld [vmem:[%s17416_s5 + $0x998] sm:$0xff]   ;;  %v11745_v5 = vld [vmem:[%s17416_s5 + $0x9d0] sm:$0xff]   ;;  %v11751_v36 = vld [vmem:[%s17416_s5 + $0x988] sm:$0xff]  }
 0x23f   : > { %v5258_v63 = vadd.f32 %v10637_v3, %v14185_v9  ;;  %10929 = vmatpush3.bf16.msra.mxu0 %v11734_v1  ;;  %v11741_v9 = vld [vmem:[%s17416_s5 + $0x9d8] sm:$0xff]   ;;  %v11746_v1 = vld [vmem:[%s17416_s5 + $0x910] sm:$0xff]   ;;  %v11750_v3 = vld [vmem:[%s17416_s5 + $0x908] sm:$0xff]  }
 0x240   : > { %10951 = vmatpush3.bf16.msra.mxu1 %v11735_v10  ;;  %10930 = vmatprep.subr.bf16.mxu0 %v11736_v49  ;;  %v11747_v39 = vld [vmem:[%s17416_s5 + $0x990] sm:$0xff]   ;;  %v11748_v10 = vld [vmem:[%s17416_s5 + $0x948] sm:$0xff]  }
 0x241   : > { %v14327_v7 = vadd.f32 %v10659_v6, %v5258_v63  ;;  %10952 = vmatprep.subr.bf16.mxu1 %v11737_v60  ;;  %v11749_v49 = vld [vmem:[%s17416_s5 + $0x9c8] sm:$0xff]   ;;  %v11752_v60 = vld [vmem:[%s17416_s5 + $0x940] sm:$0xff]  }
 0x242   : > { %v11753_v63 = vld [vmem:[%s17416_s5 + $0x9c0] sm:$0xff]  }
 0x243   : > { %10931 = vmatpush3.bf16.msra.mxu0 %v11738_v59  ;;  %v11754_v6 = vld [vmem:[%s17416_s5 + $0x900] sm:$0xff]   ;;  %v17727_v59 = vld [vmem:[#allocation28_spill] sm:$0xff] }
 0x244   : > { %10953 = vmatpush3.bf16.msra.mxu1 %v11739_v25  ;;  %10932 = vmatprep.subr.bf16.mxu0 %v11740_v23  ;;  %v14373_v25 = vadd.f32 %v13943_v37, %v17727_v59  ;;  %v11755_v23 = vld [vmem:[%s17416_s5 + $0x980] sm:$0xff]   ;;  %v17733_v37 = vld [vmem:[#allocation25_spill] sm:$0xff] }
 0x245   : > { %10954 = vmatprep.subr.bf16.mxu1 %v11741_v9  ;;  %v17729_v9 = vld [vmem:[#allocation29_spill] sm:$0xff] }
 0x246   : > { %17728 = vst [vmem:[#allocation28_spill] sm:$0xff] %v14373_v25  ;;  %v11922_v59 = vld [vmem:[%s17416_s5 + $0x38] sm:$0xff]  }
 0x247   : > { %10933 = vmatpush3.bf16.msra.mxu0 %v11742_v52  ;;  %v14380_v52 = vadd.f32 %v13955_v20, %v17729_v9  ;;  %v11923_v9 = vld [vmem:[%s17416_s5 + $0xb8] sm:$0xff]  }
 0x248   : > { %10955 = vmatpush3.bf16.msra.mxu1 %v11743_v45  ;;  %10934 = vmatprep.subr.bf16.mxu0 %v11744_v56  ;;  %v17731_v45 = vld [vmem:[#allocation24_spill] sm:$0xff] }
 0x249   : > { %10956 = vmatprep.subr.bf16.mxu1 %v11745_v5  ;;  %17730 = vst [vmem:[#allocation29_spill] sm:$0xff] %v14380_v52  ;;  %v14384_v56 = vadd.f32 %v13907_v19, %v17731_v45  ;;  %v3057_v5 = vmul.f32 %v13060_v17, %v13060_v17  ;;  %v11920_v19 = vld [vmem:[%s17416_s5 + $0x78] sm:$0xff]  }
 0x24b   : > { %10935 = vmatpush3.bf16.msra.mxu0 %v11746_v1  ;;  %17732 = vst [vmem:[#allocation24_spill] sm:$0xff] %v14384_v56  ;;  %v14390_v1 = vadd.f32 %v13915_v11, %v17733_v37  ;;  %v3019_v11 = vmul.f32 %v13069_v31, %v13069_v31 }
 0x24c   : > { %10957 = vmatpush3.bf16.msra.mxu1 %v11747_v39  ;;  %10936 = vmatprep.subr.bf16.mxu0 %v11748_v10  ;;  %v3059_v39 = vmul.f32 %v13072_v29, %v13072_v29  ;;  %v17735_v10 = vld [vmem:[#allocation33_spill] sm:$0xff]  ;;  %v17741_v29 = vld [vmem:[#allocation42_spill] sm:$0xff] }
 0x24d   : > { %10958 = vmatprep.subr.bf16.mxu1 %v11749_v49  ;;  %17734 = vst [vmem:[#allocation25_spill] sm:$0xff] %v14390_v1  ;;  %v3017_v20 = vmul.f32 %v17735_v10, %v17735_v10  ;;  %v3012_v49 = vpack.c.bf16 %v14373_v25, %v14384_v56 }
 0x24f   : > { %10937 = vmatpush3.bf16.msra.mxu0 %v11750_v3  ;;  %v3014_v3 = vpack.c.bf16 %v14380_v52, %v14390_v1 }
 0x250   : > { %10959 = vmatpush3.bf16.msra.mxu1 %v11751_v36  ;;  %10938 = vmatprep.subr.bf16.mxu0 %v11752_v60  ;;  %v11921_v36 = vld [vmem:[%s17416_s5 + $0xf8] sm:$0xff]  }
 0x251   : > { %10960 = vmatprep.subr.bf16.mxu1 %v11753_v63  ;;  %v3097_v63 = vpack.c.bf16 %v3057_v5, %v3017_v20  ;;  %v11924_v5 = vld [vmem:[%s17416_s5 + $0x70] sm:$0xff]  }
 0x253   : > { %10939 = vmatpush3.bf16.msra.mxu0 %v11754_v6 }
 0x254   : > { %10961 = vmatpush3.bf16.msra.mxu1 %v11755_v23  ;;  %10968 = vmatprep.subr.bf16.mxu0 %v11920_v19  ;;  %v3099_v23 = vpack.c.bf16 %v3059_v39, %v3019_v11  ;;  %v11925_v39 = vld [vmem:[%s17416_s5 + $0xf0] sm:$0xff]  }
 0x255   : > { %10990 = vmatprep.subr.bf16.mxu1 %v11921_v36  ;;  %v11926_v36 = vld [vmem:[%s17416_s5 + $0x30] sm:$0xff]  }
 0x256   : > { %v10676_v60 = vpop.f32.mrf.mxu0  ;;  %5827 = vmatmul.mubr.bf16.vlgmr.msra.gmra.mxu0 %v3012_v49 }
 0x257   : > { %v10698_v6 = vpop.f32.mrf.mxu1  ;;  %5868 = vmatmul.mubr.bf16.vlgmr.msra.gmra.mxu1 %v3014_v3  ;;  %10969 = vmatpush3.bf16.msra.mxu0 %v11922_v59 }
 0x258   : > { %5908 = vmatprep.mubr.bf16.mxu0 %v3097_v63  ;;  %10991 = vmatpush3.bf16.msra.mxu1 %v11923_v9  ;;  %v10677_v45 = vpop.f32.mrf.mxu0  ;;  %v11929_v9 = vld [vmem:[%s17416_s5 + $0xe8] sm:$0xff]  }
 0x259   : > { %5949 = vmatprep.mubr.bf16.mxu1 %v3099_v23  ;;  %v10678_v37 = vadd.f32 %v10677_v45, %v10676_v60  ;;  %v10699_v19 = vpop.f32.mrf.mxu1  ;;  %10970 = vmatprep.subr.bf16.mxu0 %v11924_v5  ;;  %v11927_v60 = vld [vmem:[%s17416_s5 + $0xb0] sm:$0xff]   ;;  %v11931_v5 = vld [vmem:[%s17416_s5 + $0xa8] sm:$0xff]  }
 0x25a   : > { %v10700_v20 = vadd.f32 %v10699_v19, %v10698_v6  ;;  %v10679_v49 = vpop.f32.mrf.mxu0  ;;  %10992 = vmatprep.subr.bf16.mxu1 %v11925_v39  ;;  %v11928_v6 = vld [vmem:[%s17416_s5 + $0x68] sm:$0xff]   ;;  %v11934_v39 = vld [vmem:[%s17416_s5 + $0x20] sm:$0xff]  }
 0x25b   : > { %v5337_v11 = vadd.f32 %v10678_v37, %v14312_v8  ;;  %v10701_v3 = vpop.f32.mrf.mxu1  ;;  %10971 = vmatpush3.bf16.msra.mxu0 %v11926_v36  ;;  %v11930_v19 = vld [vmem:[%s17416_s5 + $0x28] sm:$0xff]   ;;  %v11937_v36 = vld [vmem:[%s17416_s5 + $0xd8] sm:$0xff]  }
 0x25c   : > { %10993 = vmatpush3.bf16.msra.mxu1 %v11927_v60  ;;  %v10680_v63 = vpop.f32.mrf.mxu0  ;;  %10972 = vmatprep.subr.bf16.mxu0 %v11928_v6  ;;  %v11938_v60 = vld [vmem:[%s17416_s5 + $0x18] sm:$0xff]   ;;  %v11940_v6 = vld [vmem:[%s17416_s5 + $0x50] sm:$0xff]  }
 0x25d   : > { %v14430_v59 = vadd.f32 %v10700_v20, %v5337_v11  ;;  %v10681_v8 = vadd.f32 %v10680_v63, %v10679_v49  ;;  %v10702_v23 = vpop.f32.mrf.mxu1  ;;  %10994 = vmatprep.subr.bf16.mxu1 %v11929_v9  ;;  %v11932_v20 = vld [vmem:[%s17416_s5 + $0x60] sm:$0xff]   ;;  %v11939_v63 = vld [vmem:[%s17416_s5 + $0x98] sm:$0xff]   ;;  %v11943_v9 = vld [vmem:[%s17416_s5 + $0x90] sm:$0xff]  }
 0x25e   : > { %v10703_v37 = vadd.f32 %v10702_v23, %v10701_v3  ;;  %v11935_v11 = vld [vmem:[%s17416_s5 + $0xa0] sm:$0xff]   ;;  %v11936_v3 = vld [vmem:[%s17416_s5 + $0x58] sm:$0xff]   ;;  %v11942_v23 = vld [vmem:[%s17416_s5 + $0x10] sm:$0xff]  }
 0x25f   : > { %v5340_v45 = vadd.f32 %v10681_v8, %v14327_v7  ;;  %10973 = vmatpush3.bf16.msra.mxu0 %v11930_v19  ;;  %v11933_v7 = vld [vmem:[%s17416_s5 + $0xe0] sm:$0xff]   ;;  %v11941_v8 = vld [vmem:[%s17416_s5 + $0xd0] sm:$0xff]   ;;  %v11946_v19 = vld [vmem:[%s17416_s5 + $0x8] sm:$0xff]  }
 0x260   : > { %10995 = vmatpush3.bf16.msra.mxu1 %v11931_v5  ;;  %10974 = vmatprep.subr.bf16.mxu0 %v11932_v20  ;;  %v17736_v5 = vld [vmem:[#allocation32_spill] sm:$0xff] }
 0x261   : > { %v14445_v49 = vadd.f32 %v10703_v37, %v5340_v45  ;;  %10996 = vmatprep.subr.bf16.mxu1 %v11933_v7  ;;  %v11944_v45 = vld [vmem:[%s17416_s5 + $0x48] sm:$0xff]   ;;  %v3056_v20 = vmul.f32 %v17736_v5, %v17736_v5 }
 0x262   : > { %v11945_v37 = vld [vmem:[%s17416_s5 + $0xc8] sm:$0xff]  }
 0x263   : > { %10975 = vmatpush3.bf16.msra.mxu0 %v11934_v39  ;;  %v11947_v7 = vld [vmem:[%s17416_s5 + $0x88] sm:$0xff]   ;;  %v11948_v39 = vld [vmem:[%s17416_s5 + $0x40] sm:$0xff]  }
 0x264   : > { %10997 = vmatpush3.bf16.msra.mxu1 %v11935_v11  ;;  %10976 = vmatprep.subr.bf16.mxu0 %v11936_v3  ;;  %v17737_v11 = vld [vmem:[#allocation34_spill] sm:$0xff] }
 0x265   : > { %10998 = vmatprep.subr.bf16.mxu1 %v11937_v36  ;;  %v3058_v3 = vmul.f32 %v17737_v11, %v17737_v11  ;;  %v11949_v36 = vld [vmem:[%s17416_s5 + $0xc0] sm:$0xff]  }
 0x267   : > { %10977 = vmatpush3.bf16.msra.mxu0 %v11938_v60  ;;  %v17738_v60 = vld [vmem:[#allocation36_spill] sm:$0xff] }
 0x268   : > { %10999 = vmatpush3.bf16.msra.mxu1 %v11939_v63  ;;  %10978 = vmatprep.subr.bf16.mxu0 %v11940_v6  ;;  %v3016_v63 = vmul.f32 %v17738_v60, %v17738_v60  ;;  %v3061_v6 = vmul.f32 %v13115_v33, %v13115_v33 }
 0x269   : > { %11000 = vmatprep.subr.bf16.mxu1 %v11941_v8  ;;  %v17739_v8 = vld [vmem:[#allocation39_spill] sm:$0xff] }
 0x26b   : > { %10979 = vmatpush3.bf16.msra.mxu0 %v11942_v23  ;;  %v3018_v23 = vmul.f32 %v17739_v8, %v17739_v8 }
 0x26c   : > { %11001 = vmatpush3.bf16.msra.mxu1 %v11943_v9  ;;  %10980 = vmatprep.subr.bf16.mxu0 %v11944_v45  ;;  %v11950_v9 = vld [vmem:[%s17416_s5] sm:$0xff]   ;;  %v3063_v45 = vmul.f32 %v13124_v26, %v13124_v26 }
 0x26d   : > { %11002 = vmatprep.subr.bf16.mxu1 %v11945_v37  ;;  %v3096_v37 = vpack.c.bf16 %v3056_v20, %v3016_v63  ;;  %v3098_v33 = vpack.c.bf16 %v3058_v3, %v3018_v23  ;;  %v11953_v20 = vld [vmem:[%s17416_s5 + $0x1f8] sm:$0xff]  }
 0x26e   : > { %v11955_v3 = vld [vmem:[%s17416_s5 + $0x1b8] sm:$0xff]  }
 0x26f   : > { %10981 = vmatpush3.bf16.msra.mxu0 %v11946_v19  ;;  %v17740_v19 = vld [vmem:[#allocation40_spill] sm:$0xff] }
 0x270   : > { %11003 = vmatpush3.bf16.msra.mxu1 %v11947_v7  ;;  %10982 = vmatprep.subr.bf16.mxu0 %v11948_v39  ;;  %v3021_v7 = vmul.f32 %v17740_v19, %v17740_v19  ;;  %v11951_v39 = vld [vmem:[%s17416_s5 + $0x80] sm:$0xff]  }
 0x271   : > { %11004 = vmatprep.subr.bf16.mxu1 %v11949_v36  ;;  %v11952_v36 = vld [vmem:[%s17416_s5 + $0x178] sm:$0xff]  }
 0x272   : > { %v3101_v26 = vpack.c.bf16 %v3061_v6, %v3021_v7 }
 0x273   : > { %10983 = vmatpush3.bf16.msra.mxu0 %v11950_v9  ;;  %v3023_v9 = vmul.f32 %v17741_v29, %v17741_v29 }
 0x274   : > { %11005 = vmatpush3.bf16.msra.mxu1 %v11951_v39  ;;  %11012 = vmatprep.subr.bf16.mxu0 %v11952_v36  ;;  %v11954_v39 = vld [vmem:[%s17416_s5 + $0x138] sm:$0xff]  }
 0x275   : > { %11034 = vmatprep.subr.bf16.mxu1 %v11953_v20  ;;  %v3103_v36 = vpack.c.bf16 %v3063_v45, %v3023_v9  ;;  %v11958_v9 = vld [vmem:[%s17416_s5 + $0x130] sm:$0xff]  }
 0x276   : > { %v10720_v63 = vpop.f32.mrf.mxu0  ;;  %5909 = vmatmul.mubr.bf16.vlgmr.msra.gmra.mxu0 %v3096_v37 }
 0x277   : > { %v10742_v19 = vpop.f32.mrf.mxu1  ;;  %5950 = vmatmul.mubr.bf16.vlgmr.msra.gmra.mxu1 %v3098_v33  ;;  %11013 = vmatpush3.bf16.msra.mxu0 %v11954_v39  ;;  %v11956_v33 = vld [vmem:[%s17416_s5 + $0x170] sm:$0xff]  }
 0x278   : > { %5990 = vmatprep.mubr.bf16.mxu0 %v3101_v26  ;;  %11035 = vmatpush3.bf16.msra.mxu1 %v11955_v3  ;;  %v10721_v23 = vpop.f32.mrf.mxu0  ;;  %v11957_v26 = vld [vmem:[%s17416_s5 + $0x1f0] sm:$0xff]   ;;  %v11961_v3 = vld [vmem:[%s17416_s5 + $0x1e8] sm:$0xff]  }
 0x279   : > { %6031 = vmatprep.mubr.bf16.mxu1 %v3103_v36  ;;  %v10722_v20 = vadd.f32 %v10721_v23, %v10720_v63  ;;  %v10743_v29 = vpop.f32.mrf.mxu1  ;;  %11014 = vmatprep.subr.bf16.mxu0 %v11956_v33  ;;  %v11959_v63 = vld [vmem:[%s17416_s5 + $0x1b0] sm:$0xff]   ;;  %v11962_v33 = vld [vmem:[%s17416_s5 + $0x128] sm:$0xff]  }
 0x27a   : > { %v10744_v6 = vadd.f32 %v10743_v29, %v10742_v19  ;;  %v10723_v37 = vpop.f32.mrf.mxu0  ;;  %11036 = vmatprep.subr.bf16.mxu1 %v11957_v26  ;;  %v11960_v19 = vld [vmem:[%s17416_s5 + $0x168] sm:$0xff]  }
 0x27b   : > { %v5419_v45 = vadd.f32 %v10722_v20, %v14430_v59  ;;  %v10745_v7 = vpop.f32.mrf.mxu1  ;;  %11015 = vmatpush3.bf16.msra.mxu0 %v11958_v9  ;;  %v11968_v9 = vld [vmem:[%s17416_s5 + $0x158] sm:$0xff]  }
 0x27c   : > { %11037 = vmatpush3.bf16.msra.mxu1 %v11959_v63  ;;  %v10724_v29 = vpop.f32.mrf.mxu0  ;;  %11016 = vmatprep.subr.bf16.mxu0 %v11960_v19  ;;  %v11969_v63 = vld [vmem:[%s17416_s5 + $0x1d8] sm:$0xff]  }
 0x27d   : > { %v14548_v39 = vadd.f32 %v10744_v6, %v5419_v45  ;;  %v10725_v59 = vadd.f32 %v10724_v29, %v10723_v37  ;;  %v10746_v36 = vpop.f32.mrf.mxu1  ;;  %11038 = vmatprep.subr.bf16.mxu1 %v11961_v3  ;;  %v11963_v6 = vld [vmem:[%s17416_s5 + $0x1a8] sm:$0xff]   ;;  %v11964_v37 = vld [vmem:[%s17416_s5 + $0x160] sm:$0xff]   ;;  %v11970_v29 = vld [vmem:[%s17416_s5 + $0x118] sm:$0xff]  }
 0x27e   : > { %v10747_v20 = vadd.f32 %v10746_v36, %v10745_v7  ;;  %v11966_v45 = vld [vmem:[%s17416_s5 + $0x120] sm:$0xff]   ;;  %v11971_v19 = vld [vmem:[%s17416_s5 + $0x198] sm:$0xff]   ;;  %v11973_v36 = vld [vmem:[%s17416_s5 + $0x1d0] sm:$0xff]  }
 0x27f   : > { %v5422_v23 = vadd.f32 %v10725_v59, %v14445_v49  ;;  %11017 = vmatpush3.bf16.msra.mxu0 %v11962_v33  ;;  %v11965_v49 = vld [vmem:[%s17416_s5 + $0x1e0] sm:$0xff]   ;;  %v11972_v59 = vld [vmem:[%s17416_s5 + $0x150] sm:$0xff]   ;;  %v11977_v33 = vld [vmem:[%s17416_s5 + $0x1c8] sm:$0xff]  }
 0x280   : > { %11039 = vmatpush3.bf16.msra.mxu1 %v11963_v6  ;;  %11018 = vmatprep.subr.bf16.mxu0 %v11964_v37  ;;  %v11967_v7 = vld [vmem:[%s17416_s5 + $0x1a0] sm:$0xff]   ;;  %v11974_v3 = vld [vmem:[%s17416_s5 + $0x110] sm:$0xff]   ;;  %v11978_v6 = vld [vmem:[%s17416_s5 + $0x108] sm:$0xff]   ;;  %v3060_v37 = vmul.f32 %v13206_v12, %v13206_v12 }
 0x281   : > { %v14563_v26 = vadd.f32 %v10747_v20, %v5422_v23  ;;  %11040 = vmatprep.subr.bf16.mxu1 %v11965_v49  ;;  %v11975_v23 = vld [vmem:[%s17416_s5 + $0x190] sm:$0xff]   ;;  %v11976_v20 = vld [vmem:[%s17416_s5 + $0x148] sm:$0xff]  }
 0x282   : > { %v11979_v49 = vld [vmem:[%s17416_s5 + $0x188] sm:$0xff]  }
 0x283   : > { %11019 = vmatpush3.bf16.msra.mxu0 %v11966_v45  ;;  %v11980_v45 = vld [vmem:[%s17416_s5 + $0x140] sm:$0xff]  }
 0x284   : > { %11041 = vmatpush3.bf16.msra.mxu1 %v11967_v7  ;;  %11020 = vmatprep.subr.bf16.mxu0 %v11968_v9  ;;  %v3062_v7 = vmul.f32 %v13216_v14, %v13216_v14  ;;  %v11981_v9 = vld [vmem:[%s17416_s5 + $0x1c0] sm:$0xff]  }
 0x285   : > { %11042 = vmatprep.subr.bf16.mxu1 %v11969_v63  ;;  %v3020_v63 = vmul.f32 %v13223_v24, %v13223_v24 }
 0x287   : > { %11021 = vmatpush3.bf16.msra.mxu0 %v11970_v29  ;;  %v3065_v29 = vmul.f32 %v13226_v22, %v13226_v22 }
 0x288   : > { %11043 = vmatpush3.bf16.msra.mxu1 %v11971_v19  ;;  %11022 = vmatprep.subr.bf16.mxu0 %v11972_v59  ;;  %v3022_v19 = vmul.f32 %v13233_v40, %v13233_v40  ;;  %v11982_v59 = vld [vmem:[%s17416_s5 + $0x100] sm:$0xff]  }
 0x289   : > { %11044 = vmatprep.subr.bf16.mxu1 %v11973_v36  ;;  %v3067_v36 = vmul.f32 %v13236_v13, %v13236_v13 }
 0x28b   : > { %11023 = vmatpush3.bf16.msra.mxu0 %v11974_v3  ;;  %v3100_v3 = vpack.c.bf16 %v3060_v37, %v3020_v63  ;;  %v11985_v37 = vld [vmem:[%s17416_s5 + $0x2f8] sm:$0xff]  }
 0x28c   : > { %11045 = vmatpush3.bf16.msra.mxu1 %v11975_v23  ;;  %11024 = vmatprep.subr.bf16.mxu0 %v11976_v20  ;;  %v3025_v23 = vmul.f32 %v13244_v15, %v13244_v15  ;;  %v11983_v20 = vld [vmem:[%s17416_s5 + $0x180] sm:$0xff]  }
 0x28d   : > { %11046 = vmatprep.subr.bf16.mxu1 %v11977_v33  ;;  %v11984_v33 = vld [vmem:[%s17416_s5 + $0x278] sm:$0xff]  }
 0x28f   : > { %11025 = vmatpush3.bf16.msra.mxu0 %v11978_v6  ;;  %v3102_v6 = vpack.c.bf16 %v3062_v7, %v3022_v19  ;;  %v11987_v7 = vld [vmem:[%s17416_s5 + $0x2b8] sm:$0xff]  }
 0x290   : > { %11047 = vmatpush3.bf16.msra.mxu1 %v11979_v49  ;;  %11026 = vmatprep.subr.bf16.mxu0 %v11980_v45  ;;  %v3027_v49 = vmul.f32 %v13249_v27, %v13249_v27 }
 0x291   : > { %11048 = vmatprep.subr.bf16.mxu1 %v11981_v9  ;;  %v3105_v9 = vpack.c.bf16 %v3065_v29, %v3025_v23  ;;  %v11988_v29 = vld [vmem:[%s17416_s5 + $0x270] sm:$0xff]  }
 0x293   : > { %11027 = vmatpush3.bf16.msra.mxu0 %v11982_v59  ;;  %v11986_v59 = vld [vmem:[%s17416_s5 + $0x238] sm:$0xff]  }
 0x294   : > { %11049 = vmatpush3.bf16.msra.mxu1 %v11983_v20  ;;  %11056 = vmatprep.subr.bf16.mxu0 %v11984_v33  ;;  %v3107_v20 = vpack.c.bf16 %v3067_v36, %v3027_v49  ;;  %v11989_v36 = vld [vmem:[%s17416_s5 + $0x2f0] sm:$0xff]  }
 0x295   : > { %11078 = vmatprep.subr.bf16.mxu1 %v11985_v37 }
 0x296   : > { %v10764_v45 = vpop.f32.mrf.mxu0  ;;  %5991 = vmatmul.mubr.bf16.vlgmr.msra.gmra.mxu0 %v3100_v3 }
 0x297   : > { %v10786_v63 = vpop.f32.mrf.mxu1  ;;  %6032 = vmatmul.mubr.bf16.vlgmr.msra.gmra.mxu1 %v3102_v6  ;;  %11057 = vmatpush3.bf16.msra.mxu0 %v11986_v59  ;;  %v11992_v59 = vld [vmem:[%s17416_s5 + $0x268] sm:$0xff]  }
 0x298   : > { %6072 = vmatprep.mubr.bf16.mxu0 %v3105_v9  ;;  %11079 = vmatpush3.bf16.msra.mxu1 %v11987_v7  ;;  %v10765_v19 = vpop.f32.mrf.mxu0  ;;  %v11991_v9 = vld [vmem:[%s17416_s5 + $0x2b0] sm:$0xff]  }
 0x299   : > { %6113 = vmatprep.mubr.bf16.mxu1 %v3107_v20  ;;  %v10766_v33 = vadd.f32 %v10765_v19, %v10764_v45  ;;  %v10787_v37 = vpop.f32.mrf.mxu1  ;;  %11058 = vmatprep.subr.bf16.mxu0 %v11988_v29  ;;  %v11990_v45 = vld [vmem:[%s17416_s5 + $0x230] sm:$0xff]   ;;  %v11993_v19 = vld [vmem:[%s17416_s5 + $0x2e8] sm:$0xff]  }
 0x29a   : > { %v10788_v3 = vadd.f32 %v10787_v37, %v10786_v63  ;;  %v10767_v23 = vpop.f32.mrf.mxu0  ;;  %11080 = vmatprep.subr.bf16.mxu1 %v11989_v36  ;;  %v11994_v29 = vld [vmem:[%s17416_s5 + $0x228] sm:$0xff]  }
 0x29b   : > { %v5501_v6 = vadd.f32 %v10766_v33, %v14548_v39  ;;  %v10789_v49 = vpop.f32.mrf.mxu1  ;;  %11059 = vmatpush3.bf16.msra.mxu0 %v11990_v45  ;;  %v12000_v45 = vld [vmem:[%s17416_s5 + $0x258] sm:$0xff]  }
 0x29c   : > { %11081 = vmatpush3.bf16.msra.mxu1 %v11991_v9  ;;  %v10768_v63 = vpop.f32.mrf.mxu0  ;;  %11060 = vmatprep.subr.bf16.mxu0 %v11992_v59  ;;  %v12001_v9 = vld [vmem:[%s17416_s5 + $0x2d8] sm:$0xff]  }
 0x29d   : > { %v14666_v20 = vadd.f32 %v10788_v3, %v5501_v6  ;;  %v10769_v39 = vadd.f32 %v10768_v63, %v10767_v23  ;;  %v10790_v7 = vpop.f32.mrf.mxu1  ;;  %11082 = vmatprep.subr.bf16.mxu1 %v11993_v19  ;;  %v11995_v3 = vld [vmem:[%s17416_s5 + $0x2a8] sm:$0xff]   ;;  %v11996_v23 = vld [vmem:[%s17416_s5 + $0x260] sm:$0xff]   ;;  %v12002_v63 = vld [vmem:[%s17416_s5 + $0x218] sm:$0xff]  }
 0x29e   : > { %v10791_v37 = vadd.f32 %v10790_v7, %v10789_v49  ;;  %v11998_v6 = vld [vmem:[%s17416_s5 + $0x220] sm:$0xff]   ;;  %v12003_v59 = vld [vmem:[%s17416_s5 + $0x298] sm:$0xff]   ;;  %v12005_v7 = vld [vmem:[%s17416_s5 + $0x2d0] sm:$0xff]  }
 0x29f   : > { %v5504_v33 = vadd.f32 %v10769_v39, %v14563_v26  ;;  %11061 = vmatpush3.bf16.msra.mxu0 %v11994_v29  ;;  %v11997_v26 = vld [vmem:[%s17416_s5 + $0x2e0] sm:$0xff]   ;;  %v12004_v39 = vld [vmem:[%s17416_s5 + $0x250] sm:$0xff]   ;;  %v12009_v29 = vld [vmem:[%s17416_s5 + $0x2c8] sm:$0xff]  }
 0x2a0   : > { %11083 = vmatpush3.bf16.msra.mxu1 %v11995_v3  ;;  %11062 = vmatprep.subr.bf16.mxu0 %v11996_v23  ;;  %v11999_v49 = vld [vmem:[%s17416_s5 + $0x2a0] sm:$0xff]   ;;  %v12006_v19 = vld [vmem:[%s17416_s5 + $0x210] sm:$0xff]   ;;  %v12010_v3 = vld [vmem:[%s17416_s5 + $0x208] sm:$0xff]   ;;  %v3064_v23 = vmul.f32 %v13343_v0, %v13343_v0 }
 0x2a1   : > { %v14681_v36 = vadd.f32 %v10791_v37, %v5504_v33  ;;  %11084 = vmatprep.subr.bf16.mxu1 %v11997_v26  ;;  %v12007_v33 = vld [vmem:[%s17416_s5 + $0x290] sm:$0xff]   ;;  %v12008_v37 = vld [vmem:[%s17416_s5 + $0x248] sm:$0xff]  }
 0x2a2   : > { %v12011_v26 = vld [vmem:[%s17416_s5 + $0x288] sm:$0xff]  }
 0x2a3   : > { %11063 = vmatpush3.bf16.msra.mxu0 %v11998_v6  ;;  %v12012_v6 = vld [vmem:[%s17416_s5 + $0x240] sm:$0xff]  }
 0x2a4   : > { %11085 = vmatpush3.bf16.msra.mxu1 %v11999_v49  ;;  %11064 = vmatprep.subr.bf16.mxu0 %v12000_v45  ;;  %v3066_v49 = vmul.f32 %v13353_v41, %v13353_v41  ;;  %v12013_v45 = vld [vmem:[%s17416_s5 + $0x2c0] sm:$0xff]  }
 0x2a5   : > { %11086 = vmatprep.subr.bf16.mxu1 %v12001_v9  ;;  %v3024_v9 = vmul.f32 %v13360_v34, %v13360_v34 }
 0x2a7   : > { %11065 = vmatpush3.bf16.msra.mxu0 %v12002_v63  ;;  %v3069_v63 = vmul.f32 %v13363_v32, %v13363_v32 }
 0x2a8   : > { %11087 = vmatpush3.bf16.msra.mxu1 %v12003_v59  ;;  %11066 = vmatprep.subr.bf16.mxu0 %v12004_v39  ;;  %v3026_v59 = vmul.f32 %v13367_v30, %v13367_v30  ;;  %v12014_v39 = vld [vmem:[%s17416_s5 + $0x200] sm:$0xff]  }
 0x2a9   : > { %11088 = vmatprep.subr.bf16.mxu1 %v12005_v7  ;;  %v3071_v7 = vmul.f32 %v13370_v35, %v13370_v35  ;;  %v6773_v35 = vld [vmem:[%s17417_s6 + $0x1f8] sm:$0xff] }
 0x2ab   : > { %11067 = vmatpush3.bf16.msra.mxu0 %v12006_v19  ;;  %v3104_v19 = vpack.c.bf16 %v3064_v23, %v3024_v9  ;;  %v12017_v23 = vld [vmem:[%s17416_s5 + $0x3f8] sm:$0xff]  }
 0x2ac   : > { %11089 = vmatpush3.bf16.msra.mxu1 %v12007_v33  ;;  %11068 = vmatprep.subr.bf16.mxu0 %v12008_v37  ;;  %v3029_v33 = vmul.f32 %v13378_v43, %v13378_v43  ;;  %v12015_v37 = vld [vmem:[%s17416_s5 + $0x280] sm:$0xff]  }
 0x2ad   : > { %11090 = vmatprep.subr.bf16.mxu1 %v12009_v29  ;;  %v12016_v29 = vld [vmem:[%s17416_s5 + $0x378] sm:$0xff]  }
 0x2af   : > { %11069 = vmatpush3.bf16.msra.mxu0 %v12010_v3  ;;  %v3106_v3 = vpack.c.bf16 %v3066_v49, %v3026_v59  ;;  %v12019_v49 = vld [vmem:[%s17416_s5 + $0x3b8] sm:$0xff]  }
 0x2b0   : > { %11091 = vmatpush3.bf16.msra.mxu1 %v12011_v26  ;;  %11070 = vmatprep.subr.bf16.mxu0 %v12012_v6  ;;  %v3031_v26 = vmul.f32 %v13386_v58, %v13386_v58 }
 0x2b1   : > { %11092 = vmatprep.subr.bf16.mxu1 %v12013_v45  ;;  %v3109_v45 = vpack.c.bf16 %v3069_v63, %v3029_v33  ;;  %v12020_v63 = vld [vmem:[%s17416_s5 + $0x370] sm:$0xff]  }
 0x2b3   : > { %11071 = vmatpush3.bf16.msra.mxu0 %v12014_v39  ;;  %v12018_v39 = vld [vmem:[%s17416_s5 + $0x338] sm:$0xff]  }
 0x2b4   : > { %11093 = vmatpush3.bf16.msra.mxu1 %v12015_v37  ;;  %11100 = vmatprep.subr.bf16.mxu0 %v12016_v29  ;;  %v3111_v37 = vpack.c.bf16 %v3071_v7, %v3031_v26  ;;  %v12021_v7 = vld [vmem:[%s17416_s5 + $0x3f0] sm:$0xff]  }
 0x2b5   : > { %11122 = vmatprep.subr.bf16.mxu1 %v12017_v23 }
 0x2b6   : > { %v10808_v6 = vpop.f32.mrf.mxu0  ;;  %6073 = vmatmul.mubr.bf16.vlgmr.msra.gmra.mxu0 %v3104_v19 }
 0x2b7   : > { %v10830_v9 = vpop.f32.mrf.mxu1  ;;  %6114 = vmatmul.mubr.bf16.vlgmr.msra.gmra.mxu1 %v3106_v3  ;;  %11101 = vmatpush3.bf16.msra.mxu0 %v12018_v39  ;;  %v12024_v39 = vld [vmem:[%s17416_s5 + $0x368] sm:$0xff]  }
 0x2b8   : > { %6154 = vmatprep.mubr.bf16.mxu0 %v3109_v45  ;;  %11123 = vmatpush3.bf16.msra.mxu1 %v12019_v49  ;;  %v10809_v59 = vpop.f32.mrf.mxu0  ;;  %v12023_v45 = vld [vmem:[%s17416_s5 + $0x3b0] sm:$0xff]  }
 0x2b9   : > { %6195 = vmatprep.mubr.bf16.mxu1 %v3111_v37  ;;  %v10810_v29 = vadd.f32 %v10809_v59, %v10808_v6  ;;  %v10831_v23 = vpop.f32.mrf.mxu1  ;;  %11102 = vmatprep.subr.bf16.mxu0 %v12020_v63  ;;  %v12022_v6 = vld [vmem:[%s17416_s5 + $0x330] sm:$0xff]   ;;  %v12025_v59 = vld [vmem:[%s17416_s5 + $0x3e8] sm:$0xff]  }
 0x2ba   : > { %v10832_v19 = vadd.f32 %v10831_v23, %v10830_v9  ;;  %v10811_v33 = vpop.f32.mrf.mxu0  ;;  %11124 = vmatprep.subr.bf16.mxu1 %v12021_v7  ;;  %v12026_v63 = vld [vmem:[%s17416_s5 + $0x328] sm:$0xff]  }
 0x2bb   : > { %v5583_v3 = vadd.f32 %v10810_v29, %v14666_v20  ;;  %v10833_v26 = vpop.f32.mrf.mxu1  ;;  %11103 = vmatpush3.bf16.msra.mxu0 %v12022_v6  ;;  %v12032_v6 = vld [vmem:[%s17416_s5 + $0x358] sm:$0xff]  }
 0x2bc   : > { %11125 = vmatpush3.bf16.msra.mxu1 %v12023_v45  ;;  %v10812_v9 = vpop.f32.mrf.mxu0  ;;  %11104 = vmatprep.subr.bf16.mxu0 %v12024_v39  ;;  %v12033_v45 = vld [vmem:[%s17416_s5 + $0x3d8] sm:$0xff]  }
 0x2bd   : > { %v14784_v37 = vadd.f32 %v10832_v19, %v5583_v3  ;;  %v10813_v20 = vadd.f32 %v10812_v9, %v10811_v33  ;;  %v10834_v49 = vpop.f32.mrf.mxu1  ;;  %11126 = vmatprep.subr.bf16.mxu1 %v12025_v59  ;;  %v12027_v19 = vld [vmem:[%s17416_s5 + $0x3a8] sm:$0xff]   ;;  %v12028_v33 = vld [vmem:[%s17416_s5 + $0x360] sm:$0xff]   ;;  %v12034_v9 = vld [vmem:[%s17416_s5 + $0x318] sm:$0xff]  }
 0x2be   : > { %v10835_v23 = vadd.f32 %v10834_v49, %v10833_v26  ;;  %v12030_v3 = vld [vmem:[%s17416_s5 + $0x320] sm:$0xff]   ;;  %v12035_v39 = vld [vmem:[%s17416_s5 + $0x398] sm:$0xff]   ;;  %v12037_v49 = vld [vmem:[%s17416_s5 + $0x3d0] sm:$0xff]  }
 0x2bf   : > { %v5586_v29 = vadd.f32 %v10813_v20, %v14681_v36  ;;  %11105 = vmatpush3.bf16.msra.mxu0 %v12026_v63  ;;  %v12029_v36 = vld [vmem:[%s17416_s5 + $0x3e0] sm:$0xff]   ;;  %v12036_v20 = vld [vmem:[%s17416_s5 + $0x350] sm:$0xff]   ;;  %v12041_v63 = vld [vmem:[%s17416_s5 + $0x3c8] sm:$0xff]  }
 0x2c0   : > { %11127 = vmatpush3.bf16.msra.mxu1 %v12027_v19  ;;  %11106 = vmatprep.subr.bf16.mxu0 %v12028_v33  ;;  %v12031_v26 = vld [vmem:[%s17416_s5 + $0x3a0] sm:$0xff]   ;;  %v12038_v59 = vld [vmem:[%s17416_s5 + $0x310] sm:$0xff]   ;;  %v12042_v19 = vld [vmem:[%s17416_s5 + $0x308] sm:$0xff]   ;;  %v3068_v33 = vmul.f32 %v13483_v54, %v13483_v54 }
 0x2c1   : > { %v14799_v7 = vadd.f32 %v10835_v23, %v5586_v29  ;;  %11128 = vmatprep.subr.bf16.mxu1 %v12029_v36  ;;  %v12039_v29 = vld [vmem:[%s17416_s5 + $0x390] sm:$0xff]   ;;  %v12040_v23 = vld [vmem:[%s17416_s5 + $0x348] sm:$0xff]  }
 0x2c2   : > { %v12043_v36 = vld [vmem:[%s17416_s5 + $0x388] sm:$0xff]  }
 0x2c3   : > { %11107 = vmatpush3.bf16.msra.mxu0 %v12030_v3  ;;  %v12044_v3 = vld [vmem:[%s17416_s5 + $0x340] sm:$0xff]  }
 0x2c4   : > { %11129 = vmatpush3.bf16.msra.mxu1 %v12031_v26  ;;  %11108 = vmatprep.subr.bf16.mxu0 %v12032_v6  ;;  %v3070_v26 = vmul.f32 %v13493_v21, %v13493_v21  ;;  %v12045_v6 = vld [vmem:[%s17416_s5 + $0x3c0] sm:$0xff]  }
 0x2c5   : > { %11130 = vmatprep.subr.bf16.mxu1 %v12033_v45  ;;  %v3028_v45 = vmul.f32 %v13500_v38, %v13500_v38 }
 0x2c7   : > { %11109 = vmatpush3.bf16.msra.mxu0 %v12034_v9  ;;  %v3073_v9 = vmul.f32 %v13503_v47, %v13503_v47  ;;  %v17745_v47 = vld [vmem:[#allocation67_spill] sm:$0xff] }
 0x2c8   : > { %11131 = vmatpush3.bf16.msra.mxu1 %v12035_v39  ;;  %11110 = vmatprep.subr.bf16.mxu0 %v12036_v20  ;;  %v17742_v39 = vld [vmem:[#allocation64_spill] sm:$0xff] }
 0x2c9   : > { %11132 = vmatprep.subr.bf16.mxu1 %v12037_v49  ;;  %v3030_v20 = vmul.f32 %v17742_v39, %v17742_v39  ;;  %v12046_v49 = vld [vmem:[%s17416_s5 + $0x300] sm:$0xff]  }
 0x2cb   : > { %11111 = vmatpush3.bf16.msra.mxu0 %v12038_v59  ;;  %v17743_v59 = vld [vmem:[#allocation65_spill] sm:$0xff] }
 0x2cc   : > { %11133 = vmatpush3.bf16.msra.mxu1 %v12039_v29  ;;  %11112 = vmatprep.subr.bf16.mxu0 %v12040_v23  ;;  %v3075_v29 = vmul.f32 %v17743_v59, %v17743_v59  ;;  %v3108_v23 = vpack.c.bf16 %v3068_v33, %v3028_v45  ;;  %v12049_v33 = vld [vmem:[%s17416_s5 + $0x4f8] sm:$0xff]  }
 0x2cd   : > { %11134 = vmatprep.subr.bf16.mxu1 %v12041_v63  ;;  %v17744_v63 = vld [vmem:[#allocation66_spill] sm:$0xff] }
 0x2cf   : > { %11113 = vmatpush3.bf16.msra.mxu0 %v12042_v19  ;;  %v3033_v19 = vmul.f32 %v17744_v63, %v17744_v63 }
 0x2d0   : > { %11135 = vmatpush3.bf16.msra.mxu1 %v12043_v36  ;;  %11114 = vmatprep.subr.bf16.mxu0 %v12044_v3  ;;  %v12047_v36 = vld [vmem:[%s17416_s5 + $0x380] sm:$0xff]   ;;  %v12048_v3 = vld [vmem:[%s17416_s5 + $0x478] sm:$0xff]  }
 0x2d1   : > { %11136 = vmatprep.subr.bf16.mxu1 %v12045_v6  ;;  %v3110_v6 = vpack.c.bf16 %v3070_v26, %v3030_v20  ;;  %v3113_v59 = vpack.c.bf16 %v3073_v9, %v3033_v19  ;;  %v12051_v26 = vld [vmem:[%s17416_s5 + $0x4b8] sm:$0xff]   ;;  %v12052_v9 = vld [vmem:[%s17416_s5 + $0x470] sm:$0xff]  }
 0x2d3   : > { %11115 = vmatpush3.bf16.msra.mxu0 %v12046_v49  ;;  %v3035_v49 = vmul.f32 %v17745_v47, %v17745_v47 }
 0x2d4   : > { %11137 = vmatpush3.bf16.msra.mxu1 %v12047_v36  ;;  %11144 = vmatprep.subr.bf16.mxu0 %v12048_v3  ;;  %v12050_v36 = vld [vmem:[%s17416_s5 + $0x438] sm:$0xff]  }
 0x2d5   : > { %11166 = vmatprep.subr.bf16.mxu1 %v12049_v33  ;;  %v3115_v3 = vpack.c.bf16 %v3075_v29, %v3035_v49  ;;  %v12054_v49 = vld [vmem:[%s17416_s5 + $0x430] sm:$0xff]  }
 0x2d6   : > { %v10852_v45 = vpop.f32.mrf.mxu0  ;;  %6155 = vmatmul.mubr.bf16.vlgmr.msra.gmra.mxu0 %v3108_v23 }
 0x2d7   : > { %v10874_v63 = vpop.f32.mrf.mxu1  ;;  %6196 = vmatmul.mubr.bf16.vlgmr.msra.gmra.mxu1 %v3110_v6  ;;  %11145 = vmatpush3.bf16.msra.mxu0 %v12050_v36 }
 0x2d8   : > { %6236 = vmatprep.mubr.bf16.mxu0 %v3113_v59  ;;  %11167 = vmatpush3.bf16.msra.mxu1 %v12051_v26  ;;  %v10853_v20 = vpop.f32.mrf.mxu0  ;;  %v12053_v59 = vld [vmem:[%s17416_s5 + $0x4f0] sm:$0xff]   ;;  %v12057_v26 = vld [vmem:[%s17416_s5 + $0x4e8] sm:$0xff]  }
 0x2d9   : > { %6277 = vmatprep.mubr.bf16.mxu1 %v3115_v3  ;;  %v10854_v33 = vadd.f32 %v10853_v20, %v10852_v45  ;;  %v10875_v47 = vpop.f32.mrf.mxu1  ;;  %11146 = vmatprep.subr.bf16.mxu0 %v12052_v9  ;;  %v12055_v45 = vld [vmem:[%s17416_s5 + $0x4b0] sm:$0xff]   ;;  %v12058_v9 = vld [vmem:[%s17416_s5 + $0x428] sm:$0xff]  }
 0x2da   : > { %v10876_v23 = vadd.f32 %v10875_v47, %v10874_v63  ;;  %v10855_v19 = vpop.f32.mrf.mxu0  ;;  %11168 = vmatprep.subr.bf16.mxu1 %v12053_v59  ;;  %v12056_v63 = vld [vmem:[%s17416_s5 + $0x468] sm:$0xff]  }
 0x2db   : > { %v5665_v29 = vadd.f32 %v10854_v33, %v14784_v37  ;;  %v10877_v6 = vpop.f32.mrf.mxu1  ;;  %11147 = vmatpush3.bf16.msra.mxu0 %v12054_v49  ;;  %v12064_v49 = vld [vmem:[%s17416_s5 + $0x458] sm:$0xff]  }
 0x2dc   : > { %11169 = vmatpush3.bf16.msra.mxu1 %v12055_v45  ;;  %v10856_v47 = vpop.f32.mrf.mxu0  ;;  %11148 = vmatprep.subr.bf16.mxu0 %v12056_v63  ;;  %v12065_v45 = vld [vmem:[%s17416_s5 + $0x4d8] sm:$0xff]  }
 0x2dd   : > { %v14902_v36 = vadd.f32 %v10876_v23, %v5665_v29  ;;  %v10857_v37 = vadd.f32 %v10856_v47, %v10855_v19  ;;  %v10878_v3 = vpop.f32.mrf.mxu1  ;;  %11170 = vmatprep.subr.bf16.mxu1 %v12057_v26  ;;  %v12059_v23 = vld [vmem:[%s17416_s5 + $0x4a8] sm:$0xff]   ;;  %v12060_v19 = vld [vmem:[%s17416_s5 + $0x460] sm:$0xff]   ;;  %v12066_v47 = vld [vmem:[%s17416_s5 + $0x418] sm:$0xff]  }
 0x2de   : > { %v10879_v33 = vadd.f32 %v10878_v3, %v10877_v6  ;;  %v12062_v29 = vld [vmem:[%s17416_s5 + $0x420] sm:$0xff]   ;;  %v12067_v63 = vld [vmem:[%s17416_s5 + $0x498] sm:$0xff]   ;;  %v12069_v3 = vld [vmem:[%s17416_s5 + $0x4d0] sm:$0xff]  }
 0x2df   : > { %v5668_v20 = vadd.f32 %v10857_v37, %v14799_v7  ;;  %11149 = vmatpush3.bf16.msra.mxu0 %v12058_v9  ;;  %v12061_v7 = vld [vmem:[%s17416_s5 + $0x4e0] sm:$0xff]   ;;  %v12068_v37 = vld [vmem:[%s17416_s5 + $0x450] sm:$0xff]   ;;  %v12073_v9 = vld [vmem:[%s17416_s5 + $0x4c8] sm:$0xff]  }
 0x2e0   : > { %11171 = vmatpush3.bf16.msra.mxu1 %v12059_v23  ;;  %11150 = vmatprep.subr.bf16.mxu0 %v12060_v19  ;;  %v12063_v6 = vld [vmem:[%s17416_s5 + $0x4a0] sm:$0xff]   ;;  %v12070_v26 = vld [vmem:[%s17416_s5 + $0x410] sm:$0xff]   ;;  %v12074_v23 = vld [vmem:[%s17416_s5 + $0x408] sm:$0xff]  }
 0x2e1   : > { %v14917_v59 = vadd.f32 %v10879_v33, %v5668_v20  ;;  %11172 = vmatprep.subr.bf16.mxu1 %v12061_v7  ;;  %v12071_v20 = vld [vmem:[%s17416_s5 + $0x490] sm:$0xff]   ;;  %v12072_v33 = vld [vmem:[%s17416_s5 + $0x448] sm:$0xff]  }
 0x2e2   : > { %v17746_v19 = vld [vmem:[#allocation68_spill] sm:$0xff] }
 0x2e3   : > { %11151 = vmatpush3.bf16.msra.mxu0 %v12062_v29  ;;  %v3072_v7 = vmul.f32 %v17746_v19, %v17746_v19  ;;  %v12075_v29 = vld [vmem:[%s17416_s5 + $0x488] sm:$0xff]   ;;  %v12079_v19 = vld [vmem:[%s17416_s5 + $0x480] sm:$0xff]  }
 0x2e4   : > { %11173 = vmatpush3.bf16.msra.mxu1 %v12063_v6  ;;  %11152 = vmatprep.subr.bf16.mxu0 %v12064_v49  ;;  %v12076_v6 = vld [vmem:[%s17416_s5 + $0x440] sm:$0xff]   ;;  %v17747_v49 = vld [vmem:[#allocation69_spill] sm:$0xff] }
 0x2e5   : > { %11174 = vmatprep.subr.bf16.mxu1 %v12065_v45  ;;  %v3074_v45 = vmul.f32 %v17747_v49, %v17747_v49  ;;  %v17752_v49 = vld [vmem:[#allocation74_spill] sm:$0xff] }
 0x2e7   : > { %11153 = vmatpush3.bf16.msra.mxu0 %v12066_v47  ;;  %v12077_v47 = vld [vmem:[%s17416_s5 + $0x4c0] sm:$0xff]  }
 0x2e8   : > { %11175 = vmatpush3.bf16.msra.mxu1 %v12067_v63  ;;  %11154 = vmatprep.subr.bf16.mxu0 %v12068_v37  ;;  %v17748_v63 = vld [vmem:[#allocation70_spill] sm:$0xff] }
 0x2e9   : > { %11176 = vmatprep.subr.bf16.mxu1 %v12069_v3  ;;  %v3032_v37 = vmul.f32 %v17748_v63, %v17748_v63  ;;  %v17749_v3 = vld [vmem:[#allocation71_spill] sm:$0xff] }
 0x2ea   : > { %v17753_v63 = vld [vmem:[#allocation75_spill] sm:$0xff] }
 0x2eb   : > { %11155 = vmatpush3.bf16.msra.mxu0 %v12070_v26  ;;  %v3077_v26 = vmul.f32 %v17749_v3, %v17749_v3  ;;  %v12080_v3 = vld [vmem:[%s17416_s5 + $0x578] sm:$0xff]  }
 0x2ec   : > { %11177 = vmatpush3.bf16.msra.mxu1 %v12071_v20  ;;  %11156 = vmatprep.subr.bf16.mxu0 %v12072_v33  ;;  %v17750_v20 = vld [vmem:[#allocation72_spill] sm:$0xff] }
 0x2ed   : > { %11178 = vmatprep.subr.bf16.mxu1 %v12073_v9  ;;  %v3034_v33 = vmul.f32 %v17750_v20, %v17750_v20  ;;  %v12078_v9 = vld [vmem:[%s17416_s5 + $0x400] sm:$0xff]  }
 0x2ef   : > { %11157 = vmatpush3.bf16.msra.mxu0 %v12074_v23  ;;  %v17751_v23 = vld [vmem:[#allocation73_spill] sm:$0xff]  ;;  %v3114_v20 = vpack.c.bf16 %v3074_v45, %v3034_v33 }
 0x2f0   : > { %11179 = vmatpush3.bf16.msra.mxu1 %v12075_v29  ;;  %11158 = vmatprep.subr.bf16.mxu0 %v12076_v6  ;;  %v3079_v29 = vmul.f32 %v17751_v23, %v17751_v23  ;;  %v3112_v6 = vpack.c.bf16 %v3072_v7, %v3032_v37  ;;  %v12081_v7 = vld [vmem:[%s17416_s5 + $0x5f8] sm:$0xff]  }
 0x2f1   : > { %11180 = vmatprep.subr.bf16.mxu1 %v12077_v47  ;;  %v3037_v47 = vmul.f32 %v17752_v49, %v17752_v49  ;;  %v12083_v45 = vld [vmem:[%s17416_s5 + $0x5b8] sm:$0xff]  }
 0x2f3   : > { %11159 = vmatpush3.bf16.msra.mxu0 %v12078_v9  ;;  %v3039_v9 = vmul.f32 %v17753_v63, %v17753_v63  ;;  %v3117_v23 = vpack.c.bf16 %v3077_v26, %v3037_v47  ;;  %v12084_v26 = vld [vmem:[%s17416_s5 + $0x570] sm:$0xff]  }
 0x2f4   : > { %11181 = vmatpush3.bf16.msra.mxu1 %v12079_v19  ;;  %11188 = vmatprep.subr.bf16.mxu0 %v12080_v3  ;;  %v12082_v19 = vld [vmem:[%s17416_s5 + $0x538] sm:$0xff]  }
 0x2f5   : > { %11210 = vmatprep.subr.bf16.mxu1 %v12081_v7  ;;  %v3119_v3 = vpack.c.bf16 %v3079_v29, %v3039_v9  ;;  %v12086_v9 = vld [vmem:[%s17416_s5 + $0x530] sm:$0xff]  }
 0x2f6   : > { %v10896_v37 = vpop.f32.mrf.mxu0  ;;  %6237 = vmatmul.mubr.bf16.vlgmr.msra.gmra.mxu0 %v3112_v6 }
 0x2f7   : > { %v10918_v49 = vpop.f32.mrf.mxu1  ;;  %6278 = vmatmul.mubr.bf16.vlgmr.msra.gmra.mxu1 %v3114_v20  ;;  %11189 = vmatpush3.bf16.msra.mxu0 %v12082_v19 }
 0x2f8   : > { %6318 = vmatprep.mubr.bf16.mxu0 %v3117_v23  ;;  %11211 = vmatpush3.bf16.msra.mxu1 %v12083_v45  ;;  %v10897_v33 = vpop.f32.mrf.mxu0  ;;  %v12085_v23 = vld [vmem:[%s17416_s5 + $0x5f0] sm:$0xff]   ;;  %v12089_v45 = vld [vmem:[%s17416_s5 + $0x5e8] sm:$0xff]  }
 0x2f9   : > { %6359 = vmatprep.mubr.bf16.mxu1 %v3119_v3  ;;  %v10898_v7 = vadd.f32 %v10897_v33, %v10896_v37  ;;  %v10919_v63 = vpop.f32.mrf.mxu1  ;;  %11190 = vmatprep.subr.bf16.mxu0 %v12084_v26  ;;  %v12087_v37 = vld [vmem:[%s17416_s5 + $0x5b0] sm:$0xff]   ;;  %v12090_v26 = vld [vmem:[%s17416_s5 + $0x528] sm:$0xff]  }
 0x2fa   : > { %v10920_v20 = vadd.f32 %v10919_v63, %v10918_v49  ;;  %v10899_v6 = vpop.f32.mrf.mxu0  ;;  %11212 = vmatprep.subr.bf16.mxu1 %v12085_v23  ;;  %v12088_v63 = vld [vmem:[%s17416_s5 + $0x568] sm:$0xff]  }
 0x2fb   : > { %v5747_v29 = vadd.f32 %v10898_v7, %v14902_v36  ;;  %v10921_v47 = vpop.f32.mrf.mxu1  ;;  %11191 = vmatpush3.bf16.msra.mxu0 %v12086_v9  ;;  %v12096_v9 = vld [vmem:[%s17416_s5 + $0x558] sm:$0xff]  }
 0x2fc   : > { %11213 = vmatpush3.bf16.msra.mxu1 %v12087_v37  ;;  %v10900_v49 = vpop.f32.mrf.mxu0  ;;  %11192 = vmatprep.subr.bf16.mxu0 %v12088_v63  ;;  %v12097_v37 = vld [vmem:[%s17416_s5 + $0x5d8] sm:$0xff]  }
 0x2fd   : > { %v15020_v19 = vadd.f32 %v10920_v20, %v5747_v29  ;;  %v10901_v36 = vadd.f32 %v10900_v49, %v10899_v6  ;;  %v10922_v3 = vpop.f32.mrf.mxu1  ;;  %11214 = vmatprep.subr.bf16.mxu1 %v12089_v45  ;;  %v12091_v20 = vld [vmem:[%s17416_s5 + $0x5a8] sm:$0xff]   ;;  %v12092_v6 = vld [vmem:[%s17416_s5 + $0x560] sm:$0xff]   ;;  %v12098_v49 = vld [vmem:[%s17416_s5 + $0x518] sm:$0xff]  }
 0x2fe   : > { %v10923_v7 = vadd.f32 %v10922_v3, %v10921_v47  ;;  %v12094_v29 = vld [vmem:[%s17416_s5 + $0x520] sm:$0xff]   ;;  %v12099_v63 = vld [vmem:[%s17416_s5 + $0x598] sm:$0xff]   ;;  %v12101_v3 = vld [vmem:[%s17416_s5 + $0x5d0] sm:$0xff]  }
 0x2ff   : > { %v5750_v33 = vadd.f32 %v10901_v36, %v14917_v59  ;;  %11193 = vmatpush3.bf16.msra.mxu0 %v12090_v26  ;;  %v12093_v59 = vld [vmem:[%s17416_s5 + $0x5e0] sm:$0xff]   ;;  %v12100_v36 = vld [vmem:[%s17416_s5 + $0x550] sm:$0xff]   ;;  %v12105_v26 = vld [vmem:[%s17416_s5 + $0x5c8] sm:$0xff]  }
 0x300   : > { %11215 = vmatpush3.bf16.msra.mxu1 %v12091_v20  ;;  %11194 = vmatprep.subr.bf16.mxu0 %v12092_v6  ;;  %v12095_v47 = vld [vmem:[%s17416_s5 + $0x5a0] sm:$0xff]   ;;  %v12102_v45 = vld [vmem:[%s17416_s5 + $0x510] sm:$0xff]   ;;  %v12106_v20 = vld [vmem:[%s17416_s5 + $0x508] sm:$0xff]  }
 0x301   : > { %v15035_v23 = vadd.f32 %v10923_v7, %v5750_v33  ;;  %11216 = vmatprep.subr.bf16.mxu1 %v12093_v59  ;;  %v12103_v33 = vld [vmem:[%s17416_s5 + $0x590] sm:$0xff]   ;;  %v12104_v7 = vld [vmem:[%s17416_s5 + $0x548] sm:$0xff]  }
 0x302   : > { %v17754_v6 = vld [vmem:[#allocation76_spill] sm:$0xff] }
 0x303   : > { %11195 = vmatpush3.bf16.msra.mxu0 %v12094_v29  ;;  %v3076_v59 = vmul.f32 %v17754_v6, %v17754_v6  ;;  %v12107_v29 = vld [vmem:[%s17416_s5 + $0x588] sm:$0xff]   ;;  %v12111_v6 = vld [vmem:[%s17416_s5 + $0x580] sm:$0xff]  }
 0x304   : > { %11217 = vmatpush3.bf16.msra.mxu1 %v12095_v47  ;;  %11196 = vmatprep.subr.bf16.mxu0 %v12096_v9  ;;  %v12108_v47 = vld [vmem:[%s17416_s5 + $0x540] sm:$0xff]   ;;  %v17755_v9 = vld [vmem:[#allocation77_spill] sm:$0xff] }
 0x305   : > { %11218 = vmatprep.subr.bf16.mxu1 %v12097_v37  ;;  %v3078_v37 = vmul.f32 %v17755_v9, %v17755_v9  ;;  %v17760_v9 = vld [vmem:[#allocation4_spill] sm:$0xff] }
 0x307   : > { %11197 = vmatpush3.bf16.msra.mxu0 %v12098_v49  ;;  %v12109_v49 = vld [vmem:[%s17416_s5 + $0x5c0] sm:$0xff]  }
 0x308   : > { %11219 = vmatpush3.bf16.msra.mxu1 %v12099_v63  ;;  %11198 = vmatprep.subr.bf16.mxu0 %v12100_v36  ;;  %v17756_v63 = vld [vmem:[#allocation78_spill] sm:$0xff] }
 0x309   : > { %11220 = vmatprep.subr.bf16.mxu1 %v12101_v3  ;;  %v3036_v36 = vmul.f32 %v17756_v63, %v17756_v63  ;;  %v17757_v3 = vld [vmem:[#allocation79_spill] sm:$0xff]  ;;  %v17761_v63 = vld [vmem:[#allocation5_spill] sm:$0xff] }
 0x30b   : > { %11199 = vmatpush3.bf16.msra.mxu0 %v12102_v45  ;;  %v3081_v45 = vmul.f32 %v17757_v3, %v17757_v3  ;;  %v12112_v3 = vld [vmem:[%s17416_s5 + $0x678] sm:$0xff]  }
 0x30c   : > { %11221 = vmatpush3.bf16.msra.mxu1 %v12103_v33  ;;  %11200 = vmatprep.subr.bf16.mxu0 %v12104_v7  ;;  %v17758_v33 = vld [vmem:[#allocation80_spill] sm:$0xff] }
 0x30d   : > { %11222 = vmatprep.subr.bf16.mxu1 %v12105_v26  ;;  %v3038_v7 = vmul.f32 %v17758_v33, %v17758_v33  ;;  %v12110_v26 = vld [vmem:[%s17416_s5 + $0x500] sm:$0xff]  }
 0x30f   : > { %11201 = vmatpush3.bf16.msra.mxu0 %v12106_v20  ;;  %v17759_v20 = vld [vmem:[#allocation81_spill] sm:$0xff]  ;;  %v3118_v33 = vpack.c.bf16 %v3078_v37, %v3038_v7 }
 0x310   : > { %11223 = vmatpush3.bf16.msra.mxu1 %v12107_v29  ;;  %11202 = vmatprep.subr.bf16.mxu0 %v12108_v47  ;;  %v3083_v29 = vmul.f32 %v17759_v20, %v17759_v20  ;;  %v3116_v47 = vpack.c.bf16 %v3076_v59, %v3036_v36  ;;  %v12113_v59 = vld [vmem:[%s17416_s5 + $0x6f8] sm:$0xff]  }
 0x311   : > { %11224 = vmatprep.subr.bf16.mxu1 %v12109_v49  ;;  %v3041_v49 = vmul.f32 %v17760_v9, %v17760_v9  ;;  %v12115_v37 = vld [vmem:[%s17416_s5 + $0x6b8] sm:$0xff]  }
 0x313   : > { %11203 = vmatpush3.bf16.msra.mxu0 %v12110_v26  ;;  %v3043_v26 = vmul.f32 %v17761_v63, %v17761_v63  ;;  %v3121_v20 = vpack.c.bf16 %v3081_v45, %v3041_v49  ;;  %v12116_v45 = vld [vmem:[%s17416_s5 + $0x670] sm:$0xff]  }
 0x314   : > { %11225 = vmatpush3.bf16.msra.mxu1 %v12111_v6  ;;  %11232 = vmatprep.subr.bf16.mxu0 %v12112_v3  ;;  %v12114_v6 = vld [vmem:[%s17416_s5 + $0x638] sm:$0xff]  }
 0x315   : > { %11254 = vmatprep.subr.bf16.mxu1 %v12113_v59  ;;  %v3123_v3 = vpack.c.bf16 %v3083_v29, %v3043_v26  ;;  %v12118_v26 = vld [vmem:[%s17416_s5 + $0x630] sm:$0xff]  }
 0x316   : > { %v10940_v36 = vpop.f32.mrf.mxu0  ;;  %6319 = vmatmul.mubr.bf16.vlgmr.msra.gmra.mxu0 %v3116_v47 }
 0x317   : > { %v10962_v9 = vpop.f32.mrf.mxu1  ;;  %6360 = vmatmul.mubr.bf16.vlgmr.msra.gmra.mxu1 %v3118_v33  ;;  %11233 = vmatpush3.bf16.msra.mxu0 %v12114_v6 }
 0x318   : > { %6400 = vmatprep.mubr.bf16.mxu0 %v3121_v20  ;;  %11255 = vmatpush3.bf16.msra.mxu1 %v12115_v37  ;;  %v10941_v7 = vpop.f32.mrf.mxu0  ;;  %v12117_v20 = vld [vmem:[%s17416_s5 + $0x6f0] sm:$0xff]   ;;  %v12121_v37 = vld [vmem:[%s17416_s5 + $0x6e8] sm:$0xff]  }
 0x319   : > { %6441 = vmatprep.mubr.bf16.mxu1 %v3123_v3  ;;  %v10942_v59 = vadd.f32 %v10941_v7, %v10940_v36  ;;  %v10963_v63 = vpop.f32.mrf.mxu1  ;;  %11234 = vmatprep.subr.bf16.mxu0 %v12116_v45  ;;  %v12119_v36 = vld [vmem:[%s17416_s5 + $0x6b0] sm:$0xff]   ;;  %v12122_v45 = vld [vmem:[%s17416_s5 + $0x628] sm:$0xff]  }
 0x31a   : > { %v10964_v33 = vadd.f32 %v10963_v63, %v10962_v9  ;;  %v10943_v47 = vpop.f32.mrf.mxu0  ;;  %11256 = vmatprep.subr.bf16.mxu1 %v12117_v20  ;;  %v12120_v63 = vld [vmem:[%s17416_s5 + $0x668] sm:$0xff]  }
 0x31b   : > { %v5829_v29 = vadd.f32 %v10942_v59, %v15020_v19  ;;  %v10965_v49 = vpop.f32.mrf.mxu1  ;;  %11235 = vmatpush3.bf16.msra.mxu0 %v12118_v26  ;;  %v12128_v26 = vld [vmem:[%s17416_s5 + $0x658] sm:$0xff]  }
 0x31c   : > { %11257 = vmatpush3.bf16.msra.mxu1 %v12119_v36  ;;  %v10944_v9 = vpop.f32.mrf.mxu0  ;;  %11236 = vmatprep.subr.bf16.mxu0 %v12120_v63  ;;  %v12129_v36 = vld [vmem:[%s17416_s5 + $0x6d8] sm:$0xff]  }
 0x31d   : > { %v15138_v6 = vadd.f32 %v10964_v33, %v5829_v29  ;;  %v10945_v19 = vadd.f32 %v10944_v9, %v10943_v47  ;;  %v10966_v3 = vpop.f32.mrf.mxu1  ;;  %11258 = vmatprep.subr.bf16.mxu1 %v12121_v37  ;;  %v12123_v33 = vld [vmem:[%s17416_s5 + $0x6a8] sm:$0xff]   ;;  %v12124_v47 = vld [vmem:[%s17416_s5 + $0x660] sm:$0xff]   ;;  %v12130_v9 = vld [vmem:[%s17416_s5 + $0x618] sm:$0xff]  }
 0x31e   : > { %v10967_v59 = vadd.f32 %v10966_v3, %v10965_v49  ;;  %v12126_v29 = vld [vmem:[%s17416_s5 + $0x620] sm:$0xff]   ;;  %v12131_v63 = vld [vmem:[%s17416_s5 + $0x698] sm:$0xff]   ;;  %v12133_v3 = vld [vmem:[%s17416_s5 + $0x6d0] sm:$0xff]  }
 0x31f   : > { %v5832_v7 = vadd.f32 %v10945_v19, %v15035_v23  ;;  %11237 = vmatpush3.bf16.msra.mxu0 %v12122_v45  ;;  %v12125_v23 = vld [vmem:[%s17416_s5 + $0x6e0] sm:$0xff]   ;;  %v12132_v19 = vld [vmem:[%s17416_s5 + $0x650] sm:$0xff]   ;;  %v12137_v45 = vld [vmem:[%s17416_s5 + $0x6c8] sm:$0xff]  }
 0x320   : > { %11259 = vmatpush3.bf16.msra.mxu1 %v12123_v33  ;;  %11238 = vmatprep.subr.bf16.mxu0 %v12124_v47  ;;  %v12127_v49 = vld [vmem:[%s17416_s5 + $0x6a0] sm:$0xff]   ;;  %v12134_v37 = vld [vmem:[%s17416_s5 + $0x610] sm:$0xff]   ;;  %v12138_v33 = vld [vmem:[%s17416_s5 + $0x608] sm:$0xff]   ;;  %v3080_v47 = vmul.f32 %v13941_v53, %v13941_v53 }
 0x321   : > { %v15153_v20 = vadd.f32 %v10967_v59, %v5832_v7  ;;  %11260 = vmatprep.subr.bf16.mxu1 %v12125_v23  ;;  %v12135_v7 = vld [vmem:[%s17416_s5 + $0x690] sm:$0xff]   ;;  %v12136_v59 = vld [vmem:[%s17416_s5 + $0x648] sm:$0xff]  }
 0x322   : > { %v12139_v23 = vld [vmem:[%s17416_s5 + $0x688] sm:$0xff]  }
 0x323   : > { %11239 = vmatpush3.bf16.msra.mxu0 %v12126_v29  ;;  %v12140_v29 = vld [vmem:[%s17416_s5 + $0x640] sm:$0xff]   ;;  %v17767_v53 = vld [vmem:[#allocation11_spill] sm:$0xff] }
 0x324   : > { %11261 = vmatpush3.bf16.msra.mxu1 %v12127_v49  ;;  %11240 = vmatprep.subr.bf16.mxu0 %v12128_v26  ;;  %v3082_v49 = vmul.f32 %v13953_v62, %v13953_v62  ;;  %v12141_v26 = vld [vmem:[%s17416_s5 + $0x6c0] sm:$0xff]  }
 0x325   : > { %11262 = vmatprep.subr.bf16.mxu1 %v12129_v36  ;;  %v17762_v36 = vld [vmem:[#allocation2_spill] sm:$0xff] }
 0x327   : > { %11241 = vmatpush3.bf16.msra.mxu0 %v12130_v9  ;;  %v3040_v9 = vmul.f32 %v17762_v36, %v17762_v36  ;;  %v6752_v36 = vld [vmem:[%s17417_s6 + $0x150] sm:$0xff] }
 0x328   : > { %11263 = vmatpush3.bf16.msra.mxu1 %v12131_v63  ;;  %11242 = vmatprep.subr.bf16.mxu0 %v12132_v19  ;;  %v17763_v63 = vld [vmem:[#allocation14_spill] sm:$0xff] }
 0x329   : > { %11264 = vmatprep.subr.bf16.mxu1 %v12133_v3  ;;  %v3085_v19 = vmul.f32 %v17763_v63, %v17763_v63  ;;  %v17764_v3 = vld [vmem:[#allocation3_spill] sm:$0xff]  ;;  %v12144_v63 = vld [vmem:[%s17416_s5 + $0x778] sm:$0xff]  }
 0x32b   : > { %11243 = vmatpush3.bf16.msra.mxu0 %v12134_v37  ;;  %v3042_v37 = vmul.f32 %v17764_v3, %v17764_v3 }
 0x32c   : > { %11265 = vmatpush3.bf16.msra.mxu1 %v12135_v7  ;;  %11244 = vmatprep.subr.bf16.mxu0 %v12136_v59  ;;  %v12142_v7 = vld [vmem:[%s17416_s5 + $0x600] sm:$0xff]   ;;  %v17765_v59 = vld [vmem:[#allocation15_spill] sm:$0xff] }
 0x32d   : > { %11266 = vmatprep.subr.bf16.mxu1 %v12137_v45  ;;  %v3087_v45 = vmul.f32 %v17765_v59, %v17765_v59  ;;  %v3122_v62 = vpack.c.bf16 %v3082_v49, %v3042_v37  ;;  %v12147_v49 = vld [vmem:[%s17416_s5 + $0x7b8] sm:$0xff]   ;;  %v12151_v37 = vld [vmem:[%s17416_s5 + $0x7b0] sm:$0xff]  }
 0x32f   : > { %11245 = vmatpush3.bf16.msra.mxu0 %v12138_v33  ;;  %v3120_v33 = vpack.c.bf16 %v3080_v47, %v3040_v9  ;;  %v12145_v47 = vld [vmem:[%s17416_s5 + $0x7f8] sm:$0xff]  }
 0x330   : > { %11267 = vmatpush3.bf16.msra.mxu1 %v12139_v23  ;;  %11246 = vmatprep.subr.bf16.mxu0 %v12140_v29  ;;  %v17766_v23 = vld [vmem:[#allocation10_spill] sm:$0xff] }
 0x331   : > { %11268 = vmatprep.subr.bf16.mxu1 %v12141_v26  ;;  %v3045_v29 = vmul.f32 %v17766_v23, %v17766_v23  ;;  %v12143_v26 = vld [vmem:[%s17416_s5 + $0x680] sm:$0xff]  }
 0x333   : > { %11247 = vmatpush3.bf16.msra.mxu0 %v12142_v7  ;;  %v3047_v7 = vmul.f32 %v17767_v53, %v17767_v53  ;;  %v3125_v9 = vpack.c.bf16 %v3085_v19, %v3045_v29  ;;  %v12150_v19 = vld [vmem:[%s17416_s5 + $0x730] sm:$0xff]   ;;  %v12155_v29 = vld [vmem:[%s17416_s5 + $0x7a8] sm:$0xff]  }
 0x334   : > { %11269 = vmatpush3.bf16.msra.mxu1 %v12143_v26  ;;  %11276 = vmatprep.subr.bf16.mxu0 %v12144_v63  ;;  %v12146_v26 = vld [vmem:[%s17416_s5 + $0x738] sm:$0xff]   ;;  %v12148_v63 = vld [vmem:[%s17416_s5 + $0x770] sm:$0xff]  }
 0x335   : > { %11298 = vmatprep.subr.bf16.mxu1 %v12145_v47  ;;  %v3127_v59 = vpack.c.bf16 %v3087_v45, %v3047_v7  ;;  %v12153_v45 = vld [vmem:[%s17416_s5 + $0x7e8] sm:$0xff]   ;;  %v12156_v7 = vld [vmem:[%s17416_s5 + $0x760] sm:$0xff]  }
 0x336   : > { %6401 = vmatmul.mubr.bf16.vlgmr.msra.gmra.mxu0 %v3120_v33  ;;  %v12154_v33 = vld [vmem:[%s17416_s5 + $0x728] sm:$0xff]   ;;  %v12157_v47 = vld [vmem:[%s17416_s5 + $0x7e0] sm:$0xff]  }
 0x337   : > { %6442 = vmatmul.mubr.bf16.vlgmr.msra.gmra.mxu1 %v3122_v62  ;;  %11277 = vmatpush3.bf16.msra.mxu0 %v12146_v26  ;;  %v12149_v62 = vld [vmem:[%s17416_s5 + $0x7f0] sm:$0xff]   ;;  %v12159_v26 = vld [vmem:[%s17416_s5 + $0x7a0] sm:$0xff]  }
 0x338   : > { %6482 = vmatprep.mubr.bf16.mxu0 %v3125_v9  ;;  %11299 = vmatpush3.bf16.msra.mxu1 %v12147_v49  ;;  %v12158_v9 = vld [vmem:[%s17416_s5 + $0x720] sm:$0xff]   ;;  %v12160_v49 = vld [vmem:[%s17416_s5 + $0x758] sm:$0xff]  }
 0x339   : > { %6523 = vmatprep.mubr.bf16.mxu1 %v3127_v59  ;;  %11278 = vmatprep.subr.bf16.mxu0 %v12148_v63  ;;  %v12152_v59 = vld [vmem:[%s17416_s5 + $0x768] sm:$0xff]   ;;  %v12161_v63 = vld [vmem:[%s17416_s5 + $0x7d8] sm:$0xff]  }
 0x33a   : > { %11300 = vmatprep.subr.bf16.mxu1 %v12149_v62  ;;  %v12162_v62 = vld [vmem:[%s17416_s5 + $0x718] sm:$0xff]  }
 0x33b   : > { %11279 = vmatpush3.bf16.msra.mxu0 %v12150_v19  ;;  %v12163_v19 = vld [vmem:[%s17416_s5 + $0x798] sm:$0xff]  }
 0x33c   : > { %11301 = vmatpush3.bf16.msra.mxu1 %v12151_v37  ;;  %11280 = vmatprep.subr.bf16.mxu0 %v12152_v59  ;;  %v12164_v37 = vld [vmem:[%s17416_s5 + $0x750] sm:$0xff]  }
 0x33d   : > { %11302 = vmatprep.subr.bf16.mxu1 %v12153_v45  ;;  %v12165_v59 = vld [vmem:[%s17416_s5 + $0x7d0] sm:$0xff]  }
 0x33e   : > { %v12166_v45 = vld [vmem:[%s17416_s5 + $0x710] sm:$0xff]  }
 0x33f   : > { %11281 = vmatpush3.bf16.msra.mxu0 %v12154_v33  ;;  %v12167_v33 = vld [vmem:[%s17416_s5 + $0x790] sm:$0xff]  }
 0x340   : > { %11303 = vmatpush3.bf16.msra.mxu1 %v12155_v29  ;;  %11282 = vmatprep.subr.bf16.mxu0 %v12156_v7  ;;  %v12168_v29 = vld [vmem:[%s17416_s5 + $0x748] sm:$0xff]  }
 0x341   : > { %11304 = vmatprep.subr.bf16.mxu1 %v12157_v47  ;;  %v12169_v7 = vld [vmem:[%s17416_s5 + $0x7c8] sm:$0xff]  }
 0x342   : > { %v12170_v47 = vld [vmem:[%s17416_s5 + $0x708] sm:$0xff]  }
 0x343   : > { %11283 = vmatpush3.bf16.msra.mxu0 %v12158_v9  ;;  %v3084_v9 = vmul.f32 %v14089_v51, %v14089_v51  ;;  %v6710_v51 = vld [vmem:[%s17417_s6] sm:$0xff] }
 0x344   : > { %11305 = vmatpush3.bf16.msra.mxu1 %v12159_v26  ;;  %11284 = vmatprep.subr.bf16.mxu0 %v12160_v49  ;;  %v12171_v26 = vld [vmem:[%s17416_s5 + $0x788] sm:$0xff]   ;;  %v12172_v49 = vld [vmem:[%s17416_s5 + $0x740] sm:$0xff]  }
 0x345   : > { %11306 = vmatprep.subr.bf16.mxu1 %v12161_v63  ;;  %v3086_v63 = vmul.f32 %v14099_v2, %v14099_v2 }
 0x347   : > { %11285 = vmatpush3.bf16.msra.mxu0 %v12162_v62  ;;  %v12173_v62 = vld [vmem:[%s17416_s5 + $0x7c0] sm:$0xff]  }
 0x348   : > { %11307 = vmatpush3.bf16.msra.mxu1 %v12163_v19  ;;  %11286 = vmatprep.subr.bf16.mxu0 %v12164_v37  ;;  %v3044_v19 = vmul.f32 %v14106_v46, %v14106_v46  ;;  %v3089_v37 = vmul.f32 %v14110_v18, %v14110_v18  ;;  %v17769_v18 = vld [vmem:[#allocation19_spill] sm:$0xff] }
 0x349   : > { %11308 = vmatprep.subr.bf16.mxu1 %v12165_v59  ;;  %v3046_v59 = vmul.f32 %v14114_v16, %v14114_v16 }
 0x34b   : > { %11287 = vmatpush3.bf16.msra.mxu0 %v12166_v45  ;;  %v12174_v45 = vld [vmem:[%s17416_s5 + $0x700] sm:$0xff]  }
 0x34c   : > { %11309 = vmatpush3.bf16.msra.mxu1 %v12167_v33  ;;  %11288 = vmatprep.subr.bf16.mxu0 %v12168_v29  ;;  %v3091_v33 = vmul.f32 %v14118_v55, %v14118_v55  ;;  %v3124_v29 = vpack.c.bf16 %v3084_v9, %v3044_v19  ;;  %v12177_v9 = vld [vmem:[%s17416_s5 + $0x8f8] sm:$0xff]  }
 0x34d   : > { %11310 = vmatprep.subr.bf16.mxu1 %v12169_v7  ;;  %v17768_v7 = vld [vmem:[#allocation18_spill] sm:$0xff] }
 0x34f   : > { %11289 = vmatpush3.bf16.msra.mxu0 %v12170_v47  ;;  %v3049_v47 = vmul.f32 %v17768_v7, %v17768_v7 }
 0x350   : > { %11311 = vmatpush3.bf16.msra.mxu1 %v12171_v26  ;;  %11290 = vmatprep.subr.bf16.mxu0 %v12172_v49  ;;  %v12175_v26 = vld [vmem:[%s17416_s5 + $0x780] sm:$0xff]   ;;  %v12176_v49 = vld [vmem:[%s17416_s5 + $0x878] sm:$0xff]  }
 0x351   : > { %11312 = vmatprep.subr.bf16.mxu1 %v12173_v62  ;;  %v3126_v62 = vpack.c.bf16 %v3086_v63, %v3046_v59  ;;  %v3129_v19 = vpack.c.bf16 %v3089_v37, %v3049_v47  ;;  %v12179_v63 = vld [vmem:[%s17416_s5 + $0x8b8] sm:$0xff]   ;;  %v12180_v59 = vld [vmem:[%s17416_s5 + $0x870] sm:$0xff]   ;;  %v12185_v47 = vld [vmem:[%s17416_s5 + $0x8e8] sm:$0xff]  }
 0x352   : > { %v12181_v37 = vld [vmem:[%s17416_s5 + $0x8f0] sm:$0xff]  }
 0x353   : > { %11291 = vmatpush3.bf16.msra.mxu0 %v12174_v45  ;;  %v3051_v45 = vmul.f32 %v17769_v18, %v17769_v18 }
 0x354   : > { %11313 = vmatpush3.bf16.msra.mxu1 %v12175_v26  ;;  %11320 = vmatprep.subr.bf16.mxu0 %v12176_v49  ;;  %v12178_v26 = vld [vmem:[%s17416_s5 + $0x838] sm:$0xff]   ;;  %v12186_v49 = vld [vmem:[%s17416_s5 + $0x828] sm:$0xff]  }
 0x355   : > { %11342 = vmatprep.subr.bf16.mxu1 %v12177_v9  ;;  %v3131_v55 = vpack.c.bf16 %v3091_v33, %v3051_v45  ;;  %v12182_v33 = vld [vmem:[%s17416_s5 + $0x830] sm:$0xff]   ;;  %v12188_v45 = vld [vmem:[%s17416_s5 + $0x860] sm:$0xff]  }
 0x356   : > { %6483 = vmatmul.mubr.bf16.vlgmr.msra.gmra.mxu0 %v3124_v29  ;;  %v12183_v29 = vld [vmem:[%s17416_s5 + $0x8b0] sm:$0xff]   ;;  %v12189_v9 = vld [vmem:[%s17416_s5 + $0x8e0] sm:$0xff]  }
 0x357   : > { %6524 = vmatmul.mubr.bf16.vlgmr.msra.gmra.mxu1 %v3126_v62  ;;  %11321 = vmatpush3.bf16.msra.mxu0 %v12178_v26  ;;  %v12187_v62 = vld [vmem:[%s17416_s5 + $0x8a8] sm:$0xff]   ;;  %v12191_v26 = vld [vmem:[%s17416_s5 + $0x8a0] sm:$0xff]  }
 0x358   : > { %6564 = vmatprep.mubr.bf16.mxu0 %v3129_v19  ;;  %11343 = vmatpush3.bf16.msra.mxu1 %v12179_v63  ;;  %v12190_v19 = vld [vmem:[%s17416_s5 + $0x820] sm:$0xff]   ;;  %v12192_v63 = vld [vmem:[%s17416_s5 + $0x858] sm:$0xff]  }
 0x359   : > { %6605 = vmatprep.mubr.bf16.mxu1 %v3131_v55  ;;  %11322 = vmatprep.subr.bf16.mxu0 %v12180_v59  ;;  %v12184_v55 = vld [vmem:[%s17416_s5 + $0x868] sm:$0xff]   ;;  %v12193_v59 = vld [vmem:[%s17416_s5 + $0x8d8] sm:$0xff]  }
 0x35a   : > { %11344 = vmatprep.subr.bf16.mxu1 %v12181_v37  ;;  %v12194_v37 = vld [vmem:[%s17416_s5 + $0x818] sm:$0xff]  }
 0x35b   : > { %11323 = vmatpush3.bf16.msra.mxu0 %v12182_v33  ;;  %v12195_v33 = vld [vmem:[%s17416_s5 + $0x898] sm:$0xff]  }
 0x35c   : > { %11345 = vmatpush3.bf16.msra.mxu1 %v12183_v29  ;;  %11324 = vmatprep.subr.bf16.mxu0 %v12184_v55  ;;  %v12196_v29 = vld [vmem:[%s17416_s5 + $0x850] sm:$0xff]  }
 0x35d   : > { %11346 = vmatprep.subr.bf16.mxu1 %v12185_v47  ;;  %v12197_v55 = vld [vmem:[%s17416_s5 + $0x8d0] sm:$0xff]  }
 0x35e   : > { %v12198_v47 = vld [vmem:[%s17416_s5 + $0x810] sm:$0xff]  }
 0x35f   : > { %11325 = vmatpush3.bf16.msra.mxu0 %v12186_v49  ;;  %v12199_v49 = vld [vmem:[%s17416_s5 + $0x890] sm:$0xff]  }
 0x360   : > { %11347 = vmatpush3.bf16.msra.mxu1 %v12187_v62  ;;  %11326 = vmatprep.subr.bf16.mxu0 %v12188_v45  ;;  %v12200_v62 = vld [vmem:[%s17416_s5 + $0x848] sm:$0xff]  }
 0x361   : > { %11348 = vmatprep.subr.bf16.mxu1 %v12189_v9  ;;  %v12201_v45 = vld [vmem:[%s17416_s5 + $0x8c8] sm:$0xff]  }
 0x362   : > { %v12202_v9 = vld [vmem:[%s17416_s5 + $0x808] sm:$0xff]  }
 0x363   : > { %11327 = vmatpush3.bf16.msra.mxu0 %v12190_v19  ;;  %v3088_v19 = vmul.f32 %v14231_v57, %v14231_v57  ;;  %v6771_v57 = vld [vmem:[%s17417_s6 + $0x1e8] sm:$0xff] }
 0x364   : > { %11349 = vmatpush3.bf16.msra.mxu1 %v12191_v26  ;;  %11328 = vmatprep.subr.bf16.mxu0 %v12192_v63  ;;  %v12203_v26 = vld [vmem:[%s17416_s5 + $0x888] sm:$0xff]   ;;  %v12204_v63 = vld [vmem:[%s17416_s5 + $0x840] sm:$0xff]  }
 0x365   : > { %11350 = vmatprep.subr.bf16.mxu1 %v12193_v59  ;;  %v3090_v59 = vmul.f32 %v14241_v44, %v14241_v44 }
 0x367   : > { %11329 = vmatpush3.bf16.msra.mxu0 %v12194_v37  ;;  %v12205_v37 = vld [vmem:[%s17416_s5 + $0x8c0] sm:$0xff]  }
 0x368   : > { %11351 = vmatpush3.bf16.msra.mxu1 %v12195_v33  ;;  %11330 = vmatprep.subr.bf16.mxu0 %v12196_v29  ;;  %v3048_v33 = vmul.f32 %v14248_v42, %v14248_v42  ;;  %v3093_v29 = vmul.f32 %v14252_v48, %v14252_v48 }
 0x369   : > { %11352 = vmatprep.subr.bf16.mxu1 %v12197_v55  ;;  %v3050_v55 = vmul.f32 %v14256_v61, %v14256_v61 }
 0x36b   : > { %11331 = vmatpush3.bf16.msra.mxu0 %v12198_v47  ;;  %v12206_v47 = vld [vmem:[%s17416_s5 + $0x800] sm:$0xff]  }
 0x36c   : > { %11353 = vmatpush3.bf16.msra.mxu1 %v12199_v49  ;;  %11332 = vmatprep.subr.bf16.mxu0 %v12200_v62  ;;  %v3095_v49 = vmul.f32 %v14260_v50, %v14260_v50  ;;  %v3128_v62 = vpack.c.bf16 %v3088_v19, %v3048_v33  ;;  %v12209_v19 = vld [vmem:[%s17416_s5 + $0x9f8] sm:$0xff]  }
 0x36d   : > { %11354 = vmatprep.subr.bf16.mxu1 %v12201_v45  ;;  %v3053_v45 = vmul.f32 %v14269_v4, %v14269_v4  ;;  %v6770_v4 = vld [vmem:[%s17417_s6 + $0x1e0] sm:$0xff] }
 0x36f   : > { %11333 = vmatpush3.bf16.msra.mxu0 %v12202_v9  ;;  %v12207_v9 = vld [vmem:[%s17416_s5 + $0x880] sm:$0xff]   ;;  %v3133_v33 = vpack.c.bf16 %v3093_v29, %v3053_v45  ;;  %v12213_v29 = vld [vmem:[%s17416_s5 + $0x9f0] sm:$0xff]   ;;  %v12216_v45 = vld [vmem:[%s17416_s5 + $0x968] sm:$0xff]  }
 0x370   : > { %11355 = vmatpush3.bf16.msra.mxu1 %v12203_v26  ;;  %11334 = vmatprep.subr.bf16.mxu0 %v12204_v63  ;;  %v12208_v26 = vld [vmem:[%s17416_s5 + $0x978] sm:$0xff]   ;;  %v3130_v63 = vpack.c.bf16 %v3090_v59, %v3050_v55  ;;  %v12212_v55 = vld [vmem:[%s17416_s5 + $0x970] sm:$0xff]  }
 0x371   : > { %11356 = vmatprep.subr.bf16.mxu1 %v12205_v37  ;;  %v3055_v37 = vmul.f32 %v14278_v28, %v14278_v28  ;;  %v12211_v59 = vld [vmem:[%s17416_s5 + $0x9b8] sm:$0xff]   ;;  %v6750_v28 = vld [vmem:[%s17417_s6 + $0x140] sm:$0xff] }
 0x372   : > { %v15601_v44 = vcombine.high %v6750_v28, %v6770_v4  ;;  %v15606_v18 = vcombine.low %v6750_v28, %v6770_v4  ;;  %v6730_v4 = vld [vmem:[%s17417_s6 + $0xa0] sm:$0xff] }
 0x373   : > { %11335 = vmatpush3.bf16.msra.mxu0 %v12206_v47  ;;  %v12210_v47 = vld [vmem:[%s17416_s5 + $0x938] sm:$0xff]   ;;  %v15629_v28 = vcombine.high %v6710_v51, %v6730_v4  ;;  %v15634_v53 = vcombine.low %v6710_v51, %v6730_v4  ;;  %v6772_v51 = vld [vmem:[%s17417_s6 + $0x1f0] sm:$0xff] }
 0x374   : > { %11357 = vmatpush3.bf16.msra.mxu1 %v12207_v9  ;;  %11364 = vmatprep.subr.bf16.mxu0 %v12208_v26  ;;  %v3135_v9 = vpack.c.bf16 %v3095_v49, %v3055_v37  ;;  %v12214_v49 = vld [vmem:[%s17416_s5 + $0x930] sm:$0xff]   ;;  %v12217_v26 = vld [vmem:[%s17416_s5 + $0x9e8] sm:$0xff]   ;;  %v6753_v4 = vld [vmem:[%s17417_s6 + $0x158] sm:$0xff] }
 0x375   : > { %11386 = vmatprep.subr.bf16.mxu1 %v12209_v19  ;;  %v12219_v37 = vld [vmem:[%s17416_s5 + $0x9a8] sm:$0xff]   ;;  %v12220_v19 = vld [vmem:[%s17416_s5 + $0x960] sm:$0xff]   ;;  %17772 = vst [vmem:[#allocation83_spill] sm:$0xff] %v15629_v28  ;;  %17773 = vst [vmem:[#allocation84_spill] sm:$0xff] %v15634_v53  ;;  %v15662_v32 = vcombine.low %v6753_v4, %v6773_v35  ;;  %v15664_v21 = vcombine.high %v6753_v4, %v6773_v35 }
 0x376   : > { %6565 = vmatmul.mubr.bf16.vlgmr.msra.gmra.mxu0 %v3128_v62  ;;  %v12215_v62 = vld [vmem:[%s17416_s5 + $0x9b0] sm:$0xff]  }
 0x377   : > { %6606 = vmatmul.mubr.bf16.vlgmr.msra.gmra.mxu1 %v3130_v63  ;;  %11365 = vmatpush3.bf16.msra.mxu0 %v12210_v47  ;;  %v12218_v63 = vld [vmem:[%s17416_s5 + $0x928] sm:$0xff]   ;;  %v12222_v47 = vld [vmem:[%s17416_s5 + $0x920] sm:$0xff]   ;;  %17777 = vst [vmem:[#allocation88_spill] sm:$0xff] %v15664_v21 }
 0x378   : > { %6646 = vmatprep.mubr.bf16.mxu0 %v3133_v33  ;;  %11387 = vmatpush3.bf16.msra.mxu1 %v12211_v59  ;;  %v12221_v33 = vld [vmem:[%s17416_s5 + $0x9e0] sm:$0xff]   ;;  %v12224_v59 = vld [vmem:[%s17416_s5 + $0x958] sm:$0xff]  }
 0x379   : > { %6687 = vmatprep.mubr.bf16.mxu1 %v3135_v9  ;;  %11366 = vmatprep.subr.bf16.mxu0 %v12212_v55  ;;  %v12223_v9 = vld [vmem:[%s17416_s5 + $0x9a0] sm:$0xff]   ;;  %v12225_v55 = vld [vmem:[%s17416_s5 + $0x9d8] sm:$0xff]  }
 0x37a   : > { %11388 = vmatprep.subr.bf16.mxu1 %v12213_v29  ;;  %v12226_v29 = vld [vmem:[%s17416_s5 + $0x918] sm:$0xff]  }
 0x37b   : > { %11367 = vmatpush3.bf16.msra.mxu0 %v12214_v49  ;;  %v12227_v49 = vld [vmem:[%s17416_s5 + $0x998] sm:$0xff]  }
 0x37c   : > { %11389 = vmatpush3.bf16.msra.mxu1 %v12215_v62  ;;  %11368 = vmatprep.subr.bf16.mxu0 %v12216_v45  ;;  %v12228_v62 = vld [vmem:[%s17416_s5 + $0x950] sm:$0xff]  }
 0x37d   : > { %11390 = vmatprep.subr.bf16.mxu1 %v12217_v26  ;;  %v12229_v45 = vld [vmem:[%s17416_s5 + $0x9d0] sm:$0xff]  }
 0x37e   : > { %v12230_v26 = vld [vmem:[%s17416_s5 + $0x910] sm:$0xff]  }
 0x37f   : > { %11369 = vmatpush3.bf16.msra.mxu0 %v12218_v63  ;;  %v12231_v63 = vld [vmem:[%s17416_s5 + $0x990] sm:$0xff]  }
 0x380   : > { %11391 = vmatpush3.bf16.msra.mxu1 %v12219_v37  ;;  %11370 = vmatprep.subr.bf16.mxu0 %v12220_v19  ;;  %v12232_v37 = vld [vmem:[%s17416_s5 + $0x948] sm:$0xff]  }
 0x381   : > { %11392 = vmatprep.subr.bf16.mxu1 %v12221_v33  ;;  %v12233_v19 = vld [vmem:[%s17416_s5 + $0x9c8] sm:$0xff]  }
 0x382   : > { %v12234_v33 = vld [vmem:[%s17416_s5 + $0x908] sm:$0xff]  }
 0x383   : > { %11371 = vmatpush3.bf16.msra.mxu0 %v12222_v47  ;;  %v3092_v47 = vmul.f32 %v14373_v25, %v14373_v25 }
 0x384   : > { %11393 = vmatpush3.bf16.msra.mxu1 %v12223_v9  ;;  %11372 = vmatprep.subr.bf16.mxu0 %v12224_v59  ;;  %v12235_v9 = vld [vmem:[%s17416_s5 + $0x988] sm:$0xff]   ;;  %v12236_v59 = vld [vmem:[%s17416_s5 + $0x940] sm:$0xff]  }
 0x385   : > { %11394 = vmatprep.subr.bf16.mxu1 %v12225_v55  ;;  %v3094_v55 = vmul.f32 %v14380_v52, %v14380_v52 }
 0x387   : > { %11373 = vmatpush3.bf16.msra.mxu0 %v12226_v29  ;;  %v12237_v29 = vld [vmem:[%s17416_s5 + $0x9c0] sm:$0xff]  }
 0x388   : > { %11395 = vmatpush3.bf16.msra.mxu1 %v12227_v49  ;;  %11374 = vmatprep.subr.bf16.mxu0 %v12228_v62  ;;  %v3052_v49 = vmul.f32 %v14384_v56, %v14384_v56  ;;  %v3054_v62 = vmul.f32 %v14390_v1, %v14390_v1  ;;  %v6751_v1 = vld [vmem:[%s17417_s6 + $0x148] sm:$0xff] }
 0x389   : > { %11396 = vmatprep.subr.bf16.mxu1 %v12229_v45  ;;  %v12238_v45 = vld [vmem:[%s17416_s5 + $0x900] sm:$0xff]   ;;  %v15608_v7 = vcombine.low %v6751_v1, %v6771_v57  ;;  %v15610_v61 = vcombine.high %v6751_v1, %v6771_v57  ;;  %v6711_v57 = vld [vmem:[%s17417_s6 + $0x8] sm:$0xff] }
 0x38a   : > { %v6731_v1 = vld [vmem:[%s17417_s6 + $0xa8] sm:$0xff] }
 0x38b   : > { %11375 = vmatpush3.bf16.msra.mxu0 %v12230_v26  ;;  %v3132_v26 = vpack.c.bf16 %v3092_v47, %v3052_v49  ;;  %17771 = vst [vmem:[#allocation82_spill] sm:$0xff] %v15608_v7  ;;  %v15636_v23 = vcombine.low %v6711_v57, %v6731_v1  ;;  %v15638_v16 = vcombine.high %v6711_v57, %v6731_v1 }
 0x38c   : > { %11397 = vmatpush3.bf16.msra.mxu1 %v12231_v63  ;;  %11376 = vmatprep.subr.bf16.mxu0 %v12232_v37  ;;  %v12239_v63 = vld [vmem:[%s17416_s5 + $0x980] sm:$0xff]   ;;  %v3134_v37 = vpack.c.bf16 %v3094_v55, %v3054_v62  ;;  %v15655_v57 = vcombine.low %v6752_v36, %v6772_v51  ;;  %v15657_v1 = vcombine.high %v6752_v36, %v6772_v51 }
 0x38d   : > { %11398 = vmatprep.subr.bf16.mxu1 %v12233_v19  ;;  %v17770_v19 = vmov 0   ;;  %17774 = vst [vmem:[#allocation85_spill] sm:$0xff] %v15636_v23  ;;  %17775 = vst [vmem:[#allocation86_spill] sm:$0xff] %v15638_v16 }
 0x38e   : > { %17776 = vst [vmem:[#allocation87_spill] sm:$0xff] %v15657_v1 }
 0x38f   : > { %11377 = vmatpush3.bf16.msra.mxu0 %v12234_v33  ;;  %v15558_v33 = vpop.f32.mrf.mxu0 }
 0x390   : > { %11399 = vmatpush3.bf16.msra.mxu1 %v12235_v9  ;;  %11378 = vmatprep.subr.bf16.mxu0 %v12236_v59  ;;  %v15560_v9 = vpop.f32.mrf.mxu1 }
 0x391   : > { %11400 = vmatprep.subr.bf16.mxu1 %v12237_v29  ;;  %v15562_v59 = vpop.f32.mrf.mxu0 }
 0x392   : > { %v15564_v29 = vpop.f32.mrf.mxu1  ;;  %v10986_v31 = vadd.f32 %v15562_v59, %v15558_v33 }
 0x393   : > { %11379 = vmatpush3.bf16.msra.mxu0 %v12238_v45  ;;  %v15566_v47 = vpop.f32.mrf.mxu0  ;;  %v11008_v10 = vadd.f32 %v15564_v29, %v15560_v9 }
 0x394   : > { %11401 = vmatpush3.bf16.msra.mxu1 %v12239_v63  ;;  %v15568_v49 = vpop.f32.mrf.mxu1  ;;  %7207 = vmatprep.subr.bf16.mxu0 %v15601_v44 }
 0x395   : > { %v15570_v45 = vpop.f32.mrf.mxu0  ;;  %7250 = vmatprep.subr.bf16.mxu1 %v15610_v61 }
 0x396   : > { %6647 = vmatmul.mubr.bf16.vlgmr.msra.gmra.mxu0 %v3132_v26  ;;  %v15574_v62 = vpop.f32.mrf.mxu1 }
 0x397   : > { %6688 = vmatmul.mubr.bf16.vlgmr.msra.gmra.mxu1 %v3134_v37  ;;  %7227 = vmatprep.mubr.bf16.mxu0 %v17770_v19  ;;  %v15572_v55 = vpop.f32.mrf.mxu0 }
 0x398   : > { %7270 = vmatprep.mubr.bf16.mxu1 %v17770_v19  ;;  %v15576_v26 = vpop.f32.mrf.mxu1  ;;  %7208 = vmatpush1.bf16.msra.mxu0 %v15606_v18 }
 0x399   : > { %v15578_v63 = vpop.f32.mrf.mxu0  ;;  %7251 = vmatpush1.bf16.msra.mxu1 %v15608_v7  ;;  %7209 = vmatprep.subr.bf16.mxu0 %v15629_v28 }
 0x39a   : > { %v15580_v37 = vpop.f32.mrf.mxu1  ;;  %7252 = vmatprep.subr.bf16.mxu1 %v15638_v16  ;;  %v11030_v8 = vadd.f32 %v15578_v63, %v15572_v55 }
 0x39b   : > { %v15582_v50 = vpop.f32.mrf.mxu0  ;;  %v11052_v9 = vadd.f32 %v15580_v37, %v15576_v26 }
 0x39c   : > { %v15584_v48 = vpop.f32.mrf.mxu1  ;;  %7210 = vmatpush1.bf16.msra.mxu0 %v15634_v53  ;;  %v11011_v53 = vadd.f32 %v15574_v62, %v15568_v49 }
 0x39d   : > { %v15586_v52 = vpop.f32.mrf.mxu0  ;;  %7253 = vmatpush1.bf16.msra.mxu1 %v15636_v23  ;;  %7293 = vmatprep.subr.bf16.mxu0 %v15657_v1  ;;  %v5952_v1 = vadd.f32 %v11008_v10, %v10986_v31  ;;  %v10989_v23 = vadd.f32 %v15570_v45, %v15566_v47 }
 0x39e   : > { %v15599_v56 = vpop.f32.mrf.mxu1  ;;  %7336 = vmatprep.subr.bf16.mxu1 %v15664_v21  ;;  %v11033_v33 = vadd.f32 %v15586_v52, %v15582_v50 }
 0x39f   : > { %v15588_v25 = vpop.f32.mrf.mxu0  ;;  %v5993_v28 = vadd.f32 %v11030_v8, %v5952_v1  ;;  %v5955_v7 = vadd.f32 %v11011_v53, %v10989_v23  ;;  %v11055_v49 = vadd.f32 %v15599_v56, %v15584_v48 }
 0x3a0   : > { %v15612_v42 = vpop.f32.mrf.mxu1 }
 0x3a1   : > { %v15615_v2 = vpop.f32.mrf.mxu0  ;;  %v6034_v55 = vadd.f32 %v11052_v9, %v5993_v28  ;;  %v5996_v47 = vadd.f32 %v11033_v33, %v5955_v7 }
 0x3a2   : > { %v15640_v46 = vpop.f32.mrf.mxu1  ;;  %v11074_v29 = vadd.f32 %v15615_v2, %v15588_v25 }
 0x3a3   : > { %v11075_v3 = vpop.f32.mrf.mxu0  ;;  %v6037_v50 = vadd.f32 %v11055_v49, %v5996_v47  ;;  %v11096_v53 = vadd.f32 %v15640_v46, %v15612_v42 }
 0x3a4   : > { %v11097_v54 = vpop.f32.mrf.mxu1  ;;  %v6075_v45 = vadd.f32 %v11074_v29, %v6034_v55 }
 0x3a5   : > { %v11076_v58 = vpop.f32.mrf.mxu0 }
 0x3a6   : > { %v11098_v39 = vpop.f32.mrf.mxu1  ;;  %v11077_v8 = vadd.f32 %v11076_v58, %v11075_v3  ;;  %v6116_v23 = vadd.f32 %v11096_v53, %v6075_v45 }
 0x3a7   : > { %v11116_v43 = vpop.f32.mrf.mxu0  ;;  %v11099_v25 = vadd.f32 %v11098_v39, %v11097_v54 }
 0x3a8   : > { %v11138_v38 = vpop.f32.mrf.mxu1  ;;  %v6078_v26 = vadd.f32 %v11077_v8, %v6037_v50 }
 0x3a9   : > { %v11117_v13 = vpop.f32.mrf.mxu0 }
 0x3aa   : > { %v11139_v36 = vpop.f32.mrf.mxu1  ;;  %v11118_v52 = vadd.f32 %v11117_v13, %v11116_v43  ;;  %v6119_v33 = vadd.f32 %v11099_v25, %v6078_v26 }
 0x3ab   : > { %v11119_v51 = vpop.f32.mrf.mxu0  ;;  %v11140_v9 = vadd.f32 %v11139_v36, %v11138_v38 }
 0x3ac   : > { %v11141_v22 = vpop.f32.mrf.mxu1  ;;  %v6157_v1 = vadd.f32 %v11118_v52, %v6116_v23 }
 0x3ad   : > { %v11120_v41 = vpop.f32.mrf.mxu0 }
 0x3ae   : > { %v11142_v27 = vpop.f32.mrf.mxu1  ;;  %v11121_v28 = vadd.f32 %v11120_v41, %v11119_v51  ;;  %v6198_v58 = vadd.f32 %v11140_v9, %v6157_v1 }
 0x3af   : > { %v11143_v47 = vadd.f32 %v11142_v27, %v11141_v22 }
 0x3b0   : > { %v6160_v3 = vadd.f32 %v11121_v28, %v6119_v33 }
 0x3b2   : > { %v6201_v13 = vadd.f32 %v11143_v47, %v6160_v3 }
 0x3b6   : > { %v11160_v0 = vpop.f32.mrf.mxu0 }
 0x3b7   : > { %v11182_v15 = vpop.f32.mrf.mxu1 }
 0x3b8   : > { %v11161_v30 = vpop.f32.mrf.mxu0 }
 0x3b9   : > { %v11183_v35 = vpop.f32.mrf.mxu1  ;;  %v11162_v48 = vadd.f32 %v11161_v30, %v11160_v0 }
 0x3ba   : > { %v11163_v4 = vpop.f32.mrf.mxu0  ;;  %v11184_v43 = vadd.f32 %v11183_v35, %v11182_v15 }
 0x3bb   : > { %v11185_v34 = vpop.f32.mrf.mxu1  ;;  %v6239_v49 = vadd.f32 %v11162_v48, %v6198_v58 }
 0x3bc   : > { %v11164_v14 = vpop.f32.mrf.mxu0 }
 0x3bd   : > { %v11186_v40 = vpop.f32.mrf.mxu1  ;;  %v11165_v46 = vadd.f32 %v11164_v14, %v11163_v4  ;;  %v6280_v54 = vadd.f32 %v11184_v43, %v6239_v49 }
 0x3be   : > { %v11187_v41 = vadd.f32 %v11186_v40, %v11185_v34 }
 0x3bf   : > { %v6242_v39 = vadd.f32 %v11165_v46, %v6201_v13 }
 0x3c1   : > { %v6283_v30 = vadd.f32 %v11187_v41, %v6242_v39 }
 0x3d6   : > { %v11204_v12 = vpop.f32.mrf.mxu0 }
 0x3d7   : > { %v15668_v24 = vpop.f32.mrf.mxu1 }
 0x3d8   : > { %v11205_v17 = vpop.f32.mrf.mxu0 }
 0x3d9   : > { %v11227_v11 = vpop.f32.mrf.mxu1  ;;  %v11206_v42 = vadd.f32 %v11205_v17, %v11204_v12 }
 0x3da   : > { %v11207_v5 = vpop.f32.mrf.mxu0  ;;  %v11228_v36 = vadd.f32 %v11227_v11, %v15668_v24 }
 0x3db   : > { %v11229_v60 = vpop.f32.mrf.mxu1  ;;  %v6321_v51 = vadd.f32 %v11206_v42, %v6280_v54 }
 0x3dc   : > { %v11208_v21 = vpop.f32.mrf.mxu0 }
 0x3dd   : > { %v11230_v59 = vpop.f32.mrf.mxu1  ;;  %v11209_v50 = vadd.f32 %v11208_v21, %v11207_v5  ;;  %v6362_v22 = vadd.f32 %v11228_v36, %v6321_v51 }
 0x3de   : > { %v11231_v4 = vadd.f32 %v11230_v59, %v11229_v60 }
 0x3df   : > { %v6324_v27 = vadd.f32 %v11209_v50, %v6283_v30 }
 0x3e1   : > { %v6365_v23 = vadd.f32 %v11231_v4, %v6324_v27 }
 0x3f6   : > { %v11248_v16 = vpop.f32.mrf.mxu0 }
 0x3f7   : > { %v11270_v31 = vpop.f32.mrf.mxu1 }
 0x3f8   : > { %v11249_v10 = vpop.f32.mrf.mxu0 }
 0x3f9   : > { %v11271_v62 = vpop.f32.mrf.mxu1  ;;  %v11250_v53 = vadd.f32 %v11249_v10, %v11248_v16 }
 0x3fa   : > { %v11251_v63 = vpop.f32.mrf.mxu0  ;;  %v11272_v26 = vadd.f32 %v11271_v62, %v11270_v31 }
 0x3fb   : > { %v11273_v37 = vpop.f32.mrf.mxu1  ;;  %v6403_v15 = vadd.f32 %v11250_v53, %v6362_v22 }
 0x3fc   : > { %v11252_v2 = vpop.f32.mrf.mxu0 }
 0x3fd   : > { %v11274_v56 = vpop.f32.mrf.mxu1  ;;  %v11253_v17 = vadd.f32 %v11252_v2, %v11251_v63  ;;  %v6444_v34 = vadd.f32 %v11272_v26, %v6403_v15  ;;  %v6733_v26 = vld [vmem:[%s17417_s6 + $0xb8] sm:$0xff] }
 0x3fe   : > { %v11275_v1 = vadd.f32 %v11274_v56, %v11273_v37 }
 0x3ff   : > { %v6406_v21 = vadd.f32 %v11253_v17, %v6365_v23  ;;  %v6713_v23 = vld [vmem:[%s17417_s6 + $0x18] sm:$0xff] }
 0x401   : > { %v6447_v16 = vadd.f32 %v11275_v1, %v6406_v21  ;;  %v15709_v1 = vcombine.high %v6713_v23, %v6733_v26 }
 0x416   : > { %v11292_v7 = vpop.f32.mrf.mxu0 }
 0x417   : > { %v11314_v29 = vpop.f32.mrf.mxu1 }
 0x418   : > { %v11293_v55 = vpop.f32.mrf.mxu0 }
 0x419   : > { %v11315_v45 = vpop.f32.mrf.mxu1  ;;  %v11294_v40 = vadd.f32 %v11293_v55, %v11292_v7 }
 0x41a   : > { %v11295_v8 = vpop.f32.mrf.mxu0  ;;  %v11316_v11 = vadd.f32 %v11315_v45, %v11314_v29  ;;  %v6696_v29 = vmul.f32 0.00625, %v15138_v6 }
 0x41b   : > { %v11317_v38 = vpop.f32.mrf.mxu1  ;;  %v6485_v28 = vadd.f32 %v11294_v40, %v6444_v34 }
 0x41c   : > { %v11296_v0 = vpop.f32.mrf.mxu0  ;;  %v6700_v50 = vmul.f32 %v6696_v29, %v6696_v29 }
 0x41d   : > { %v11318_v14 = vpop.f32.mrf.mxu1  ;;  %v11297_v24 = vadd.f32 %v11296_v0, %v11295_v8  ;;  %v6526_v60 = vadd.f32 %v11316_v11, %v6485_v28  ;;  %v6754_v28 = vld [vmem:[%s17417_s6 + $0x160] sm:$0xff]  ;;  %v6775_v11 = vld [vmem:[%s17417_s6 + $0x208] sm:$0xff] }
 0x41e   : > { %v11319_v63 = vadd.f32 %v11318_v14, %v11317_v38  ;;  %v6697_v38 = vmul.f32 0.00625, %v15153_v20  ;;  %v6732_v20 = vld [vmem:[%s17417_s6 + $0xb0] sm:$0xff] }
 0x41f   : > { %v6488_v59 = vadd.f32 %v11297_v24, %v6447_v16  ;;  %v6774_v24 = vld [vmem:[%s17417_s6 + $0x200] sm:$0xff]  ;;  %v6755_v16 = vld [vmem:[%s17417_s6 + $0x168] sm:$0xff] }
 0x420   : > { %v6701_v22 = vmul.f32 %v6697_v38, %v6697_v38 }
 0x421   : > { %v6529_v62 = vadd.f32 %v11319_v63, %v6488_v59  ;;  %v15739_v59 = vcombine.high %v6755_v16, %v6775_v11  ;;  %v6714_v63 = vld [vmem:[%s17417_s6 + $0x20] sm:$0xff] }
 0x436   : > { %v11336_v52 = vpop.f32.mrf.mxu0 }
 0x437   : > { %v11358_v12 = vpop.f32.mrf.mxu1 }
 0x438   : > { %v11337_v35 = vpop.f32.mrf.mxu0 }
 0x439   : > { %v11359_v5 = vpop.f32.mrf.mxu1  ;;  %v11338_v10 = vadd.f32 %v11337_v35, %v11336_v52 }
 0x43a   : > { %v11339_v25 = vpop.f32.mrf.mxu0  ;;  %v11360_v7 = vadd.f32 %v11359_v5, %v11358_v12  ;;  %v6712_v12 = vld [vmem:[%s17417_s6 + $0x10] sm:$0xff] }
 0x43b   : > { %v11361_v33 = vpop.f32.mrf.mxu1  ;;  %v6567_v2 = vadd.f32 %v11338_v10, %v6526_v60  ;;  %v15705_v34 = vcombine.high %v6712_v12, %v6732_v20  ;;  %v15737_v60 = vcombine.high %v6754_v28, %v6774_v24 }
 0x43c   : > { %v11340_v9 = vpop.f32.mrf.mxu0 }
 0x43d   : > { %v11341_v48 = vadd.f32 %v11340_v9, %v11339_v25  ;;  %v11362_v58 = vpop.f32.mrf.mxu1  ;;  %v6608_v47 = vadd.f32 %v11360_v7, %v6567_v2  ;;  %v15733_v9 = vcombine.low %v6713_v23, %v6733_v26  ;;  %v6734_v2 = vld [vmem:[%s17417_s6 + $0xc0] sm:$0xff]  ;;  %v6780_v23 = vld [vmem:[%s17417_s6 + $0x230] sm:$0xff]  ;;  %v6761_v26 = vld [vmem:[%s17417_s6 + $0x198] sm:$0xff] }
 0x43e   : > { %v11363_v13 = vadd.f32 %v11362_v58, %v11361_v33  ;;  %v15731_v33 = vcombine.low %v6712_v12, %v6732_v20  ;;  %v6735_v58 = vld [vmem:[%s17417_s6 + $0xc8] sm:$0xff]  ;;  %v15763_v7 = vcombine.high %v6714_v63, %v6734_v2 }
 0x43f   : > { %v6570_v37 = vadd.f32 %v11341_v48, %v6529_v62  ;;  %v6715_v48 = vld [vmem:[%s17417_s6 + $0x28] sm:$0xff]  ;;  %v15759_v62 = vcombine.low %v6755_v16, %v6775_v11  ;;  %v6720_v16 = vld [vmem:[%s17417_s6 + $0x50] sm:$0xff] }
 0x440   : > { %v6740_v11 = vld [vmem:[%s17417_s6 + $0xf0] sm:$0xff] }
 0x441   : > { %v6611_v54 = vadd.f32 %v11363_v13, %v6570_v37  ;;  %v6757_v37 = vld [vmem:[%s17417_s6 + $0x178] sm:$0xff] }
 0x456   : > { %v11380_v31 = vpop.f32.mrf.mxu0 }
 0x457   : > { %v11402_v3 = vpop.f32.mrf.mxu1 }
 0x458   : > { %v11381_v55 = vpop.f32.mrf.mxu0 }
 0x459   : > { %v11382_v56 = vadd.f32 %v11381_v55, %v11380_v31  ;;  %v11403_v49 = vpop.f32.mrf.mxu1  ;;  %v15757_v31 = vcombine.low %v6754_v28, %v6774_v24  ;;  %v6756_v55 = vld [vmem:[%s17417_s6 + $0x170] sm:$0xff] }
 0x45a   : > { %v11383_v46 = vpop.f32.mrf.mxu0  ;;  %v11404_v42 = vadd.f32 %v11403_v49, %v11402_v3  ;;  %v15765_v3 = vcombine.high %v6715_v48, %v6735_v58  ;;  %v15785_v49 = vcombine.low %v6714_v63, %v6734_v2  ;;  %v6721_v63 = vld [vmem:[%s17417_s6 + $0x58] sm:$0xff] }
 0x45b   : > { %v6649_v43 = vadd.f32 %v11382_v56, %v6608_v47  ;;  %v11405_v45 = vpop.f32.mrf.mxu1  ;;  %v6776_v47 = vld [vmem:[%s17417_s6 + $0x210] sm:$0xff]  ;;  %v6777_v56 = vld [vmem:[%s17417_s6 + $0x218] sm:$0xff] }
 0x45c   : > { %v11384_v8 = vpop.f32.mrf.mxu0  ;;  %v15793_v13 = vcombine.high %v6757_v37, %v6777_v56  ;;  %v6741_v2 = vld [vmem:[%s17417_s6 + $0xf8] sm:$0xff] }
 0x45d   : > { %v6690_v39 = vadd.f32 %v11404_v42, %v6649_v43  ;;  %v11385_v41 = vadd.f32 %v11384_v8, %v11383_v46  ;;  %v11406_v51 = vpop.f32.mrf.mxu1  ;;  %v15791_v46 = vcombine.high %v6756_v55, %v6776_v47  ;;  %v6716_v43 = vld [vmem:[%s17417_s6 + $0x30] sm:$0xff]  ;;  %v6737_v8 = vld [vmem:[%s17417_s6 + $0xd8] sm:$0xff] }
 0x45e   : > { %v11407_v36 = vadd.f32 %v11406_v51, %v11405_v45  ;;  %v6736_v42 = vld [vmem:[%s17417_s6 + $0xd0] sm:$0xff]  ;;  %v6717_v45 = vld [vmem:[%s17417_s6 + $0x38] sm:$0xff] }
 0x45f   : > { %v6698_v0 = vmul.f32 0.00625, %v6690_v39  ;;  %v6652_v30 = vadd.f32 %v11385_v41, %v6611_v54  ;;  %v15811_v54 = vcombine.low %v6756_v55, %v6776_v47  ;;  %v15813_v39 = vcombine.low %v6757_v37, %v6777_v56  ;;  %v6762_v37 = vld [vmem:[%s17417_s6 + $0x1a0] sm:$0xff] }
 0x460   : > { %v15817_v41 = vcombine.high %v6716_v43, %v6736_v42  ;;  %v15819_v51 = vcombine.high %v6717_v45, %v6737_v8  ;;  %v15925_v55 = vcombine.high %v6720_v16, %v6740_v11  ;;  %v15927_v47 = vcombine.high %v6721_v63, %v6741_v2  ;;  %v6782_v56 = vld [vmem:[%s17417_s6 + $0x240] sm:$0xff] }
 0x461   : > { %v6702_v53 = vsub.f32 %v6698_v0, %v6700_v50  ;;  %v6693_v52 = vadd.f32 %v11407_v36, %v6652_v30  ;;  %v6758_v50 = vld [vmem:[%s17417_s6 + $0x180] sm:$0xff]  ;;  %v6759_v0 = vld [vmem:[%s17417_s6 + $0x188] sm:$0xff]  ;;  %v15839_v36 = vcombine.low %v6716_v43, %v6736_v42 }
 0x462   : > { %v6779_v30 = vld [vmem:[%s17417_s6 + $0x228] sm:$0xff] }
 0x463   : > { %v6704_v6 = vmax.f32 %v6702_v53, 0.0  ;;  %v6699_v27 = vmul.f32 0.00625, %v6693_v52  ;;  %v15841_v53 = vcombine.low %v6717_v45, %v6737_v8  ;;  %v6763_v43 = vld [vmem:[%s17417_s6 + $0x1a8] sm:$0xff]  ;;  %v15947_v45 = vcombine.low %v6720_v16, %v6740_v11  ;;  %v6765_v16 = vld [vmem:[%s17417_s6 + $0x1b8] sm:$0xff] }
 0x464   : > { %v6783_v42 = vld [vmem:[%s17417_s6 + $0x248] sm:$0xff]  ;;  %v15949_v8 = vcombine.low %v6721_v63, %v6741_v2  ;;  %v6785_v11 = vld [vmem:[%s17417_s6 + $0x258] sm:$0xff] }
 0x465   : > { %v6706_v14 = vadd.f32 1e-05, %v6704_v6  ;;  %v6703_v4 = vsub.f32 %v6699_v27, %v6701_v22  ;;  %v15847_v22 = vcombine.high %v6759_v0, %v6779_v30  ;;  %v6718_v6 = vld [vmem:[%s17417_s6 + $0x40] sm:$0xff] }
 0x466   : > { %v6738_v27 = vld [vmem:[%s17417_s6 + $0xe0] sm:$0xff] }
 0x467   : > { %v6705_v15 = vmax.f32 %v6703_v4, 0.0  ;;  %11756 = vrsqrt.f32 %v6706_v14  ;;  %v6719_v14 = vld [vmem:[%s17417_s6 + $0x48] sm:$0xff]  ;;  %v15871_v12 = vcombine.high %v6718_v6, %v6738_v27 }
 0x468   : > { %v6739_v4 = vld [vmem:[%s17417_s6 + $0xe8] sm:$0xff] }
 0x469   : > { %v6707_v17 = vadd.f32 1e-05, %v6705_v15  ;;  %v15873_v20 = vcombine.high %v6719_v14, %v6739_v4 }
 0x46b   : > { %11758 = vrsqrt.f32 %v6707_v17  ;;  %v15867_v17 = vcombine.low %v6759_v0, %v6779_v30  ;;  %v6722_v0 = vld [vmem:[%s17417_s6 + $0x60] sm:$0xff] }
 0x46c   : > { %v6742_v30 = vld [vmem:[%s17417_s6 + $0x100] sm:$0xff] }
 0x46d   : > { %v16001_v63 = vcombine.low %v6722_v0, %v6742_v30 }
 0x46f   : > { %17781 = vst [vmem:[#allocation92_spill] sm:$0xff] %v16001_v63 }
 0x474   : > { %v11757_v35 = vpop.eup %11756 }
 0x475   : > { %v8055_v21 = vmul.f32 %v11757_v35, %v6696_v29  ;;  %v15787_v29 = vcombine.low %v6715_v48, %v6735_v58 }
 0x478   : > { %v11759_v40 = vpop.eup %11758 }
 0x479   : > { %v15707_v5 = vpack.c.bf16 %v11759_v40, %v11757_v35  ;;  %v8056_v25 = vmul.f32 %v11759_v40, %v6697_v38  ;;  %v6778_v38 = vld [vmem:[%s17417_s6 + $0x220] sm:$0xff]  ;;  %v6760_v35 = vld [vmem:[%s17417_s6 + $0x190] sm:$0xff]  ;;  %v6781_v40 = vld [vmem:[%s17417_s6 + $0x238] sm:$0xff] }
 0x47a   : > { %v15845_v52 = vcombine.high %v6758_v50, %v6778_v38  ;;  %v15865_v15 = vcombine.low %v6758_v50, %v6778_v38  ;;  %v15899_v28 = vcombine.high %v6760_v35, %v6780_v23  ;;  %v15901_v24 = vcombine.high %v6761_v26, %v6781_v40 }
 0x47b   : > { %v15723_v10 = vpack.c.bf16 %v8056_v25, %v8055_v21  ;;  %10486 = vmatmul.mubr.msk.bf16.vlgmr.msra.gmra.mxu0 %vm7191_vm1, %v15707_v5  ;;  %10487 = vmatmul.mubr.msk.bf16.vlgmr.msra.gmra.mxu1 %vm7191_vm1, %v15707_v5  ;;  %v15893_v21 = vcombine.low %v6718_v6, %v6738_v27  ;;  %v15895_v25 = vcombine.low %v6719_v14, %v6739_v4  ;;  %v6723_v6 = vld [vmem:[%s17417_s6 + $0x68] sm:$0xff] }
 0x47c   : > { %7294 = vmatpush1.bf16.msra.mxu0 %v15655_v57  ;;  %7337 = vmatpush1.bf16.msra.mxu1 %v15662_v32  ;;  %v15919_v48 = vcombine.low %v6760_v35, %v6780_v23  ;;  %v15921_v58 = vcombine.low %v6761_v26, %v6781_v40  ;;  %v15953_v50 = vcombine.high %v6762_v37, %v6782_v56  ;;  %v6743_v27 = vld [vmem:[%s17417_s6 + $0x108] sm:$0xff]  ;;  %v6764_v26 = vld [vmem:[%s17417_s6 + $0x1b0] sm:$0xff] }
 0x47d   : > { %7295 = vmatprep.subr.bf16.mxu0 %v15705_v34  ;;  %7338 = vmatprep.subr.bf16.mxu1 %v15709_v1  ;;  %v15955_v38 = vcombine.high %v6763_v43, %v6783_v42  ;;  %v15973_v14 = vcombine.low %v6762_v37, %v6782_v56  ;;  %v15975_v4 = vcombine.low %v6763_v43, %v6783_v42  ;;  %v6784_v40 = vld [vmem:[%s17417_s6 + $0x250] sm:$0xff] }
 0x47e   : > { %7313 = vmatprep.mubr.bf16.mxu0 %v17770_v19  ;;  %7356 = vmatprep.mubr.bf16.mxu1 %v17770_v19  ;;  %v15979_v35 = vcombine.high %v6722_v0, %v6742_v30  ;;  %v15981_v23 = vcombine.high %v6723_v6, %v6743_v27  ;;  %v16003_v2 = vcombine.low %v6723_v6, %v6743_v27  ;;  %v6724_v43 = vld [vmem:[%s17417_s6 + $0x70] sm:$0xff]  ;;  %v6725_v0 = vld [vmem:[%s17417_s6 + $0x78] sm:$0xff] }
 0x47f   : > { %17778 = vst [vmem:[#allocation89_spill] sm:$0xff] %v15975_v4  ;;  %v16007_v37 = vcombine.high %v6764_v26, %v6784_v40  ;;  %v16009_v56 = vcombine.high %v6765_v16, %v6785_v11  ;;  %v6744_v42 = vld [vmem:[%s17417_s6 + $0x110] sm:$0xff]  ;;  %v6745_v30 = vld [vmem:[%s17417_s6 + $0x118] sm:$0xff]  ;;  %v16027_v6 = vcombine.low %v6764_v26, %v6784_v40  ;;  %v16029_v27 = vcombine.low %v6765_v16, %v6785_v11  ;;  %v6767_v26 = vld [vmem:[%s17417_s6 + $0x1c8] sm:$0xff] }
 0x480   : > { %7296 = vmatpush1.bf16.msra.mxu0 %v15731_v33  ;;  %7339 = vmatpush1.bf16.msra.mxu1 %v15733_v9  ;;  %17779 = vst [vmem:[#allocation90_spill] sm:$0xff] %v15979_v35  ;;  %17780 = vst [vmem:[#allocation91_spill] sm:$0xff] %v15981_v23  ;;  %v6787_v40 = vld [vmem:[%s17417_s6 + $0x268] sm:$0xff]  ;;  %v16055_v16 = vcombine.low %v6724_v43, %v6744_v42  ;;  %v16057_v11 = vcombine.low %v6725_v0, %v6745_v30 }
 0x481   : > { %7379 = vmatprep.subr.bf16.mxu0 %v15737_v60  ;;  %7422 = vmatprep.subr.bf16.mxu1 %v15739_v59  ;;  %17782 = vst [vmem:[#allocation93_spill] sm:$0xff] %v16003_v2  ;;  %17783 = vst [vmem:[#allocation94_spill] sm:$0xff] %v16007_v37 }
 0x482   : > { %17784 = vst [vmem:[#allocation95_spill] sm:$0xff] %v16009_v56  ;;  %17785 = vst [vmem:[#allocation96_spill] sm:$0xff] %v16027_v6 }
 0x483   : > { %10488 = vmatmul.mubr.msk.bf16.vlgmr.msra.gmra.mxu0 %vm7191_vm1, %v15707_v5  ;;  %10489 = vmatmul.mubr.msk.bf16.vlgmr.msra.gmra.mxu1 %vm7191_vm1, %v15707_v5  ;;  %17786 = vst [vmem:[#allocation97_spill] sm:$0xff] %v16029_v27  ;;  %17789 = vst [vmem:[#allocation100_spill] sm:$0xff] %v16055_v16 }
 0x484   : > { %7380 = vmatpush1.bf16.msra.mxu0 %v15757_v31  ;;  %7423 = vmatpush1.bf16.msra.mxu1 %v15759_v62  ;;  %17790 = vst [vmem:[#allocation101_spill] sm:$0xff] %v16057_v11 }
 0x485   : > { %7381 = vmatprep.subr.bf16.mxu0 %v15763_v7  ;;  %7424 = vmatprep.subr.bf16.mxu1 %v15765_v3 }
 0x486   : > { %7399 = vmatprep.mubr.bf16.mxu0 %v17770_v19  ;;  %7442 = vmatprep.mubr.bf16.mxu1 %v17770_v19 }
 0x488   : > { %7382 = vmatpush1.bf16.msra.mxu0 %v15785_v49  ;;  %7425 = vmatpush1.bf16.msra.mxu1 %v15787_v29 }
 0x489   : > { %7465 = vmatprep.subr.bf16.mxu0 %v15791_v46  ;;  %7508 = vmatprep.subr.bf16.mxu1 %v15793_v13 }
 0x48b   : > { %10490 = vmatmul.mubr.msk.bf16.vlgmr.msra.gmra.mxu0 %vm7191_vm1, %v15707_v5  ;;  %10491 = vmatmul.mubr.msk.bf16.vlgmr.msra.gmra.mxu1 %vm7191_vm1, %v15707_v5 }
 0x48c   : > { %7466 = vmatpush1.bf16.msra.mxu0 %v15811_v54  ;;  %7509 = vmatpush1.bf16.msra.mxu1 %v15813_v39 }
 0x48d   : > { %7467 = vmatprep.subr.bf16.mxu0 %v15817_v41  ;;  %7510 = vmatprep.subr.bf16.mxu1 %v15819_v51 }
 0x48e   : > { %7485 = vmatprep.mubr.bf16.mxu0 %v17770_v19  ;;  %7528 = vmatprep.mubr.bf16.mxu1 %v17770_v19 }
 0x490   : > { %7468 = vmatpush1.bf16.msra.mxu0 %v15839_v36  ;;  %7511 = vmatpush1.bf16.msra.mxu1 %v15841_v53 }
 0x491   : > { %7551 = vmatprep.subr.bf16.mxu0 %v15845_v52  ;;  %7594 = vmatprep.subr.bf16.mxu1 %v15847_v22 }
 0x493   : > { %10492 = vmatmul.mubr.msk.bf16.vlgmr.msra.gmra.mxu0 %vm7191_vm1, %v15707_v5  ;;  %10493 = vmatmul.mubr.msk.bf16.vlgmr.msra.gmra.mxu1 %vm7191_vm1, %v15707_v5 }
 0x494   : > { %7552 = vmatpush1.bf16.msra.mxu0 %v15865_v15  ;;  %7595 = vmatpush1.bf16.msra.mxu1 %v15867_v17 }
 0x495   : > { %7553 = vmatprep.subr.bf16.mxu0 %v15871_v12  ;;  %7596 = vmatprep.subr.bf16.mxu1 %v15873_v20 }
 0x496   : > { %7571 = vmatprep.mubr.bf16.mxu0 %v17770_v19  ;;  %7614 = vmatprep.mubr.bf16.mxu1 %v17770_v19 }
 0x498   : > { %7554 = vmatpush1.bf16.msra.mxu0 %v15893_v21  ;;  %7597 = vmatpush1.bf16.msra.mxu1 %v15895_v25 }
 0x499   : > { %7637 = vmatprep.subr.bf16.mxu0 %v15899_v28  ;;  %7680 = vmatprep.subr.bf16.mxu1 %v15901_v24 }
 0x49b   : > { %10494 = vmatmul.mubr.msk.bf16.vlgmr.msra.gmra.mxu0 %vm7191_vm1, %v15707_v5  ;;  %10495 = vmatmul.mubr.msk.bf16.vlgmr.msra.gmra.mxu1 %vm7191_vm1, %v15707_v5 }
 0x49c   : > { %7638 = vmatpush1.bf16.msra.mxu0 %v15919_v48  ;;  %7681 = vmatpush1.bf16.msra.mxu1 %v15921_v58 }
 0x49d   : > { %7639 = vmatprep.subr.bf16.mxu0 %v15925_v55  ;;  %7682 = vmatprep.subr.bf16.mxu1 %v15927_v47 }
 0x49e   : > { %7657 = vmatprep.mubr.bf16.mxu0 %v17770_v19  ;;  %7700 = vmatprep.mubr.bf16.mxu1 %v17770_v19 }
 0x4a0   : > { %7640 = vmatpush1.bf16.msra.mxu0 %v15947_v45  ;;  %7683 = vmatpush1.bf16.msra.mxu1 %v15949_v8 }
 0x4a1   : > { %7723 = vmatprep.subr.bf16.mxu0 %v15953_v50  ;;  %7766 = vmatprep.subr.bf16.mxu1 %v15955_v38 }
 0x4a3   : > { %10496 = vmatmul.mubr.msk.bf16.vlgmr.msra.gmra.mxu0 %vm7191_vm1, %v15707_v5  ;;  %10497 = vmatmul.mubr.msk.bf16.vlgmr.msra.gmra.mxu1 %vm7191_vm1, %v15707_v5 }
 0x4a4   : > { %7724 = vmatpush1.bf16.msra.mxu0 %v15973_v14  ;;  %7767 = vmatpush1.bf16.msra.mxu1 %v15975_v4  ;;  %v6766_v4 = vld [vmem:[%s17417_s6 + $0x1c0] sm:$0xff] }
 0x4a5   : > { %7725 = vmatprep.subr.bf16.mxu0 %v15979_v35  ;;  %7768 = vmatprep.subr.bf16.mxu1 %v15981_v23  ;;  %v16033_v23 = vcombine.high %v6724_v43, %v6744_v42  ;;  %v16035_v35 = vcombine.high %v6725_v0, %v6745_v30  ;;  %v6746_v43 = vld [vmem:[%s17417_s6 + $0x120] sm:$0xff]  ;;  %v6727_v42 = vld [vmem:[%s17417_s6 + $0x88] sm:$0xff] }
 0x4a6   : > { %7743 = vmatprep.mubr.bf16.mxu0 %v17770_v19  ;;  %7786 = vmatprep.mubr.bf16.mxu1 %v17770_v19  ;;  %v6747_v0 = vld [vmem:[%s17417_s6 + $0x128] sm:$0xff] }
 0x4a7   : > { %17787 = vst [vmem:[#allocation98_spill] sm:$0xff] %v16033_v23  ;;  %17788 = vst [vmem:[#allocation99_spill] sm:$0xff] %v16035_v35 }
 0x4a8   : > { %7726 = vmatpush1.bf16.msra.mxu0 %v16001_v63  ;;  %7769 = vmatpush1.bf16.msra.mxu1 %v16003_v2  ;;  %v6786_v2 = vld [vmem:[%s17417_s6 + $0x260] sm:$0xff] }
 0x4a9   : > { %7809 = vmatprep.subr.bf16.mxu0 %v16007_v37  ;;  %7852 = vmatprep.subr.bf16.mxu1 %v16009_v56  ;;  %v16061_v56 = vcombine.high %v6766_v4, %v6786_v2  ;;  %v16063_v37 = vcombine.high %v6767_v26, %v6787_v40  ;;  %v6726_v63 = vld [vmem:[%s17417_s6 + $0x80] sm:$0xff]  ;;  %v16081_v30 = vcombine.low %v6766_v4, %v6786_v2  ;;  %v6769_v4 = vld [vmem:[%s17417_s6 + $0x1d8] sm:$0xff] }
 0x4aa   : > { %v6789_v2 = vld [vmem:[%s17417_s6 + $0x278] sm:$0xff] }
 0x4ab   : > { %10498 = vmatmul.mubr.msk.bf16.vlgmr.msra.gmra.mxu0 %vm7191_vm1, %v15707_v5  ;;  %10499 = vmatmul.mubr.msk.bf16.vlgmr.msra.gmra.mxu1 %vm7191_vm1, %v15707_v5  ;;  %17791 = vst [vmem:[#allocation102_spill] sm:$0xff] %v16061_v56  ;;  %17792 = vst [vmem:[#allocation103_spill] sm:$0xff] %v16063_v37 }
 0x4ac   : > { %7810 = vmatpush1.bf16.msra.mxu0 %v16027_v6  ;;  %7853 = vmatpush1.bf16.msra.mxu1 %v16029_v27  ;;  %v16089_v27 = vcombine.high %v6727_v42, %v6747_v0  ;;  %v6768_v6 = vld [vmem:[%s17417_s6 + $0x1d0] sm:$0xff] }
 0x4ad   : > { %7811 = vmatprep.subr.bf16.mxu0 %v16033_v23  ;;  %7854 = vmatprep.subr.bf16.mxu1 %v16035_v35  ;;  %v16083_v35 = vcombine.low %v6767_v26, %v6787_v40  ;;  %v16087_v23 = vcombine.high %v6726_v63, %v6746_v43  ;;  %v16109_v26 = vcombine.low %v6726_v63, %v6746_v43  ;;  %v6748_v63 = vld [vmem:[%s17417_s6 + $0x130] sm:$0xff]  ;;  %v6729_v43 = vld [vmem:[%s17417_s6 + $0x98] sm:$0xff] }
 0x4ae   : > { %7829 = vmatprep.mubr.bf16.mxu0 %v17770_v19  ;;  %7872 = vmatprep.mubr.bf16.mxu1 %v17770_v19  ;;  %17795 = vst [vmem:[#allocation106_spill] sm:$0xff] %v16089_v27  ;;  %v16111_v40 = vcombine.low %v6727_v42, %v6747_v0  ;;  %v6749_v42 = vld [vmem:[%s17417_s6 + $0x138] sm:$0xff] }
 0x4af   : > { %17793 = vst [vmem:[#allocation104_spill] sm:$0xff] %v16083_v35  ;;  %17794 = vst [vmem:[#allocation105_spill] sm:$0xff] %v16087_v23 }
 0x4b0   : > { %7812 = vmatpush1.bf16.msra.mxu0 %v16055_v16  ;;  %7855 = vmatpush1.bf16.msra.mxu1 %v16057_v11  ;;  %v6788_v11 = vld [vmem:[%s17417_s6 + $0x270] sm:$0xff] }
 0x4b1   : > { %7895 = vmatprep.subr.bf16.mxu0 %v16061_v56  ;;  %7938 = vmatprep.subr.bf16.mxu1 %v16063_v37  ;;  %v16115_v37 = vcombine.high %v6768_v6, %v6788_v11  ;;  %v16117_v56 = vcombine.high %v6769_v4, %v6789_v2  ;;  %v6728_v16 = vld [vmem:[%s17417_s6 + $0x90] sm:$0xff]  ;;  %v16135_v0 = vcombine.low %v6768_v6, %v6788_v11 }
 0x4b2   : > { %v16151_v6 = vcombine.low %v6728_v16, %v6748_v63  ;;  %v16153_v11 = vcombine.low %v6729_v43, %v6749_v42 }
 0x4b3   : > { %10500 = vmatmul.mubr.msk.bf16.vlgmr.msra.gmra.mxu0 %vm7191_vm1, %v15707_v5  ;;  %10501 = vmatmul.mubr.msk.bf16.vlgmr.msra.gmra.mxu1 %vm7191_vm1, %v15707_v5 }
 0x4b4   : > { %7896 = vmatpush1.bf16.msra.mxu0 %v16081_v30  ;;  %7939 = vmatpush1.bf16.msra.mxu1 %v16083_v35  ;;  %v16143_v35 = vcombine.high %v6729_v43, %v6749_v42  ;;  %v17802_v43 = vld [vmem:[#allocation88_spill] sm:$0xff] }
 0x4b5   : > { %7897 = vmatprep.subr.bf16.mxu0 %v16087_v23  ;;  %7940 = vmatprep.subr.bf16.mxu1 %v16089_v27  ;;  %v16137_v27 = vcombine.low %v6769_v4, %v6789_v2  ;;  %v16141_v23 = vcombine.high %v6728_v16, %v6748_v63  ;;  %v17796_v16 = vld [vmem:[#allocation82_spill] sm:$0xff]  ;;  %v17797_v4 = vld [vmem:[#allocation83_spill] sm:$0xff] }
 0x4b6   : > { %7915 = vmatprep.mubr.bf16.mxu0 %v17770_v19  ;;  %7958 = vmatprep.mubr.bf16.mxu1 %v17770_v19  ;;  %v17798_v2 = vld [vmem:[#allocation86_spill] sm:$0xff]  ;;  %v17801_v63 = vld [vmem:[#allocation87_spill] sm:$0xff] }
 0x4b8   : > { %7898 = vmatpush1.bf16.msra.mxu0 %v16109_v26  ;;  %7941 = vmatpush1.bf16.msra.mxu1 %v16111_v40 }
 0x4b9   : > { %7981 = vmatprep.subr.bf16.mxu0 %v16115_v37  ;;  %8024 = vmatprep.subr.bf16.mxu1 %v16117_v56 }
 0x4bb   : > { %10502 = vmatmul.mubr.msk.bf16.vlgmr.msra.gmra.mxu0 %vm7191_vm1, %v15707_v5  ;;  %10503 = vmatmul.mubr.msk.bf16.vlgmr.msra.gmra.mxu1 %vm7191_vm1, %v15707_v5 }
 0x4bc   : > { %7982 = vmatpush1.bf16.msra.mxu0 %v16135_v0  ;;  %8025 = vmatpush1.bf16.msra.mxu1 %v16137_v27 }
 0x4bd   : > { %7983 = vmatprep.subr.bf16.mxu0 %v16141_v23  ;;  %8026 = vmatprep.subr.bf16.mxu1 %v16143_v35 }
 0x4be   : > { %8001 = vmatprep.mubr.bf16.mxu0 %v17770_v19  ;;  %8044 = vmatprep.mubr.bf16.mxu1 %v17770_v19 }
 0x4c0   : > { %7984 = vmatpush1.bf16.msra.mxu0 %v16151_v6  ;;  %8027 = vmatpush1.bf16.msra.mxu1 %v16153_v11 }
 0x4c1   : > { %8073 = vmatprep.subr.bf16.mxu0 %v15601_v44  ;;  %8116 = vmatprep.subr.bf16.mxu1 %v15610_v61  ;;  %v17799_v44 = vld [vmem:[#allocation84_spill] sm:$0xff]  ;;  %v17800_v61 = vld [vmem:[#allocation85_spill] sm:$0xff] }
 0x4c3   : > { %10504 = vmatmul.mubr.msk.bf16.vlgmr.msra.gmra.mxu0 %vm7191_vm1, %v15707_v5  ;;  %10505 = vmatmul.mubr.msk.bf16.vlgmr.msra.gmra.mxu1 %vm7191_vm1, %v15707_v5  ;;  %v17807_v5 = vld [vmem:[#allocation93_spill] sm:$0xff] }
 0x4c4   : > { %8074 = vmatpush1.bf16.msra.mxu0 %v15606_v18  ;;  %8117 = vmatpush1.bf16.msra.mxu1 %v17796_v16  ;;  %v17804_v18 = vld [vmem:[#allocation90_spill] sm:$0xff] }
 0x4c5   : > { %8075 = vmatprep.subr.bf16.mxu0 %v17797_v4  ;;  %8118 = vmatprep.subr.bf16.mxu1 %v17798_v2 }
 0x4c6   : > { %8093 = vmatprep.mubr.bf16.mxu0 %v17770_v19  ;;  %8136 = vmatprep.mubr.bf16.mxu1 %v17770_v19 }
 0x4c8   : > { %8076 = vmatpush1.bf16.msra.mxu0 %v17799_v44  ;;  %8119 = vmatpush1.bf16.msra.mxu1 %v17800_v61 }
 0x4c9   : > { %8159 = vmatprep.subr.bf16.mxu0 %v17801_v63  ;;  %8202 = vmatprep.subr.bf16.mxu1 %v17802_v43  ;;  %v9091_v63 = vlaneseq }
 0x4cb   : > { %10506 = vmatmul.mubr.msk.bf16.vlgmr.msra.gmra.mxu0 %vm7191_vm1, %v15723_v10  ;;  %10507 = vmatmul.mubr.msk.bf16.vlgmr.msra.gmra.mxu1 %vm7191_vm1, %v15723_v10 }
 0x4cc   : > { %8160 = vmatpush1.bf16.msra.mxu0 %v15655_v57  ;;  %8203 = vmatpush1.bf16.msra.mxu1 %v15662_v32  ;;  %v17803_v32 = vld [vmem:[#allocation89_spill] sm:$0xff]  ;;  %v17805_v57 = vld [vmem:[#allocation91_spill] sm:$0xff] }
 0x4cd   : > { %8161 = vmatprep.subr.bf16.mxu0 %v15705_v34  ;;  %8204 = vmatprep.subr.bf16.mxu1 %v15709_v1  ;;  %v17806_v34 = vld [vmem:[#allocation92_spill] sm:$0xff]  ;;  %v17808_v1 = vld [vmem:[#allocation94_spill] sm:$0xff] }
 0x4ce   : > { %8179 = vmatprep.mubr.bf16.mxu0 %v17770_v19  ;;  %8222 = vmatprep.mubr.bf16.mxu1 %v17770_v19 }
 0x4d0   : > { %8162 = vmatpush1.bf16.msra.mxu0 %v15731_v33  ;;  %8205 = vmatpush1.bf16.msra.mxu1 %v15733_v9  ;;  %v17809_v33 = vld [vmem:[#allocation95_spill] sm:$0xff]  ;;  %v17810_v9 = vld [vmem:[#allocation96_spill] sm:$0xff] }
 0x4d1   : > { %8245 = vmatprep.subr.bf16.mxu0 %v15737_v60  ;;  %8288 = vmatprep.subr.bf16.mxu1 %v15739_v59  ;;  %v17811_v60 = vld [vmem:[#allocation97_spill] sm:$0xff]  ;;  %v17812_v59 = vld [vmem:[#allocation98_spill] sm:$0xff] }
 0x4d3   : > { %10508 = vmatmul.mubr.msk.bf16.vlgmr.msra.gmra.mxu0 %vm7191_vm1, %v15723_v10  ;;  %10509 = vmatmul.mubr.msk.bf16.vlgmr.msra.gmra.mxu1 %vm7191_vm1, %v15723_v10 }
 0x4d4   : > { %8246 = vmatpush1.bf16.msra.mxu0 %v15757_v31  ;;  %8289 = vmatpush1.bf16.msra.mxu1 %v15759_v62  ;;  %v17813_v31 = vld [vmem:[#allocation99_spill] sm:$0xff]  ;;  %v17814_v62 = vld [vmem:[#allocation100_spill] sm:$0xff] }
 0x4d5   : > { %8247 = vmatprep.subr.bf16.mxu0 %v15763_v7  ;;  %8290 = vmatprep.subr.bf16.mxu1 %v15765_v3  ;;  %v17815_v7 = vld [vmem:[#allocation101_spill] sm:$0xff]  ;;  %v17816_v3 = vld [vmem:[#allocation102_spill] sm:$0xff] }
 0x4d6   : > { %8265 = vmatprep.mubr.bf16.mxu0 %v17770_v19  ;;  %8308 = vmatprep.mubr.bf16.mxu1 %v17770_v19 }
 0x4d8   : > { %8248 = vmatpush1.bf16.msra.mxu0 %v15785_v49  ;;  %8291 = vmatpush1.bf16.msra.mxu1 %v15787_v29  ;;  %v17817_v49 = vld [vmem:[#allocation103_spill] sm:$0xff]  ;;  %v17818_v29 = vld [vmem:[#allocation104_spill] sm:$0xff] }
 0x4d9   : > { %8331 = vmatprep.subr.bf16.mxu0 %v15791_v46  ;;  %8374 = vmatprep.subr.bf16.mxu1 %v15793_v13  ;;  %v17819_v46 = vld [vmem:[#allocation105_spill] sm:$0xff]  ;;  %v17820_v13 = vld [vmem:[#allocation106_spill] sm:$0xff] }
 0x4db   : > { %10510 = vmatmul.mubr.msk.bf16.vlgmr.msra.gmra.mxu0 %vm7191_vm1, %v15723_v10  ;;  %10511 = vmatmul.mubr.msk.bf16.vlgmr.msra.gmra.mxu1 %vm7191_vm1, %v15723_v10 }
 0x4dc   : > { %8332 = vmatpush1.bf16.msra.mxu0 %v15811_v54  ;;  %8375 = vmatpush1.bf16.msra.mxu1 %v15813_v39 }
 0x4dd   : > { %8333 = vmatprep.subr.bf16.mxu0 %v15817_v41  ;;  %8376 = vmatprep.subr.bf16.mxu1 %v15819_v51 }
 0x4de   : > { %8351 = vmatprep.mubr.bf16.mxu0 %v17770_v19  ;;  %8394 = vmatprep.mubr.bf16.mxu1 %v17770_v19 }
 0x4e0   : > { %8334 = vmatpush1.bf16.msra.mxu0 %v15839_v36  ;;  %8377 = vmatpush1.bf16.msra.mxu1 %v15841_v53 }
 0x4e1   : > { %8417 = vmatprep.subr.bf16.mxu0 %v15845_v52  ;;  %8460 = vmatprep.subr.bf16.mxu1 %v15847_v22 }
 0x4e3   : > { %10512 = vmatmul.mubr.msk.bf16.vlgmr.msra.gmra.mxu0 %vm7191_vm1, %v15723_v10  ;;  %10513 = vmatmul.mubr.msk.bf16.vlgmr.msra.gmra.mxu1 %vm7191_vm1, %v15723_v10 }
 0x4e4   : > { %8418 = vmatpush1.bf16.msra.mxu0 %v15865_v15  ;;  %8461 = vmatpush1.bf16.msra.mxu1 %v15867_v17 }
 0x4e5   : > { %8419 = vmatprep.subr.bf16.mxu0 %v15871_v12  ;;  %8462 = vmatprep.subr.bf16.mxu1 %v15873_v20 }
 0x4e6   : > { %8437 = vmatprep.mubr.bf16.mxu0 %v17770_v19  ;;  %8480 = vmatprep.mubr.bf16.mxu1 %v17770_v19 }
 0x4e8   : > { %8420 = vmatpush1.bf16.msra.mxu0 %v15893_v21  ;;  %8463 = vmatpush1.bf16.msra.mxu1 %v15895_v25 }
 0x4e9   : > { %8503 = vmatprep.subr.bf16.mxu0 %v15899_v28  ;;  %8546 = vmatprep.subr.bf16.mxu1 %v15901_v24 }
 0x4eb   : > { %10514 = vmatmul.mubr.msk.bf16.vlgmr.msra.gmra.mxu0 %vm7191_vm1, %v15723_v10  ;;  %10515 = vmatmul.mubr.msk.bf16.vlgmr.msra.gmra.mxu1 %vm7191_vm1, %v15723_v10 }
 0x4ec   : > { %8504 = vmatpush1.bf16.msra.mxu0 %v15919_v48  ;;  %8547 = vmatpush1.bf16.msra.mxu1 %v15921_v58 }
 0x4ed   : > { %8505 = vmatprep.subr.bf16.mxu0 %v15925_v55  ;;  %8548 = vmatprep.subr.bf16.mxu1 %v15927_v47 }
 0x4ee   : > { %8523 = vmatprep.mubr.bf16.mxu0 %v17770_v19  ;;  %8566 = vmatprep.mubr.bf16.mxu1 %v17770_v19 }
 0x4f0   : > { %8506 = vmatpush1.bf16.msra.mxu0 %v15947_v45  ;;  %8549 = vmatpush1.bf16.msra.mxu1 %v15949_v8 }
 0x4f1   : > { %8589 = vmatprep.subr.bf16.mxu0 %v15953_v50  ;;  %8632 = vmatprep.subr.bf16.mxu1 %v15955_v38 }
 0x4f3   : > { %10516 = vmatmul.mubr.msk.bf16.vlgmr.msra.gmra.mxu0 %vm7191_vm1, %v15723_v10  ;;  %10517 = vmatmul.mubr.msk.bf16.vlgmr.msra.gmra.mxu1 %vm7191_vm1, %v15723_v10 }
 0x4f4   : > { %8590 = vmatpush1.bf16.msra.mxu0 %v15973_v14  ;;  %8633 = vmatpush1.bf16.msra.mxu1 %v17803_v32 }
 0x4f5   : > { %8591 = vmatprep.subr.bf16.mxu0 %v17804_v18  ;;  %8634 = vmatprep.subr.bf16.mxu1 %v17805_v57 }
 0x4f6   : > { %8609 = vmatprep.mubr.bf16.mxu0 %v17770_v19  ;;  %8652 = vmatprep.mubr.bf16.mxu1 %v17770_v19 }
 0x4f8   : > { %8592 = vmatpush1.bf16.msra.mxu0 %v17806_v34  ;;  %8635 = vmatpush1.bf16.msra.mxu1 %v17807_v5  ;;  %v9092_v34 = vshrl.u32 %v9091_v63, 7 }
 0x4f9   : > { %8675 = vmatprep.subr.bf16.mxu0 %v17808_v1  ;;  %8718 = vmatprep.subr.bf16.mxu1 %v17809_v33 }
 0x4fa   : > { %v16430_v63 = vsub.s32 7, %v9092_v34 }
 0x4fb   : > { %10518 = vmatmul.mubr.msk.bf16.vlgmr.msra.gmra.mxu0 %vm7191_vm1, %v15723_v10  ;;  %10519 = vmatmul.mubr.msk.bf16.vlgmr.msra.gmra.mxu1 %vm7191_vm1, %v15723_v10 }
 0x4fc   : > { %8676 = vmatpush1.bf16.msra.mxu0 %v17810_v9  ;;  %8719 = vmatpush1.bf16.msra.mxu1 %v17811_v60  ;;  %v16409_v60 = vsub.s32 0, %v9092_v34  ;;  %17831 = vst [vmem:[#allocation92_spill] sm:$0xff] %v16430_v63 }
 0x4fd   : > { %8677 = vmatprep.subr.bf16.mxu0 %v17812_v59  ;;  %8720 = vmatprep.subr.bf16.mxu1 %v17813_v31  ;;  %v16411_v59 = vsub.s32 2, %v9092_v34  ;;  %v16413_v31 = vsub.s32 1, %v9092_v34 }
 0x4fe   : > { %8695 = vmatprep.mubr.bf16.mxu0 %v17770_v19  ;;  %8738 = vmatprep.mubr.bf16.mxu1 %v17770_v19 }
 0x500   : > { %8678 = vmatpush1.bf16.msra.mxu0 %v17814_v62  ;;  %8721 = vmatpush1.bf16.msra.mxu1 %v17815_v7  ;;  %v16415_v62 = vsub.s32 3, %v9092_v34 }
 0x501   : > { %8761 = vmatprep.subr.bf16.mxu0 %v17816_v3  ;;  %8804 = vmatprep.subr.bf16.mxu1 %v17817_v49  ;;  %v9081_v49 = vld [vmem:[%s17415_s4] sm:$0xff] }
 0x503   : > { %10520 = vmatmul.mubr.msk.bf16.vlgmr.msra.gmra.mxu0 %vm7191_vm1, %v15723_v10  ;;  %10521 = vmatmul.mubr.msk.bf16.vlgmr.msra.gmra.mxu1 %vm7191_vm1, %v15723_v10 }
 0x504   : > { %8762 = vmatpush1.bf16.msra.mxu0 %v16081_v30  ;;  %8805 = vmatpush1.bf16.msra.mxu1 %v17818_v29  ;;  %v16424_v29 = vsub.s32 4, %v9092_v34 }
 0x505   : > { %8763 = vmatprep.subr.bf16.mxu0 %v17819_v46  ;;  %8806 = vmatprep.subr.bf16.mxu1 %v17820_v13  ;;  %v16426_v46 = vsub.s32 6, %v9092_v34  ;;  %v16428_v13 = vsub.s32 5, %v9092_v34  ;;  %v16449_v34 = vrot.slane %v9081_v49, %v16415_v62 }
 0x506   : > { %8781 = vmatprep.mubr.bf16.mxu0 %v17770_v19  ;;  %8824 = vmatprep.mubr.bf16.mxu1 %v17770_v19 }
 0x507   : > { %17829 = vst [vmem:[#allocation90_spill] sm:$0xff] %v16426_v46  ;;  %17830 = vst [vmem:[#allocation91_spill] sm:$0xff] %v16428_v13 }
 0x508   : > { %8764 = vmatpush1.bf16.msra.mxu0 %v16109_v26  ;;  %8807 = vmatpush1.bf16.msra.mxu1 %v16111_v40  ;;  %17837 = vst [vmem:[#allocation98_spill] sm:$0xff] %v16449_v34 }
 0x509   : > { %8847 = vmatprep.subr.bf16.mxu0 %v16115_v37  ;;  %8890 = vmatprep.subr.bf16.mxu1 %v16117_v56 }
 0x50b   : > { %10522 = vmatmul.mubr.msk.bf16.vlgmr.msra.gmra.mxu0 %vm7191_vm1, %v15723_v10  ;;  %10523 = vmatmul.mubr.msk.bf16.vlgmr.msra.gmra.mxu1 %vm7191_vm1, %v15723_v10 }
 0x50c   : > { %8848 = vmatpush1.bf16.msra.mxu0 %v16135_v0  ;;  %8891 = vmatpush1.bf16.msra.mxu1 %v16137_v27 }
 0x50d   : > { %8849 = vmatprep.subr.bf16.mxu0 %v16141_v23  ;;  %8892 = vmatprep.subr.bf16.mxu1 %v16143_v35 }
 0x50e   : > { %8867 = vmatprep.mubr.bf16.mxu0 %v17770_v19  ;;  %8910 = vmatprep.mubr.bf16.mxu1 %v17770_v19 }
 0x510   : > { %8850 = vmatpush1.bf16.msra.mxu0 %v16151_v6  ;;  %8893 = vmatpush1.bf16.msra.mxu1 %v16153_v11 }
 0x513   : > { %10524 = vmatmul.mubr.msk.bf16.vlgmr.msra.gmra.mxu0 %vm7191_vm1, %v15723_v10  ;;  %10525 = vmatmul.mubr.msk.bf16.vlgmr.msra.gmra.mxu1 %vm7191_vm1, %v15723_v10 }
 0x53b   : > { %v16305_v54 = vpop.f32.mrf.mxu0  ;;  %v16307_v39 = vpop.f32.mrf.mxu1 }
 0x53d   : > { %v16309_v41 = vpop.f32.mrf.mxu0  ;;  %v16311_v51 = vpop.f32.mrf.mxu1 }
 0x53f   : > { %v16313_v36 = vpop.f32.mrf.mxu0  ;;  %v16315_v19 = vpop.f32.mrf.mxu1 }
 0x541   : > { %v16317_v53 = vpop.f32.mrf.mxu0  ;;  %v16319_v52 = vpop.f32.mrf.mxu1 }
 0x543   : > { %v16321_v22 = vpop.f32.mrf.mxu0  ;;  %v16323_v15 = vpop.f32.mrf.mxu1 }
 0x545   : > { %v16325_v10 = vpop.f32.mrf.mxu0  ;;  %v16327_v17 = vpop.f32.mrf.mxu1 }
 0x547   : > { %v16329_v12 = vpop.f32.mrf.mxu0  ;;  %v16331_v20 = vpop.f32.mrf.mxu1 }
 0x549   : > { %v16333_v21 = vpop.f32.mrf.mxu0  ;;  %v16335_v25 = vpop.f32.mrf.mxu1 }
 0x54b   : > { %v16337_v28 = vpop.f32.mrf.mxu0  ;;  %v16339_v24 = vpop.f32.mrf.mxu1 }
 0x54d   : > { %v16341_v48 = vpop.f32.mrf.mxu0  ;;  %v16343_v58 = vpop.f32.mrf.mxu1 }
 0x54f   : > { %v16345_v55 = vpop.f32.mrf.mxu0  ;;  %v16347_v47 = vpop.f32.mrf.mxu1 }
 0x551   : > { %v16349_v45 = vpop.f32.mrf.mxu0  ;;  %v16351_v8 = vpop.f32.mrf.mxu1 }
 0x553   : > { %v16353_v50 = vpop.f32.mrf.mxu0  ;;  %v16355_v38 = vpop.f32.mrf.mxu1 }
 0x555   : > { %v16357_v14 = vpop.f32.mrf.mxu0  ;;  %v16359_v35 = vpop.f32.mrf.mxu1 }
 0x557   : > { %v16361_v23 = vpop.f32.mrf.mxu0  ;;  %v16363_v37 = vpop.f32.mrf.mxu1 }
 0x559   : > { %v16365_v56 = vpop.f32.mrf.mxu0  ;;  %v16367_v27 = vpop.f32.mrf.mxu1 }
 0x55b   : > { %v16369_v30 = vpop.f32.mrf.mxu0  ;;  %v16371_v26 = vpop.f32.mrf.mxu1 }
 0x55d   : > { %v16373_v40 = vpop.f32.mrf.mxu0  ;;  %v16375_v42 = vpop.f32.mrf.mxu1 }
 0x55f   : > { %v16377_v0 = vpop.f32.mrf.mxu0  ;;  %v16379_v6 = vpop.f32.mrf.mxu1 }
 0x561   : > { %v16381_v11 = vpop.f32.mrf.mxu0  ;;  %v16383_v16 = vpop.f32.mrf.mxu1 }
 0x563   : > { %v16385_v4 = vpop.f32.mrf.mxu0  ;;  %v16387_v2 = vpop.f32.mrf.mxu1 }
 0x565   : > { %v16389_v44 = vpop.f32.mrf.mxu0  ;;  %v16391_v61 = vpop.f32.mrf.mxu1 }
 0x567   : > { %v16393_v43 = vpop.f32.mrf.mxu0  ;;  %v16395_v32 = vpop.f32.mrf.mxu1 }
 0x569   : > { %v16397_v18 = vpop.f32.mrf.mxu0  ;;  %v16399_v57 = vpop.f32.mrf.mxu1 }
 0x56a   : > { %17821 = vst [vmem:[#allocation82_spill] sm:$0xff] %v16397_v18  ;;  %17822 = vst [vmem:[#allocation83_spill] sm:$0xff] %v16399_v57  ;;  %v16459_v18 = vrot.slane %v9081_v49, %v16426_v46 }
 0x56b   : > { %v16401_v5 = vpop.f32.mrf.mxu0  ;;  %v16403_v1 = vpop.f32.mrf.mxu1 }
 0x56c   : > { %17823 = vst [vmem:[#allocation86_spill] sm:$0xff] %v16401_v5  ;;  %17824 = vst [vmem:[#allocation84_spill] sm:$0xff] %v16403_v1  ;;  %v16443_v1 = vrot.slane %v9081_v49, %v16411_v59  ;;  %v16446_v5 = vrot.slane %v9081_v49, %v16413_v31 }
 0x56d   : > { %v16405_v33 = vpop.f32.mrf.mxu0  ;;  %v16407_v9 = vpop.f32.mrf.mxu1  ;;  %17841 = vst [vmem:[#allocation102_spill] sm:$0xff] %v16459_v18 }
 0x56e   : > { %17825 = vst [vmem:[#allocation85_spill] sm:$0xff] %v16405_v33  ;;  %17826 = vst [vmem:[#allocation87_spill] sm:$0xff] %v16407_v9 }
 0x56f   : > { %v16417_v7 = vpop.f32.mrf.mxu0  ;;  %v16419_v3 = vpop.f32.mrf.mxu1  ;;  %17835 = vst [vmem:[#allocation96_spill] sm:$0xff] %v16443_v1  ;;  %17836 = vst [vmem:[#allocation97_spill] sm:$0xff] %v16446_v5  ;;  %v16465_v1 = vrot.slane %v9081_v49, %v16430_v63 }
 0x570   : > { %17827 = vst [vmem:[#allocation88_spill] sm:$0xff] %v16417_v7  ;;  %17828 = vst [vmem:[#allocation89_spill] sm:$0xff] %v16419_v3  ;;  %v9082_v3 = vld [vmem:[%s17415_s4 + $0x8] sm:$0xff]  ;;  %v16440_v7 = vrot.slane %v9081_v49, %v16409_v60 }
 0x571   : > { %v16432_v9 = vpop.f32.mrf.mxu0  ;;  %v16434_v33 = vpop.f32.mrf.mxu1  ;;  %17843 = vst [vmem:[#allocation104_spill] sm:$0xff] %v16465_v1  ;;  %v16468_v5 = vrot.slane %v9082_v3, %v16409_v60  ;;  %v16471_v34 = vrot.slane %v9082_v3, %v16411_v59 }
 0x572   : > { %17832 = vst [vmem:[#allocation93_spill] sm:$0xff] %v16432_v9  ;;  %17833 = vst [vmem:[#allocation94_spill] sm:$0xff] %v16434_v33  ;;  %v16456_v33 = vrot.slane %v9081_v49, %v16424_v29 }
 0x573   : > { %17834 = vst [vmem:[#allocation95_spill] sm:$0xff] %v16440_v7  ;;  %v16451_v57 = vpop.f32.mrf.mxu0  ;;  %v16453_v9 = vpop.f32.mrf.mxu1  ;;  %v16462_v7 = vrot.slane %v9081_v49, %v16428_v13  ;;  %17844 = vst [vmem:[#allocation105_spill] sm:$0xff] %v16468_v5 }
 0x574   : > { %17838 = vst [vmem:[#allocation99_spill] sm:$0xff] %v16451_v57  ;;  %17839 = vst [vmem:[#allocation100_spill] sm:$0xff] %v16453_v9  ;;  %v16474_v9 = vrot.slane %v9082_v3, %v16413_v31  ;;  %v17848_v57 = vld [vmem:[#allocation36_spill] sm:$0xff] }
 0x575   : > { %17840 = vst [vmem:[#allocation101_spill] sm:$0xff] %v16456_v33  ;;  %17842 = vst [vmem:[#allocation103_spill] sm:$0xff] %v16462_v7  ;;  %v16477_v33 = vrot.slane %v9082_v3, %v16415_v62  ;;  %v16481_v18 = vmul.f32 %v16305_v54, %v17848_v57  ;;  %v17850_v7 = vld [vmem:[#allocation39_spill] sm:$0xff]  ;;  %v16487_v1 = vpop.f32.mrf.mxu0  ;;  %v16489_v5 = vpop.f32.mrf.mxu1  ;;  %v17856_v54 = vld [vmem:[#allocation33_spill] sm:$0xff] }
 0x576   : > { %17845 = vst [vmem:[#allocation106_spill] sm:$0xff] %v16471_v34  ;;  %17846 = vst [vmem:[#allocation107_spill] sm:$0xff] %v16474_v9  ;;  %v16485_v49 = vmul.f32 %v16307_v39, %v17850_v7  ;;  %v16492_v34 = vrot.slane %v9082_v3, %v16424_v29  ;;  %v16495_v9 = vrot.slane %v9082_v3, %v16426_v46  ;;  %v17857_v39 = vld [vmem:[#allocation37_spill] sm:$0xff] }
 0x577   : > { %17847 = vst [vmem:[#allocation108_spill] sm:$0xff] %v16477_v33  ;;  %17849 = vst [vmem:[#allocation36_spill] sm:$0xff] %v16481_v18  ;;  %v9083_v33 = vld [vmem:[%s17415_s4 + $0x10] sm:$0xff]  ;;  %v16502_v57 = vmul.f32 %v16309_v41, %v17856_v54  ;;  %v16506_v7 = vmul.f32 %v16311_v51, %v17857_v39  ;;  %v17862_v41 = vld [vmem:[#allocation35_spill] sm:$0xff] }
 0x578   : > { %17851 = vst [vmem:[#allocation39_spill] sm:$0xff] %v16485_v49  ;;  %17852 = vst [vmem:[#allocation109_spill] sm:$0xff] %v16487_v1  ;;  %v16509_v49 = vrot.slane %v9082_v3, %v16428_v13  ;;  %v17860_v18 = vld [vmem:[#allocation32_spill] sm:$0xff]  ;;  %v16524_v54 = vmul.f32 %v16317_v53, %v17862_v41  ;;  %v17863_v51 = vld [vmem:[#allocation38_spill] sm:$0xff]  ;;  %v16546_v53 = vrot.slane %v9083_v33, %v16411_v59 }
 0x579   : > { %17853 = vst [vmem:[#allocation110_spill] sm:$0xff] %v16489_v5  ;;  %17854 = vst [vmem:[#allocation111_spill] sm:$0xff] %v16492_v34  ;;  %v16512_v34 = vrot.slane %v9082_v3, %v16430_v63  ;;  %v17861_v5 = vld [vmem:[#allocation34_spill] sm:$0xff]  ;;  %v16528_v39 = vmul.f32 %v16319_v52, %v17863_v51  ;;  %v16532_v3 = vpop.f32.mrf.mxu1  ;;  %v17870_v52 = vld [vmem:[#allocation40_spill] sm:$0xff] }
 0x57a   : > { %17855 = vst [vmem:[#allocation112_spill] sm:$0xff] %v16495_v9  ;;  %17858 = vst [vmem:[#allocation33_spill] sm:$0xff] %v16509_v49  ;;  %v16516_v9 = vmul.f32 %v16313_v36, %v17860_v18  ;;  %v16520_v1 = vmul.f32 %v16315_v19, %v17861_v5  ;;  %v16530_v49 = vpop.f32.mrf.mxu0  ;;  %v17866_v18 = vld [vmem:[#allocation48_spill] sm:$0xff]  ;;  %v16543_v5 = vrot.slane %v9083_v33, %v16409_v60  ;;  %v17872_v51 = vld [vmem:[#allocation42_spill] sm:$0xff] }
 0x57b   : > { %17859 = vst [vmem:[#allocation37_spill] sm:$0xff] %v16512_v34  ;;  %17864 = vst [vmem:[#allocation32_spill] sm:$0xff] %v16528_v39  ;;  %v17865_v34 = vld [vmem:[#allocation46_spill] sm:$0xff]  ;;  %v16540_v19 = vmul.f32 %v16323_v15, %v17866_v18  ;;  %v16550_v41 = vmul.f32 %v16325_v10, %v17870_v52  ;;  %v16554_v39 = vmul.f32 %v16327_v17, %v17872_v51  ;;  %v17877_v10 = vld [vmem:[#allocation45_spill] sm:$0xff] }
 0x57c   : > { %v16536_v36 = vmul.f32 %v16321_v22, %v17865_v34  ;;  %17868 = vst [vmem:[#allocation35_spill] sm:$0xff] %v16543_v5  ;;  %17869 = vst [vmem:[#allocation38_spill] sm:$0xff] %v16546_v53  ;;  %v16556_v22 = vpop.f32.mrf.mxu0  ;;  %v16558_v34 = vpop.f32.mrf.mxu1  ;;  %v16561_v15 = vrot.slane %v9083_v33, %v16413_v31  ;;  %v16564_v18 = vrot.slane %v9083_v33, %v16415_v62  ;;  %v17876_v5 = vld [vmem:[#allocation44_spill] sm:$0xff]  ;;  %v17878_v17 = vld [vmem:[#allocation41_spill] sm:$0xff] }
 0x57d   : > { %17867 = vst [vmem:[#allocation34_spill] sm:$0xff] %v16540_v19  ;;  %17871 = vst [vmem:[#allocation46_spill] sm:$0xff] %v16550_v41  ;;  %v16568_v53 = vmul.f32 %v16329_v12, %v17876_v5  ;;  %v16572_v52 = vmul.f32 %v16331_v20, %v17877_v10  ;;  %v16576_v51 = vmul.f32 %v16333_v21, %v17878_v17  ;;  %v17883_v5 = vld [vmem:[#allocation50_spill] sm:$0xff] }
 0x57e   : > { %17873 = vst [vmem:[#allocation48_spill] sm:$0xff] %v16554_v39  ;;  %17874 = vst [vmem:[#allocation40_spill] sm:$0xff] %v16561_v15  ;;  %v17879_v39 = vld [vmem:[#allocation43_spill] sm:$0xff]  ;;  %v17880_v15 = vld [vmem:[#allocation54_spill] sm:$0xff]  ;;  %v16592_v20 = vmul.f32 %v16341_v48, %v17883_v5  ;;  %v16594_v10 = vpop.f32.mrf.mxu0  ;;  %v16596_v21 = vpop.f32.mrf.mxu1  ;;  %v16599_v17 = vrot.slane %v9083_v33, %v16424_v29 }
 0x57f   : > { %17875 = vst [vmem:[#allocation42_spill] sm:$0xff] %v16564_v18  ;;  %v16580_v41 = vmul.f32 %v16335_v25, %v17879_v39  ;;  %v16584_v19 = vmul.f32 %v16337_v28, %v17880_v15  ;;  %v17881_v18 = vld [vmem:[#allocation56_spill] sm:$0xff]  ;;  %v17886_v25 = vld [vmem:[#allocation51_spill] sm:$0xff] }
 0x580   : > { %v16588_v12 = vmul.f32 %v16339_v24, %v17881_v18  ;;  %17884 = vst [vmem:[#allocation45_spill] sm:$0xff] %v16592_v20  ;;  %17885 = vst [vmem:[#allocation41_spill] sm:$0xff] %v16599_v17  ;;  %v16603_v39 = vmul.f32 %v16343_v58, %v17886_v25  ;;  %v17887_v28 = vld [vmem:[#allocation52_spill] sm:$0xff]  ;;  %v17888_v24 = vld [vmem:[#allocation53_spill] sm:$0xff] }
 0x581   : > { %v16607_v15 = vmul.f32 %v16345_v55, %v17887_v28  ;;  %v16611_v18 = vmul.f32 %v16347_v47, %v17888_v24  ;;  %v17889_v48 = vld [vmem:[#allocation47_spill] sm:$0xff]  ;;  %v17890_v20 = vld [vmem:[#allocation49_spill] sm:$0xff]  ;;  %v17891_v17 = vld [vmem:[#allocation62_spill] sm:$0xff]  ;;  %v16633_v24 = vpop.f32.mrf.mxu0 }
 0x582   : > { %17882 = vst [vmem:[#allocation44_spill] sm:$0xff] %v16588_v12  ;;  %v16615_v5 = vmul.f32 %v16349_v45, %v17889_v48  ;;  %v16619_v12 = vmul.f32 %v16351_v8, %v17890_v20  ;;  %v16623_v58 = vmul.f32 %v16353_v50, %v17891_v17  ;;  %v17892_v25 = vld [vmem:[#allocation64_spill] sm:$0xff]  ;;  %v17894_v28 = vld [vmem:[#allocation58_spill] sm:$0xff]  ;;  %v16635_v45 = vpop.f32.mrf.mxu1  ;;  %v17896_v48 = vld [vmem:[#allocation59_spill] sm:$0xff] }
 0x583   : > { %v16627_v55 = vmul.f32 %v16355_v38, %v17892_v25  ;;  %v16631_v47 = vmul.f32 %v16357_v14, %v17894_v28  ;;  %v16639_v8 = vmul.f32 %v16359_v35, %v17896_v48  ;;  %v17897_v20 = vld [vmem:[#allocation60_spill] sm:$0xff]  ;;  %v17898_v17 = vld [vmem:[#allocation61_spill] sm:$0xff]  ;;  %v17900_v25 = vld [vmem:[#allocation55_spill] sm:$0xff] }
 0x584   : > { %v16643_v50 = vmul.f32 %v16361_v23, %v17897_v20  ;;  %v16647_v38 = vmul.f32 %v16363_v37, %v17898_v17  ;;  %v16651_v14 = vmul.f32 %v16365_v56, %v17900_v25  ;;  %v17901_v28 = vld [vmem:[#allocation57_spill] sm:$0xff]  ;;  %v17903_v48 = vld [vmem:[#allocation72_spill] sm:$0xff]  ;;  %v17904_v20 = vld [vmem:[#allocation66_spill] sm:$0xff]  ;;  %v7921_v17 = vpop.f32.mrf.mxu0 }
 0x585   : > { %17893 = vst [vmem:[#allocation43_spill] sm:$0xff] %v16627_v55  ;;  %17895 = vst [vmem:[#allocation54_spill] sm:$0xff] %v16631_v47  ;;  %v16655_v47 = vmul.f32 %v16367_v27, %v17901_v28  ;;  %v17902_v55 = vld [vmem:[#allocation70_spill] sm:$0xff]  ;;  %v16663_v23 = vmul.f32 %v16371_v26, %v17903_v48  ;;  %v16667_v37 = vmul.f32 %v16373_v40, %v17904_v20  ;;  %v17905_v56 = vld [vmem:[#allocation67_spill] sm:$0xff] }
 0x586   : > { %17899 = vst [vmem:[#allocation56_spill] sm:$0xff] %v16647_v38  ;;  %v16659_v35 = vmul.f32 %v16369_v30, %v17902_v55  ;;  %v7964_v38 = vpop.f32.mrf.mxu1  ;;  %v16671_v25 = vmul.f32 %v16375_v42, %v17905_v56  ;;  %v17907_v27 = vld [vmem:[#allocation68_spill] sm:$0xff]  ;;  %v17909_v30 = vld [vmem:[#allocation69_spill] sm:$0xff]  ;;  %v16682_v26 = vrot.slane %v9083_v33, %v16426_v46  ;;  %v17912_v48 = vld [vmem:[#allocation63_spill] sm:$0xff] }
 0x587   : > { %v16675_v28 = vmul.f32 %v16377_v0, %v17907_v27  ;;  %v16679_v55 = vmul.f32 %v16379_v6, %v17909_v30  ;;  %v9084_v40 = vld [vmem:[%s17415_s4 + $0x18] sm:$0xff]  ;;  %v16689_v20 = vmul.f32 %v16381_v11, %v17912_v48  ;;  %v7923_v0 = vpop.f32.mrf.mxu0  ;;  %v16696_v6 = vrot.slane %v9083_v33, %v16428_v13  ;;  %v17922_v48 = vld [vmem:[#allocation74_spill] sm:$0xff] }
 0x588   : > { %17906 = vst [vmem:[#allocation50_spill] sm:$0xff] %v16671_v25  ;;  %17911 = vst [vmem:[#allocation53_spill] sm:$0xff] %v16682_v26  ;;  %v17914_v42 = vld [vmem:[#allocation65_spill] sm:$0xff]  ;;  %v7966_v27 = vpop.f32.mrf.mxu1  ;;  %v16699_v30 = vrot.slane %v9083_v33, %v16430_v63  ;;  %v17918_v26 = vld [vmem:[#allocation78_spill] sm:$0xff] }
 0x589   : > { %17908 = vst [vmem:[#allocation51_spill] sm:$0xff] %v16675_v28  ;;  %17910 = vst [vmem:[#allocation52_spill] sm:$0xff] %v16679_v55  ;;  %v16693_v56 = vmul.f32 %v16383_v16, %v17914_v42  ;;  %v16703_v55 = vmul.f32 %v16385_v4, %v17918_v26  ;;  %v17920_v28 = vld [vmem:[#allocation80_spill] sm:$0xff]  ;;  %v16711_v16 = vmul.f32 %v16389_v44, %v17922_v48  ;;  %v17924_v42 = vld [vmem:[#allocation75_spill] sm:$0xff]  ;;  %v8003_v26 = vpop.f32.mrf.mxu0 }
 0x58a   : > { %17913 = vst [vmem:[#allocation47_spill] sm:$0xff] %v16689_v20  ;;  %17916 = vst [vmem:[#allocation62_spill] sm:$0xff] %v16696_v6  ;;  %v16707_v11 = vmul.f32 %v16387_v2, %v17920_v28  ;;  %v17926_v6 = vld [vmem:[#allocation76_spill] sm:$0xff]  ;;  %v16726_v2 = vrot.slane %v9084_v40, %v16409_v60  ;;  %v16729_v44 = vrot.slane %v9084_v40, %v16411_v59  ;;  %v17932_v28 = vld [vmem:[#allocation71_spill] sm:$0xff] }
 0x58b   : > { %17915 = vst [vmem:[#allocation49_spill] sm:$0xff] %v16693_v56  ;;  %17917 = vst [vmem:[#allocation64_spill] sm:$0xff] %v16699_v30  ;;  %v16715_v56 = vmul.f32 %v16391_v61, %v17924_v42  ;;  %v16719_v33 = vmul.f32 %v16393_v43, %v17926_v6  ;;  %v17928_v30 = vld [vmem:[#allocation77_spill] sm:$0xff]  ;;  %v17933_v48 = vld [vmem:[#allocation82_spill] sm:$0xff]  ;;  %v16740_v6 = vrot.slane %v9084_v40, %v16413_v31 }
 0x58c   : > { %17919 = vst [vmem:[#allocation58_spill] sm:$0xff] %v16703_v55  ;;  %17921 = vst [vmem:[#allocation59_spill] sm:$0xff] %v16707_v11  ;;  %v16723_v4 = vmul.f32 %v16395_v32, %v17928_v30  ;;  %v8046_v55 = vpop.f32.mrf.mxu1  ;;  %v16733_v61 = vmul.f32 %v17933_v48, %v17932_v28  ;;  %v17935_v42 = vld [vmem:[#allocation73_spill] sm:$0xff]  ;;  %v16743_v32 = vrot.slane %v9084_v40, %v16415_v62  ;;  %v17940_v30 = vld [vmem:[#allocation2_spill] sm:$0xff] }
 0x58d   : > { %17923 = vst [vmem:[#allocation60_spill] sm:$0xff] %v16711_v16  ;;  %17925 = vst [vmem:[#allocation61_spill] sm:$0xff] %v16715_v56  ;;  %v17936_v56 = vld [vmem:[#allocation83_spill] sm:$0xff]  ;;  %v17946_v28 = vld [vmem:[#allocation4_spill] sm:$0xff] }
 0x58e   : > { %17927 = vst [vmem:[#allocation55_spill] sm:$0xff] %v16719_v33  ;;  %17929 = vst [vmem:[#allocation57_spill] sm:$0xff] %v16723_v4  ;;  %v16737_v43 = vmul.f32 %v17936_v56, %v17935_v42  ;;  %v17941_v4 = vld [vmem:[#allocation86_spill] sm:$0xff]  ;;  %v17943_v33 = vld [vmem:[#allocation3_spill] sm:$0xff]  ;;  %v8048_v11 = vpop.f32.mrf.mxu1 }
 0x58f   : > { %17930 = vst [vmem:[#allocation70_spill] sm:$0xff] %v16726_v2  ;;  %17931 = vst [vmem:[#allocation72_spill] sm:$0xff] %v16729_v44  ;;  %v16747_v2 = vmul.f32 %v17941_v4, %v17940_v30  ;;  %v17944_v44 = vld [vmem:[#allocation84_spill] sm:$0xff]  ;;  %v17947_v48 = vld [vmem:[#allocation85_spill] sm:$0xff] }
 0x590   : > { %17934 = vst [vmem:[#allocation66_spill] sm:$0xff] %v16733_v61  ;;  %17937 = vst [vmem:[#allocation67_spill] sm:$0xff] %v16737_v43  ;;  %v16751_v16 = vmul.f32 %v17944_v44, %v17943_v33  ;;  %v16755_v61 = vmul.f32 %v17947_v48, %v17946_v28  ;;  %v17949_v56 = vld [vmem:[#allocation5_spill] sm:$0xff]  ;;  %v17950_v42 = vld [vmem:[#allocation87_spill] sm:$0xff]  ;;  %v16770_v33 = vrot.slane %v9084_v40, %v16424_v29 }
 0x591   : > { %17938 = vst [vmem:[#allocation68_spill] sm:$0xff] %v16740_v6  ;;  %17939 = vst [vmem:[#allocation69_spill] sm:$0xff] %v16743_v32  ;;  %v16759_v43 = vmul.f32 %v17950_v42, %v17949_v56  ;;  %v8005_v6 = vpop.f32.mrf.mxu0  ;;  %v17952_v20 = vld [vmem:[#allocation6_spill] sm:$0xff]  ;;  %v17953_v32 = vld [vmem:[#allocation88_spill] sm:$0xff]  ;;  %v16773_v44 = vrot.slane %v9084_v40, %v16426_v46 }
 0x592   : > { %17942 = vst [vmem:[#allocation63_spill] sm:$0xff] %v16747_v2  ;;  %17945 = vst [vmem:[#allocation65_spill] sm:$0xff] %v16751_v16  ;;  %v16763_v25 = vmul.f32 %v17953_v32, %v17952_v20  ;;  %v17955_v4 = vld [vmem:[#allocation7_spill] sm:$0xff]  ;;  %v17956_v30 = vld [vmem:[#allocation89_spill] sm:$0xff]  ;;  %v8050_v32 = vpop.f32.mrf.mxu1 }
 0x593   : > { %17948 = vst [vmem:[#allocation78_spill] sm:$0xff] %v16755_v61  ;;  %17951 = vst [vmem:[#allocation80_spill] sm:$0xff] %v16759_v43  ;;  %v16767_v2 = vmul.f32 %v17956_v30, %v17955_v4  ;;  %v17960_v28 = vld [vmem:[#allocation79_spill] sm:$0xff]  ;;  %v17961_v48 = vld [vmem:[#allocation93_spill] sm:$0xff]  ;;  %v8007_v20 = vpop.f32.mrf.mxu0  ;;  %v16787_v4 = vrot.slane %v9084_v40, %v16430_v63 }
 0x594   : > { %17954 = vst [vmem:[#allocation74_spill] sm:$0xff] %v16763_v25  ;;  %17958 = vst [vmem:[#allocation76_spill] sm:$0xff] %v16770_v33  ;;  %v16777_v56 = vmul.f32 %v17961_v48, %v17960_v28  ;;  %v17963_v42 = vld [vmem:[#allocation81_spill] sm:$0xff]  ;;  %v17964_v43 = vld [vmem:[#allocation94_spill] sm:$0xff]  ;;  %v16784_v25 = vrot.slane %v9084_v40, %v16428_v13 }
 0x595   : > { %17957 = vst [vmem:[#allocation75_spill] sm:$0xff] %v16767_v2  ;;  %17959 = vst [vmem:[#allocation77_spill] sm:$0xff] %v16773_v44  ;;  %v16781_v61 = vmul.f32 %v17964_v43, %v17963_v42  ;;  %v17967_v30 = vld [vmem:[#allocation8_spill] sm:$0xff]  ;;  %v17968_v33 = vld [vmem:[#allocation99_spill] sm:$0xff] }
 0x596   : > { %17962 = vst [vmem:[#allocation71_spill] sm:$0xff] %v16777_v56  ;;  %17966 = vst [vmem:[#allocation73_spill] sm:$0xff] %v16787_v4  ;;  %v16791_v46 = vmul.f32 %v17968_v33, %v17967_v30  ;;  %v17969_v44 = vld [vmem:[#allocation9_spill] sm:$0xff]  ;;  %v17970_v2 = vld [vmem:[#allocation100_spill] sm:$0xff]  ;;  %v8052_v4 = vpop.f32.mrf.mxu1 }
 0x597   : > { %17965 = vst [vmem:[#allocation82_spill] sm:$0xff] %v16781_v61  ;;  %v16795_v28 = vmul.f32 %v17970_v2, %v17969_v44  ;;  %v17971_v48 = vld [vmem:[#allocation10_spill] sm:$0xff]  ;;  %v17972_v56 = vld [vmem:[#allocation109_spill] sm:$0xff]  ;;  %v17973_v42 = vld [vmem:[#allocation11_spill] sm:$0xff] }
 0x598   : > { %v16799_v43 = vmul.f32 %v17972_v56, %v17971_v48  ;;  %v17974_v61 = vld [vmem:[#allocation110_spill] sm:$0xff]  ;;  %v17975_v13 = vld [vmem:[#allocation12_spill] sm:$0xff]  ;;  %v17976_v63 = vld [vmem:[#allocation13_spill] sm:$0xff]  ;;  %v8009_v48 = vpop.f32.mrf.mxu0 }
 0x599   : > { %v16803_v16 = vmul.f32 %v17974_v61, %v17973_v42  ;;  %v16807_v40 = vmul.f32 %v16530_v49, %v17975_v13  ;;  %v16811_v33 = vmul.f32 %v16532_v3, %v17976_v63  ;;  %v17977_v30 = vld [vmem:[#allocation14_spill] sm:$0xff]  ;;  %v17979_v44 = vld [vmem:[#allocation15_spill] sm:$0xff]  ;;  %v17981_v61 = vld [vmem:[#allocation16_spill] sm:$0xff] }
 0x59a   : > { %v16815_v2 = vmul.f32 %v16556_v22, %v17977_v30  ;;  %v16819_v56 = vmul.f32 %v16558_v34, %v17979_v44  ;;  %v16823_v42 = vmul.f32 %v16594_v10, %v17981_v61  ;;  %v17983_v13 = vld [vmem:[#allocation17_spill] sm:$0xff]  ;;  %v17985_v63 = vld [vmem:[#allocation18_spill] sm:$0xff]  ;;  %v17987_v22 = vld [vmem:[#allocation19_spill] sm:$0xff] }
 0x59b   : > { %v16827_v49 = vmul.f32 %v16596_v21, %v17983_v13  ;;  %v16831_v3 = vmul.f32 %v16633_v24, %v17985_v63  ;;  %v16835_v30 = vmul.f32 %v16635_v45, %v17987_v22  ;;  %v17988_v34 = vld [vmem:[#allocation20_spill] sm:$0xff]  ;;  %v17991_v10 = vld [vmem:[#allocation22_spill] sm:$0xff]  ;;  %v8095_v13 = vpop.f32.mrf.mxu0 }
 0x59c   : > { %17978 = vst [vmem:[#allocation83_spill] sm:$0xff] %v16815_v2  ;;  %17980 = vst [vmem:[#allocation2_spill] sm:$0xff] %v16819_v56  ;;  %v16838_v44 = vmul.f32 %v7921_v17, %v17988_v34  ;;  %v17990_v56 = vld [vmem:[#allocation21_spill] sm:$0xff]  ;;  %v16844_v61 = vmul.f32 %v7923_v0, %v17991_v10  ;;  %v17993_v24 = vld [vmem:[#allocation24_spill] sm:$0xff] }
 0x59d   : > { %17982 = vst [vmem:[#allocation86_spill] sm:$0xff] %v16823_v42  ;;  %17984 = vst [vmem:[#allocation3_spill] sm:$0xff] %v16827_v49  ;;  %v16841_v2 = vmul.f32 %v7964_v38, %v17990_v56  ;;  %v17992_v42 = vld [vmem:[#allocation23_spill] sm:$0xff]  ;;  %v8138_v49 = vpop.f32.mrf.mxu1  ;;  %v16850_v63 = vmul.f32 %v8003_v26, %v17993_v24  ;;  %v17997_v22 = vld [vmem:[#allocation36_spill] sm:$0xff] }
 0x59e   : > { %17986 = vst [vmem:[#allocation84_spill] sm:$0xff] %v16831_v3  ;;  %17989 = vst [vmem:[#allocation4_spill] sm:$0xff] %v16838_v44  ;;  %v16847_v21 = vmul.f32 %v7966_v27, %v17992_v42  ;;  %v17995_v3 = vld [vmem:[#allocation25_spill] sm:$0xff]  ;;  %v9001_v17 = vsub.f32 %v17997_v22, %v8095_v13  ;;  %v17998_v34 = vld [vmem:[#allocation39_spill] sm:$0xff] }
 0x59f   : > { %17994 = vst [vmem:[#allocation85_spill] sm:$0xff] %v16850_v63  ;;  %v16853_v45 = vmul.f32 %v8046_v55, %v17995_v3  ;;  %v9003_v44 = vsub.f32 %v17998_v34, %v8138_v49  ;;  %v9085_v38 = vld [vmem:[%s17415_s4 + $0x20] sm:$0xff]  ;;  %v18001_v27 = vld [vmem:[#allocation27_spill] sm:$0xff]  ;;  %v18002_v10 = vld [vmem:[#allocation28_spill] sm:$0xff]  ;;  %v8097_v3 = vpop.f32.mrf.mxu0  ;;  %v8140_v13 = vpop.f32.mrf.mxu1 }
 0x5a0   : > { %v17999_v0 = vld [vmem:[#allocation26_spill] sm:$0xff]  ;;  %v16864_v42 = vmul.f32 %v8048_v11, %v18001_v27  ;;  %v16867_v26 = vmul.f32 %v8007_v20, %v18002_v10  ;;  %v18004_v24 = vld [vmem:[#allocation29_spill] sm:$0xff]  ;;  %v18006_v22 = vld [vmem:[#allocation95_spill] sm:$0xff]  ;;  %v9002_v63 = vsub.f32 %v16502_v57, %v8097_v3 }
 0x5a1   : > { %17996 = vst [vmem:[#allocation5_spill] sm:$0xff] %v16853_v45  ;;  %v16861_v56 = vmul.f32 %v8005_v6, %v17999_v0  ;;  %v16870_v55 = vmul.f32 %v8050_v32, %v18004_v24  ;;  %v9291_v49 = vadd.f32 %v18006_v22, %v9001_v17  ;;  %v18007_v34 = vld [vmem:[#allocation96_spill] sm:$0xff]  ;;  %v9004_v6 = vsub.f32 %v16506_v7, %v8140_v13  ;;  %v18008_v0 = vld [vmem:[#allocation30_spill] sm:$0xff]  ;;  %v18010_v11 = vld [vmem:[#allocation31_spill] sm:$0xff]  ;;  %v8099_v20 = vpop.f32.mrf.mxu0  ;;  %v8142_v10 = vpop.f32.mrf.mxu1 }
 0x5a2   : > { %18003 = vst [vmem:[#allocation6_spill] sm:$0xff] %v16867_v26  ;;  %v9293_v45 = vadd.f32 %v18007_v34, %v9003_v44  ;;  %v16880_v27 = vmul.f32 %v8052_v4, %v18010_v11  ;;  %v16883_v32 = vrot.slane %v9085_v38, %v16409_v60  ;;  %v16886_v24 = vrot.slane %v9085_v38, %v16411_v59  ;;  %v18013_v3 = vld [vmem:[#allocation98_spill] sm:$0xff] }
 0x5a3   : > { %18000 = vst [vmem:[#allocation87_spill] sm:$0xff] %v16861_v56  ;;  %18005 = vst [vmem:[#allocation88_spill] sm:$0xff] %v16870_v55  ;;  %v16877_v56 = vmul.f32 %v8009_v48, %v18008_v0  ;;  %v9371_v17 = vmul.f32 0.5, %v9291_v49  ;;  %v18012_v55 = vld [vmem:[#allocation97_spill] sm:$0xff]  ;;  %v9294_v7 = vadd.f32 %v18013_v3, %v9004_v6  ;;  %v9041_v48 = vsub.f32 %v16516_v9, %v8099_v20  ;;  %v8101_v4 = vpop.f32.mrf.mxu0  ;;  %v8144_v0 = vpop.f32.mrf.mxu1  ;;  %v18014_v6 = vld [vmem:[#allocation32_spill] sm:$0xff] }
 0x5a4   : > { %18011 = vst [vmem:[#allocation89_spill] sm:$0xff] %v16880_v27  ;;  %v9373_v44 = vmul.f32 0.5, %v9293_v45  ;;  %v9292_v57 = vadd.f32 %v18012_v55, %v9002_v63  ;;  %v9043_v13 = vsub.f32 %v16520_v1, %v8142_v10  ;;  %v16893_v11 = vrot.slane %v9085_v38, %v16413_v31  ;;  %v18015_v27 = vld [vmem:[#allocation34_spill] sm:$0xff] }
 0x5a5   : > { %18009 = vst [vmem:[#allocation7_spill] sm:$0xff] %v16877_v56  ;;  %v16896_v60 = vrot.slane %v9085_v38, %v16415_v62  ;;  %11760 = vtanh.f32 %v9371_v17  ;;  %v9374_v49 = vmul.f32 0.5, %v9294_v7  ;;  %v9042_v45 = vsub.f32 %v16524_v54, %v8101_v4  ;;  %v8181_v20 = vpop.f32.mrf.mxu0  ;;  %v8224_v10 = vpop.f32.mrf.mxu1  ;;  %v18017_v4 = vld [vmem:[#allocation102_spill] sm:$0xff]  ;;  %v12260_v56 = vld [vmem:[%s12621_s13 + $0x30] sm:$0xff] }
 0x5a6   : > { %v9372_v59 = vmul.f32 0.5, %v9292_v57  ;;  %11762 = vtanh.f32 %v9373_v44  ;;  %v9331_v63 = vadd.f32 %v18006_v22, %v9041_v48  ;;  %v9333_v9 = vadd.f32 %v18007_v34, %v9043_v13  ;;  %v18016_v34 = vld [vmem:[#allocation101_spill] sm:$0xff] }
 0x5a7   : > { %v9044_v1 = vsub.f32 %v18014_v6, %v8144_v0  ;;  %v9332_v31 = vadd.f32 %v18012_v55, %v9042_v45  ;;  %v9005_v62 = vsub.f32 %v16536_v36, %v8181_v20  ;;  %v9007_v17 = vsub.f32 %v18015_v27, %v8224_v10  ;;  %v8183_v44 = vpop.f32.mrf.mxu0  ;;  %v8226_v22 = vpop.f32.mrf.mxu1  ;;  %v18018_v6 = vld [vmem:[#allocation46_spill] sm:$0xff]  ;;  %v18019_v45 = vld [vmem:[#allocation48_spill] sm:$0xff] }
 0x5a8   : > { %11764 = vtanh.f32 %v9372_v59  ;;  %v9411_v57 = vmul.f32 0.5, %v9331_v63  ;;  %v9413_v7 = vmul.f32 0.5, %v9333_v9  ;;  %v9006_v59 = vsub.f32 %v18018_v6, %v8183_v44  ;;  %v18020_v9 = vld [vmem:[#allocation103_spill] sm:$0xff]  ;;  %v18021_v10 = vld [vmem:[#allocation104_spill] sm:$0xff] }
 0x5a9   : > { %11766 = vtanh.f32 %v9374_v49  ;;  %v9334_v54 = vadd.f32 %v18013_v3, %v9044_v1  ;;  %v9412_v48 = vmul.f32 0.5, %v9332_v31  ;;  %v9295_v13 = vadd.f32 %v18016_v34, %v9005_v62  ;;  %v8185_v20 = vpop.f32.mrf.mxu0  ;;  %v8228_v27 = vpop.f32.mrf.mxu1 }
 0x5aa   : > { %v9297_v0 = vadd.f32 %v18017_v4, %v9007_v17  ;;  %11768 = vtanh.f32 %v9411_v57  ;;  %v9008_v36 = vsub.f32 %v18019_v45, %v8226_v22  ;;  %v16911_v49 = vrot.slane %v9085_v38, %v16424_v29 }
 0x5ab   : > { %v9414_v55 = vmul.f32 0.5, %v9334_v54  ;;  %11770 = vtanh.f32 %v9413_v7  ;;  %v9375_v3 = vmul.f32 0.5, %v9295_v13  ;;  %v9296_v1 = vadd.f32 %v18020_v9, %v9006_v59  ;;  %v8187_v57 = vpop.f32.mrf.mxu0  ;;  %v8230_v54 = vpop.f32.mrf.mxu1 }
 0x5ac   : > { %v9377_v63 = vmul.f32 0.5, %v9297_v0  ;;  %11772 = vtanh.f32 %v9412_v48  ;;  %v9298_v31 = vadd.f32 %v18021_v10, %v9008_v36  ;;  %v9045_v62 = vsub.f32 %v16568_v53, %v8185_v20 }
 0x5ad   : > { %v9047_v17 = vsub.f32 %v16572_v52, %v8228_v27  ;;  %11774 = vtanh.f32 %v9414_v55  ;;  %v9376_v44 = vmul.f32 0.5, %v9296_v1  ;;  %v9046_v22 = vsub.f32 %v16576_v51, %v8187_v57  ;;  %v8267_v13 = vpop.f32.mrf.mxu0  ;;  %v8310_v0 = vpop.f32.mrf.mxu1  ;;  %v18022_v55 = vld [vmem:[#allocation44_spill] sm:$0xff]  ;;  %v18025_v1 = vld [vmem:[#allocation45_spill] sm:$0xff] }
 0x5ae   : > { %v9048_v29 = vsub.f32 %v16580_v41, %v8230_v54  ;;  %11776 = vtanh.f32 %v9375_v3  ;;  %v9378_v38 = vmul.f32 0.5, %v9298_v31  ;;  %v9335_v7 = vadd.f32 %v18016_v34, %v9045_v62 }
 0x5af   : > { %v9337_v48 = vadd.f32 %v18017_v4, %v9047_v17  ;;  %11778 = vtanh.f32 %v9377_v63  ;;  %v9336_v53 = vadd.f32 %v18020_v9, %v9046_v22  ;;  %v9009_v6 = vsub.f32 %v16584_v19, %v8267_v13  ;;  %v8269_v45 = vpop.f32.mrf.mxu0  ;;  %v8312_v36 = vpop.f32.mrf.mxu1  ;;  %v18023_v4 = vld [vmem:[#allocation105_spill] sm:$0xff]  ;;  %v18024_v63 = vld [vmem:[#allocation106_spill] sm:$0xff] }
 0x5b0   : > { %v9338_v52 = vadd.f32 %v18021_v10, %v9048_v29  ;;  %11780 = vtanh.f32 %v9376_v44  ;;  %v9415_v59 = vmul.f32 0.5, %v9335_v7  ;;  %v9011_v41 = vsub.f32 %v18022_v55, %v8310_v0  ;;  %v12240_v55 = vld [vmem:[%s12492_s8] sm:$0xff] }
 0x5b1   : > { %v9417_v51 = vmul.f32 0.5, %v9337_v48  ;;  %11782 = vtanh.f32 %v9378_v38  ;;  %v9416_v34 = vmul.f32 0.5, %v9336_v53  ;;  %v9299_v27 = vadd.f32 %v18023_v4, %v9009_v6  ;;  %v8271_v31 = vpop.f32.mrf.mxu0  ;;  %v18026_v38 = vld [vmem:[#allocation107_spill] sm:$0xff]  ;;  %v16931_v48 = vpop.f32.mrf.mxu1  ;;  %v18027_v53 = vld [vmem:[#allocation108_spill] sm:$0xff] }
 0x5b2   : > { %v9418_v20 = vmul.f32 0.5, %v9338_v52  ;;  %v11761_v3 = vpop.eup %11760  ;;  %11784 = vtanh.f32 %v9415_v59  ;;  %v9301_v9 = vadd.f32 %v18024_v63, %v9011_v41  ;;  %v9010_v10 = vsub.f32 %v18025_v1, %v8269_v45 }
 0x5b3   : > { %v9012_v19 = vsub.f32 %v16603_v39, %v8312_v36  ;;  %v11763_v62 = vpop.eup %11762  ;;  %v9531_v17 = vmul.f32 0.5, %v11761_v3  ;;  %11786 = vtanh.f32 %v9417_v51  ;;  %v9379_v57 = vmul.f32 0.5, %v9299_v27 }
 0x5b4   : > { %v9049_v54 = vsub.f32 %v16607_v15, %v8271_v31  ;;  %v9533_v22 = vmul.f32 0.5, %v11763_v62  ;;  %11788 = vtanh.f32 %v9416_v34  ;;  %v9381_v29 = vmul.f32 0.5, %v9301_v9  ;;  %v16935_v34 = vpop.f32.mrf.mxu0  ;;  %v12242_v31 = vld [vmem:[%s12621_s13] sm:$0xff] }
 0x5b5   : > { %v11765_v44 = vpop.eup %11764  ;;  %v9300_v7 = vadd.f32 %v18026_v38, %v9010_v10  ;;  %v9611_v0 = vadd.f32 0.5, %v9531_v17  ;;  %11790 = vtanh.f32 %v9418_v20  ;;  %v9302_v52 = vadd.f32 %v18027_v53, %v9012_v19  ;;  %v12241_v20 = vld [vmem:[%s12492_s8 + $0x10] sm:$0xff]  ;;  %v16944_v10 = vpop.f32.mrf.mxu1  ;;  %v12243_v17 = vld [vmem:[%s12492_s8 + $0x8] sm:$0xff] }
 0x5b6   : > { %v11767_v13 = vpop.eup %11766  ;;  %v9532_v39 = vmul.f32 0.5, %v11765_v44  ;;  %v9613_v6 = vadd.f32 0.5, %v9533_v22  ;;  %11792 = vtanh.f32 %v9379_v57 }
 0x5b7   : > { %v9534_v59 = vmul.f32 0.5, %v11767_v13  ;;  %v9380_v15 = vmul.f32 0.5, %v9300_v7  ;;  %v11769_v51 = vpop.eup %11768  ;;  %v9691_v41 = vmul.f32 %v12240_v55, %v9611_v0  ;;  %11794 = vtanh.f32 %v9381_v29  ;;  %v12244_v29 = vld [vmem:[%s12621_s13 + $0x10] sm:$0xff]  ;;  %v12245_v13 = vld [vmem:[%s12492_s8 + $0x18] sm:$0xff] }
 0x5b8   : > { %v9612_v45 = vadd.f32 0.5, %v9532_v39  ;;  %v9382_v36 = vmul.f32 0.5, %v9302_v52  ;;  %v11771_v27 = vpop.eup %11770  ;;  %v9693_v3 = vmul.f32 %v12241_v20, %v9613_v6  ;;  %v9571_v1 = vmul.f32 0.5, %v11769_v51 }
 0x5b9   : > { %v9614_v9 = vadd.f32 0.5, %v9534_v59  ;;  %11796 = vtanh.f32 %v9380_v15  ;;  %v11773_v19 = vpop.eup %11772  ;;  %v9771_v62 = vadd.f32 %v12242_v31, %v9691_v41  ;;  %v9573_v44 = vmul.f32 0.5, %v11771_v27  ;;  %v12246_v59 = vld [vmem:[%s12621_s13 + $0x8] sm:$0xff]  ;;  %v12247_v27 = vld [vmem:[%s12621_s13 + $0x18] sm:$0xff]  ;;  %v16958_v31 = vpop.f32.mrf.mxu1 }
 0x5ba   : > { %v9692_v57 = vmul.f32 %v12243_v17, %v9612_v45  ;;  %11798 = vtanh.f32 %v9382_v36  ;;  %v11775_v22 = vpop.eup %11774  ;;  %v9773_v7 = vadd.f32 %v12244_v29, %v9693_v3  ;;  %v9651_v39 = vadd.f32 0.5, %v9571_v1  ;;  %v16953_v45 = vpop.f32.mrf.mxu0  ;;  %v12248_v3 = vld [vmem:[%s12492_s8 + $0x140] sm:$0xff]  ;;  %v12249_v17 = vld [vmem:[%s12492_s8 + $0x150] sm:$0xff] }
 0x5bb   : > { %v9694_v0 = vmul.f32 %v12245_v13, %v9614_v9  ;;  %v9572_v52 = vmul.f32 0.5, %v11773_v19  ;;  %v11777_v6 = vpop.eup %11776  ;;  %9851 = vst [vmem:[%s16941_s23] sm:$0xff] %v9771_v62  ;;  %v9653_v51 = vadd.f32 0.5, %v9573_v44  ;;  %v9574_v55 = vmul.f32 0.5, %v11775_v22  ;;  %v12250_v29 = vld [vmem:[%s12621_s13 + $0x140] sm:$0xff]  ;;  %v12251_v13 = vld [vmem:[%s12492_s8 + $0x148] sm:$0xff] }
 0x5bc   : > { %v9772_v15 = vadd.f32 %v12246_v59, %v9692_v57  ;;  %v9339_v41 = vadd.f32 %v18023_v4, %v9049_v54  ;;  %v11779_v36 = vpop.eup %11778  ;;  %9853 = vst [vmem:[%s16941_s23 + $0x10] sm:$0xff] %v9773_v7  ;;  %v9731_v9 = vmul.f32 %v12248_v3, %v9651_v39  ;;  %v9535_v19 = vmul.f32 0.5, %v11777_v6  ;;  %v12252_v59 = vld [vmem:[%s12621_s13 + $0x150] sm:$0xff]  ;;  %v12254_v3 = vld [vmem:[%s12621_s13 + $0x148] sm:$0xff] }
 0x5bd   : > { %v9774_v20 = vadd.f32 %v12247_v27, %v9694_v0  ;;  %v9652_v1 = vadd.f32 0.5, %v9572_v52  ;;  %v11781_v62 = vpop.eup %11780  ;;  %v9733_v4 = vmul.f32 %v12249_v17, %v9653_v51  ;;  %v9654_v54 = vadd.f32 0.5, %v9574_v55  ;;  %v12253_v51 = vld [vmem:[%s12492_s8 + $0x158] sm:$0xff]  ;;  %v16969_v27 = vpop.f32.mrf.mxu0 }
 0x5be   : > { %9852 = vst [vmem:[%s16941_s23 + $0x8] sm:$0xff] %v9772_v15  ;;  %v9537_v57 = vmul.f32 0.5, %v11779_v36  ;;  %v16962_v44 = vmul.f32 0.5, %v9339_v41  ;;  %v11783_v22 = vpop.eup %11782  ;;  %v9811_v7 = vadd.f32 %v12250_v29, %v9731_v9  ;;  %v9615_v39 = vadd.f32 0.5, %v9535_v19 }
 0x5bf   : > { %9854 = vst [vmem:[%s16941_s23 + $0x18] sm:$0xff] %v9774_v20  ;;  %v9732_v0 = vmul.f32 %v12251_v13, %v9652_v1  ;;  %v9536_v52 = vmul.f32 0.5, %v11781_v62  ;;  %v11785_v6 = vpop.eup %11784  ;;  %v9813_v15 = vadd.f32 %v12252_v59, %v9733_v4  ;;  %v9734_v55 = vmul.f32 %v12253_v51, %v9654_v54  ;;  %v12255_v1 = vld [vmem:[%s12492_s8 + $0x20] sm:$0xff]  ;;  %v16974_v4 = vpop.f32.mrf.mxu1  ;;  %v12256_v54 = vld [vmem:[%s12621_s13 + $0x158] sm:$0xff] }
 0x5c0   : > { %v9617_v41 = vadd.f32 0.5, %v9537_v57  ;;  %v9538_v36 = vmul.f32 0.5, %v11783_v22  ;;  %v11787_v20 = vpop.eup %11786  ;;  %9891 = vst [vmem:[%s16941_s23 + $0x140] sm:$0xff] %v9811_v7  ;;  %v9695_v19 = vmul.f32 %v12255_v1, %v9615_v39  ;;  %v9575_v17 = vmul.f32 0.5, %v11785_v6  ;;  %v12257_v22 = vld [vmem:[%s12492_s8 + $0x30] sm:$0xff]  ;;  %v12258_v51 = vld [vmem:[%s12621_s13 + $0x20] sm:$0xff] }
 0x5c1   : > { %v9812_v9 = vadd.f32 %v12254_v3, %v9732_v0  ;;  %v9616_v62 = vadd.f32 0.5, %v9536_v52  ;;  %v11789_v29 = vpop.eup %11788  ;;  %9893 = vst [vmem:[%s16941_s23 + $0x150] sm:$0xff] %v9813_v15  ;;  %v9814_v57 = vadd.f32 %v12256_v54, %v9734_v55  ;;  %v9577_v59 = vmul.f32 0.5, %v11787_v20  ;;  %v12259_v52 = vld [vmem:[%s12492_s8 + $0x28] sm:$0xff]  ;;  %v12261_v54 = vld [vmem:[%s12492_s8 + $0x38] sm:$0xff] }
 0x5c2   : > { %v9697_v7 = vmul.f32 %v12257_v22, %v9617_v41  ;;  %v9618_v13 = vadd.f32 0.5, %v9538_v36  ;;  %v11791_v0 = vpop.eup %11790  ;;  %v9775_v39 = vadd.f32 %v12258_v51, %v9695_v19  ;;  %v9655_v3 = vadd.f32 0.5, %v9575_v17  ;;  %v12262_v22 = vld [vmem:[%s12621_s13 + $0x28] sm:$0xff]  ;;  %v12263_v17 = vld [vmem:[%s12492_s8 + $0x160] sm:$0xff] }
 0x5c3   : > { %9892 = vst [vmem:[%s16941_s23 + $0x148] sm:$0xff] %v9812_v9  ;;  %v9696_v6 = vmul.f32 %v12259_v52, %v9616_v62  ;;  %v9576_v15 = vmul.f32 0.5, %v11789_v29  ;;  %v11793_v1 = vpop.eup %11792  ;;  %9894 = vst [vmem:[%s16941_s23 + $0x158] sm:$0xff] %v9814_v57  ;;  %v9657_v36 = vadd.f32 0.5, %v9577_v59  ;;  %v9578_v20 = vmul.f32 0.5, %v11791_v0  ;;  %v16985_v9 = vpop.f32.mrf.mxu0  ;;  %v12265_v0 = vld [vmem:[%s12492_s8 + $0x170] sm:$0xff] }
 0x5c4   : > { %v9777_v55 = vadd.f32 %v12260_v56, %v9697_v7  ;;  %v9698_v41 = vmul.f32 %v12261_v54, %v9618_v13  ;;  %v11795_v19 = vpop.eup %11794  ;;  %9855 = vst [vmem:[%s16941_s23 + $0x20] sm:$0xff] %v9775_v39  ;;  %v9735_v29 = vmul.f32 %v12263_v17, %v9655_v3  ;;  %v9539_v56 = vmul.f32 0.5, %v11793_v1  ;;  %v16990_v7 = vpop.f32.mrf.mxu1  ;;  %v12264_v13 = vld [vmem:[%s12621_s13 + $0x38] sm:$0xff]  ;;  %v12266_v3 = vld [vmem:[%s12621_s13 + $0x160] sm:$0xff]  ;;  %v12267_v1 = vld [vmem:[%s12492_s8 + $0x168] sm:$0xff] }
 0x5c5   : > { %v9776_v62 = vadd.f32 %v12262_v22, %v9696_v6  ;;  %v9656_v57 = vadd.f32 0.5, %v9576_v15  ;;  %v9737_v39 = vmul.f32 %v12265_v0, %v9657_v36  ;;  %v9658_v52 = vadd.f32 0.5, %v9578_v20  ;;  %v17001_v0 = vpop.f32.mrf.mxu0 }
 0x5c6   : > { %v11797_v51 = vpop.eup %11796  ;;  %9857 = vst [vmem:[%s16941_s23 + $0x30] sm:$0xff] %v9777_v55  ;;  %v9778_v59 = vadd.f32 %v12264_v13, %v9698_v41  ;;  %v9541_v54 = vmul.f32 0.5, %v11795_v19  ;;  %v9815_v15 = vadd.f32 %v12266_v3, %v9735_v29  ;;  %v9619_v17 = vadd.f32 0.5, %v9539_v56  ;;  %v12268_v55 = vld [vmem:[%s12621_s13 + $0x170] sm:$0xff]  ;;  %v12269_v13 = vld [vmem:[%s12492_s8 + $0x178] sm:$0xff] }
 0x5c7   : > { %v11799_v6 = vpop.eup %11798  ;;  %9856 = vst [vmem:[%s16941_s23 + $0x28] sm:$0xff] %v9776_v62  ;;  %v9736_v22 = vmul.f32 %v12267_v1, %v9656_v57  ;;  %v9540_v26 = vmul.f32 0.5, %v11797_v51  ;;  %v9817_v41 = vadd.f32 %v12268_v55, %v9737_v39  ;;  %v9738_v36 = vmul.f32 %v12269_v13, %v9658_v52  ;;  %v12270_v62 = vld [vmem:[%s12621_s13 + $0x168] sm:$0xff]  ;;  %v12271_v57 = vld [vmem:[%s12492_s8 + $0x40] sm:$0xff]  ;;  %v12272_v39 = vld [vmem:[%s12621_s13 + $0x178] sm:$0xff] }
 0x5c8   : > { %9858 = vst [vmem:[%s16941_s23 + $0x38] sm:$0xff] %v9778_v59  ;;  %v9621_v20 = vadd.f32 0.5, %v9541_v54  ;;  %v9542_v19 = vmul.f32 0.5, %v11799_v6  ;;  %9895 = vst [vmem:[%s16941_s23 + $0x160] sm:$0xff] %v9815_v15  ;;  %v9699_v56 = vmul.f32 %v12271_v57, %v9619_v17  ;;  %11800 = vtanh.f32 %v16962_v44  ;;  %v17007_v59 = vpop.f32.mrf.mxu1  ;;  %v12273_v54 = vld [vmem:[%s12492_s8 + $0x50] sm:$0xff]  ;;  %v12275_v44 = vld [vmem:[%s12492_s8 + $0x48] sm:$0xff] }
 0x5c9   : > { %v9816_v29 = vadd.f32 %v12270_v62, %v9736_v22  ;;  %v9620_v51 = vadd.f32 0.5, %v9540_v26  ;;  %9897 = vst [vmem:[%s16941_s23 + $0x170] sm:$0xff] %v9817_v41  ;;  %v9818_v52 = vadd.f32 %v12272_v39, %v9738_v36  ;;  %v9051_v15 = vsub.f32 %v16611_v18, %v16931_v48  ;;  %v12274_v26 = vld [vmem:[%s12621_s13 + $0x40] sm:$0xff]  ;;  %v12276_v41 = vld [vmem:[%s12621_s13 + $0x50] sm:$0xff]  ;;  %v12277_v36 = vld [vmem:[%s12492_s8 + $0x58] sm:$0xff] }
 0x5ca   : > { %v9701_v6 = vmul.f32 %v12273_v54, %v9621_v20  ;;  %v9622_v3 = vadd.f32 0.5, %v9542_v19  ;;  %v9779_v1 = vadd.f32 %v12274_v26, %v9699_v56  ;;  %v9050_v17 = vsub.f32 %v16615_v5, %v16935_v34  ;;  %v8439_v19 = vpop.f32.mrf.mxu0  ;;  %v12278_v62 = vld [vmem:[%s12621_s13 + $0x48] sm:$0xff]  ;;  %v8482_v57 = vpop.f32.mrf.mxu1  ;;  %v12279_v56 = vld [vmem:[%s12621_s13 + $0x58] sm:$0xff] }
 0x5cb   : > { %9896 = vst [vmem:[%s16941_s23 + $0x168] sm:$0xff] %v9816_v29  ;;  %v9700_v22 = vmul.f32 %v12275_v44, %v9620_v51  ;;  %v9052_v55 = vsub.f32 %v16619_v12, %v16944_v10  ;;  %9898 = vst [vmem:[%s16941_s23 + $0x178] sm:$0xff] %v9818_v52  ;;  %v9341_v48 = vadd.f32 %v18024_v63, %v9051_v15  ;;  %v18028_v10 = vld [vmem:[#allocation43_spill] sm:$0xff]  ;;  %v18032_v15 = vld [vmem:[#allocation33_spill] sm:$0xff] }
 0x5cc   : > { %v9781_v13 = vadd.f32 %v12276_v41, %v9701_v6  ;;  %v9702_v18 = vmul.f32 %v12277_v36, %v9622_v3  ;;  %v9013_v20 = vsub.f32 %v16623_v58, %v16953_v45  ;;  %9859 = vst [vmem:[%s16941_s23 + $0x40] sm:$0xff] %v9779_v1  ;;  %v9340_v12 = vadd.f32 %v18026_v38, %v9050_v17  ;;  %v18029_v39 = vld [vmem:[#allocation111_spill] sm:$0xff]  ;;  %v18030_v58 = vld [vmem:[#allocation54_spill] sm:$0xff]  ;;  %v18031_v3 = vld [vmem:[#allocation112_spill] sm:$0xff]  ;;  %v8441_v44 = vpop.f32.mrf.mxu0 }
 0x5cd   : > { %v9780_v5 = vadd.f32 %v12278_v62, %v9700_v22  ;;  %v9342_v34 = vadd.f32 %v18027_v53, %v9052_v55  ;;  %v9015_v29 = vsub.f32 %v18028_v10, %v16958_v31  ;;  %v9421_v51 = vmul.f32 0.5, %v9341_v48  ;;  %v18034_v55 = vld [vmem:[#allocation56_spill] sm:$0xff] }
 0x5ce   : > { %9861 = vst [vmem:[%s16941_s23 + $0x50] sm:$0xff] %v9781_v13  ;;  %v9782_v63 = vadd.f32 %v12279_v56, %v9702_v18  ;;  %v9303_v52 = vadd.f32 %v18029_v39, %v9013_v20  ;;  %v9014_v45 = vsub.f32 %v18030_v58, %v16969_v27  ;;  %v9420_v54 = vmul.f32 0.5, %v9340_v12  ;;  %v18033_v27 = vld [vmem:[#allocation37_spill] sm:$0xff]  ;;  %v8484_v13 = vpop.f32.mrf.mxu1  ;;  %v8443_v62 = vpop.f32.mrf.mxu0  ;;  %v18038_v58 = vld [vmem:[#allocation50_spill] sm:$0xff] }
 0x5cf   : > { %9860 = vst [vmem:[%s16941_s23 + $0x48] sm:$0xff] %v9780_v5  ;;  %v9422_v6 = vmul.f32 0.5, %v9342_v34  ;;  %v9305_v38 = vadd.f32 %v18031_v3, %v9015_v29  ;;  %v9016_v53 = vsub.f32 %v16639_v8, %v16974_v4  ;;  %11802 = vtanh.f32 %v9421_v51  ;;  %v18035_v29 = vld [vmem:[#allocation35_spill] sm:$0xff]  ;;  %v18036_v51 = vld [vmem:[#allocation38_spill] sm:$0xff] }
 0x5d0   : > { %9862 = vst [vmem:[%s16941_s23 + $0x58] sm:$0xff] %v9782_v63  ;;  %v9383_v31 = vmul.f32 0.5, %v9303_v52  ;;  %v9304_v26 = vadd.f32 %v18032_v15, %v9014_v45  ;;  %v9053_v1 = vsub.f32 %v16643_v50, %v16985_v9  ;;  %11804 = vtanh.f32 %v9420_v54 }
 0x5d1   : > { %v9385_v22 = vmul.f32 0.5, %v9305_v38  ;;  %v9306_v17 = vadd.f32 %v18033_v27, %v9016_v53  ;;  %v9055_v41 = vsub.f32 %v18034_v55, %v16990_v7  ;;  %11806 = vtanh.f32 %v9422_v6  ;;  %v18039_v6 = vld [vmem:[#allocation51_spill] sm:$0xff]  ;;  %v18040_v53 = vld [vmem:[#allocation42_spill] sm:$0xff] }
 0x5d2   : > { %v9384_v36 = vmul.f32 0.5, %v9304_v26  ;;  %v9343_v8 = vadd.f32 %v18029_v39, %v9053_v1  ;;  %v9054_v4 = vsub.f32 %v16651_v14, %v17001_v0  ;;  %11808 = vtanh.f32 %v9383_v31  ;;  %v8486_v0 = vpop.f32.mrf.mxu1  ;;  %v18037_v39 = vld [vmem:[#allocation40_spill] sm:$0xff]  ;;  %v12280_v1 = vld [vmem:[%s12492_s8 + $0x180] sm:$0xff] }
 0x5d3   : > { %v9386_v18 = vmul.f32 0.5, %v9306_v17  ;;  %v9345_v50 = vadd.f32 %v18031_v3, %v9055_v41  ;;  %v9056_v9 = vsub.f32 %v16655_v47, %v17007_v59  ;;  %11810 = vtanh.f32 %v9385_v22 }
 0x5d4   : > { %v9423_v48 = vmul.f32 0.5, %v9343_v8  ;;  %v9344_v20 = vadd.f32 %v18032_v15, %v9054_v4  ;;  %v9017_v7 = vsub.f32 %v16659_v35, %v8439_v19  ;;  %11812 = vtanh.f32 %v9384_v36  ;;  %v8488_v38 = vpop.f32.mrf.mxu1  ;;  %v18041_v15 = vld [vmem:[#allocation52_spill] sm:$0xff] }
 0x5d5   : > { %v9425_v5 = vmul.f32 0.5, %v9345_v50  ;;  %v9346_v12 = vadd.f32 %v18033_v27, %v9056_v9  ;;  %v9019_v14 = vsub.f32 %v16663_v23, %v8482_v57  ;;  %v11801_v34 = vpop.eup %11800  ;;  %11814 = vtanh.f32 %v9386_v18  ;;  %v8445_v57 = vpop.f32.mrf.mxu0  ;;  %v18042_v27 = vld [vmem:[#allocation47_spill] sm:$0xff]  ;;  %v12281_v18 = vld [vmem:[%s12621_s13 + $0x180] sm:$0xff] }
 0x5d6   : > { %v9424_v10 = vmul.f32 0.5, %v9344_v20  ;;  %v9307_v56 = vadd.f32 %v18035_v29, %v9017_v7  ;;  %v9018_v47 = vsub.f32 %v16667_v37, %v8441_v44  ;;  %v9579_v59 = vmul.f32 0.5, %v11801_v34  ;;  %v17074_v20 = vpop.f32.mrf.mxu1 }
 0x5d7   : > { %11816 = vtanh.f32 %v9423_v48  ;;  %v9426_v63 = vmul.f32 0.5, %v9346_v12  ;;  %v9309_v35 = vadd.f32 %v18036_v51, %v9019_v14  ;;  %v9020_v23 = vsub.f32 %v18038_v58, %v8484_v13  ;;  %v18043_v13 = vld [vmem:[#allocation49_spill] sm:$0xff]  ;;  %v8525_v8 = vpop.f32.mrf.mxu0 }
 0x5d8   : > { %11818 = vtanh.f32 %v9425_v5  ;;  %v9387_v19 = vmul.f32 0.5, %v9307_v56  ;;  %v9308_v52 = vadd.f32 %v18037_v39, %v9018_v47  ;;  %v9659_v45 = vadd.f32 0.5, %v9579_v59 }
 0x5d9   : > { %11820 = vtanh.f32 %v9424_v10  ;;  %v9389_v54 = vmul.f32 0.5, %v9309_v35  ;;  %v9057_v3 = vsub.f32 %v18039_v6, %v8443_v62  ;;  %v9310_v31 = vadd.f32 %v18040_v53, %v9020_v23  ;;  %v18044_v10 = vld [vmem:[#allocation58_spill] sm:$0xff]  ;;  %v17082_v23 = vpop.f32.mrf.mxu1 }
 0x5da   : > { %11822 = vtanh.f32 %v9426_v63  ;;  %v9388_v37 = vmul.f32 0.5, %v9308_v52  ;;  %v9059_v26 = vsub.f32 %v18041_v15, %v8486_v0  ;;  %v9739_v44 = vmul.f32 %v12280_v1, %v9659_v45  ;;  %v18045_v52 = vld [vmem:[#allocation41_spill] sm:$0xff]  ;;  %v12282_v45 = vld [vmem:[%s12492_s8 + $0x190] sm:$0xff] }
 0x5db   : > { %11824 = vtanh.f32 %v9387_v19  ;;  %v9347_v22 = vadd.f32 %v18035_v29, %v9057_v3  ;;  %v9058_v17 = vsub.f32 %v18042_v27, %v8445_v57  ;;  %v9390_v55 = vmul.f32 0.5, %v9310_v31  ;;  %v12285_v27 = vld [vmem:[%s12492_s8 + $0x198] sm:$0xff] }
 0x5dc   : > { %11826 = vtanh.f32 %v9389_v54  ;;  %v9349_v41 = vadd.f32 %v18036_v51, %v9059_v26  ;;  %v9060_v36 = vsub.f32 %v18043_v13, %v8488_v38  ;;  %v11803_v4 = vpop.eup %11802  ;;  %v9819_v50 = vadd.f32 %v12281_v18, %v9739_v44  ;;  %v17079_v51 = vpop.f32.mrf.mxu0  ;;  %v12284_v44 = vld [vmem:[%s12621_s13 + $0x190] sm:$0xff]  ;;  %v12287_v18 = vld [vmem:[%s12492_s8 + $0x60] sm:$0xff] }
 0x5dd   : > { %11828 = vtanh.f32 %v9388_v37  ;;  %v9427_v9 = vmul.f32 0.5, %v9347_v22  ;;  %v9348_v48 = vadd.f32 %v18037_v39, %v9058_v17  ;;  %v11805_v7 = vpop.eup %11804  ;;  %v9581_v62 = vmul.f32 0.5, %v11803_v4  ;;  %v12283_v37 = vld [vmem:[%s12492_s8 + $0x188] sm:$0xff] }
 0x5de   : > { %11830 = vtanh.f32 %v9390_v55  ;;  %v9429_v5 = vmul.f32 0.5, %v9349_v41  ;;  %v9350_v12 = vadd.f32 %v18040_v53, %v9060_v36  ;;  %v11807_v14 = vpop.eup %11806  ;;  %9899 = vst [vmem:[%s16941_s23 + $0x180] sm:$0xff] %v9819_v50  ;;  %v9580_v0 = vmul.f32 0.5, %v11805_v7  ;;  %v17090_v13 = vpop.f32.mrf.mxu0 }
 0x5df   : > { %11832 = vtanh.f32 %v9427_v9  ;;  %v9428_v34 = vmul.f32 0.5, %v9348_v48  ;;  %v9021_v29 = vsub.f32 %v18044_v10, %v8525_v8  ;;  %v11809_v56 = vpop.eup %11808  ;;  %v9661_v47 = vadd.f32 0.5, %v9581_v62  ;;  %v12286_v8 = vld [vmem:[%s12621_s13 + $0x188] sm:$0xff]  ;;  %v17094_v7 = vpop.f32.mrf.mxu1 }
 0x5e0   : > { %v9582_v59 = vmul.f32 0.5, %v11807_v14  ;;  %11834 = vtanh.f32 %v9429_v5  ;;  %v9430_v63 = vmul.f32 0.5, %v9350_v12  ;;  %v11811_v35 = vpop.eup %11810  ;;  %v9660_v19 = vadd.f32 0.5, %v9580_v0  ;;  %v12288_v5 = vld [vmem:[%s12621_s13 + $0x198] sm:$0xff]  ;;  %v12289_v14 = vld [vmem:[%s12492_s8 + $0x70] sm:$0xff] }
 0x5e1   : > { %v9543_v39 = vmul.f32 0.5, %v11809_v56  ;;  %11836 = vtanh.f32 %v9428_v34  ;;  %v9311_v58 = vadd.f32 %v18045_v52, %v9021_v29  ;;  %v11813_v57 = vpop.eup %11812  ;;  %v9741_v54 = vmul.f32 %v12282_v45, %v9661_v47  ;;  %v12290_v56 = vld [vmem:[%s12621_s13 + $0x60] sm:$0xff]  ;;  %v12293_v45 = vld [vmem:[%s12492_s8 + $0x78] sm:$0xff] }
 0x5e2   : > { %v9662_v6 = vadd.f32 0.5, %v9582_v59  ;;  %v9545_v3 = vmul.f32 0.5, %v11811_v35  ;;  %11838 = vtanh.f32 %v9430_v63  ;;  %v11815_v38 = vpop.eup %11814  ;;  %v9740_v53 = vmul.f32 %v12283_v37, %v9660_v19  ;;  %v12291_v59 = vld [vmem:[%s12492_s8 + $0x68] sm:$0xff] }
 0x5e3   : > { %v9623_v31 = vadd.f32 0.5, %v9543_v39  ;;  %v9544_v15 = vmul.f32 0.5, %v11813_v57  ;;  %v17086_v26 = vmul.f32 0.5, %v9311_v58  ;;  %v9821_v22 = vadd.f32 %v12284_v44, %v9741_v54  ;;  %v12292_v58 = vld [vmem:[%s12621_s13 + $0x70] sm:$0xff] }
 0x5e4   : > { %v11817_v1 = vpop.eup %11816  ;;  %v9742_v17 = vmul.f32 %v12285_v27, %v9662_v6  ;;  %v9625_v55 = vadd.f32 0.5, %v9545_v3  ;;  %v9546_v41 = vmul.f32 0.5, %v11815_v38  ;;  %v9820_v4 = vadd.f32 %v12286_v8, %v9740_v53  ;;  %v17105_v38 = vpop.f32.mrf.mxu0  ;;  %v12294_v53 = vld [vmem:[%s12621_s13 + $0x68] sm:$0xff] }
 0x5e5   : > { %v11819_v36 = vpop.eup %11818  ;;  %v9703_v50 = vmul.f32 %v12287_v18, %v9623_v31  ;;  %v9624_v9 = vadd.f32 0.5, %v9544_v15  ;;  %v9583_v48 = vmul.f32 0.5, %v11817_v1  ;;  %9901 = vst [vmem:[%s16941_s23 + $0x190] sm:$0xff] %v9821_v22  ;;  %v12295_v15 = vld [vmem:[%s12492_s8 + $0x1a0] sm:$0xff]  ;;  %v17110_v27 = vpop.f32.mrf.mxu1  ;;  %11840 = vtanh.f32 %v17086_v26  ;;  %v12315_v26 = vld [vmem:[%s12492_s8 + $0x1c8] sm:$0xff] }
 0x5e6   : > { %v11821_v62 = vpop.eup %11820  ;;  %v9822_v12 = vadd.f32 %v12288_v5, %v9742_v17  ;;  %v9705_v0 = vmul.f32 %v12289_v14, %v9625_v55  ;;  %v9626_v34 = vadd.f32 0.5, %v9546_v41  ;;  %v9585_v10 = vmul.f32 0.5, %v11819_v36  ;;  %9900 = vst [vmem:[%s16941_s23 + $0x188] sm:$0xff] %v9820_v4  ;;  %v12296_v55 = vld [vmem:[%s12621_s13 + $0x78] sm:$0xff]  ;;  %v12297_v36 = vld [vmem:[%s12492_s8 + $0x1b0] sm:$0xff] }
 0x5e7   : > { %v11823_v29 = vpop.eup %11822  ;;  %v9783_v47 = vadd.f32 %v12290_v56, %v9703_v50  ;;  %v9704_v63 = vmul.f32 %v12291_v59, %v9624_v9  ;;  %v9663_v35 = vadd.f32 0.5, %v9583_v48  ;;  %v9584_v19 = vmul.f32 0.5, %v11821_v62  ;;  %v12298_v9 = vld [vmem:[%s12621_s13 + $0x1a0] sm:$0xff]  ;;  %v12299_v62 = vld [vmem:[%s12492_s8 + $0x1a8] sm:$0xff] }
 0x5e8   : > { %v11825_v39 = vpop.eup %11824  ;;  %9902 = vst [vmem:[%s16941_s23 + $0x198] sm:$0xff] %v9822_v12  ;;  %v9785_v57 = vadd.f32 %v12292_v58, %v9705_v0  ;;  %v9706_v54 = vmul.f32 %v12293_v45, %v9626_v34  ;;  %v9665_v6 = vadd.f32 0.5, %v9585_v10  ;;  %v9586_v3 = vmul.f32 0.5, %v11823_v29  ;;  %v12300_v34 = vld [vmem:[%s12621_s13 + $0x1b0] sm:$0xff]  ;;  %v12301_v29 = vld [vmem:[%s12492_s8 + $0x1b8] sm:$0xff]  ;;  %v12303_v58 = vld [vmem:[%s12492_s8 + $0x80] sm:$0xff] }
 0x5e9   : > { %v11827_v37 = vpop.eup %11826  ;;  %9863 = vst [vmem:[%s16941_s23 + $0x60] sm:$0xff] %v9783_v47  ;;  %v9784_v31 = vadd.f32 %v12294_v53, %v9704_v63  ;;  %v9743_v1 = vmul.f32 %v12295_v15, %v9663_v35  ;;  %v9664_v44 = vadd.f32 0.5, %v9584_v19  ;;  %v9547_v22 = vmul.f32 0.5, %v11825_v39  ;;  %v17121_v63 = vpop.f32.mrf.mxu0  ;;  %v12302_v19 = vld [vmem:[%s12621_s13 + $0x1a8] sm:$0xff] }
 0x5ea   : > { %v11829_v17 = vpop.eup %11828  ;;  %9865 = vst [vmem:[%s16941_s23 + $0x70] sm:$0xff] %v9785_v57  ;;  %v9786_v41 = vadd.f32 %v12296_v55, %v9706_v54  ;;  %v9745_v8 = vmul.f32 %v12297_v36, %v9665_v6  ;;  %v9666_v4 = vadd.f32 0.5, %v9586_v3  ;;  %v9549_v18 = vmul.f32 0.5, %v11827_v37  ;;  %v17126_v6 = vpop.f32.mrf.mxu1  ;;  %v12304_v37 = vld [vmem:[%s12621_s13 + $0x1b8] sm:$0xff] }
 0x5eb   : > { %v11831_v50 = vpop.eup %11830  ;;  %9864 = vst [vmem:[%s16941_s23 + $0x68] sm:$0xff] %v9784_v31  ;;  %v9823_v48 = vadd.f32 %v12298_v9, %v9743_v1  ;;  %v9744_v5 = vmul.f32 %v12299_v62, %v9664_v44  ;;  %v9627_v12 = vadd.f32 0.5, %v9547_v22  ;;  %v9548_v14 = vmul.f32 0.5, %v11829_v17  ;;  %v12305_v31 = vld [vmem:[%s12492_s8 + $0x90] sm:$0xff]  ;;  %v12306_v17 = vld [vmem:[%s12621_s13 + $0x80] sm:$0xff]  ;;  %v12309_v9 = vld [vmem:[%s12492_s8 + $0x98] sm:$0xff] }
 0x5ec   : > { %v11833_v0 = vpop.eup %11832  ;;  %9866 = vst [vmem:[%s16941_s23 + $0x78] sm:$0xff] %v9786_v41  ;;  %v9825_v10 = vadd.f32 %v12300_v34, %v9745_v8  ;;  %v9746_v56 = vmul.f32 %v12301_v29, %v9666_v4  ;;  %v9629_v47 = vadd.f32 0.5, %v9549_v18  ;;  %v9550_v59 = vmul.f32 0.5, %v11831_v50  ;;  %v12307_v41 = vld [vmem:[%s12492_s8 + $0x88] sm:$0xff]  ;;  %v12308_v18 = vld [vmem:[%s12621_s13 + $0x90] sm:$0xff]  ;;  %v12311_v34 = vld [vmem:[%s12492_s8 + $0x1c0] sm:$0xff] }
 0x5ed   : > { %v11835_v35 = vpop.eup %11834  ;;  %9903 = vst [vmem:[%s16941_s23 + $0x1a0] sm:$0xff] %v9823_v48  ;;  %v9824_v39 = vadd.f32 %v12302_v19, %v9744_v5  ;;  %v9707_v57 = vmul.f32 %v12303_v58, %v9627_v12  ;;  %v9628_v45 = vadd.f32 0.5, %v9548_v14  ;;  %v9587_v54 = vmul.f32 0.5, %v11833_v0  ;;  %v17137_v12 = vpop.f32.mrf.mxu0  ;;  %v12310_v14 = vld [vmem:[%s12621_s13 + $0x88] sm:$0xff] }
 0x5ee   : > { %v11837_v3 = vpop.eup %11836  ;;  %9905 = vst [vmem:[%s16941_s23 + $0x1b0] sm:$0xff] %v9825_v10  ;;  %v9826_v53 = vadd.f32 %v12304_v37, %v9746_v56  ;;  %v9709_v15 = vmul.f32 %v12305_v31, %v9629_v47  ;;  %v9630_v1 = vadd.f32 0.5, %v9550_v59  ;;  %v9589_v44 = vmul.f32 0.5, %v11835_v35  ;;  %v17143_v56 = vpop.f32.mrf.mxu1  ;;  %v12312_v47 = vld [vmem:[%s12621_s13 + $0x98] sm:$0xff]  ;;  %v12313_v35 = vld [vmem:[%s12492_s8 + $0x1d0] sm:$0xff]  ;;  %v18046_v58 = vld [vmem:[#allocation59_spill] sm:$0xff] }
 0x5ef   : > { %v11839_v22 = vpop.eup %11838  ;;  %9904 = vst [vmem:[%s16941_s23 + $0x1a8] sm:$0xff] %v9824_v39  ;;  %v9787_v55 = vadd.f32 %v12306_v17, %v9707_v57  ;;  %v9708_v36 = vmul.f32 %v12307_v41, %v9628_v45  ;;  %v9667_v8 = vadd.f32 0.5, %v9587_v54  ;;  %v9588_v4 = vmul.f32 0.5, %v11837_v3  ;;  %v12314_v45 = vld [vmem:[%s12621_s13 + $0x1c0] sm:$0xff]  ;;  %v18047_v37 = vld [vmem:[#allocation60_spill] sm:$0xff]  ;;  %v18048_v31 = vld [vmem:[#allocation61_spill] sm:$0xff] }
 0x5f0   : > { %9906 = vst [vmem:[%s16941_s23 + $0x1b8] sm:$0xff] %v9826_v53  ;;  %v9789_v50 = vadd.f32 %v12308_v18, %v9709_v15  ;;  %v9710_v48 = vmul.f32 %v12309_v9, %v9630_v1  ;;  %v9669_v62 = vadd.f32 0.5, %v9589_v44  ;;  %v9590_v5 = vmul.f32 0.5, %v11839_v22  ;;  %v12316_v1 = vld [vmem:[%s12621_s13 + $0x1d0] sm:$0xff]  ;;  %v12317_v22 = vld [vmem:[%s12492_s8 + $0x1d8] sm:$0xff]  ;;  %v18050_v41 = vld [vmem:[#allocation55_spill] sm:$0xff] }
 0x5f1   : > { %9867 = vst [vmem:[%s16941_s23 + $0x80] sm:$0xff] %v9787_v55  ;;  %v9788_v0 = vadd.f32 %v12310_v14, %v9708_v36  ;;  %v9747_v10 = vmul.f32 %v12311_v34, %v9667_v8  ;;  %v9668_v29 = vadd.f32 0.5, %v9588_v4  ;;  %v9023_v57 = vsub.f32 %v18046_v58, %v17074_v20  ;;  %v18049_v17 = vld [vmem:[#allocation53_spill] sm:$0xff]  ;;  %v8615_v8 = vpop.f32.mrf.mxu0  ;;  %v12318_v4 = vld [vmem:[%s12621_s13 + $0x1c8] sm:$0xff]  ;;  %v18051_v18 = vld [vmem:[#allocation62_spill] sm:$0xff] }
 0x5f2   : > { %9869 = vst [vmem:[%s16941_s23 + $0x90] sm:$0xff] %v9789_v50  ;;  %v9790_v59 = vadd.f32 %v12312_v47, %v9710_v48  ;;  %v9749_v19 = vmul.f32 %v12313_v35, %v9669_v62  ;;  %v9670_v39 = vadd.f32 0.5, %v9590_v5  ;;  %v9022_v53 = vsub.f32 %v18047_v37, %v17079_v51  ;;  %v18052_v50 = vld [vmem:[#allocation64_spill] sm:$0xff]  ;;  %v18053_v48 = vld [vmem:[#allocation57_spill] sm:$0xff]  ;;  %v8658_v5 = vpop.f32.mrf.mxu1 }
 0x5f3   : > { %9868 = vst [vmem:[%s16941_s23 + $0x88] sm:$0xff] %v9788_v0  ;;  %v9827_v54 = vadd.f32 %v12314_v45, %v9747_v10  ;;  %v9748_v3 = vmul.f32 %v12315_v26, %v9668_v29  ;;  %v9024_v15 = vsub.f32 %v18048_v31, %v17082_v23  ;;  %v9313_v55 = vadd.f32 %v18049_v17, %v9023_v57  ;;  %v12319_v14 = vld [vmem:[%s12621_s13 + $0x1d8] sm:$0xff]  ;;  %v18056_v57 = vld [vmem:[#allocation63_spill] sm:$0xff] }
 0x5f4   : > { %9870 = vst [vmem:[%s16941_s23 + $0x98] sm:$0xff] %v9790_v59  ;;  %v9829_v44 = vadd.f32 %v12316_v1, %v9749_v19  ;;  %v9750_v20 = vmul.f32 %v12317_v22, %v9670_v39  ;;  %v9061_v36 = vsub.f32 %v18050_v41, %v17090_v13  ;;  %v9312_v23 = vadd.f32 %v18051_v18, %v9022_v53  ;;  %v18054_v13 = vld [vmem:[#allocation66_spill] sm:$0xff]  ;;  %v18055_v19 = vld [vmem:[#allocation67_spill] sm:$0xff]  ;;  %v18057_v26 = vld [vmem:[#allocation65_spill] sm:$0xff]  ;;  %v8660_v37 = vpop.f32.mrf.mxu1 }
 0x5f5   : > { %9907 = vst [vmem:[%s16941_s23 + $0x1c0] sm:$0xff] %v9827_v54  ;;  %v9828_v51 = vadd.f32 %v12318_v4, %v9748_v3  ;;  %v9314_v9 = vadd.f32 %v18052_v50, %v9024_v15  ;;  %v9063_v62 = vsub.f32 %v18053_v48, %v17094_v7  ;;  %v9393_v34 = vmul.f32 0.5, %v9313_v55  ;;  %v18059_v15 = vld [vmem:[#allocation78_spill] sm:$0xff]  ;;  %v18060_v22 = vld [vmem:[#allocation72_spill] sm:$0xff] }
 0x5f6   : > { %9909 = vst [vmem:[%s16941_s23 + $0x1d0] sm:$0xff] %v9829_v44  ;;  %v9830_v0 = vadd.f32 %v12319_v14, %v9750_v20  ;;  %v9351_v10 = vadd.f32 %v18045_v52, %v9061_v36  ;;  %v9062_v29 = vsub.f32 %v18054_v13, %v17105_v38  ;;  %v9392_v47 = vmul.f32 0.5, %v9312_v23  ;;  %v8617_v52 = vpop.f32.mrf.mxu0  ;;  %v18061_v20 = vld [vmem:[#allocation80_spill] sm:$0xff]  ;;  %v18064_v23 = vld [vmem:[#allocation69_spill] sm:$0xff]  ;;  %v8740_v48 = vpop.f32.mrf.mxu1 }
 0x5f7   : > { %9908 = vst [vmem:[%s16941_s23 + $0x1c8] sm:$0xff] %v9828_v51  ;;  %v9394_v59 = vmul.f32 0.5, %v9314_v9  ;;  %v9353_v35 = vadd.f32 %v18049_v17, %v9063_v62  ;;  %v9064_v39 = vsub.f32 %v18055_v19, %v17110_v27  ;;  %11842 = vtanh.f32 %v9393_v34  ;;  %v18058_v27 = vld [vmem:[#allocation70_spill] sm:$0xff]  ;;  %v18062_v41 = vld [vmem:[#allocation68_spill] sm:$0xff]  ;;  %v18065_v9 = vld [vmem:[#allocation75_spill] sm:$0xff]  ;;  %v11841_v62 = vpop.eup %11840 }
 0x5f8   : > { %9910 = vst [vmem:[%s16941_s23 + $0x1d8] sm:$0xff] %v9830_v0  ;;  %v9431_v7 = vmul.f32 0.5, %v9351_v10  ;;  %v9352_v58 = vadd.f32 %v18051_v18, %v9062_v29  ;;  %v9025_v45 = vsub.f32 %v18056_v57, %v17121_v63  ;;  %11844 = vtanh.f32 %v9392_v47  ;;  %v8697_v51 = vpop.f32.mrf.mxu0 }
 0x5f9   : > { %v9433_v54 = vmul.f32 0.5, %v9353_v35  ;;  %v9354_v38 = vadd.f32 %v18052_v50, %v9064_v39  ;;  %v9027_v3 = vsub.f32 %v18057_v26, %v17126_v6  ;;  %11846 = vtanh.f32 %v9394_v59  ;;  %v18063_v6 = vld [vmem:[#allocation74_spill] sm:$0xff]  ;;  %v18068_v26 = vld [vmem:[#allocation76_spill] sm:$0xff] }
 0x5fa   : > { %v9432_v53 = vmul.f32 0.5, %v9352_v58  ;;  %v9315_v31 = vadd.f32 %v18058_v27, %v9025_v45  ;;  %v9026_v1 = vsub.f32 %v18059_v15, %v17137_v12  ;;  %11848 = vtanh.f32 %v9431_v7  ;;  %v18067_v59 = vld [vmem:[#allocation82_spill] sm:$0xff]  ;;  %v8699_v35 = vpop.f32.mrf.mxu0  ;;  %v8742_v58 = vpop.f32.mrf.mxu1 }
 0x5fb   : > { %v9434_v44 = vmul.f32 0.5, %v9354_v38  ;;  %v9317_v63 = vadd.f32 %v18060_v22, %v9027_v3  ;;  %v9028_v17 = vsub.f32 %v18061_v20, %v17143_v56  ;;  %11850 = vtanh.f32 %v9433_v54  ;;  %v18066_v56 = vld [vmem:[#allocation71_spill] sm:$0xff]  ;;  %v12320_v54 = vld [vmem:[%s12492_s8 + $0xa0] sm:$0xff] }
 0x5fc   : > { %v9395_v55 = vmul.f32 0.5, %v9315_v31  ;;  %v9316_v36 = vadd.f32 %v18062_v41, %v9026_v1  ;;  %v9065_v4 = vsub.f32 %v18063_v6, %v8615_v8  ;;  %11852 = vtanh.f32 %v9432_v53  ;;  %v8701_v15 = vpop.f32.mrf.mxu0 }
 0x5fd   : > { %v9397_v18 = vmul.f32 0.5, %v9317_v63  ;;  %v9318_v50 = vadd.f32 %v18064_v23, %v9028_v17  ;;  %v9067_v12 = vsub.f32 %v18065_v9, %v8658_v5  ;;  %11854 = vtanh.f32 %v9434_v44  ;;  %v12321_v44 = vld [vmem:[%s12621_s13 + $0xa0] sm:$0xff] }
 0x5fe   : > { %v9396_v14 = vmul.f32 0.5, %v9316_v36  ;;  %v9355_v0 = vadd.f32 %v18058_v27, %v9065_v4  ;;  %v9066_v34 = vsub.f32 %v18066_v56, %v8617_v52  ;;  %v9551_v10 = vmul.f32 0.5, %v11841_v62  ;;  %v18069_v27 = vld [vmem:[#allocation77_spill] sm:$0xff]  ;;  %v17211_v36 = vpop.f32.mrf.mxu1 }
 0x5ff   : > { %11856 = vtanh.f32 %v9395_v55  ;;  %v9398_v13 = vmul.f32 0.5, %v9318_v50  ;;  %v9357_v8 = vadd.f32 %v18060_v22, %v9067_v12  ;;  %v9068_v5 = vsub.f32 %v18067_v59, %v8660_v37 }
 0x600   : > { %11858 = vtanh.f32 %v9397_v18  ;;  %v9435_v29 = vmul.f32 0.5, %v9355_v0  ;;  %v9356_v47 = vadd.f32 %v18062_v41, %v9066_v34  ;;  %v9631_v19 = vadd.f32 0.5, %v9551_v10  ;;  %v17216_v0 = vpop.f32.mrf.mxu0  ;;  %v12322_v34 = vld [vmem:[%s12492_s8 + $0xb0] sm:$0xff] }
 0x601   : > { %11860 = vtanh.f32 %v9396_v14  ;;  %v9437_v39 = vmul.f32 0.5, %v9357_v8  ;;  %v9029_v7 = vsub.f32 %v16791_v46, %v8697_v51  ;;  %v9358_v45 = vadd.f32 %v18064_v23, %v9068_v5  ;;  %v17219_v8 = vpop.f32.mrf.mxu1 }
 0x602   : > { %11862 = vtanh.f32 %v9398_v13  ;;  %v9436_v57 = vmul.f32 0.5, %v9356_v47  ;;  %v9031_v52 = vsub.f32 %v16795_v28, %v8740_v48  ;;  %v9711_v38 = vmul.f32 %v12320_v54, %v9631_v19  ;;  %v12323_v47 = vld [vmem:[%s12492_s8 + $0xa8] sm:$0xff] }
 0x603   : > { %11864 = vtanh.f32 %v9435_v29  ;;  %v9319_v3 = vadd.f32 %v18068_v26, %v9029_v7  ;;  %v9030_v37 = vsub.f32 %v16799_v43, %v8699_v35  ;;  %v9438_v53 = vmul.f32 0.5, %v9358_v45  ;;  %v18070_v43 = vld [vmem:[#allocation73_spill] sm:$0xff]  ;;  %v12324_v7 = vld [vmem:[%s12621_s13 + $0xb0] sm:$0xff] }
 0x604   : > { %11866 = vtanh.f32 %v9437_v39  ;;  %v9321_v31 = vadd.f32 %v18069_v27, %v9031_v52  ;;  %v9032_v46 = vsub.f32 %v16803_v16, %v8742_v58  ;;  %v11843_v1 = vpop.eup %11842  ;;  %v9791_v22 = vadd.f32 %v12321_v44, %v9711_v38  ;;  %v12328_v44 = vld [vmem:[%s12621_s13 + $0xb8] sm:$0xff] }
 0x605   : > { %11868 = vtanh.f32 %v9436_v57  ;;  %v9399_v28 = vmul.f32 0.5, %v9319_v3  ;;  %v9320_v63 = vadd.f32 %v16784_v25, %v9030_v37  ;;  %v11845_v20 = vpop.eup %11844  ;;  %v9553_v17 = vmul.f32 0.5, %v11843_v1  ;;  %v12325_v57 = vld [vmem:[%s12492_s8 + $0xb8] sm:$0xff]  ;;  %v12327_v37 = vld [vmem:[%s12492_s8 + $0x1e0] sm:$0xff] }
 0x606   : > { %11870 = vtanh.f32 %v9438_v53  ;;  %v9401_v55 = vmul.f32 0.5, %v9321_v31  ;;  %v9322_v41 = vadd.f32 %v18070_v43, %v9032_v46  ;;  %v11847_v6 = vpop.eup %11846  ;;  %9871 = vst [vmem:[%s16941_s23 + $0xa0] sm:$0xff] %v9791_v22  ;;  %v9552_v4 = vmul.f32 0.5, %v11845_v20 }
 0x607   : > { %11872 = vtanh.f32 %v9399_v28  ;;  %v9400_v16 = vmul.f32 0.5, %v9320_v63  ;;  %v9069_v51 = vsub.f32 %v16807_v40, %v8701_v15  ;;  %v11849_v18 = vpop.eup %11848  ;;  %v9633_v23 = vadd.f32 0.5, %v9553_v17  ;;  %v17228_v15 = vpop.f32.mrf.mxu0  ;;  %v12329_v28 = vld [vmem:[%s12492_s8 + $0x1f0] sm:$0xff] }
 0x608   : > { %v9554_v50 = vmul.f32 0.5, %v11847_v6  ;;  %11874 = vtanh.f32 %v9401_v55  ;;  %v9402_v9 = vmul.f32 0.5, %v9322_v41  ;;  %v11851_v12 = vpop.eup %11850  ;;  %v9632_v48 = vadd.f32 0.5, %v9552_v4  ;;  %v17233_v55 = vpop.f32.mrf.mxu1  ;;  %v12330_v6 = vld [vmem:[%s12621_s13 + $0x1e0] sm:$0xff] }
 0x609   : > { %v9591_v62 = vmul.f32 0.5, %v11849_v18  ;;  %11876 = vtanh.f32 %v9400_v16  ;;  %v9359_v14 = vadd.f32 %v18068_v26, %v9069_v51  ;;  %v11853_v56 = vpop.eup %11852  ;;  %v9713_v10 = vmul.f32 %v12322_v34, %v9633_v23  ;;  %v12326_v26 = vld [vmem:[%s12621_s13 + $0xa8] sm:$0xff] }
 0x60a   : > { %v9634_v40 = vadd.f32 0.5, %v9554_v50  ;;  %v9593_v13 = vmul.f32 0.5, %v11851_v12  ;;  %11878 = vtanh.f32 %v9402_v9  ;;  %v11855_v29 = vpop.eup %11854  ;;  %v9712_v59 = vmul.f32 %v12323_v47, %v9632_v48  ;;  %v12331_v16 = vld [vmem:[%s12492_s8 + $0x1e8] sm:$0xff]  ;;  %v12332_v9 = vld [vmem:[%s12621_s13 + $0x1f0] sm:$0xff]  ;;  %v12333_v48 = vld [vmem:[%s12492_s8 + $0x1f8] sm:$0xff] }
 0x60b   : > { %v9671_v5 = vadd.f32 0.5, %v9591_v62  ;;  %v9592_v35 = vmul.f32 0.5, %v11853_v56  ;;  %v17222_v19 = vmul.f32 0.5, %v9359_v14  ;;  %v9793_v58 = vadd.f32 %v12324_v7, %v9713_v10  ;;  %v12334_v10 = vld [vmem:[%s12621_s13 + $0x1e8] sm:$0xff] }
 0x60c   : > { %v11857_v39 = vpop.eup %11856  ;;  %v9714_v45 = vmul.f32 %v12325_v57, %v9634_v40  ;;  %v9673_v52 = vadd.f32 0.5, %v9593_v13  ;;  %v9594_v54 = vmul.f32 0.5, %v11855_v29  ;;  %v9792_v3 = vadd.f32 %v12326_v26, %v9712_v59  ;;  %v12335_v13 = vld [vmem:[%s12492_s8 + $0xc0] sm:$0xff] }
 0x60d   : > { %v11859_v38 = vpop.eup %11858  ;;  %v9751_v53 = vmul.f32 %v12327_v37, %v9671_v5  ;;  %v9672_v31 = vadd.f32 0.5, %v9592_v35  ;;  %v9555_v46 = vmul.f32 0.5, %v11857_v39  ;;  %9873 = vst [vmem:[%s16941_s23 + $0xb0] sm:$0xff] %v9793_v58  ;;  %v17244_v5 = vpop.f32.mrf.mxu0  ;;  %v12336_v39 = vld [vmem:[%s12621_s13 + $0x1f8] sm:$0xff]  ;;  %v12337_v58 = vld [vmem:[%s12492_s8 + $0xd0] sm:$0xff]  ;;  %v12338_v26 = vld [vmem:[%s12621_s13 + $0xc0] sm:$0xff]  ;;  %11880 = vtanh.f32 %v17222_v19 }
 0x60e   : > { %v11861_v1 = vpop.eup %11860  ;;  %v9794_v22 = vadd.f32 %v12328_v44, %v9714_v45  ;;  %v9753_v63 = vmul.f32 %v12329_v28, %v9673_v52  ;;  %v9674_v20 = vadd.f32 0.5, %v9594_v54  ;;  %v9557_v17 = vmul.f32 0.5, %v11859_v38  ;;  %9872 = vst [vmem:[%s16941_s23 + $0xa8] sm:$0xff] %v9792_v3  ;;  %v17249_v54 = vpop.f32.mrf.mxu1  ;;  %v12339_v37 = vld [vmem:[%s12492_s8 + $0xc8] sm:$0xff]  ;;  %v12340_v44 = vld [vmem:[%s12621_s13 + $0xd0] sm:$0xff]  ;;  %v12341_v28 = vld [vmem:[%s12492_s8 + $0xd8] sm:$0xff] }
 0x60f   : > { %v11863_v41 = vpop.eup %11862  ;;  %v9831_v4 = vadd.f32 %v12330_v6, %v9751_v53  ;;  %v9752_v51 = vmul.f32 %v12331_v16, %v9672_v31  ;;  %v9635_v18 = vadd.f32 0.5, %v9555_v46  ;;  %v9556_v23 = vmul.f32 0.5, %v11861_v1  ;;  %v12342_v6 = vld [vmem:[%s12621_s13 + $0xc8] sm:$0xff]  ;;  %v12343_v16 = vld [vmem:[%s12492_s8 + $0x200] sm:$0xff] }
 0x610   : > { %v11865_v50 = vpop.eup %11864  ;;  %9874 = vst [vmem:[%s16941_s23 + $0xb8] sm:$0xff] %v9794_v22  ;;  %v9833_v12 = vadd.f32 %v12332_v9, %v9753_v63  ;;  %v9754_v62 = vmul.f32 %v12333_v48, %v9674_v20  ;;  %v9637_v14 = vadd.f32 0.5, %v9557_v17  ;;  %v9558_v56 = vmul.f32 0.5, %v11863_v41 }
 0x611   : > { %v11867_v34 = vpop.eup %11866  ;;  %9911 = vst [vmem:[%s16941_s23 + $0x1e0] sm:$0xff] %v9831_v4  ;;  %v9832_v40 = vadd.f32 %v12334_v10, %v9752_v51  ;;  %v9715_v29 = vmul.f32 %v12335_v13, %v9635_v18  ;;  %v9636_v47 = vadd.f32 0.5, %v9556_v23  ;;  %v9595_v59 = vmul.f32 0.5, %v11865_v50  ;;  %v17260_v50 = vpop.f32.mrf.mxu0  ;;  %v12346_v13 = vld [vmem:[%s12621_s13 + $0x200] sm:$0xff] }
 0x612   : > { %v11869_v35 = vpop.eup %11868  ;;  %9913 = vst [vmem:[%s16941_s23 + $0x1f0] sm:$0xff] %v9833_v12  ;;  %v9834_v7 = vadd.f32 %v12336_v39, %v9754_v62  ;;  %v9717_v57 = vmul.f32 %v12337_v58, %v9637_v14  ;;  %v9638_v45 = vadd.f32 0.5, %v9558_v56  ;;  %v9597_v52 = vmul.f32 0.5, %v11867_v34  ;;  %v12344_v12 = vld [vmem:[%s12621_s13 + $0xd8] sm:$0xff]  ;;  %v12345_v62 = vld [vmem:[%s12492_s8 + $0x210] sm:$0xff]  ;;  %v17265_v10 = vpop.f32.mrf.mxu1 }
 0x613   : > { %v11871_v38 = vpop.eup %11870  ;;  %9912 = vst [vmem:[%s16941_s23 + $0x1e8] sm:$0xff] %v9832_v40  ;;  %v9795_v3 = vadd.f32 %v12338_v26, %v9715_v29  ;;  %v9716_v53 = vmul.f32 %v12339_v37, %v9636_v47  ;;  %v9675_v31 = vadd.f32 0.5, %v9595_v59  ;;  %v9596_v46 = vmul.f32 0.5, %v11869_v35  ;;  %v12347_v47 = vld [vmem:[%s12492_s8 + $0x208] sm:$0xff]  ;;  %v12351_v37 = vld [vmem:[%s12492_s8 + $0xe0] sm:$0xff] }
 0x614   : > { %v11873_v1 = vpop.eup %11872  ;;  %9914 = vst [vmem:[%s16941_s23 + $0x1f8] sm:$0xff] %v9834_v7  ;;  %v9797_v22 = vadd.f32 %v12340_v44, %v9717_v57  ;;  %v9718_v63 = vmul.f32 %v12341_v28, %v9638_v45  ;;  %v9677_v20 = vadd.f32 0.5, %v9597_v52  ;;  %v9598_v17 = vmul.f32 0.5, %v11871_v38  ;;  %v12348_v7 = vld [vmem:[%s12621_s13 + $0x210] sm:$0xff]  ;;  %v12349_v57 = vld [vmem:[%s12492_s8 + $0x218] sm:$0xff]  ;;  %v12350_v26 = vld [vmem:[%s12621_s13 + $0x208] sm:$0xff] }
 0x615   : > { %v11875_v41 = vpop.eup %11874  ;;  %9875 = vst [vmem:[%s16941_s23 + $0xc0] sm:$0xff] %v9795_v3  ;;  %v9796_v4 = vadd.f32 %v12342_v6, %v9716_v53  ;;  %v9755_v51 = vmul.f32 %v12343_v16, %v9675_v31  ;;  %v9676_v18 = vadd.f32 0.5, %v9596_v46  ;;  %v9559_v23 = vmul.f32 0.5, %v11873_v1  ;;  %v17277_v46 = vpop.f32.mrf.mxu0  ;;  %v12352_v1 = vld [vmem:[%s12621_s13 + $0x218] sm:$0xff]  ;;  %v12355_v6 = vld [vmem:[%s12492_s8 + $0xe8] sm:$0xff] }
 0x616   : > { %v11877_v9 = vpop.eup %11876  ;;  %9877 = vst [vmem:[%s16941_s23 + $0xd0] sm:$0xff] %v9797_v22  ;;  %v9798_v48 = vadd.f32 %v12344_v12, %v9718_v63  ;;  %v9757_v14 = vmul.f32 %v12345_v62, %v9677_v20  ;;  %v9678_v56 = vadd.f32 0.5, %v9598_v17  ;;  %v9561_v34 = vmul.f32 0.5, %v11875_v41  ;;  %v12353_v22 = vld [vmem:[%s12492_s8 + $0xf0] sm:$0xff]  ;;  %v8832_v17 = vpop.f32.mrf.mxu1  ;;  %v12354_v41 = vld [vmem:[%s12621_s13 + $0xe0] sm:$0xff]  ;;  %v18071_v16 = vld [vmem:[#allocation83_spill] sm:$0xff] }
 0x617   : > { %v11879_v40 = vpop.eup %11878  ;;  %9876 = vst [vmem:[%s16941_s23 + $0xc8] sm:$0xff] %v9796_v4  ;;  %v9835_v29 = vadd.f32 %v12346_v13, %v9755_v51  ;;  %v9756_v59 = vmul.f32 %v12347_v47, %v9676_v18  ;;  %v9639_v35 = vadd.f32 0.5, %v9559_v23  ;;  %v9560_v39 = vmul.f32 0.5, %v11877_v9  ;;  %v18072_v18 = vld [vmem:[#allocation2_spill] sm:$0xff]  ;;  %v12356_v9 = vld [vmem:[%s12621_s13 + $0xf0] sm:$0xff]  ;;  %v12359_v47 = vld [vmem:[%s12621_s13 + $0xf8] sm:$0xff] }
 0x618   : > { %9878 = vst [vmem:[%s16941_s23 + $0xd8] sm:$0xff] %v9798_v48  ;;  %v9837_v58 = vadd.f32 %v12348_v7, %v9757_v14  ;;  %v9758_v45 = vmul.f32 %v12349_v57, %v9678_v56  ;;  %v9641_v52 = vadd.f32 0.5, %v9561_v34  ;;  %v9562_v38 = vmul.f32 0.5, %v11879_v40  ;;  %v18073_v62 = vld [vmem:[#allocation86_spill] sm:$0xff]  ;;  %v12358_v56 = vld [vmem:[%s12621_s13 + $0xe8] sm:$0xff]  ;;  %v8912_v7 = vpop.f32.mrf.mxu1 }
 0x619   : > { %9915 = vst [vmem:[%s16941_s23 + $0x200] sm:$0xff] %v9835_v29  ;;  %v9836_v3 = vadd.f32 %v12350_v26, %v9756_v59  ;;  %v9719_v53 = vmul.f32 %v12351_v37, %v9639_v35  ;;  %v9640_v31 = vadd.f32 0.5, %v9560_v39  ;;  %v9071_v20 = vsub.f32 %v16811_v33, %v17211_v36  ;;  %v12357_v33 = vld [vmem:[%s12492_s8 + $0xf8] sm:$0xff]  ;;  %v18074_v40 = vld [vmem:[#allocation3_spill] sm:$0xff]  ;;  %v8869_v29 = vpop.f32.mrf.mxu0 }
 0x61a   : > { %9917 = vst [vmem:[%s16941_s23 + $0x210] sm:$0xff] %v9837_v58  ;;  %v9838_v44 = vadd.f32 %v12352_v1, %v9758_v45  ;;  %v9721_v28 = vmul.f32 %v12353_v22, %v9641_v52  ;;  %v9642_v63 = vadd.f32 0.5, %v9562_v38  ;;  %v9070_v51 = vsub.f32 %v18071_v16, %v17216_v0  ;;  %v18076_v52 = vld [vmem:[#allocation4_spill] sm:$0xff] }
 0x61b   : > { %9916 = vst [vmem:[%s16941_s23 + $0x208] sm:$0xff] %v9836_v3  ;;  %v9799_v19 = vadd.f32 %v12354_v41, %v9719_v53  ;;  %v9720_v4 = vmul.f32 %v12355_v6, %v9640_v31  ;;  %v9072_v23 = vsub.f32 %v18072_v18, %v17219_v8  ;;  %v9361_v48 = vadd.f32 %v18069_v27, %v9071_v20  ;;  %v8871_v37 = vpop.f32.mrf.mxu0  ;;  %v8914_v31 = vpop.f32.mrf.mxu1  ;;  %v18078_v20 = vld [vmem:[#allocation5_spill] sm:$0xff] }
 0x61c   : > { %9918 = vst [vmem:[%s16941_s23 + $0x218] sm:$0xff] %v9838_v44  ;;  %v9801_v12 = vadd.f32 %v12356_v9, %v9721_v28  ;;  %v9722_v36 = vmul.f32 %v12357_v33, %v9642_v63  ;;  %v9033_v14 = vsub.f32 %v18073_v62, %v17228_v15  ;;  %v9360_v0 = vadd.f32 %v16784_v25, %v9070_v51  ;;  %v18075_v15 = vld [vmem:[#allocation84_spill] sm:$0xff]  ;;  %v18080_v51 = vld [vmem:[#allocation87_spill] sm:$0xff] }
 0x61d   : > { %9879 = vst [vmem:[%s16941_s23 + $0xe0] sm:$0xff] %v9799_v19  ;;  %v9800_v34 = vadd.f32 %v12358_v56, %v9720_v4  ;;  %v9362_v8 = vadd.f32 %v18070_v43, %v9072_v23  ;;  %v9035_v13 = vsub.f32 %v18074_v40, %v17233_v55  ;;  %v9441_v27 = vmul.f32 0.5, %v9361_v48  ;;  %v8916_v6 = vpop.f32.mrf.mxu1  ;;  %v18081_v9 = vld [vmem:[#allocation91_spill] sm:$0xff]  ;;  %v18082_v48 = vld [vmem:[#allocation92_spill] sm:$0xff] }
 0x61e   : > { %9881 = vst [vmem:[%s16941_s23 + $0xf0] sm:$0xff] %v9801_v12  ;;  %v9802_v59 = vadd.f32 %v12359_v47, %v9722_v36  ;;  %v9323_v35 = vadd.f32 %v16883_v32, %v9033_v14  ;;  %v9034_v39 = vsub.f32 %v18075_v15, %v17244_v5  ;;  %v9440_v58 = vmul.f32 0.5, %v9360_v0  ;;  %v18083_v0 = vld [vmem:[#allocation6_spill] sm:$0xff]  ;;  %v18085_v15 = vld [vmem:[#allocation7_spill] sm:$0xff] }
 0x61f   : > { %9880 = vst [vmem:[%s16941_s23 + $0xe8] sm:$0xff] %v9800_v34  ;;  %v9442_v25 = vmul.f32 0.5, %v9362_v8  ;;  %v9325_v57 = vadd.f32 %v16886_v24, %v9035_v13  ;;  %v9036_v43 = vsub.f32 %v16835_v30, %v17249_v54  ;;  %11882 = vtanh.f32 %v9441_v27  ;;  %v8918_v40 = vpop.f32.mrf.mxu1  ;;  %v12361_v13 = vld [vmem:[%s12492_s8 + $0x220] sm:$0xff] }
 0x620   : > { %9882 = vst [vmem:[%s16941_s23 + $0xf8] sm:$0xff] %v9802_v59  ;;  %v9403_v55 = vmul.f32 0.5, %v9323_v35  ;;  %v9324_v45 = vadd.f32 %v16893_v11, %v9034_v39  ;;  %v9073_v38 = vsub.f32 %v18076_v52, %v17260_v50  ;;  %11884 = vtanh.f32 %v9440_v58  ;;  %v18084_v59 = vld [vmem:[#allocation88_spill] sm:$0xff]  ;;  %v12362_v58 = vld [vmem:[%s12621_s13 + $0x220] sm:$0xff] }
 0x621   : > { %v9405_v26 = vmul.f32 0.5, %v9325_v57  ;;  %v9326_v5 = vadd.f32 %v16896_v60, %v9036_v43  ;;  %v9075_v3 = vsub.f32 %v16841_v2, %v17265_v10  ;;  %11886 = vtanh.f32 %v9442_v25  ;;  %v18077_v2 = vld [vmem:[#allocation85_spill] sm:$0xff] }
 0x622   : > { %v9404_v53 = vmul.f32 0.5, %v9324_v45  ;;  %v9363_v30 = vadd.f32 %v16883_v32, %v9073_v38  ;;  %v9074_v54 = vsub.f32 %v16844_v61, %v17277_v46  ;;  %11888 = vtanh.f32 %v9403_v55  ;;  %v8873_v61 = vpop.f32.mrf.mxu0  ;;  %v11881_v46 = vpop.eup %11880  ;;  %v18086_v55 = vld [vmem:[#allocation89_spill] sm:$0xff] }
 0x623   : > { %v9406_v1 = vmul.f32 0.5, %v9326_v5  ;;  %v9365_v50 = vadd.f32 %v16886_v24, %v9075_v3  ;;  %v9076_v44 = vsub.f32 %v16847_v21, %v8832_v17  ;;  %11890 = vtanh.f32 %v9405_v26  ;;  %v12360_v21 = vld [vmem:[%s17415_s4 + $0x20] sm:$0xff] }
 0x624   : > { %v9443_v22 = vmul.f32 0.5, %v9363_v30  ;;  %v9364_v28 = vadd.f32 %v16893_v11, %v9074_v54  ;;  %v9037_v10 = vsub.f32 %v18077_v2, %v8869_v29  ;;  %11892 = vtanh.f32 %v9404_v53  ;;  %v18079_v17 = vld [vmem:[#allocation90_spill] sm:$0xff]  ;;  %v8875_v14 = vpop.f32.mrf.mxu0 }
 0x625   : > { %v9445_v63 = vmul.f32 0.5, %v9365_v50  ;;  %v9366_v32 = vadd.f32 %v16896_v60, %v9076_v44  ;;  %v9039_v41 = vsub.f32 %v18078_v20, %v8912_v7  ;;  %11894 = vtanh.f32 %v9406_v1 }
 0x626   : > { %v9444_v19 = vmul.f32 0.5, %v9364_v28  ;;  %v9327_v24 = vadd.f32 %v16911_v49, %v9037_v10  ;;  %v9246_v11 = vrot.slane %v12360_v21, %v18079_v17  ;;  %v9599_v4 = vmul.f32 0.5, %v11881_v46  ;;  %v12363_v10 = vld [vmem:[%s12492_s8 + $0x230] sm:$0xff] }
 0x627   : > { %11896 = vtanh.f32 %v9443_v22  ;;  %v9446_v16 = vmul.f32 0.5, %v9366_v32  ;;  %v9038_v60 = vsub.f32 %v18080_v51, %v8871_v37  ;;  %v9242_v12 = vrot.slane %v12360_v21, %v18081_v9  ;;  %v12365_v17 = vld [vmem:[%s12621_s13 + $0x230] sm:$0xff]  ;;  %v12368_v9 = vld [vmem:[%s12492_s8 + $0x100] sm:$0xff] }
 0x628   : > { %11898 = vtanh.f32 %v9445_v63  ;;  %v9407_v18 = vmul.f32 0.5, %v9327_v24  ;;  %v9329_v23 = vadd.f32 %v9246_v11, %v9039_v41  ;;  %v9679_v33 = vadd.f32 0.5, %v9599_v4 }
 0x629   : > { %11900 = vtanh.f32 %v9444_v19  ;;  %v9040_v36 = vsub.f32 %v16864_v42, %v8914_v31  ;;  %v9250_v62 = vrot.slane %v12360_v21, %v18082_v48  ;;  %v9328_v34 = vadd.f32 %v9242_v12, %v9038_v60 }
 0x62a   : > { %11902 = vtanh.f32 %v9446_v16  ;;  %v9409_v56 = vmul.f32 0.5, %v9329_v23  ;;  %v9077_v8 = vsub.f32 %v18083_v0, %v8873_v61  ;;  %v9759_v29 = vmul.f32 %v12361_v13, %v9679_v33  ;;  %v12364_v61 = vld [vmem:[%s12492_s8 + $0x228] sm:$0xff]  ;;  %v12371_v13 = vld [vmem:[%s12621_s13 + $0x100] sm:$0xff] }
 0x62b   : > { %11904 = vtanh.f32 %v9407_v18  ;;  %v9330_v47 = vadd.f32 %v9250_v62, %v9040_v36  ;;  %v9079_v27 = vsub.f32 %v18084_v59, %v8916_v6  ;;  %v9408_v35 = vmul.f32 0.5, %v9328_v34  ;;  %v12366_v6 = vld [vmem:[%s12492_s8 + $0x238] sm:$0xff]  ;;  %v12367_v18 = vld [vmem:[%s12621_s13 + $0x228] sm:$0xff] }
 0x62c   : > { %11906 = vtanh.f32 %v9409_v56  ;;  %v9367_v42 = vadd.f32 %v16911_v49, %v9077_v8  ;;  %v9078_v39 = vsub.f32 %v18085_v15, %v8875_v14  ;;  %v11883_v7 = vpop.eup %11882  ;;  %v9839_v25 = vadd.f32 %v12362_v58, %v9759_v29  ;;  %v12370_v56 = vld [vmem:[%s12492_s8 + $0x110] sm:$0xff] }
 0x62d   : > { %v9410_v57 = vmul.f32 0.5, %v9330_v47  ;;  %v9369_v43 = vadd.f32 %v9246_v11, %v9079_v27  ;;  %v9080_v45 = vsub.f32 %v18086_v55, %v8918_v40  ;;  %v11885_v52 = vpop.eup %11884  ;;  %v9601_v38 = vmul.f32 0.5, %v11883_v7  ;;  %v12372_v47 = vld [vmem:[%s12492_s8 + $0x108] sm:$0xff]  ;;  %v12373_v15 = vld [vmem:[%s12621_s13 + $0x110] sm:$0xff]  ;;  %v12374_v7 = vld [vmem:[%s12492_s8 + $0x118] sm:$0xff] }
 0x62e   : > { %11908 = vtanh.f32 %v9408_v35  ;;  %v9447_v26 = vmul.f32 0.5, %v9367_v42  ;;  %v9368_v5 = vadd.f32 %v9242_v12, %v9078_v39  ;;  %v11887_v3 = vpop.eup %11886  ;;  %9919 = vst [vmem:[%s16941_s23 + $0x220] sm:$0xff] %v9839_v25  ;;  %v9600_v37 = vmul.f32 0.5, %v11885_v52  ;;  %v12375_v55 = vld [vmem:[%s12621_s13 + $0x108] sm:$0xff]  ;;  %v12376_v52 = vld [vmem:[%s12492_s8 + $0x240] sm:$0xff] }
 0x62f   : > { %11910 = vtanh.f32 %v9410_v57  ;;  %v9449_v49 = vmul.f32 0.5, %v9369_v43  ;;  %v9370_v53 = vadd.f32 %v9250_v62, %v9080_v45  ;;  %v11889_v30 = vpop.eup %11888  ;;  %v9681_v54 = vadd.f32 0.5, %v9601_v38  ;;  %v12369_v62 = vld [vmem:[%s12621_s13 + $0x238] sm:$0xff] }
 0x630   : > { %v9602_v31 = vmul.f32 0.5, %v11887_v3  ;;  %11912 = vtanh.f32 %v9447_v26  ;;  %v9448_v1 = vmul.f32 0.5, %v9368_v5  ;;  %v11891_v50 = vpop.eup %11890  ;;  %v9680_v44 = vadd.f32 0.5, %v9600_v37  ;;  %v12377_v3 = vld [vmem:[%s12621_s13 + $0x118] sm:$0xff] }
 0x631   : > { %v9563_v22 = vmul.f32 0.5, %v11889_v30  ;;  %11914 = vtanh.f32 %v9449_v49  ;;  %v9450_v28 = vmul.f32 0.5, %v9370_v53  ;;  %v11893_v2 = vpop.eup %11892  ;;  %v9761_v63 = vmul.f32 %v12363_v10, %v9681_v54  ;;  %v12378_v49 = vld [vmem:[%s12492_s8 + $0x250] sm:$0xff] }
 0x632   : > { %v9682_v32 = vadd.f32 0.5, %v9602_v31  ;;  %v9565_v20 = vmul.f32 0.5, %v11891_v50  ;;  %11916 = vtanh.f32 %v9448_v1  ;;  %v11895_v41 = vpop.eup %11894  ;;  %v9760_v46 = vmul.f32 %v12364_v61, %v9680_v44  ;;  %v12379_v1 = vld [vmem:[%s12621_s13 + $0x240] sm:$0xff]  ;;  %v12380_v44 = vld [vmem:[%s12492_s8 + $0x248] sm:$0xff]  ;;  %v12381_v10 = vld [vmem:[%s12621_s13 + $0x250] sm:$0xff] }
 0x633   : > { %v9643_v19 = vadd.f32 0.5, %v9563_v22  ;;  %v9564_v24 = vmul.f32 0.5, %v11893_v2  ;;  %11918 = vtanh.f32 %v9450_v28  ;;  %v9841_v11 = vadd.f32 %v12365_v17, %v9761_v63 }
 0x634   : > { %v11897_v21 = vpop.eup %11896  ;;  %v9762_v4 = vmul.f32 %v12366_v6, %v9682_v32  ;;  %v9645_v16 = vadd.f32 0.5, %v9565_v20  ;;  %v9566_v51 = vmul.f32 0.5, %v11895_v41  ;;  %v9840_v23 = vadd.f32 %v12367_v18, %v9760_v46  ;;  %v12382_v32 = vld [vmem:[%s12492_s8 + $0x258] sm:$0xff] }
 0x635   : > { %v11899_v60 = vpop.eup %11898  ;;  %v9723_v12 = vmul.f32 %v12368_v9, %v9643_v19  ;;  %v9644_v33 = vadd.f32 0.5, %v9564_v24  ;;  %v9603_v36 = vmul.f32 0.5, %v11897_v21  ;;  %9921 = vst [vmem:[%s16941_s23 + $0x230] sm:$0xff] %v9841_v11  ;;  %v12383_v19 = vld [vmem:[%s12621_s13 + $0x248] sm:$0xff]  ;;  %v12384_v21 = vld [vmem:[%s12492_s8 + $0x120] sm:$0xff] }
 0x636   : > { %v11901_v48 = vpop.eup %11900  ;;  %v9842_v14 = vadd.f32 %v12369_v62, %v9762_v4  ;;  %v9725_v34 = vmul.f32 %v12370_v56, %v9645_v16  ;;  %v9646_v0 = vadd.f32 0.5, %v9566_v51  ;;  %v9605_v8 = vmul.f32 0.5, %v11899_v60  ;;  %9920 = vst [vmem:[%s16941_s23 + $0x228] sm:$0xff] %v9840_v23  ;;  %v12385_v4 = vld [vmem:[%s12621_s13 + $0x258] sm:$0xff]  ;;  %v12386_v51 = vld [vmem:[%s12492_s8 + $0x130] sm:$0xff] }
 0x637   : > { %v11903_v40 = vpop.eup %11902  ;;  %v9803_v29 = vadd.f32 %v12371_v13, %v9723_v12  ;;  %v9724_v59 = vmul.f32 %v12372_v47, %v9644_v33  ;;  %v9683_v27 = vadd.f32 0.5, %v9603_v36  ;;  %v9604_v35 = vmul.f32 0.5, %v11901_v48  ;;  %v12387_v12 = vld [vmem:[%s12621_s13 + $0x120] sm:$0xff]  ;;  %v12390_v13 = vld [vmem:[%s12492_s8 + $0x138] sm:$0xff] }
 0x638   : > { %v11905_v42 = vpop.eup %11904  ;;  %9922 = vst [vmem:[%s16941_s23 + $0x238] sm:$0xff] %v9842_v14  ;;  %v9805_v39 = vadd.f32 %v12373_v15, %v9725_v34  ;;  %v9726_v58 = vmul.f32 %v12374_v7, %v9646_v0  ;;  %v9685_v25 = vadd.f32 0.5, %v9605_v8  ;;  %v9606_v57 = vmul.f32 0.5, %v11903_v40  ;;  %v12388_v14 = vld [vmem:[%s12621_s13 + $0x130] sm:$0xff]  ;;  %v12389_v34 = vld [vmem:[%s12492_s8 + $0x128] sm:$0xff]  ;;  %v12393_v7 = vld [vmem:[%s12621_s13 + $0x138] sm:$0xff] }
 0x639   : > { %v11907_v43 = vpop.eup %11906  ;;  %9883 = vst [vmem:[%s16941_s23 + $0x100] sm:$0xff] %v9803_v29  ;;  %v9804_v45 = vadd.f32 %v12375_v55, %v9724_v59  ;;  %v9763_v38 = vmul.f32 %v12376_v52, %v9683_v27  ;;  %v9684_v26 = vadd.f32 0.5, %v9604_v35  ;;  %v9567_v5 = vmul.f32 0.5, %v11905_v42  ;;  %v12391_v27 = vld [vmem:[%s12621_s13 + $0x128] sm:$0xff]  ;;  %v12392_v42 = vld [vmem:[%s12492_s8 + $0x260] sm:$0xff] }
 0x63a   : > { %9885 = vst [vmem:[%s16941_s23 + $0x110] sm:$0xff] %v9805_v39  ;;  %v9806_v37 = vadd.f32 %v12377_v3, %v9726_v58  ;;  %v9765_v53 = vmul.f32 %v12378_v49, %v9685_v25  ;;  %v9686_v30 = vadd.f32 0.5, %v9606_v57  ;;  %v9569_v54 = vmul.f32 0.5, %v11907_v43  ;;  %v12394_v25 = vld [vmem:[%s12492_s8 + $0x270] sm:$0xff]  ;;  %v12395_v55 = vld [vmem:[%s12621_s13 + $0x260] sm:$0xff]  ;;  %v12396_v52 = vld [vmem:[%s12492_s8 + $0x268] sm:$0xff] }
 0x63b   : > { %v11909_v31 = vpop.eup %11908  ;;  %9884 = vst [vmem:[%s16941_s23 + $0x108] sm:$0xff] %v9804_v45  ;;  %v9843_v50 = vadd.f32 %v12379_v1, %v9763_v38  ;;  %v9764_v22 = vmul.f32 %v12380_v44, %v9684_v26  ;;  %v9647_v28 = vadd.f32 0.5, %v9567_v5  ;;  %v12397_v26 = vld [vmem:[%s12621_s13 + $0x270] sm:$0xff]  ;;  %v12398_v3 = vld [vmem:[%s12492_s8 + $0x278] sm:$0xff]  ;;  %v12399_v49 = vld [vmem:[%s12621_s13 + $0x268] sm:$0xff] }
 0x63c   : > { %v11911_v2 = vpop.eup %11910  ;;  %9886 = vst [vmem:[%s16941_s23 + $0x118] sm:$0xff] %v9806_v37  ;;  %v9845_v63 = vadd.f32 %v12381_v10, %v9765_v53  ;;  %v9766_v20 = vmul.f32 %v12382_v32, %v9686_v30  ;;  %v9649_v41 = vadd.f32 0.5, %v9569_v54  ;;  %v9568_v61 = vmul.f32 0.5, %v11909_v31  ;;  %v12400_v30 = vld [vmem:[%s12621_s13 + $0x278] sm:$0xff] }
 0x63d   : > { %v11913_v46 = vpop.eup %11912  ;;  %9923 = vst [vmem:[%s16941_s23 + $0x240] sm:$0xff] %v9843_v50  ;;  %v9844_v24 = vadd.f32 %v12383_v19, %v9764_v22  ;;  %v9727_v17 = vmul.f32 %v12384_v21, %v9647_v28  ;;  %v9570_v11 = vmul.f32 0.5, %v11911_v2 }
 0x63e   : > { %v11915_v6 = vpop.eup %11914  ;;  %9925 = vst [vmem:[%s16941_s23 + $0x250] sm:$0xff] %v9845_v63  ;;  %v9846_v16 = vadd.f32 %v12385_v4, %v9766_v20  ;;  %v9729_v60 = vmul.f32 %v12386_v51, %v9649_v41  ;;  %v9648_v18 = vadd.f32 0.5, %v9568_v61  ;;  %v9607_v23 = vmul.f32 0.5, %v11913_v46 }
 0x63f   : > { %v11917_v9 = vpop.eup %11916  ;;  %9924 = vst [vmem:[%s16941_s23 + $0x248] sm:$0xff] %v9844_v24  ;;  %v9807_v33 = vadd.f32 %v12387_v12, %v9727_v17  ;;  %v9650_v36 = vadd.f32 0.5, %v9570_v11  ;;  %v9609_v48 = vmul.f32 0.5, %v11915_v6 }
 0x640   : > { %v11919_v62 = vpop.eup %11918  ;;  %9926 = vst [vmem:[%s16941_s23 + $0x258] sm:$0xff] %v9846_v16  ;;  %v9809_v56 = vadd.f32 %v12388_v14, %v9729_v60  ;;  %v9728_v0 = vmul.f32 %v12389_v34, %v9648_v18  ;;  %v9687_v8 = vadd.f32 0.5, %v9607_v23  ;;  %v9608_v40 = vmul.f32 0.5, %v11917_v9 }
 0x641   : > { %9887 = vst [vmem:[%s16941_s23 + $0x120] sm:$0xff] %v9807_v33  ;;  %v9730_v29 = vmul.f32 %v12390_v13, %v9650_v36  ;;  %v9689_v47 = vadd.f32 0.5, %v9609_v48  ;;  %v9610_v59 = vmul.f32 0.5, %v11919_v62 }
 0x642   : > { %9889 = vst [vmem:[%s16941_s23 + $0x130] sm:$0xff] %v9809_v56  ;;  %v9808_v35 = vadd.f32 %v12391_v27, %v9728_v0  ;;  %v9767_v15 = vmul.f32 %v12392_v42, %v9687_v8  ;;  %v9688_v39 = vadd.f32 0.5, %v9608_v40 }
 0x643   : > { %v9810_v58 = vadd.f32 %v12393_v7, %v9730_v29  ;;  %v9769_v57 = vmul.f32 %v12394_v25, %v9689_v47  ;;  %v9690_v43 = vadd.f32 0.5, %v9610_v59 }
 0x644   : > { %9888 = vst [vmem:[%s16941_s23 + $0x128] sm:$0xff] %v9808_v35  ;;  %v9847_v45 = vadd.f32 %v12395_v55, %v9767_v15  ;;  %v9768_v38 = vmul.f32 %v12396_v52, %v9688_v39 }
 0x645   : > { %9890 = vst [vmem:[%s16941_s23 + $0x138] sm:$0xff] %v9810_v58  ;;  %v9849_v5 = vadd.f32 %v12397_v26, %v9769_v57  ;;  %v9770_v37 = vmul.f32 %v12398_v3, %v9690_v43 }
 0x646   : > { %9927 = vst [vmem:[%s16941_s23 + $0x260] sm:$0xff] %v9847_v45  ;;  %v9848_v53 = vadd.f32 %v12399_v49, %v9768_v38 }
 0x647   : > { %9929 = vst [vmem:[%s16941_s23 + $0x270] sm:$0xff] %v9849_v5  ;;  %v9850_v54 = vadd.f32 %v12400_v30, %v9770_v37 }
 0x648   : > { %9928 = vst [vmem:[%s16941_s23 + $0x268] sm:$0xff] %v9848_v53 }
 0x649   : > { %9930 = vst [vmem:[%s16941_s23 + $0x278] sm:$0xff] %v9850_v54 }
 0x64a PF: > { %s17_s26 = sadd.s32 1, %s12423_s26   ;;  %s18087_s24 = smov %s12419_s25 }
 0x64b   : > { %p14_p5 = scmp.ge.s32.totalorder %s17_s26, 4   ;;  %s18088_s25 = smov %s18090_s27 }
 0x64d   :  { %16 = sbr.rel (!%p14_p5) target bundleno = 2 (0x2), region = 81 }

</bundles_post_ra>
